<compile_context>
chip_gen: v7x
topology: tpu7x:2x2x1
jax: 0.10.0
libtpu: 0.0.40
codegen_flags: <defaults>
</compile_context>

<pallas_src>
import functools

import jax
import jax.numpy as jnp
from jax.experimental import pallas as pl
from jax.experimental.pallas import tpu as pltpu

LEAKY_SLOPE = 0.01
# Set to jnp.bfloat16 on v6e/v7x for ~2x matmul-operand bandwidth (f32 accumulate).
MATMUL_DTYPE = jnp.float32
_VMEM_LIMIT = 64 * 1024 * 1024          # sized for v7x's 64 MiB VMEM
_LANE_TILE_THRESHOLD = 8192             # single lane block below this
_LANE_TILE = 4096                       # multiple of 128, used above the threshold


def _leaky_relu(x):
    return jnp.where(x > 0, x, LEAKY_SLOPE * x)


def _dot(a, b):
    return jnp.dot(a.astype(MATMUL_DTYPE), b.astype(MATMUL_DTYPE),
                   preferred_element_type=jnp.float32)


def _bdot(eq, a, b):
    return jnp.einsum(eq, a.astype(MATMUL_DTYPE), b.astype(MATMUL_DTYPE),
                      preferred_element_type=jnp.float32)


# ----------------------------------------------------------------------------
# 1x1 conv: y[Cout, M] = W @ x[Cin, M] + b   (lane-dense output, lane-tiled grid)
# ----------------------------------------------------------------------------
def _conv1x1_kernel(x_ref, w_ref, b_ref, o_ref):
    o_ref[0] = _dot(w_ref[...], x_ref[0]) + b_ref[...]


def conv1x1(x_flat, w, b=None):
    B, Cin, M = x_flat.shape
    Cout = w.shape[0]
    bias = jnp.zeros((Cout, 1), jnp.float32) if b is None else b.reshape(Cout, 1)
    TL = M if M <= _LANE_TILE_THRESHOLD else _LANE_TILE
    nt = pl.cdiv(M, TL)
    return pl.pallas_call(
        _conv1x1_kernel,
        grid=(B, nt),
        in_specs=[pl.BlockSpec((1, Cin, TL), lambda b_, t: (b_, 0, t)),
                  pl.BlockSpec((Cout, Cin), lambda b_, t: (0, 0)),
                  pl.BlockSpec((Cout, 1), lambda b_, t: (0, 0))],
        out_specs=pl.BlockSpec((1, Cout, TL), lambda b_, t: (b_, 0, t)),
        out_shape=jax.ShapeDtypeStruct((B, Cout, M), jnp.float32),
        compiler_params=pltpu.CompilerParams(
            dimension_semantics=("parallel", "parallel"),
            vmem_limit_bytes=_VMEM_LIMIT),
    )(x_flat.astype(jnp.float32), w.astype(jnp.float32), bias.astype(jnp.float32))


# ----------------------------------------------------------------------------
# Fused head: from one time-padded flat block of x, produce both
#   x_input = conv1(x) (1x1 + bias)  and  x_1 = leaky_relu(time_conv(x)) ((1,3)).
# The three temporal taps are static lane slices (offsets 0, N, 2N) -> no im2col;
# the centre tap is exactly the unpadded x, reused for the 1x1 conv.
# ----------------------------------------------------------------------------
def _head_kernel(xp_ref, w1_ref, b1_ref, wt_ref, bt_ref, xin_ref, x1_ref, *, N, LN):
    x_mid = xp_ref[0, :, N:N + LN]                        # unpadded x, time-major
    xin_ref[0] = _dot(w1_ref[...], x_mid) + b1_ref[...]
    acc = _dot(wt_ref[0], xp_ref[0, :, 0:LN])
    acc = acc + _dot(wt_ref[1], x_mid)
    acc = acc + _dot(wt_ref[2], xp_ref[0, :, 2 * N:2 * N + LN])
    acc = acc + bt_ref[...]
    x1_ref[0] = _leaky_relu(acc)


def pallas_head(xp_flat, w1, b1, wt, bt, *, N, L):
    B, Cin, LpN = xp_flat.shape
    C = w1.shape[0]
    Kt = wt.shape[0]
    assert Kt == 3 and LpN == (L + 2) * N
    LN = L * N
    return pl.pallas_call(
        functools.partial(_head_kernel, N=N, LN=LN),
        grid=(B,),
        in_specs=[pl.BlockSpec((1, Cin, LpN), lambda b_: (b_, 0, 0)),
                  pl.BlockSpec((C, Cin), lambda b_: (0, 0)),
                  pl.BlockSpec((C, 1), lambda b_: (0, 0)),
                  pl.BlockSpec((Kt, C, Cin), lambda b_: (0, 0, 0)),
                  pl.BlockSpec((C, 1), lambda b_: (0, 0))],
        out_specs=[pl.BlockSpec((1, C, LN), lambda b_: (b_, 0, 0)),
                   pl.BlockSpec((1, C, LN), lambda b_: (b_, 0, 0))],
        out_shape=(jax.ShapeDtypeStruct((B, C, LN), jnp.float32),
                   jax.ShapeDtypeStruct((B, C, LN), jnp.float32)),
        compiler_params=pltpu.CompilerParams(
            dimension_semantics=("parallel",),
            vmem_limit_bytes=_VMEM_LIMIT),
    )(xp_flat.astype(jnp.float32), w1.astype(jnp.float32),
      b1.reshape(C, 1).astype(jnp.float32), wt.astype(jnp.float32),
      bt.reshape(C, 1).astype(jnp.float32))


# ----------------------------------------------------------------------------
# (1,3) temporal conv on time-major flat input  [Cin, (L+2)*N], optionally fused
# with the sigmoid(gate)*leaky(filter) GLU of the dynamic GCN.
# ----------------------------------------------------------------------------
def _tconv_kernel(xp_ref, w_ref, b_ref, o_ref, *, N, LN, leaky, glu_channels):
    acc = _dot(w_ref[0], xp_ref[0, :, 0:LN])
    acc = acc + _dot(w_ref[1], xp_ref[0, :, N:N + LN])
    acc = acc + _dot(w_ref[2], xp_ref[0, :, 2 * N:2 * N + LN])
    acc = acc + b_ref[...]
    if glu_channels is not None:
        c = glu_channels
        acc = jax.nn.sigmoid(acc[c:2 * c, :]) * _leaky_relu(acc[0:c, :])
    elif leaky:
        acc = _leaky_relu(acc)
    o_ref[0] = acc


def tconv(xp_flat, w, b, *, N, L, leaky=False, glu_channels=None):
    B, Cin, LpN = xp_flat.shape
    Kt, Cw, _ = w.shape
    assert Kt == 3 and LpN == (L + 2) * N
    if glu_channels is not None:
        assert Cw == 2 * glu_channels
    Cout = Cw if glu_channels is None else glu_channels
    LN = L * N
    return pl.pallas_call(
        functools.partial(_tconv_kernel, N=N, LN=LN, leaky=leaky,
                          glu_channels=glu_channels),
        grid=(B,),
        in_specs=[pl.BlockSpec((1, Cin, LpN), lambda b_: (b_, 0, 0)),
                  pl.BlockSpec((Kt, Cw, Cin), lambda b_: (0, 0, 0)),
                  pl.BlockSpec((Cw, 1), lambda b_: (0, 0))],
        out_specs=pl.BlockSpec((1, Cout, LN), lambda b_: (b_, 0, 0)),
        out_shape=jax.ShapeDtypeStruct((B, Cout, LN), jnp.float32),
        compiler_params=pltpu.CompilerParams(
            dimension_semantics=("parallel",),
            vmem_limit_bytes=_VMEM_LIMIT),
    )(xp_flat.astype(jnp.float32), w.astype(jnp.float32),
      b.reshape(Cw, 1).astype(jnp.float32))


# ----------------------------------------------------------------------------
# SATT attention: out[l,n,q] = mean_m sigmoid(sum_c f1[(m,l),n,c] * f2[(m,l),q,c])
# One grid step per batch (all m*l pairs batched into one einsum).
# ----------------------------------------------------------------------------
def _satt_kernel(f1_ref, f2_ref, o_ref, *, M, Ls):
    logits = _bdot('gnc,gqc->gnq', f1_ref[0], f2_ref[0])       # [M*Ls, N, N]
    s = jax.nn.sigmoid(logits)
    s = s.reshape(M, Ls, s.shape[1], s.shape[2])
    o_ref[0] = jnp.mean(s, axis=0)


def pallas_satt(f1k, f2k, M, Ls):
    B, G2, N, C4 = f1k.shape
    return pl.pallas_call(
        functools.partial(_satt_kernel, M=M, Ls=Ls),
        grid=(B,),
        in_specs=[pl.BlockSpec((1, G2, N, C4), lambda b_: (b_, 0, 0, 0)),
                  pl.BlockSpec((1, G2, N, C4), lambda b_: (b_, 0, 0, 0))],
        out_specs=pl.BlockSpec((1, Ls, N, N), lambda b_: (b_, 0, 0, 0)),
        out_shape=jax.ShapeDtypeStruct((B, Ls, N, N), jnp.float32),
        compiler_params=pltpu.CompilerParams(dimension_semantics=("parallel",)),
    )(f1k.astype(jnp.float32), f2k.astype(jnp.float32))


def _satt_block(seq_lsN, w1, w2, M=4):
    """seq_lsN: [B, Cin, Ls, N] (time-major).  Returns [B, Ls, N, N]."""
    B, Cin, Ls, N = seq_lsN.shape
    C = w1.shape[0]
    C4 = C // M
    w_cat = jnp.concatenate([w1, w2], axis=0)                  # both 1x1 convs fused
    f = conv1x1(seq_lsN.reshape(B, Cin, Ls * N), w_cat)        # [B, 2C, Ls*N]
    f = f.reshape(B, 2, C4, M, Ls, N)
    f1k = f[:, 0].transpose(0, 2, 3, 4, 1).reshape(B, M * Ls, N, C4)
    f2k = f[:, 1].transpose(0, 2, 3, 4, 1).reshape(B, M * Ls, N, C4)
    return pallas_satt(f1k, f2k, M, Ls)


# ----------------------------------------------------------------------------
# LSTM (single layer, zero init state).  Input projection hoisted out of the
# recurrence; independent rows split over a parallel grid axis.
# ----------------------------------------------------------------------------
def _lstm_kernel(x_ref, wih_ref, whh_ref, b_ref, h_ref, gx_ref, *, T, H):
    for t in range(T):                                   # hoisted x @ W_ih
        gx_ref[t] = _dot(x_ref[t], wih_ref[...]) + b_ref[...]

    BNb = x_ref.shape[1]

    def step(t, carry):
        h, c = carry
        gates = _dot(h, whh_ref[...]) + gx_ref[t]
        i = jax.nn.sigmoid(gates[:, 0:H])
        f = jax.nn.sigmoid(gates[:, H:2 * H])
        g = jnp.tanh(gates[:, 2 * H:3 * H])
        o = jax.nn.sigmoid(gates[:, 3 * H:4 * H])
        c_new = f * c + i * g
        h_new = o * jnp.tanh(c_new)
        return (h_new, c_new)

    h0 = jnp.zeros((BNb, H), jnp.float32)
    c0 = jnp.zeros((BNb, H), jnp.float32)
    h_fin, _ = jax.lax.fori_loop(0, T, step, (h0, c0))
    h_ref[...] = h_fin


def pallas_lstm(x_seq, wih, whh, bias):
    T, BN, H = x_seq.shape
    nb = 1
    for cand in (8, 4, 2):
        if BN % cand == 0 and (BN // cand) % 8 == 0:
            nb = cand
            break
    BNb = BN // nb
    return pl.pallas_call(
        functools.partial(_lstm_kernel, T=T, H=H),
        grid=(nb,),
        in_specs=[pl.BlockSpec((T, BNb, H), lambda g: (0, g, 0)),
                  pl.BlockSpec((H, 4 * H), lambda g: (0, 0)),
                  pl.BlockSpec((H, 4 * H), lambda g: (0, 0)),
                  pl.BlockSpec((1, 4 * H), lambda g: (0, 0))],
        out_specs=pl.BlockSpec((BNb, H), lambda g: (g, 0)),
        out_shape=jax.ShapeDtypeStruct((BN, H), jnp.float32),
        scratch_shapes=[pltpu.VMEM((T, BNb, 4 * H), jnp.float32)],
        compiler_params=pltpu.CompilerParams(dimension_semantics=("parallel",)),
    )(x_seq.astype(jnp.float32), wih.astype(jnp.float32),
      whh.astype(jnp.float32), bias.astype(jnp.float32))


# ----------------------------------------------------------------------------
# Chebyshev recursion applied directly to the node-major activation (no Laplacian
# stack, no broadcast).  adj = adj_out * supports is formed in-kernel.
# ----------------------------------------------------------------------------
def _cheb_kernel(adj_ref, sup_ref, x_ref, o_ref, *, K):
    adj = adj_ref[0] * sup_ref[...]
    x0 = x_ref[0]                                        # [N, C*Lp]
    o_ref[0, 0] = x0
    t_prev = x0
    t_curr = _dot(adj, x0)
    o_ref[0, 1] = t_curr
    for k in range(2, K):
        t_next = 2.0 * _dot(adj, t_curr) - t_prev
        o_ref[0, k] = t_next
        t_prev, t_curr = t_curr, t_next


def pallas_cheb(adj_out, supports, x_nm, K):
    B, N, CLp = x_nm.shape
    return pl.pallas_call(
        functools.partial(_cheb_kernel, K=K),
        grid=(B,),
        in_specs=[pl.BlockSpec((1, N, N), lambda b_: (b_, 0, 0)),
                  pl.BlockSpec((N, N), lambda b_: (0, 0)),
                  pl.BlockSpec((1, N, CLp), lambda b_: (b_, 0, 0))],
        out_specs=pl.BlockSpec((1, K, N, CLp), lambda b_: (b_, 0, 0, 0)),
        out_shape=jax.ShapeDtypeStruct((B, K, N, CLp), jnp.float32),
        compiler_params=pltpu.CompilerParams(
            dimension_semantics=("parallel",),
            vmem_limit_bytes=_VMEM_LIMIT),
    )(adj_out.astype(jnp.float32), supports.astype(jnp.float32),
      x_nm.astype(jnp.float32))


# ----------------------------------------------------------------------------
# Fused tail: full TATT_1 (two 1x1 convs, f1 W f2 + b, sigmoid, v@, eval
# BatchNorm1d affine, temporal mask, softmax) followed by x1_g @ T_coef,
# leaky_relu, residual with x_input and LayerNorm([C,N,L]).  x1_g is read once;
# both the attention coefficients and the block output are produced per batch.
# ----------------------------------------------------------------------------
def _tatt_tail_kernel(x_ref, w1_ref, w2_ref, w_ref, b_ref, v_ref,
                      sc_ref, sh_ref, m_ref, xin_ref, g_ref, be_ref,
                      coef_ref, o_ref, *, eps):
    x3 = x_ref[0]                                        # [C, L, N] time-major
    # --- TATT_1 ---
    f1 = jnp.sum(x3 * w1_ref[...], axis=0)               # [L, N]
    f2 = jnp.sum(x3 * w2_ref[...], axis=2)               # [C, L]
    tmp = _dot(f1, w_ref[...])                           # [L, C]
    g = jax.nn.sigmoid(_dot(tmp, f2) + b_ref[...])       # [L, L]
    h = _dot(v_ref[...], g)                              # [L, L]
    h = h * sc_ref[...] + sh_ref[...] + m_ref[...]       # BN (eval) + mask
    mx = jnp.max(h, axis=-1, keepdims=True)
    e = jnp.exp(h - mx)
    denom = jnp.sum(e, axis=-1, keepdims=True)
    coefs = e * pl.reciprocal(denom, approx=True)        # [L, L]
    coef_ref[0] = coefs
    # --- temporal mixing + residual + LayerNorm ---
    C = x3.shape[0]
    cfb = jnp.broadcast_to(coefs[None], (C,) + coefs.shape)
    x_att = _bdot('cql,cln->cqn', cfb, x3)               # [C, L, N]
    y = _leaky_relu(x_att) + xin_ref[0]
    mu = jnp.mean(y)
    var = jnp.mean(jnp.square(y - mu))
    o_ref[0] = (y - mu) * jax.lax.rsqrt(var + eps) * g_ref[...] + be_ref[...]


def pallas_tatt_tail(x1g_tm, x_input_tm, p, eps=1e-5):
    B, C, L, N = x1g_tm.shape
    bn_eps = 1e-5
    scale = p['tatt_bn_gamma'] * jax.lax.rsqrt(p['tatt_bn_var'] + bn_eps)
    shift = p['tatt_bn_beta'] - p['tatt_bn_mean'] * scale
    gamma_tm = p['ln_gamma'].transpose(0, 2, 1)           # [C, L, N]
    beta_tm = p['ln_beta'].transpose(0, 2, 1)
    return pl.pallas_call(
        functools.partial(_tatt_tail_kernel, eps=eps),
        grid=(B,),
        in_specs=[pl.BlockSpec((1, C, L, N), lambda b_: (b_, 0, 0, 0)),
                  pl.BlockSpec((C, 1, 1), lambda b_: (0, 0, 0)),
                  pl.BlockSpec((1, 1, N), lambda b_: (0, 0, 0)),
                  pl.BlockSpec((N, C), lambda b_: (0, 0)),
                  pl.BlockSpec((L, L), lambda b_: (0, 0)),
                  pl.BlockSpec((L, L), lambda b_: (0, 0)),
                  pl.BlockSpec((1, L), lambda b_: (0, 0)),
                  pl.BlockSpec((1, L), lambda b_: (0, 0)),
                  pl.BlockSpec((L, L), lambda b_: (0, 0)),
                  pl.BlockSpec((1, C, L, N), lambda b_: (b_, 0, 0, 0)),
                  pl.BlockSpec((C, L, N), lambda b_: (0, 0, 0)),
                  pl.BlockSpec((C, L, N), lambda b_: (0, 0, 0))],
        out_specs=[pl.BlockSpec((1, L, L), lambda b_: (b_, 0, 0)),
                   pl.BlockSpec((1, C, L, N), lambda b_: (b_, 0, 0, 0))],
        out_shape=(jax.ShapeDtypeStruct((B, L, L), jnp.float32),
                   jax.ShapeDtypeStruct((B, C, L, N), jnp.float32)),
        compiler_params=pltpu.CompilerParams(
            dimension_semantics=("parallel",),
            vmem_limit_bytes=_VMEM_LIMIT),
    )(x1g_tm.astype(jnp.float32), p['tatt_w1'], p['tatt_w2'], p['tatt_w'],
      p['tatt_b'], p['tatt_v'], scale.reshape(1, L), shift.reshape(1, L),
      p['mask'], x_input_tm.astype(jnp.float32), gamma_tm, beta_tm)


# ----------------------------------------------------------------------------
# ST_BLOCK_2 forward.
# ----------------------------------------------------------------------------
def st_block_2_forward(x, supports, p, K=3, Kt=3):
    B, Cin, N, L = x.shape
    C = p['conv1_w'].shape[0]
    assert L == 60 and Kt == 3 and K >= 2
    LN = L * N
    Lp = L + 2

    # Time-major channel-first flattening (lane = l*N + n, lane-dense).
    x_tm = x.transpose(0, 1, 3, 2)                                    # [B,Cin,L,N]
    x_tm_pad = jnp.pad(x_tm, ((0, 0), (0, 0), (1, 1), (0, 0))).reshape(B, Cin, Lp * N)

    # --- fused: x_input = conv1(x); x1 = leaky(time_conv(x)) ----------------
    x_input, x1 = pallas_head(x_tm_pad, p['conv1_w'], p['conv1_b'],
                              p['time_w'], p['time_b'], N=N, L=L)
    x1_tm = x1.reshape(B, C, L, N)

    # --- spatial attention on the two temporal segments ---------------------
    x_tem1 = x1_tm[:, :, 0:48, :]                                     # [B,C,48,N]
    x_tem2 = x1_tm[:, :, 48:60, :]                                    # [B,C,12,N]
    seq3 = x_tem1.reshape(B, C * 12, 4, N)                            # SATT_3 regroup
    S_coef1 = _satt_block(seq3, p['satt3_w1'], p['satt3_w2'])         # [B,4,N,N]
    S_coef2 = _satt_block(x_tem2, p['satt2_w1'], p['satt2_w2'])       # [B,12,N,N]
    S_coef = jnp.concatenate([S_coef1, S_coef2], axis=1)              # [B,16,N,N]

    # --- LSTM over the 16 attention maps per node (dropout = eval identity) --
    T = S_coef.shape[1]
    lstm_in = S_coef.transpose(1, 0, 2, 3).reshape(T, B * N, N)
    adj_out = pallas_lstm(lstm_in, p['lstm_wih'], p['lstm_whh'],
                          p['lstm_b']).reshape(B, N, N)

    # --- dynamic Chebyshev graph conv + gated fusion --------------------------
    x1p_tm = jnp.pad(x1_tm, ((0, 0), (0, 0), (1, 1), (0, 0)))         # [B,C,Lp,N]
    x_nm = x1p_tm.transpose(0, 3, 1, 2).reshape(B, N, C * Lp)         # node-major
    cheb = pallas_cheb(adj_out, supports, x_nm, K)                    # [B,K,N,C*Lp]
    cheb_cf = (cheb.reshape(B, K, N, C, Lp)
               .transpose(0, 3, 1, 4, 2)                              # [B,C,K,Lp,N]
               .reshape(B, C * K, Lp * N))                            # chan = c*K+k (torch order)
    x1g = tconv(cheb_cf, p['gcn_w'], p['gcn_b'], N=N, L=L, glu_channels=C)
    x1g_tm = x1g.reshape(B, C, L, N)

    # --- fused TATT_1 + temporal mixing + residual + LayerNorm ----------------
    coefs, out_tm = pallas_tatt_tail(x1g_tm, x_input.reshape(B, C, L, N), p)
    T_coef = coefs.transpose(0, 2, 1)
    out = out_tm.transpose(0, 1, 3, 2)                                # [B,C,N,L]
    return out, adj_out, T_coef


# ----------------------------------------------------------------------------
# Deterministic parameter init (shapes implied by the PyTorch module __init__).
# Conv weights are stored matmul-ready (channel-first); the dynamic-GCN conv's
# input channels are ordered c*K + k, matching the PyTorch view() ordering.
# ----------------------------------------------------------------------------
def init_params(key, c_in, c_out, N, L=60, K=3, Kt=3):
    ks = jax.random.split(key, 20)
    s = 0.1
    rn = lambda k, shape: s * jax.random.normal(k, shape, dtype=jnp.float32)
    p = {}
    p['conv1_w'] = rn(ks[0], (c_out, c_in))            # torch weight[:, :, 0, 0]
    p['conv1_b'] = rn(ks[1], (c_out,))
    p['time_w'] = rn(ks[2], (Kt, c_out, c_in))         # w[kt] = torch weight[:, :, 0, kt]
    p['time_b'] = rn(ks[3], (c_out,))
    p['satt3_w1'] = rn(ks[4], (c_out, c_out * 12))
    p['satt3_w2'] = rn(ks[5], (c_out, c_out * 12))
    p['satt2_w1'] = rn(ks[6], (c_out, c_out))
    p['satt2_w2'] = rn(ks[7], (c_out, c_out))
    p['gcn_w'] = rn(ks[8], (Kt, 2 * c_out, K * c_out)) # w[kt] = torch weight[:, :, 0, kt]
    p['gcn_b'] = rn(ks[9], (2 * c_out,))
    p['lstm_wih'] = rn(ks[10], (N, 4 * N))             # torch weight_ih_l0^T
    p['lstm_whh'] = rn(ks[11], (N, 4 * N))             # torch weight_hh_l0^T
    p['lstm_b'] = rn(ks[12], (1, 4 * N))               # b_ih + b_hh
    p['tatt_w1'] = rn(ks[13], (c_out, 1, 1))           # TATT conv1 weight (C,)
    p['tatt_w2'] = rn(ks[14], (1, 1, N))               # TATT conv2 weight (N,)
    p['tatt_w'] = rn(ks[15], (N, c_out))
    p['tatt_b'] = jnp.zeros((L, L), jnp.float32)
    p['tatt_v'] = rn(ks[16], (L, L))
    p['tatt_bn_gamma'] = jnp.ones((L,), jnp.float32)   # BatchNorm1d eval params
    p['tatt_bn_beta'] = jnp.zeros((L,), jnp.float32)
    p['tatt_bn_mean'] = jnp.zeros((L,), jnp.float32)
    p['tatt_bn_var'] = jnp.ones((L,), jnp.float32)
    p['ln_gamma'] = jnp.ones((c_out, N, L), jnp.float32)
    p['ln_beta'] = jnp.zeros((c_out, N, L), jnp.float32)
    # fixed 60x60 temporal mask from the reference TATT_1
    A = jnp.zeros((60, 60), jnp.float32)
    A = A.at[0:12, 0:12].set(1.0).at[12:24, 12:24].set(1.0).at[24:36, 24:36].set(1.0)
    A = A.at[36:60, 36:60].set(1.0)
    p['mask'] = -1e13 * (1.0 - A)
    return p


if __name__ == "__main__":
    B, c_in, c_out, N, L, K, Kt = 2, 4, 8, 8, 60, 3, 3
    key = jax.random.PRNGKey(0)
    kx, ksup, kp = jax.random.split(key, 3)
    x = jax.random.normal(kx, (B, c_in, N, L), dtype=jnp.float32)
    supports = jax.random.uniform(ksup, (N, N), dtype=jnp.float32)
    params = init_params(kp, c_in, c_out, N, L, K, Kt)

    fwd = jax.jit(functools.partial(st_block_2_forward, K=K, Kt=Kt))
    out, adj_out, T_coef = fwd(x, supports, params)
    jax.block_until_ready((out, adj_out, T_coef))

    assert out.shape == (B, c_out, N, L)
    assert adj_out.shape == (B, N, N)
    assert T_coef.shape == (B, L, L)
    assert bool(jnp.all(jnp.isfinite(out)))
    assert bool(jnp.all(jnp.isfinite(adj_out)))
    assert bool(jnp.all(jnp.isfinite(T_coef)))
    print("KERNEL_OK")
</pallas_src>

<mosaic_0001>
module attributes {stable_mosaic.version = 11 : i64} {
  func.func @_head_kernel(%arg0: i32, %arg1: memref<1x4x496xf32, #tpu.memory_space<vmem>>, %arg2: memref<8x4xf32, #tpu.memory_space<vmem>>, %arg3: memref<8x1xf32, #tpu.memory_space<vmem>>, %arg4: memref<3x8x4xf32, #tpu.memory_space<vmem>>, %arg5: memref<8x1xf32, #tpu.memory_space<vmem>>, %arg6: memref<1x8x480xf32, #tpu.memory_space<vmem>>, %arg7: memref<1x8x480xf32, #tpu.memory_space<vmem>>) attributes {dimension_semantics = [#tpu.dimension_semantics<parallel>], iteration_bounds = array<i64: 2>, scalar_prefetch = 0 : i64, scratch_operands = 0 : i64, tpu.core_type = #tpu.core_type<tc>, window_params = [{transform_indices = @transform_0, window_bounds = array<i64: 1, 4, 496>}, {pipeline_mode = #tpu.pipeline_mode<synchronous>, transform_indices = @transform_1, window_bounds = array<i64: 8, 4>}, {pipeline_mode = #tpu.pipeline_mode<synchronous>, transform_indices = @transform_2, window_bounds = array<i64: 8, 1>}, {pipeline_mode = #tpu.pipeline_mode<synchronous>, transform_indices = @transform_3, window_bounds = array<i64: 3, 8, 4>}, {pipeline_mode = #tpu.pipeline_mode<synchronous>, transform_indices = @transform_4, window_bounds = array<i64: 8, 1>}, {transform_indices = @transform_5, window_bounds = array<i64: 1, 8, 480>}, {transform_indices = @transform_6, window_bounds = array<i64: 1, 8, 480>}]} {
    %c0 = arith.constant 0 : index
    %c0_0 = arith.constant 0 : index
    %c8 = arith.constant 8 : index
    %0 = vector.load %arg1[%c0, %c0_0, %c8] : memref<1x4x496xf32, #tpu.memory_space<vmem>>, vector<1x4x480xf32>
    %1 = vector.shape_cast %0 : vector<1x4x480xf32> to vector<4x480xf32>
    %c0_1 = arith.constant 0 : index
    %c0_2 = arith.constant 0 : index
    %2 = vector.load %arg2[%c0_1, %c0_2] : memref<8x4xf32, #tpu.memory_space<vmem>>, vector<8x4xf32>
    %cst = arith.constant dense<0.000000e+00> : vector<8x480xf32>
    %3 = tpu.matmul %2, %1, %cst {dimension_numbers = #tpu.dot_dimension_numbers<[1], [0], [0], [1], [0, 0, 1, 1], [], []>} : vector<8x4xf32>, vector<4x480xf32>, vector<8x480xf32> -> vector<8x480xf32>
    %c0_3 = arith.constant 0 : index
    %c0_4 = arith.constant 0 : index
    %4 = vector.load %arg3[%c0_3, %c0_4] : memref<8x1xf32, #tpu.memory_space<vmem>>, vector<8x1xf32>
    %5 = vector.broadcast %4 : vector<8x1xf32> to vector<8x480xf32>
    %6 = arith.addf %3, %5 : vector<8x480xf32>
    %c0_5 = arith.constant 0 : index
    %c0_6 = arith.constant 0 : index
    %c0_7 = arith.constant 0 : index
    %7 = vector.load %arg6[%c0_5, %c0_6, %c0_7] : memref<1x8x480xf32, #tpu.memory_space<vmem>>, vector<1x8x480xf32>
    %8 = vector.shape_cast %7 : vector<1x8x480xf32> to vector<8x480xf32>
    %9 = vector.shape_cast %6 : vector<8x480xf32> to vector<1x8x480xf32>
    tpu.vector_store %arg6[%c0_5, %c0_6, %c0_7], %9 {strides = array<i32>} : memref<1x8x480xf32, #tpu.memory_space<vmem>>, vector<1x8x480xf32>,
    %c0_8 = arith.constant 0 : index
    %c0_9 = arith.constant 0 : index
    %c0_10 = arith.constant 0 : index
    %10 = vector.load %arg4[%c0_8, %c0_9, %c0_10] : memref<3x8x4xf32, #tpu.memory_space<vmem>>, vector<1x8x4xf32>
    %11 = vector.shape_cast %10 : vector<1x8x4xf32> to vector<8x4xf32>
    %c0_11 = arith.constant 0 : index
    %c0_12 = arith.constant 0 : index
    %c0_13 = arith.constant 0 : index
    %12 = vector.load %arg1[%c0_11, %c0_12, %c0_13] : memref<1x4x496xf32, #tpu.memory_space<vmem>>, vector<1x4x480xf32>
    %13 = vector.shape_cast %12 : vector<1x4x480xf32> to vector<4x480xf32>
    %cst_14 = arith.constant dense<0.000000e+00> : vector<8x480xf32>
    %14 = tpu.matmul %11, %13, %cst_14 {dimension_numbers = #tpu.dot_dimension_numbers<[1], [0], [0], [1], [0, 0, 1, 1], [], []>} : vector<8x4xf32>, vector<4x480xf32>, vector<8x480xf32> -> vector<8x480xf32>
    %c1 = arith.constant 1 : index
    %c0_15 = arith.constant 0 : index
    %c0_16 = arith.constant 0 : index
    %15 = vector.load %arg4[%c1, %c0_15, %c0_16] : memref<3x8x4xf32, #tpu.memory_space<vmem>>, vector<1x8x4xf32>
    %16 = vector.shape_cast %15 : vector<1x8x4xf32> to vector<8x4xf32>
    %cst_17 = arith.constant dense<0.000000e+00> : vector<8x480xf32>
    %17 = tpu.matmul %16, %1, %cst_17 {dimension_numbers = #tpu.dot_dimension_numbers<[1], [0], [0], [1], [0, 0, 1, 1], [], []>} : vector<8x4xf32>, vector<4x480xf32>, vector<8x480xf32> -> vector<8x480xf32>
    %18 = arith.addf %14, %17 : vector<8x480xf32>
    %c2 = arith.constant 2 : index
    %c0_18 = arith.constant 0 : index
    %c0_19 = arith.constant 0 : index
    %19 = vector.load %arg4[%c2, %c0_18, %c0_19] : memref<3x8x4xf32, #tpu.memory_space<vmem>>, vector<1x8x4xf32>
    %20 = vector.shape_cast %19 : vector<1x8x4xf32> to vector<8x4xf32>
    %c0_20 = arith.constant 0 : index
    %c0_21 = arith.constant 0 : index
    %c16 = arith.constant 16 : index
    %21 = vector.load %arg1[%c0_20, %c0_21, %c16] : memref<1x4x496xf32, #tpu.memory_space<vmem>>, vector<1x4x480xf32>
    %22 = vector.shape_cast %21 : vector<1x4x480xf32> to vector<4x480xf32>
    %cst_22 = arith.constant dense<0.000000e+00> : vector<8x480xf32>
    %23 = tpu.matmul %20, %22, %cst_22 {dimension_numbers = #tpu.dot_dimension_numbers<[1], [0], [0], [1], [0, 0, 1, 1], [], []>} : vector<8x4xf32>, vector<4x480xf32>, vector<8x480xf32> -> vector<8x480xf32>
    %24 = arith.addf %18, %23 : vector<8x480xf32>
    %c0_23 = arith.constant 0 : index
    %c0_24 = arith.constant 0 : index
    %25 = vector.load %arg5[%c0_23, %c0_24] : memref<8x1xf32, #tpu.memory_space<vmem>>, vector<8x1xf32>
    %26 = vector.broadcast %25 : vector<8x1xf32> to vector<8x480xf32>
    %27 = arith.addf %24, %26 : vector<8x480xf32>
    %cst_25 = arith.constant 0.000000e+00 : f32
    %28 = vector.broadcast %cst_25 : f32 to vector<8x480xf32>
    %29 = arith.cmpf ogt, %27, %28 : vector<8x480xf32>
    %cst_26 = arith.constant 0.00999999977 : f32
    %30 = vector.broadcast %cst_26 : f32 to vector<8x480xf32>
    %31 = arith.mulf %30, %27 : vector<8x480xf32>
    %32 = arith.select %29, %27, %31 : vector<8x480xi1>, vector<8x480xf32>
    %c0_27 = arith.constant 0 : index
    %c0_28 = arith.constant 0 : index
    %c0_29 = arith.constant 0 : index
    %33 = vector.load %arg7[%c0_27, %c0_28, %c0_29] : memref<1x8x480xf32, #tpu.memory_space<vmem>>, vector<1x8x480xf32>
    %34 = vector.shape_cast %33 : vector<1x8x480xf32> to vector<8x480xf32>
    %35 = vector.shape_cast %32 : vector<8x480xf32> to vector<1x8x480xf32>
    tpu.vector_store %arg7[%c0_27, %c0_28, %c0_29], %35 {strides = array<i32>} : memref<1x8x480xf32, #tpu.memory_space<vmem>>, vector<1x8x480xf32>,
    return
  }
  func.func @transform_0(%arg0: i32) -> (i32, i32, i32) {
    %c0_i32 = arith.constant 0 : i32
    %c0_i32_0 = arith.constant 0 : i32
    %c0_i32_1 = arith.constant 0 : i32
    return %arg0, %c0_i32, %c0_i32_0 : i32, i32, i32
  }
  func.func @transform_1(%arg0: i32) -> (i32, i32) {
    %c0_i32 = arith.constant 0 : i32
    %c0_i32_0 = arith.constant 0 : i32
    %c0_i32_1 = arith.constant 0 : i32
    return %c0_i32, %c0_i32_0 : i32, i32
  }
  func.func @transform_2(%arg0: i32) -> (i32, i32) {
    %c0_i32 = arith.constant 0 : i32
    %c0_i32_0 = arith.constant 0 : i32
    %c0_i32_1 = arith.constant 0 : i32
    return %c0_i32, %c0_i32_0 : i32, i32
  }
  func.func @transform_3(%arg0: i32) -> (i32, i32, i32) {
    %c0_i32 = arith.constant 0 : i32
    %c0_i32_0 = arith.constant 0 : i32
    %c0_i32_1 = arith.constant 0 : i32
    %c0_i32_2 = arith.constant 0 : i32
    return %c0_i32, %c0_i32_0, %c0_i32_1 : i32, i32, i32
  }
  func.func @transform_4(%arg0: i32) -> (i32, i32) {
    %c0_i32 = arith.constant 0 : i32
    %c0_i32_0 = arith.constant 0 : i32
    %c0_i32_1 = arith.constant 0 : i32
    return %c0_i32, %c0_i32_0 : i32, i32
  }
  func.func @transform_5(%arg0: i32) -> (i32, i32, i32) {
    %c0_i32 = arith.constant 0 : i32
    %c0_i32_0 = arith.constant 0 : i32
    %c0_i32_1 = arith.constant 0 : i32
    return %arg0, %c0_i32, %c0_i32_0 : i32, i32, i32
  }
  func.func @transform_6(%arg0: i32) -> (i32, i32, i32) {
    %c0_i32 = arith.constant 0 : i32
    %c0_i32_0 = arith.constant 0 : i32
    %c0_i32_1 = arith.constant 0 : i32
    return %arg0, %c0_i32, %c0_i32_0 : i32, i32, i32
  }
}

module attributes {stable_mosaic.version = 11 : i64} {
  func.func @_conv1x1_kernel(%arg0: i32, %arg1: i32, %arg2: memref<1x96x32xf32, #tpu.memory_space<vmem>>, %arg3: memref<16x96xf32, #tpu.memory_space<vmem>>, %arg4: memref<16x1xf32, #tpu.memory_space<vmem>>, %arg5: memref<1x16x32xf32, #tpu.memory_space<vmem>>) attributes {dimension_semantics = [#tpu.dimension_semantics<parallel>, #tpu.dimension_semantics<parallel>], iteration_bounds = array<i64: 2, 1>, scalar_prefetch = 0 : i64, scratch_operands = 0 : i64, tpu.core_type = #tpu.core_type<tc>, window_params = [{transform_indices = @transform_0, window_bounds = array<i64: 1, 96, 32>}, {pipeline_mode = #tpu.pipeline_mode<synchronous>, transform_indices = @transform_1, window_bounds = array<i64: 16, 96>}, {pipeline_mode = #tpu.pipeline_mode<synchronous>, transform_indices = @transform_2, window_bounds = array<i64: 16, 1>}, {transform_indices = @transform_3, window_bounds = array<i64: 1, 16, 32>}]} {
    %c0 = arith.constant 0 : index
    %c0_0 = arith.constant 0 : index
    %0 = vector.load %arg3[%c0, %c0_0] : memref<16x96xf32, #tpu.memory_space<vmem>>, vector<16x96xf32>
    %c0_1 = arith.constant 0 : index
    %c0_2 = arith.constant 0 : index
    %c0_3 = arith.constant 0 : index
    %1 = vector.load %arg2[%c0_1, %c0_2, %c0_3] : memref<1x96x32xf32, #tpu.memory_space<vmem>>, vector<1x96x32xf32>
    %2 = vector.shape_cast %1 : vector<1x96x32xf32> to vector<96x32xf32>
    %cst = arith.constant dense<0.000000e+00> : vector<16x32xf32>
    %3 = tpu.matmul %0, %2, %cst {dimension_numbers = #tpu.dot_dimension_numbers<[1], [0], [0], [1], [0, 0, 1, 1], [], []>} : vector<16x96xf32>, vector<96x32xf32>, vector<16x32xf32> -> vector<16x32xf32>
    %c0_4 = arith.constant 0 : index
    %c0_5 = arith.constant 0 : index
    %4 = vector.load %arg4[%c0_4, %c0_5] : memref<16x1xf32, #tpu.memory_space<vmem>>, vector<16x1xf32>
    %5 = vector.broadcast %4 : vector<16x1xf32> to vector<16x32xf32>
    %6 = arith.addf %3, %5 : vector<16x32xf32>
    %c0_6 = arith.constant 0 : index
    %c0_7 = arith.constant 0 : index
    %c0_8 = arith.constant 0 : index
    %7 = vector.load %arg5[%c0_6, %c0_7, %c0_8] : memref<1x16x32xf32, #tpu.memory_space<vmem>>, vector<1x16x32xf32>
    %8 = vector.shape_cast %7 : vector<1x16x32xf32> to vector<16x32xf32>
    %9 = vector.shape_cast %6 : vector<16x32xf32> to vector<1x16x32xf32>
    tpu.vector_store %arg5[%c0_6, %c0_7, %c0_8], %9 {strides = array<i32>} : memref<1x16x32xf32, #tpu.memory_space<vmem>>, vector<1x16x32xf32>,
    return
  }
  func.func @transform_0(%arg0: i32, %arg1: i32) -> (i32, i32, i32) {
    %c0_i32 = arith.constant 0 : i32
    %c0_i32_0 = arith.constant 0 : i32
    return %arg0, %c0_i32, %arg1 : i32, i32, i32
  }
  func.func @transform_1(%arg0: i32, %arg1: i32) -> (i32, i32) {
    %c0_i32 = arith.constant 0 : i32
    %c0_i32_0 = arith.constant 0 : i32
    %c0_i32_1 = arith.constant 0 : i32
    return %c0_i32, %c0_i32_0 : i32, i32
  }
  func.func @transform_2(%arg0: i32, %arg1: i32) -> (i32, i32) {
    %c0_i32 = arith.constant 0 : i32
    %c0_i32_0 = arith.constant 0 : i32
    %c0_i32_1 = arith.constant 0 : i32
    return %c0_i32, %c0_i32_0 : i32, i32
  }
  func.func @transform_3(%arg0: i32, %arg1: i32) -> (i32, i32, i32) {
    %c0_i32 = arith.constant 0 : i32
    %c0_i32_0 = arith.constant 0 : i32
    return %arg0, %c0_i32, %arg1 : i32, i32, i32
  }
}

module attributes {stable_mosaic.version = 11 : i64} {
  func.func @_satt_kernel(%arg0: i32, %arg1: memref<1x16x8x2xf32, #tpu.memory_space<vmem>>, %arg2: memref<1x16x8x2xf32, #tpu.memory_space<vmem>>, %arg3: memref<1x4x8x8xf32, #tpu.memory_space<vmem>>) attributes {dimension_semantics = [#tpu.dimension_semantics<parallel>], iteration_bounds = array<i64: 2>, scalar_prefetch = 0 : i64, scratch_operands = 0 : i64, tpu.core_type = #tpu.core_type<tc>, window_params = [{transform_indices = @transform_0, window_bounds = array<i64: 1, 16, 8, 2>}, {transform_indices = @transform_1, window_bounds = array<i64: 1, 16, 8, 2>}, {transform_indices = @transform_2, window_bounds = array<i64: 1, 4, 8, 8>}]} {
    %c0 = arith.constant 0 : index
    %c0_0 = arith.constant 0 : index
    %c0_1 = arith.constant 0 : index
    %c0_2 = arith.constant 0 : index
    %0 = vector.load %arg1[%c0, %c0_0, %c0_1, %c0_2] : memref<1x16x8x2xf32, #tpu.memory_space<vmem>>, vector<1x16x8x2xf32>
    %1 = vector.shape_cast %0 : vector<1x16x8x2xf32> to vector<16x8x2xf32>
    %c0_3 = arith.constant 0 : index
    %c0_4 = arith.constant 0 : index
    %c0_5 = arith.constant 0 : index
    %c0_6 = arith.constant 0 : index
    %2 = vector.load %arg2[%c0_3, %c0_4, %c0_5, %c0_6] : memref<1x16x8x2xf32, #tpu.memory_space<vmem>>, vector<1x16x8x2xf32>
    %3 = vector.shape_cast %2 : vector<1x16x8x2xf32> to vector<16x8x2xf32>
    "tpu.trace_start"() <{level = 10 : i32, message = "gnc,gqc->gnq"}> : () -> ()
    %cst = arith.constant dense<0.000000e+00> : vector<16x8x8xf32>
    %4 = tpu.matmul %1, %3, %cst {dimension_numbers = #tpu.dot_dimension_numbers<[2], [2], [1], [1], [0, 0, 0, 1, 1, 1], [0], [0]>} : vector<16x8x2xf32>, vector<16x8x2xf32>, vector<16x8x8xf32> -> vector<16x8x8xf32>
    "tpu.trace_stop"() : () -> ()
    %5 = arith.negf %4 : vector<16x8x8xf32>
    %6 = math.exp %5 : vector<16x8x8xf32>
    %cst_7 = arith.constant 1.000000e+00 : f32
    %7 = vector.broadcast %cst_7 : f32 to vector<16x8x8xf32>
    %8 = arith.addf %7, %6 : vector<16x8x8xf32>
    %9 = arith.divf %7, %8 : vector<16x8x8xf32>
    %10 = vector.shape_cast %9 : vector<16x8x8xf32> to vector<4x4x8x8xf32>
    %cst_8 = arith.constant dense<0.000000e+00> : vector<4x8x8xf32>
    %11 = vector.multi_reduction <add>, %10, %cst_8 [0] : vector<4x4x8x8xf32> to vector<4x8x8xf32>
    %cst_9 = arith.constant 4.000000e+00 : f32
    %12 = vector.broadcast %cst_9 : f32 to vector<4x8x8xf32>
    %13 = arith.divf %11, %12 : vector<4x8x8xf32>
    %c0_10 = arith.constant 0 : index
    %c0_11 = arith.constant 0 : index
    %c0_12 = arith.constant 0 : index
    %c0_13 = arith.constant 0 : index
    %14 = vector.load %arg3[%c0_10, %c0_11, %c0_12, %c0_13] : memref<1x4x8x8xf32, #tpu.memory_space<vmem>>, vector<1x4x8x8xf32>
    %15 = vector.shape_cast %14 : vector<1x4x8x8xf32> to vector<4x8x8xf32>
    %16 = vector.shape_cast %13 : vector<4x8x8xf32> to vector<1x4x8x8xf32>
    tpu.vector_store %arg3[%c0_10, %c0_11, %c0_12, %c0_13], %16 {strides = array<i32>} : memref<1x4x8x8xf32, #tpu.memory_space<vmem>>, vector<1x4x8x8xf32>,
    return
  }
  func.func @transform_0(%arg0: i32) -> (i32, i32, i32, i32) {
    %c0_i32 = arith.constant 0 : i32
    %c0_i32_0 = arith.constant 0 : i32
    %c0_i32_1 = arith.constant 0 : i32
    %c0_i32_2 = arith.constant 0 : i32
    return %arg0, %c0_i32, %c0_i32_0, %c0_i32_1 : i32, i32, i32, i32
  }
  func.func @transform_1(%arg0: i32) -> (i32, i32, i32, i32) {
    %c0_i32 = arith.constant 0 : i32
    %c0_i32_0 = arith.constant 0 : i32
    %c0_i32_1 = arith.constant 0 : i32
    %c0_i32_2 = arith.constant 0 : i32
    return %arg0, %c0_i32, %c0_i32_0, %c0_i32_1 : i32, i32, i32, i32
  }
  func.func @transform_2(%arg0: i32) -> (i32, i32, i32, i32) {
    %c0_i32 = arith.constant 0 : i32
    %c0_i32_0 = arith.constant 0 : i32
    %c0_i32_1 = arith.constant 0 : i32
    %c0_i32_2 = arith.constant 0 : i32
    return %arg0, %c0_i32, %c0_i32_0, %c0_i32_1 : i32, i32, i32, i32
  }
}

module attributes {stable_mosaic.version = 11 : i64} {
  func.func @_conv1x1_kernel(%arg0: i32, %arg1: i32, %arg2: memref<1x8x96xf32, #tpu.memory_space<vmem>>, %arg3: memref<16x8xf32, #tpu.memory_space<vmem>>, %arg4: memref<16x1xf32, #tpu.memory_space<vmem>>, %arg5: memref<1x16x96xf32, #tpu.memory_space<vmem>>) attributes {dimension_semantics = [#tpu.dimension_semantics<parallel>, #tpu.dimension_semantics<parallel>], iteration_bounds = array<i64: 2, 1>, scalar_prefetch = 0 : i64, scratch_operands = 0 : i64, tpu.core_type = #tpu.core_type<tc>, window_params = [{transform_indices = @transform_0, window_bounds = array<i64: 1, 8, 96>}, {pipeline_mode = #tpu.pipeline_mode<synchronous>, transform_indices = @transform_1, window_bounds = array<i64: 16, 8>}, {pipeline_mode = #tpu.pipeline_mode<synchronous>, transform_indices = @transform_2, window_bounds = array<i64: 16, 1>}, {transform_indices = @transform_3, window_bounds = array<i64: 1, 16, 96>}]} {
    %c0 = arith.constant 0 : index
    %c0_0 = arith.constant 0 : index
    %0 = vector.load %arg3[%c0, %c0_0] : memref<16x8xf32, #tpu.memory_space<vmem>>, vector<16x8xf32>
    %c0_1 = arith.constant 0 : index
    %c0_2 = arith.constant 0 : index
    %c0_3 = arith.constant 0 : index
    %1 = vector.load %arg2[%c0_1, %c0_2, %c0_3] : memref<1x8x96xf32, #tpu.memory_space<vmem>>, vector<1x8x96xf32>
    %2 = vector.shape_cast %1 : vector<1x8x96xf32> to vector<8x96xf32>
    %cst = arith.constant dense<0.000000e+00> : vector<16x96xf32>
    %3 = tpu.matmul %0, %2, %cst {dimension_numbers = #tpu.dot_dimension_numbers<[1], [0], [0], [1], [0, 0, 1, 1], [], []>} : vector<16x8xf32>, vector<8x96xf32>, vector<16x96xf32> -> vector<16x96xf32>
    %c0_4 = arith.constant 0 : index
    %c0_5 = arith.constant 0 : index
    %4 = vector.load %arg4[%c0_4, %c0_5] : memref<16x1xf32, #tpu.memory_space<vmem>>, vector<16x1xf32>
    %5 = vector.broadcast %4 : vector<16x1xf32> to vector<16x96xf32>
    %6 = arith.addf %3, %5 : vector<16x96xf32>
    %c0_6 = arith.constant 0 : index
    %c0_7 = arith.constant 0 : index
    %c0_8 = arith.constant 0 : index
    %7 = vector.load %arg5[%c0_6, %c0_7, %c0_8] : memref<1x16x96xf32, #tpu.memory_space<vmem>>, vector<1x16x96xf32>
    %8 = vector.shape_cast %7 : vector<1x16x96xf32> to vector<16x96xf32>
    %9 = vector.shape_cast %6 : vector<16x96xf32> to vector<1x16x96xf32>
    tpu.vector_store %arg5[%c0_6, %c0_7, %c0_8], %9 {strides = array<i32>} : memref<1x16x96xf32, #tpu.memory_space<vmem>>, vector<1x16x96xf32>,
    return
  }
  func.func @transform_0(%arg0: i32, %arg1: i32) -> (i32, i32, i32) {
    %c0_i32 = arith.constant 0 : i32
    %c0_i32_0 = arith.constant 0 : i32
    return %arg0, %c0_i32, %arg1 : i32, i32, i32
  }
  func.func @transform_1(%arg0: i32, %arg1: i32) -> (i32, i32) {
    %c0_i32 = arith.constant 0 : i32
    %c0_i32_0 = arith.constant 0 : i32
    %c0_i32_1 = arith.constant 0 : i32
    return %c0_i32, %c0_i32_0 : i32, i32
  }
  func.func @transform_2(%arg0: i32, %arg1: i32) -> (i32, i32) {
    %c0_i32 = arith.constant 0 : i32
    %c0_i32_0 = arith.constant 0 : i32
    %c0_i32_1 = arith.constant 0 : i32
    return %c0_i32, %c0_i32_0 : i32, i32
  }
  func.func @transform_3(%arg0: i32, %arg1: i32) -> (i32, i32, i32) {
    %c0_i32 = arith.constant 0 : i32
    %c0_i32_0 = arith.constant 0 : i32
    return %arg0, %c0_i32, %arg1 : i32, i32, i32
  }
}

module attributes {stable_mosaic.version = 11 : i64} {
  func.func @_satt_kernel(%arg0: i32, %arg1: memref<1x48x8x2xf32, #tpu.memory_space<vmem>>, %arg2: memref<1x48x8x2xf32, #tpu.memory_space<vmem>>, %arg3: memref<1x12x8x8xf32, #tpu.memory_space<vmem>>) attributes {dimension_semantics = [#tpu.dimension_semantics<parallel>], iteration_bounds = array<i64: 2>, scalar_prefetch = 0 : i64, scratch_operands = 0 : i64, tpu.core_type = #tpu.core_type<tc>, window_params = [{transform_indices = @transform_0, window_bounds = array<i64: 1, 48, 8, 2>}, {transform_indices = @transform_1, window_bounds = array<i64: 1, 48, 8, 2>}, {transform_indices = @transform_2, window_bounds = array<i64: 1, 12, 8, 8>}]} {
    %c0 = arith.constant 0 : index
    %c0_0 = arith.constant 0 : index
    %c0_1 = arith.constant 0 : index
    %c0_2 = arith.constant 0 : index
    %0 = vector.load %arg1[%c0, %c0_0, %c0_1, %c0_2] : memref<1x48x8x2xf32, #tpu.memory_space<vmem>>, vector<1x48x8x2xf32>
    %1 = vector.shape_cast %0 : vector<1x48x8x2xf32> to vector<48x8x2xf32>
    %c0_3 = arith.constant 0 : index
    %c0_4 = arith.constant 0 : index
    %c0_5 = arith.constant 0 : index
    %c0_6 = arith.constant 0 : index
    %2 = vector.load %arg2[%c0_3, %c0_4, %c0_5, %c0_6] : memref<1x48x8x2xf32, #tpu.memory_space<vmem>>, vector<1x48x8x2xf32>
    %3 = vector.shape_cast %2 : vector<1x48x8x2xf32> to vector<48x8x2xf32>
    "tpu.trace_start"() <{level = 10 : i32, message = "gnc,gqc->gnq"}> : () -> ()
    %cst = arith.constant dense<0.000000e+00> : vector<48x8x8xf32>
    %4 = tpu.matmul %1, %3, %cst {dimension_numbers = #tpu.dot_dimension_numbers<[2], [2], [1], [1], [0, 0, 0, 1, 1, 1], [0], [0]>} : vector<48x8x2xf32>, vector<48x8x2xf32>, vector<48x8x8xf32> -> vector<48x8x8xf32>
    "tpu.trace_stop"() : () -> ()
    %5 = arith.negf %4 : vector<48x8x8xf32>
    %6 = math.exp %5 : vector<48x8x8xf32>
    %cst_7 = arith.constant 1.000000e+00 : f32
    %7 = vector.broadcast %cst_7 : f32 to vector<48x8x8xf32>
    %8 = arith.addf %7, %6 : vector<48x8x8xf32>
    %9 = arith.divf %7, %8 : vector<48x8x8xf32>
    %10 = vector.shape_cast %9 : vector<48x8x8xf32> to vector<4x12x8x8xf32>
    %cst_8 = arith.constant dense<0.000000e+00> : vector<12x8x8xf32>
    %11 = vector.multi_reduction <add>, %10, %cst_8 [0] : vector<4x12x8x8xf32> to vector<12x8x8xf32>
    %cst_9 = arith.constant 4.000000e+00 : f32
    %12 = vector.broadcast %cst_9 : f32 to vector<12x8x8xf32>
    %13 = arith.divf %11, %12 : vector<12x8x8xf32>
    %c0_10 = arith.constant 0 : index
    %c0_11 = arith.constant 0 : index
    %c0_12 = arith.constant 0 : index
    %c0_13 = arith.constant 0 : index
    %14 = vector.load %arg3[%c0_10, %c0_11, %c0_12, %c0_13] : memref<1x12x8x8xf32, #tpu.memory_space<vmem>>, vector<1x12x8x8xf32>
    %15 = vector.shape_cast %14 : vector<1x12x8x8xf32> to vector<12x8x8xf32>
    %16 = vector.shape_cast %13 : vector<12x8x8xf32> to vector<1x12x8x8xf32>
    tpu.vector_store %arg3[%c0_10, %c0_11, %c0_12, %c0_13], %16 {strides = array<i32>} : memref<1x12x8x8xf32, #tpu.memory_space<vmem>>, vector<1x12x8x8xf32>,
    return
  }
  func.func @transform_0(%arg0: i32) -> (i32, i32, i32, i32) {
    %c0_i32 = arith.constant 0 : i32
    %c0_i32_0 = arith.constant 0 : i32
    %c0_i32_1 = arith.constant 0 : i32
    %c0_i32_2 = arith.constant 0 : i32
    return %arg0, %c0_i32, %c0_i32_0, %c0_i32_1 : i32, i32, i32, i32
  }
  func.func @transform_1(%arg0: i32) -> (i32, i32, i32, i32) {
    %c0_i32 = arith.constant 0 : i32
    %c0_i32_0 = arith.constant 0 : i32
    %c0_i32_1 = arith.constant 0 : i32
    %c0_i32_2 = arith.constant 0 : i32
    return %arg0, %c0_i32, %c0_i32_0, %c0_i32_1 : i32, i32, i32, i32
  }
  func.func @transform_2(%arg0: i32) -> (i32, i32, i32, i32) {
    %c0_i32 = arith.constant 0 : i32
    %c0_i32_0 = arith.constant 0 : i32
    %c0_i32_1 = arith.constant 0 : i32
    %c0_i32_2 = arith.constant 0 : i32
    return %arg0, %c0_i32, %c0_i32_0, %c0_i32_1 : i32, i32, i32, i32
  }
}

module attributes {stable_mosaic.version = 11 : i64} {
  func.func @_lstm_kernel(%arg0: i32, %arg1: memref<16x8x8xf32, #tpu.memory_space<vmem>>, %arg2: memref<8x32xf32, #tpu.memory_space<vmem>>, %arg3: memref<8x32xf32, #tpu.memory_space<vmem>>, %arg4: memref<1x32xf32, #tpu.memory_space<vmem>>, %arg5: memref<8x8xf32, #tpu.memory_space<vmem>>, %arg6: memref<16x8x32xf32, #tpu.memory_space<vmem>>) attributes {dimension_semantics = [#tpu.dimension_semantics<parallel>], iteration_bounds = array<i64: 2>, scalar_prefetch = 0 : i64, scratch_operands = 1 : i64, tpu.core_type = #tpu.core_type<tc>, window_params = [{transform_indices = @transform_0, window_bounds = array<i64: 16, 8, 8>}, {pipeline_mode = #tpu.pipeline_mode<synchronous>, transform_indices = @transform_1, window_bounds = array<i64: 8, 32>}, {pipeline_mode = #tpu.pipeline_mode<synchronous>, transform_indices = @transform_2, window_bounds = array<i64: 8, 32>}, {pipeline_mode = #tpu.pipeline_mode<synchronous>, transform_indices = @transform_3, window_bounds = array<i64: 1, 32>}, {transform_indices = @transform_4, window_bounds = array<i64: 8, 8>}]} {
    %c0 = arith.constant 0 : index
    %c0_0 = arith.constant 0 : index
    %c0_1 = arith.constant 0 : index
    %0 = vector.load %arg1[%c0, %c0_0, %c0_1] : memref<16x8x8xf32, #tpu.memory_space<vmem>>, vector<1x8x8xf32>
    %1 = vector.shape_cast %0 : vector<1x8x8xf32> to vector<8x8xf32>
    %c0_2 = arith.constant 0 : index
    %c0_3 = arith.constant 0 : index
    %2 = vector.load %arg2[%c0_2, %c0_3] : memref<8x32xf32, #tpu.memory_space<vmem>>, vector<8x32xf32>
    %cst = arith.constant dense<0.000000e+00> : vector<8x32xf32>
    %3 = tpu.matmul %1, %2, %cst {dimension_numbers = #tpu.dot_dimension_numbers<[1], [0], [0], [1], [0, 0, 1, 1], [], []>} : vector<8x8xf32>, vector<8x32xf32>, vector<8x32xf32> -> vector<8x32xf32>
    %c0_4 = arith.constant 0 : index
    %c0_5 = arith.constant 0 : index
    %4 = vector.load %arg4[%c0_4, %c0_5] : memref<1x32xf32, #tpu.memory_space<vmem>>, vector<1x32xf32>
    %5 = vector.broadcast %4 : vector<1x32xf32> to vector<8x32xf32>
    %6 = arith.addf %3, %5 : vector<8x32xf32>
    %c0_6 = arith.constant 0 : index
    %c0_7 = arith.constant 0 : index
    %c0_8 = arith.constant 0 : index
    %7 = vector.load %arg6[%c0_6, %c0_7, %c0_8] : memref<16x8x32xf32, #tpu.memory_space<vmem>>, vector<1x8x32xf32>
    %8 = vector.shape_cast %7 : vector<1x8x32xf32> to vector<8x32xf32>
    %9 = vector.shape_cast %6 : vector<8x32xf32> to vector<1x8x32xf32>
    tpu.vector_store %arg6[%c0_6, %c0_7, %c0_8], %9 {strides = array<i32>} : memref<16x8x32xf32, #tpu.memory_space<vmem>>, vector<1x8x32xf32>,
    %c1 = arith.constant 1 : index
    %c0_9 = arith.constant 0 : index
    %c0_10 = arith.constant 0 : index
    %10 = vector.load %arg1[%c1, %c0_9, %c0_10] : memref<16x8x8xf32, #tpu.memory_space<vmem>>, vector<1x8x8xf32>
    %11 = vector.shape_cast %10 : vector<1x8x8xf32> to vector<8x8xf32>
    %c0_11 = arith.constant 0 : index
    %c0_12 = arith.constant 0 : index
    %12 = vector.load %arg2[%c0_11, %c0_12] : memref<8x32xf32, #tpu.memory_space<vmem>>, vector<8x32xf32>
    %cst_13 = arith.constant dense<0.000000e+00> : vector<8x32xf32>
    %13 = tpu.matmul %11, %12, %cst_13 {dimension_numbers = #tpu.dot_dimension_numbers<[1], [0], [0], [1], [0, 0, 1, 1], [], []>} : vector<8x8xf32>, vector<8x32xf32>, vector<8x32xf32> -> vector<8x32xf32>
    %c0_14 = arith.constant 0 : index
    %c0_15 = arith.constant 0 : index
    %14 = vector.load %arg4[%c0_14, %c0_15] : memref<1x32xf32, #tpu.memory_space<vmem>>, vector<1x32xf32>
    %15 = vector.broadcast %14 : vector<1x32xf32> to vector<8x32xf32>
    %16 = arith.addf %13, %15 : vector<8x32xf32>
    %c1_16 = arith.constant 1 : index
    %c0_17 = arith.constant 0 : index
    %c0_18 = arith.constant 0 : index
    %17 = vector.load %arg6[%c1_16, %c0_17, %c0_18] : memref<16x8x32xf32, #tpu.memory_space<vmem>>, vector<1x8x32xf32>
    %18 = vector.shape_cast %17 : vector<1x8x32xf32> to vector<8x32xf32>
    %19 = vector.shape_cast %16 : vector<8x32xf32> to vector<1x8x32xf32>
    tpu.vector_store %arg6[%c1_16, %c0_17, %c0_18], %19 {strides = array<i32>} : memref<16x8x32xf32, #tpu.memory_space<vmem>>, vector<1x8x32xf32>,
    %c2 = arith.constant 2 : index
    %c0_19 = arith.constant 0 : index
    %c0_20 = arith.constant 0 : index
    %20 = vector.load %arg1[%c2, %c0_19, %c0_20] : memref<16x8x8xf32, #tpu.memory_space<vmem>>, vector<1x8x8xf32>
    %21 = vector.shape_cast %20 : vector<1x8x8xf32> to vector<8x8xf32>
    %c0_21 = arith.constant 0 : index
    %c0_22 = arith.constant 0 : index
    %22 = vector.load %arg2[%c0_21, %c0_22] : memref<8x32xf32, #tpu.memory_space<vmem>>, vector<8x32xf32>
    %cst_23 = arith.constant dense<0.000000e+00> : vector<8x32xf32>
    %23 = tpu.matmul %21, %22, %cst_23 {dimension_numbers = #tpu.dot_dimension_numbers<[1], [0], [0], [1], [0, 0, 1, 1], [], []>} : vector<8x8xf32>, vector<8x32xf32>, vector<8x32xf32> -> vector<8x32xf32>
    %c0_24 = arith.constant 0 : index
    %c0_25 = arith.constant 0 : index
    %24 = vector.load %arg4[%c0_24, %c0_25] : memref<1x32xf32, #tpu.memory_space<vmem>>, vector<1x32xf32>
    %25 = vector.broadcast %24 : vector<1x32xf32> to vector<8x32xf32>
    %26 = arith.addf %23, %25 : vector<8x32xf32>
    %c2_26 = arith.constant 2 : index
    %c0_27 = arith.constant 0 : index
    %c0_28 = arith.constant 0 : index
    %27 = vector.load %arg6[%c2_26, %c0_27, %c0_28] : memref<16x8x32xf32, #tpu.memory_space<vmem>>, vector<1x8x32xf32>
    %28 = vector.shape_cast %27 : vector<1x8x32xf32> to vector<8x32xf32>
    %29 = vector.shape_cast %26 : vector<8x32xf32> to vector<1x8x32xf32>
    tpu.vector_store %arg6[%c2_26, %c0_27, %c0_28], %29 {strides = array<i32>} : memref<16x8x32xf32, #tpu.memory_space<vmem>>, vector<1x8x32xf32>,
    %c3 = arith.constant 3 : index
    %c0_29 = arith.constant 0 : index
    %c0_30 = arith.constant 0 : index
    %30 = vector.load %arg1[%c3, %c0_29, %c0_30] : memref<16x8x8xf32, #tpu.memory_space<vmem>>, vector<1x8x8xf32>
    %31 = vector.shape_cast %30 : vector<1x8x8xf32> to vector<8x8xf32>
    %c0_31 = arith.constant 0 : index
    %c0_32 = arith.constant 0 : index
    %32 = vector.load %arg2[%c0_31, %c0_32] : memref<8x32xf32, #tpu.memory_space<vmem>>, vector<8x32xf32>
    %cst_33 = arith.constant dense<0.000000e+00> : vector<8x32xf32>
    %33 = tpu.matmul %31, %32, %cst_33 {dimension_numbers = #tpu.dot_dimension_numbers<[1], [0], [0], [1], [0, 0, 1, 1], [], []>} : vector<8x8xf32>, vector<8x32xf32>, vector<8x32xf32> -> vector<8x32xf32>
    %c0_34 = arith.constant 0 : index
    %c0_35 = arith.constant 0 : index
    %34 = vector.load %arg4[%c0_34, %c0_35] : memref<1x32xf32, #tpu.memory_space<vmem>>, vector<1x32xf32>
    %35 = vector.broadcast %34 : vector<1x32xf32> to vector<8x32xf32>
    %36 = arith.addf %33, %35 : vector<8x32xf32>
    %c3_36 = arith.constant 3 : index
    %c0_37 = arith.constant 0 : index
    %c0_38 = arith.constant 0 : index
    %37 = vector.load %arg6[%c3_36, %c0_37, %c0_38] : memref<16x8x32xf32, #tpu.memory_space<vmem>>, vector<1x8x32xf32>
    %38 = vector.shape_cast %37 : vector<1x8x32xf32> to vector<8x32xf32>
    %39 = vector.shape_cast %36 : vector<8x32xf32> to vector<1x8x32xf32>
    tpu.vector_store %arg6[%c3_36, %c0_37, %c0_38], %39 {strides = array<i32>} : memref<16x8x32xf32, #tpu.memory_space<vmem>>, vector<1x8x32xf32>,
    %c4 = arith.constant 4 : index
    %c0_39 = arith.constant 0 : index
    %c0_40 = arith.constant 0 : index
    %40 = vector.load %arg1[%c4, %c0_39, %c0_40] : memref<16x8x8xf32, #tpu.memory_space<vmem>>, vector<1x8x8xf32>
    %41 = vector.shape_cast %40 : vector<1x8x8xf32> to vector<8x8xf32>
    %c0_41 = arith.constant 0 : index
    %c0_42 = arith.constant 0 : index
    %42 = vector.load %arg2[%c0_41, %c0_42] : memref<8x32xf32, #tpu.memory_space<vmem>>, vector<8x32xf32>
    %cst_43 = arith.constant dense<0.000000e+00> : vector<8x32xf32>
    %43 = tpu.matmul %41, %42, %cst_43 {dimension_numbers = #tpu.dot_dimension_numbers<[1], [0], [0], [1], [0, 0, 1, 1], [], []>} : vector<8x8xf32>, vector<8x32xf32>, vector<8x32xf32> -> vector<8x32xf32>
    %c0_44 = arith.constant 0 : index
    %c0_45 = arith.constant 0 : index
    %44 = vector.load %arg4[%c0_44, %c0_45] : memref<1x32xf32, #tpu.memory_space<vmem>>, vector<1x32xf32>
    %45 = vector.broadcast %44 : vector<1x32xf32> to vector<8x32xf32>
    %46 = arith.addf %43, %45 : vector<8x32xf32>
    %c4_46 = arith.constant 4 : index
    %c0_47 = arith.constant 0 : index
    %c0_48 = arith.constant 0 : index
    %47 = vector.load %arg6[%c4_46, %c0_47, %c0_48] : memref<16x8x32xf32, #tpu.memory_space<vmem>>, vector<1x8x32xf32>
    %48 = vector.shape_cast %47 : vector<1x8x32xf32> to vector<8x32xf32>
    %49 = vector.shape_cast %46 : vector<8x32xf32> to vector<1x8x32xf32>
    tpu.vector_store %arg6[%c4_46, %c0_47, %c0_48], %49 {strides = array<i32>} : memref<16x8x32xf32, #tpu.memory_space<vmem>>, vector<1x8x32xf32>,
    %c5 = arith.constant 5 : index
    %c0_49 = arith.constant 0 : index
    %c0_50 = arith.constant 0 : index
    %50 = vector.load %arg1[%c5, %c0_49, %c0_50] : memref<16x8x8xf32, #tpu.memory_space<vmem>>, vector<1x8x8xf32>
    %51 = vector.shape_cast %50 : vector<1x8x8xf32> to vector<8x8xf32>
    %c0_51 = arith.constant 0 : index
    %c0_52 = arith.constant 0 : index
    %52 = vector.load %arg2[%c0_51, %c0_52] : memref<8x32xf32, #tpu.memory_space<vmem>>, vector<8x32xf32>
    %cst_53 = arith.constant dense<0.000000e+00> : vector<8x32xf32>
    %53 = tpu.matmul %51, %52, %cst_53 {dimension_numbers = #tpu.dot_dimension_numbers<[1], [0], [0], [1], [0, 0, 1, 1], [], []>} : vector<8x8xf32>, vector<8x32xf32>, vector<8x32xf32> -> vector<8x32xf32>
    %c0_54 = arith.constant 0 : index
    %c0_55 = arith.constant 0 : index
    %54 = vector.load %arg4[%c0_54, %c0_55] : memref<1x32xf32, #tpu.memory_space<vmem>>, vector<1x32xf32>
    %55 = vector.broadcast %54 : vector<1x32xf32> to vector<8x32xf32>
    %56 = arith.addf %53, %55 : vector<8x32xf32>
    %c5_56 = arith.constant 5 : index
    %c0_57 = arith.constant 0 : index
    %c0_58 = arith.constant 0 : index
    %57 = vector.load %arg6[%c5_56, %c0_57, %c0_58] : memref<16x8x32xf32, #tpu.memory_space<vmem>>, vector<1x8x32xf32>
    %58 = vector.shape_cast %57 : vector<1x8x32xf32> to vector<8x32xf32>
    %59 = vector.shape_cast %56 : vector<8x32xf32> to vector<1x8x32xf32>
    tpu.vector_store %arg6[%c5_56, %c0_57, %c0_58], %59 {strides = array<i32>} : memref<16x8x32xf32, #tpu.memory_space<vmem>>, vector<1x8x32xf32>,
    %c6 = arith.constant 6 : index
    %c0_59 = arith.constant 0 : index
    %c0_60 = arith.constant 0 : index
    %60 = vector.load %arg1[%c6, %c0_59, %c0_60] : memref<16x8x8xf32, #tpu.memory_space<vmem>>, vector<1x8x8xf32>
    %61 = vector.shape_cast %60 : vector<1x8x8xf32> to vector<8x8xf32>
    %c0_61 = arith.constant 0 : index
    %c0_62 = arith.constant 0 : index
    %62 = vector.load %arg2[%c0_61, %c0_62] : memref<8x32xf32, #tpu.memory_space<vmem>>, vector<8x32xf32>
    %cst_63 = arith.constant dense<0.000000e+00> : vector<8x32xf32>
    %63 = tpu.matmul %61, %62, %cst_63 {dimension_numbers = #tpu.dot_dimension_numbers<[1], [0], [0], [1], [0, 0, 1, 1], [], []>} : vector<8x8xf32>, vector<8x32xf32>, vector<8x32xf32> -> vector<8x32xf32>
    %c0_64 = arith.constant 0 : index
    %c0_65 = arith.constant 0 : index
    %64 = vector.load %arg4[%c0_64, %c0_65] : memref<1x32xf32, #tpu.memory_space<vmem>>, vector<1x32xf32>
    %65 = vector.broadcast %64 : vector<1x32xf32> to vector<8x32xf32>
    %66 = arith.addf %63, %65 : vector<8x32xf32>
    %c6_66 = arith.constant 6 : index
    %c0_67 = arith.constant 0 : index
    %c0_68 = arith.constant 0 : index
    %67 = vector.load %arg6[%c6_66, %c0_67, %c0_68] : memref<16x8x32xf32, #tpu.memory_space<vmem>>, vector<1x8x32xf32>
    %68 = vector.shape_cast %67 : vector<1x8x32xf32> to vector<8x32xf32>
    %69 = vector.shape_cast %66 : vector<8x32xf32> to vector<1x8x32xf32>
    tpu.vector_store %arg6[%c6_66, %c0_67, %c0_68], %69 {strides = array<i32>} : memref<16x8x32xf32, #tpu.memory_space<vmem>>, vector<1x8x32xf32>,
    %c7 = arith.constant 7 : index
    %c0_69 = arith.constant 0 : index
    %c0_70 = arith.constant 0 : index
    %70 = vector.load %arg1[%c7, %c0_69, %c0_70] : memref<16x8x8xf32, #tpu.memory_space<vmem>>, vector<1x8x8xf32>
    %71 = vector.shape_cast %70 : vector<1x8x8xf32> to vector<8x8xf32>
    %c0_71 = arith.constant 0 : index
    %c0_72 = arith.constant 0 : index
    %72 = vector.load %arg2[%c0_71, %c0_72] : memref<8x32xf32, #tpu.memory_space<vmem>>, vector<8x32xf32>
    %cst_73 = arith.constant dense<0.000000e+00> : vector<8x32xf32>
    %73 = tpu.matmul %71, %72, %cst_73 {dimension_numbers = #tpu.dot_dimension_numbers<[1], [0], [0], [1], [0, 0, 1, 1], [], []>} : vector<8x8xf32>, vector<8x32xf32>, vector<8x32xf32> -> vector<8x32xf32>
    %c0_74 = arith.constant 0 : index
    %c0_75 = arith.constant 0 : index
    %74 = vector.load %arg4[%c0_74, %c0_75] : memref<1x32xf32, #tpu.memory_space<vmem>>, vector<1x32xf32>
    %75 = vector.broadcast %74 : vector<1x32xf32> to vector<8x32xf32>
    %76 = arith.addf %73, %75 : vector<8x32xf32>
    %c7_76 = arith.constant 7 : index
    %c0_77 = arith.constant 0 : index
    %c0_78 = arith.constant 0 : index
    %77 = vector.load %arg6[%c7_76, %c0_77, %c0_78] : memref<16x8x32xf32, #tpu.memory_space<vmem>>, vector<1x8x32xf32>
    %78 = vector.shape_cast %77 : vector<1x8x32xf32> to vector<8x32xf32>
    %79 = vector.shape_cast %76 : vector<8x32xf32> to vector<1x8x32xf32>
    tpu.vector_store %arg6[%c7_76, %c0_77, %c0_78], %79 {strides = array<i32>} : memref<16x8x32xf32, #tpu.memory_space<vmem>>, vector<1x8x32xf32>,
    %c8 = arith.constant 8 : index
    %c0_79 = arith.constant 0 : index
    %c0_80 = arith.constant 0 : index
    %80 = vector.load %arg1[%c8, %c0_79, %c0_80] : memref<16x8x8xf32, #tpu.memory_space<vmem>>, vector<1x8x8xf32>
    %81 = vector.shape_cast %80 : vector<1x8x8xf32> to vector<8x8xf32>
    %c0_81 = arith.constant 0 : index
    %c0_82 = arith.constant 0 : index
    %82 = vector.load %arg2[%c0_81, %c0_82] : memref<8x32xf32, #tpu.memory_space<vmem>>, vector<8x32xf32>
    %cst_83 = arith.constant dense<0.000000e+00> : vector<8x32xf32>
    %83 = tpu.matmul %81, %82, %cst_83 {dimension_numbers = #tpu.dot_dimension_numbers<[1], [0], [0], [1], [0, 0, 1, 1], [], []>} : vector<8x8xf32>, vector<8x32xf32>, vector<8x32xf32> -> vector<8x32xf32>
    %c0_84 = arith.constant 0 : index
    %c0_85 = arith.constant 0 : index
    %84 = vector.load %arg4[%c0_84, %c0_85] : memref<1x32xf32, #tpu.memory_space<vmem>>, vector<1x32xf32>
    %85 = vector.broadcast %84 : vector<1x32xf32> to vector<8x32xf32>
    %86 = arith.addf %83, %85 : vector<8x32xf32>
    %c8_86 = arith.constant 8 : index
    %c0_87 = arith.constant 0 : index
    %c0_88 = arith.constant 0 : index
    %87 = vector.load %arg6[%c8_86, %c0_87, %c0_88] : memref<16x8x32xf32, #tpu.memory_space<vmem>>, vector<1x8x32xf32>
    %88 = vector.shape_cast %87 : vector<1x8x32xf32> to vector<8x32xf32>
    %89 = vector.shape_cast %86 : vector<8x32xf32> to vector<1x8x32xf32>
    tpu.vector_store %arg6[%c8_86, %c0_87, %c0_88], %89 {strides = array<i32>} : memref<16x8x32xf32, #tpu.memory_space<vmem>>, vector<1x8x32xf32>,
    %c9 = arith.constant 9 : index
    %c0_89 = arith.constant 0 : index
    %c0_90 = arith.constant 0 : index
    %90 = vector.load %arg1[%c9, %c0_89, %c0_90] : memref<16x8x8xf32, #tpu.memory_space<vmem>>, vector<1x8x8xf32>
    %91 = vector.shape_cast %90 : vector<1x8x8xf32> to vector<8x8xf32>
    %c0_91 = arith.constant 0 : index
    %c0_92 = arith.constant 0 : index
    %92 = vector.load %arg2[%c0_91, %c0_92] : memref<8x32xf32, #tpu.memory_space<vmem>>, vector<8x32xf32>
    %cst_93 = arith.constant dense<0.000000e+00> : vector<8x32xf32>
    %93 = tpu.matmul %91, %92, %cst_93 {dimension_numbers = #tpu.dot_dimension_numbers<[1], [0], [0], [1], [0, 0, 1, 1], [], []>} : vector<8x8xf32>, vector<8x32xf32>, vector<8x32xf32> -> vector<8x32xf32>
    %c0_94 = arith.constant 0 : index
    %c0_95 = arith.constant 0 : index
    %94 = vector.load %arg4[%c0_94, %c0_95] : memref<1x32xf32, #tpu.memory_space<vmem>>, vector<1x32xf32>
    %95 = vector.broadcast %94 : vector<1x32xf32> to vector<8x32xf32>
    %96 = arith.addf %93, %95 : vector<8x32xf32>
    %c9_96 = arith.constant 9 : index
    %c0_97 = arith.constant 0 : index
    %c0_98 = arith.constant 0 : index
    %97 = vector.load %arg6[%c9_96, %c0_97, %c0_98] : memref<16x8x32xf32, #tpu.memory_space<vmem>>, vector<1x8x32xf32>
    %98 = vector.shape_cast %97 : vector<1x8x32xf32> to vector<8x32xf32>
    %99 = vector.shape_cast %96 : vector<8x32xf32> to vector<1x8x32xf32>
    tpu.vector_store %arg6[%c9_96, %c0_97, %c0_98], %99 {strides = array<i32>} : memref<16x8x32xf32, #tpu.memory_space<vmem>>, vector<1x8x32xf32>,
    %c10 = arith.constant 10 : index
    %c0_99 = arith.constant 0 : index
    %c0_100 = arith.constant 0 : index
    %100 = vector.load %arg1[%c10, %c0_99, %c0_100] : memref<16x8x8xf32, #tpu.memory_space<vmem>>, vector<1x8x8xf32>
    %101 = vector.shape_cast %100 : vector<1x8x8xf32> to vector<8x8xf32>
    %c0_101 = arith.constant 0 : index
    %c0_102 = arith.constant 0 : index
    %102 = vector.load %arg2[%c0_101, %c0_102] : memref<8x32xf32, #tpu.memory_space<vmem>>, vector<8x32xf32>
    %cst_103 = arith.constant dense<0.000000e+00> : vector<8x32xf32>
    %103 = tpu.matmul %101, %102, %cst_103 {dimension_numbers = #tpu.dot_dimension_numbers<[1], [0], [0], [1], [0, 0, 1, 1], [], []>} : vector<8x8xf32>, vector<8x32xf32>, vector<8x32xf32> -> vector<8x32xf32>
    %c0_104 = arith.constant 0 : index
    %c0_105 = arith.constant 0 : index
    %104 = vector.load %arg4[%c0_104, %c0_105] : memref<1x32xf32, #tpu.memory_space<vmem>>, vector<1x32xf32>
    %105 = vector.broadcast %104 : vector<1x32xf32> to vector<8x32xf32>
    %106 = arith.addf %103, %105 : vector<8x32xf32>
    %c10_106 = arith.constant 10 : index
    %c0_107 = arith.constant 0 : index
    %c0_108 = arith.constant 0 : index
    %107 = vector.load %arg6[%c10_106, %c0_107, %c0_108] : memref<16x8x32xf32, #tpu.memory_space<vmem>>, vector<1x8x32xf32>
    %108 = vector.shape_cast %107 : vector<1x8x32xf32> to vector<8x32xf32>
    %109 = vector.shape_cast %106 : vector<8x32xf32> to vector<1x8x32xf32>
    tpu.vector_store %arg6[%c10_106, %c0_107, %c0_108], %109 {strides = array<i32>} : memref<16x8x32xf32, #tpu.memory_space<vmem>>, vector<1x8x32xf32>,
    %c11 = arith.constant 11 : index
    %c0_109 = arith.constant 0 : index
    %c0_110 = arith.constant 0 : index
    %110 = vector.load %arg1[%c11, %c0_109, %c0_110] : memref<16x8x8xf32, #tpu.memory_space<vmem>>, vector<1x8x8xf32>
    %111 = vector.shape_cast %110 : vector<1x8x8xf32> to vector<8x8xf32>
    %c0_111 = arith.constant 0 : index
    %c0_112 = arith.constant 0 : index
    %112 = vector.load %arg2[%c0_111, %c0_112] : memref<8x32xf32, #tpu.memory_space<vmem>>, vector<8x32xf32>
    %cst_113 = arith.constant dense<0.000000e+00> : vector<8x32xf32>
    %113 = tpu.matmul %111, %112, %cst_113 {dimension_numbers = #tpu.dot_dimension_numbers<[1], [0], [0], [1], [0, 0, 1, 1], [], []>} : vector<8x8xf32>, vector<8x32xf32>, vector<8x32xf32> -> vector<8x32xf32>
    %c0_114 = arith.constant 0 : index
    %c0_115 = arith.constant 0 : index
    %114 = vector.load %arg4[%c0_114, %c0_115] : memref<1x32xf32, #tpu.memory_space<vmem>>, vector<1x32xf32>
    %115 = vector.broadcast %114 : vector<1x32xf32> to vector<8x32xf32>
    %116 = arith.addf %113, %115 : vector<8x32xf32>
    %c11_116 = arith.constant 11 : index
    %c0_117 = arith.constant 0 : index
    %c0_118 = arith.constant 0 : index
    %117 = vector.load %arg6[%c11_116, %c0_117, %c0_118] : memref<16x8x32xf32, #tpu.memory_space<vmem>>, vector<1x8x32xf32>
    %118 = vector.shape_cast %117 : vector<1x8x32xf32> to vector<8x32xf32>
    %119 = vector.shape_cast %116 : vector<8x32xf32> to vector<1x8x32xf32>
    tpu.vector_store %arg6[%c11_116, %c0_117, %c0_118], %119 {strides = array<i32>} : memref<16x8x32xf32, #tpu.memory_space<vmem>>, vector<1x8x32xf32>,
    %c12 = arith.constant 12 : index
    %c0_119 = arith.constant 0 : index
    %c0_120 = arith.constant 0 : index
    %120 = vector.load %arg1[%c12, %c0_119, %c0_120] : memref<16x8x8xf32, #tpu.memory_space<vmem>>, vector<1x8x8xf32>
    %121 = vector.shape_cast %120 : vector<1x8x8xf32> to vector<8x8xf32>
    %c0_121 = arith.constant 0 : index
    %c0_122 = arith.constant 0 : index
    %122 = vector.load %arg2[%c0_121, %c0_122] : memref<8x32xf32, #tpu.memory_space<vmem>>, vector<8x32xf32>
    %cst_123 = arith.constant dense<0.000000e+00> : vector<8x32xf32>
    %123 = tpu.matmul %121, %122, %cst_123 {dimension_numbers = #tpu.dot_dimension_numbers<[1], [0], [0], [1], [0, 0, 1, 1], [], []>} : vector<8x8xf32>, vector<8x32xf32>, vector<8x32xf32> -> vector<8x32xf32>
    %c0_124 = arith.constant 0 : index
    %c0_125 = arith.constant 0 : index
    %124 = vector.load %arg4[%c0_124, %c0_125] : memref<1x32xf32, #tpu.memory_space<vmem>>, vector<1x32xf32>
    %125 = vector.broadcast %124 : vector<1x32xf32> to vector<8x32xf32>
    %126 = arith.addf %123, %125 : vector<8x32xf32>
    %c12_126 = arith.constant 12 : index
    %c0_127 = arith.constant 0 : index
    %c0_128 = arith.constant 0 : index
    %127 = vector.load %arg6[%c12_126, %c0_127, %c0_128] : memref<16x8x32xf32, #tpu.memory_space<vmem>>, vector<1x8x32xf32>
    %128 = vector.shape_cast %127 : vector<1x8x32xf32> to vector<8x32xf32>
    %129 = vector.shape_cast %126 : vector<8x32xf32> to vector<1x8x32xf32>
    tpu.vector_store %arg6[%c12_126, %c0_127, %c0_128], %129 {strides = array<i32>} : memref<16x8x32xf32, #tpu.memory_space<vmem>>, vector<1x8x32xf32>,
    %c13 = arith.constant 13 : index
    %c0_129 = arith.constant 0 : index
    %c0_130 = arith.constant 0 : index
    %130 = vector.load %arg1[%c13, %c0_129, %c0_130] : memref<16x8x8xf32, #tpu.memory_space<vmem>>, vector<1x8x8xf32>
    %131 = vector.shape_cast %130 : vector<1x8x8xf32> to vector<8x8xf32>
    %c0_131 = arith.constant 0 : index
    %c0_132 = arith.constant 0 : index
    %132 = vector.load %arg2[%c0_131, %c0_132] : memref<8x32xf32, #tpu.memory_space<vmem>>, vector<8x32xf32>
    %cst_133 = arith.constant dense<0.000000e+00> : vector<8x32xf32>
    %133 = tpu.matmul %131, %132, %cst_133 {dimension_numbers = #tpu.dot_dimension_numbers<[1], [0], [0], [1], [0, 0, 1, 1], [], []>} : vector<8x8xf32>, vector<8x32xf32>, vector<8x32xf32> -> vector<8x32xf32>
    %c0_134 = arith.constant 0 : index
    %c0_135 = arith.constant 0 : index
    %134 = vector.load %arg4[%c0_134, %c0_135] : memref<1x32xf32, #tpu.memory_space<vmem>>, vector<1x32xf32>
    %135 = vector.broadcast %134 : vector<1x32xf32> to vector<8x32xf32>
    %136 = arith.addf %133, %135 : vector<8x32xf32>
    %c13_136 = arith.constant 13 : index
    %c0_137 = arith.constant 0 : index
    %c0_138 = arith.constant 0 : index
    %137 = vector.load %arg6[%c13_136, %c0_137, %c0_138] : memref<16x8x32xf32, #tpu.memory_space<vmem>>, vector<1x8x32xf32>
    %138 = vector.shape_cast %137 : vector<1x8x32xf32> to vector<8x32xf32>
    %139 = vector.shape_cast %136 : vector<8x32xf32> to vector<1x8x32xf32>
    tpu.vector_store %arg6[%c13_136, %c0_137, %c0_138], %139 {strides = array<i32>} : memref<16x8x32xf32, #tpu.memory_space<vmem>>, vector<1x8x32xf32>,
    %c14 = arith.constant 14 : index
    %c0_139 = arith.constant 0 : index
    %c0_140 = arith.constant 0 : index
    %140 = vector.load %arg1[%c14, %c0_139, %c0_140] : memref<16x8x8xf32, #tpu.memory_space<vmem>>, vector<1x8x8xf32>
    %141 = vector.shape_cast %140 : vector<1x8x8xf32> to vector<8x8xf32>
    %c0_141 = arith.constant 0 : index
    %c0_142 = arith.constant 0 : index
    %142 = vector.load %arg2[%c0_141, %c0_142] : memref<8x32xf32, #tpu.memory_space<vmem>>, vector<8x32xf32>
    %cst_143 = arith.constant dense<0.000000e+00> : vector<8x32xf32>
    %143 = tpu.matmul %141, %142, %cst_143 {dimension_numbers = #tpu.dot_dimension_numbers<[1], [0], [0], [1], [0, 0, 1, 1], [], []>} : vector<8x8xf32>, vector<8x32xf32>, vector<8x32xf32> -> vector<8x32xf32>
    %c0_144 = arith.constant 0 : index
    %c0_145 = arith.constant 0 : index
    %144 = vector.load %arg4[%c0_144, %c0_145] : memref<1x32xf32, #tpu.memory_space<vmem>>, vector<1x32xf32>
    %145 = vector.broadcast %144 : vector<1x32xf32> to vector<8x32xf32>
    %146 = arith.addf %143, %145 : vector<8x32xf32>
    %c14_146 = arith.constant 14 : index
    %c0_147 = arith.constant 0 : index
    %c0_148 = arith.constant 0 : index
    %147 = vector.load %arg6[%c14_146, %c0_147, %c0_148] : memref<16x8x32xf32, #tpu.memory_space<vmem>>, vector<1x8x32xf32>
    %148 = vector.shape_cast %147 : vector<1x8x32xf32> to vector<8x32xf32>
    %149 = vector.shape_cast %146 : vector<8x32xf32> to vector<1x8x32xf32>
    tpu.vector_store %arg6[%c14_146, %c0_147, %c0_148], %149 {strides = array<i32>} : memref<16x8x32xf32, #tpu.memory_space<vmem>>, vector<1x8x32xf32>,
    %c15 = arith.constant 15 : index
    %c0_149 = arith.constant 0 : index
    %c0_150 = arith.constant 0 : index
    %150 = vector.load %arg1[%c15, %c0_149, %c0_150] : memref<16x8x8xf32, #tpu.memory_space<vmem>>, vector<1x8x8xf32>
    %151 = vector.shape_cast %150 : vector<1x8x8xf32> to vector<8x8xf32>
    %c0_151 = arith.constant 0 : index
    %c0_152 = arith.constant 0 : index
    %152 = vector.load %arg2[%c0_151, %c0_152] : memref<8x32xf32, #tpu.memory_space<vmem>>, vector<8x32xf32>
    %cst_153 = arith.constant dense<0.000000e+00> : vector<8x32xf32>
    %153 = tpu.matmul %151, %152, %cst_153 {dimension_numbers = #tpu.dot_dimension_numbers<[1], [0], [0], [1], [0, 0, 1, 1], [], []>} : vector<8x8xf32>, vector<8x32xf32>, vector<8x32xf32> -> vector<8x32xf32>
    %c0_154 = arith.constant 0 : index
    %c0_155 = arith.constant 0 : index
    %154 = vector.load %arg4[%c0_154, %c0_155] : memref<1x32xf32, #tpu.memory_space<vmem>>, vector<1x32xf32>
    %155 = vector.broadcast %154 : vector<1x32xf32> to vector<8x32xf32>
    %156 = arith.addf %153, %155 : vector<8x32xf32>
    %c15_156 = arith.constant 15 : index
    %c0_157 = arith.constant 0 : index
    %c0_158 = arith.constant 0 : index
    %157 = vector.load %arg6[%c15_156, %c0_157, %c0_158] : memref<16x8x32xf32, #tpu.memory_space<vmem>>, vector<1x8x32xf32>
    %158 = vector.shape_cast %157 : vector<1x8x32xf32> to vector<8x32xf32>
    %159 = vector.shape_cast %156 : vector<8x32xf32> to vector<1x8x32xf32>
    tpu.vector_store %arg6[%c15_156, %c0_157, %c0_158], %159 {strides = array<i32>} : memref<16x8x32xf32, #tpu.memory_space<vmem>>, vector<1x8x32xf32>,
    %cst_159 = arith.constant 0.000000e+00 : f32
    %160 = vector.broadcast %cst_159 : f32 to vector<8x8xf32>
    %cst_160 = arith.constant 0.000000e+00 : f32
    %161 = vector.broadcast %cst_160 : f32 to vector<8x8xf32>
    %c0_i32 = arith.constant 0 : i32
    %c16_i32 = arith.constant 16 : i32
    %162 = arith.addi %c0_i32, %c16_i32 : i32
    %c1_i32 = arith.constant 1 : i32
    %163:2 = scf.for %arg7 = %c0_i32 to %162 step %c1_i32 iter_args(%arg8 = %160, %arg9 = %161) -> (vector<8x8xf32>, vector<8x8xf32>)  : i32 {
      %c0_164 = arith.constant 0 : index
      %c0_165 = arith.constant 0 : index
      %165 = vector.load %arg3[%c0_164, %c0_165] : memref<8x32xf32, #tpu.memory_space<vmem>>, vector<8x32xf32>
      %cst_166 = arith.constant dense<0.000000e+00> : vector<8x32xf32>
      %166 = tpu.matmul %arg8, %165, %cst_166 {dimension_numbers = #tpu.dot_dimension_numbers<[1], [0], [0], [1], [0, 0, 1, 1], [], []>} : vector<8x8xf32>, vector<8x32xf32>, vector<8x32xf32> -> vector<8x32xf32>
      %167 = arith.index_cast %arg7 : i32 to index
      %c0_167 = arith.constant 0 : index
      %c0_168 = arith.constant 0 : index
      %168 = vector.load %arg6[%167, %c0_167, %c0_168] : memref<16x8x32xf32, #tpu.memory_space<vmem>>, vector<1x8x32xf32>
      %169 = vector.shape_cast %168 : vector<1x8x32xf32> to vector<8x32xf32>
      %170 = arith.addf %166, %169 : vector<8x32xf32>
      %171 = vector.extract_strided_slice %170 {offsets = [0, 0], sizes = [8, 8], strides = [1, 1]} : vector<8x32xf32> to vector<8x8xf32>
      %172 = arith.negf %171 : vector<8x8xf32>
      %173 = math.exp %172 : vector<8x8xf32>
      %cst_169 = arith.constant 1.000000e+00 : f32
      %174 = vector.broadcast %cst_169 : f32 to vector<8x8xf32>
      %175 = arith.addf %174, %173 : vector<8x8xf32>
      %176 = arith.divf %174, %175 : vector<8x8xf32>
      %177 = vector.extract_strided_slice %170 {offsets = [0, 8], sizes = [8, 8], strides = [1, 1]} : vector<8x32xf32> to vector<8x8xf32>
      %178 = arith.negf %177 : vector<8x8xf32>
      %179 = math.exp %178 : vector<8x8xf32>
      %cst_170 = arith.constant 1.000000e+00 : f32
      %180 = vector.broadcast %cst_170 : f32 to vector<8x8xf32>
      %181 = arith.addf %180, %179 : vector<8x8xf32>
      %182 = arith.divf %180, %181 : vector<8x8xf32>
      %183 = vector.extract_strided_slice %170 {offsets = [0, 16], sizes = [8, 8], strides = [1, 1]} : vector<8x32xf32> to vector<8x8xf32>
      %184 = math.tanh %183 : vector<8x8xf32>
      %185 = vector.extract_strided_slice %170 {offsets = [0, 24], sizes = [8, 8], strides = [1, 1]} : vector<8x32xf32> to vector<8x8xf32>
      %186 = arith.negf %185 : vector<8x8xf32>
      %187 = math.exp %186 : vector<8x8xf32>
      %cst_171 = arith.constant 1.000000e+00 : f32
      %188 = vector.broadcast %cst_171 : f32 to vector<8x8xf32>
      %189 = arith.addf %188, %187 : vector<8x8xf32>
      %190 = arith.divf %188, %189 : vector<8x8xf32>
      %191 = arith.mulf %182, %arg9 : vector<8x8xf32>
      %192 = arith.mulf %176, %184 : vector<8x8xf32>
      %193 = arith.addf %191, %192 : vector<8x8xf32>
      %194 = math.tanh %193 : vector<8x8xf32>
      %195 = arith.mulf %190, %194 : vector<8x8xf32>
      scf.yield %195, %193 : vector<8x8xf32>, vector<8x8xf32>
    }
    %c16_i32_161 = arith.constant 16 : i32
    %c0_162 = arith.constant 0 : index
    %c0_163 = arith.constant 0 : index
    %164 = vector.load %arg5[%c0_162, %c0_163] : memref<8x8xf32, #tpu.memory_space<vmem>>, vector<8x8xf32>
    tpu.vector_store %arg5[%c0_162, %c0_163], %163#0 {strides = array<i32>} : memref<8x8xf32, #tpu.memory_space<vmem>>, vector<8x8xf32>,
    return
  }
  func.func @transform_0(%arg0: i32) -> (i32, i32, i32) {
    %c0_i32 = arith.constant 0 : i32
    %c0_i32_0 = arith.constant 0 : i32
    %c0_i32_1 = arith.constant 0 : i32
    return %c0_i32, %arg0, %c0_i32_0 : i32, i32, i32
  }
  func.func @transform_1(%arg0: i32) -> (i32, i32) {
    %c0_i32 = arith.constant 0 : i32
    %c0_i32_0 = arith.constant 0 : i32
    %c0_i32_1 = arith.constant 0 : i32
    return %c0_i32, %c0_i32_0 : i32, i32
  }
  func.func @transform_2(%arg0: i32) -> (i32, i32) {
    %c0_i32 = arith.constant 0 : i32
    %c0_i32_0 = arith.constant 0 : i32
    %c0_i32_1 = arith.constant 0 : i32
    return %c0_i32, %c0_i32_0 : i32, i32
  }
  func.func @transform_3(%arg0: i32) -> (i32, i32) {
    %c0_i32 = arith.constant 0 : i32
    %c0_i32_0 = arith.constant 0 : i32
    %c0_i32_1 = arith.constant 0 : i32
    return %c0_i32, %c0_i32_0 : i32, i32
  }
  func.func @transform_4(%arg0: i32) -> (i32, i32) {
    %c0_i32 = arith.constant 0 : i32
    %c0_i32_0 = arith.constant 0 : i32
    return %arg0, %c0_i32 : i32, i32
  }
}

module attributes {stable_mosaic.version = 11 : i64} {
  func.func @_cheb_kernel(%arg0: i32, %arg1: memref<1x8x8xf32, #tpu.memory_space<vmem>>, %arg2: memref<8x8xf32, #tpu.memory_space<vmem>>, %arg3: memref<1x8x496xf32, #tpu.memory_space<vmem>>, %arg4: memref<1x3x8x496xf32, #tpu.memory_space<vmem>>) attributes {dimension_semantics = [#tpu.dimension_semantics<parallel>], iteration_bounds = array<i64: 2>, scalar_prefetch = 0 : i64, scratch_operands = 0 : i64, tpu.core_type = #tpu.core_type<tc>, window_params = [{transform_indices = @transform_0, window_bounds = array<i64: 1, 8, 8>}, {pipeline_mode = #tpu.pipeline_mode<synchronous>, transform_indices = @transform_1, window_bounds = array<i64: 8, 8>}, {transform_indices = @transform_2, window_bounds = array<i64: 1, 8, 496>}, {transform_indices = @transform_3, window_bounds = array<i64: 1, 3, 8, 496>}]} {
    %c0 = arith.constant 0 : index
    %c0_0 = arith.constant 0 : index
    %c0_1 = arith.constant 0 : index
    %0 = vector.load %arg1[%c0, %c0_0, %c0_1] : memref<1x8x8xf32, #tpu.memory_space<vmem>>, vector<1x8x8xf32>
    %1 = vector.shape_cast %0 : vector<1x8x8xf32> to vector<8x8xf32>
    %c0_2 = arith.constant 0 : index
    %c0_3 = arith.constant 0 : index
    %2 = vector.load %arg2[%c0_2, %c0_3] : memref<8x8xf32, #tpu.memory_space<vmem>>, vector<8x8xf32>
    %3 = arith.mulf %1, %2 : vector<8x8xf32>
    %c0_4 = arith.constant 0 : index
    %c0_5 = arith.constant 0 : index
    %c0_6 = arith.constant 0 : index
    %4 = vector.load %arg3[%c0_4, %c0_5, %c0_6] : memref<1x8x496xf32, #tpu.memory_space<vmem>>, vector<1x8x496xf32>
    %5 = vector.shape_cast %4 : vector<1x8x496xf32> to vector<8x496xf32>
    %c0_7 = arith.constant 0 : index
    %c0_8 = arith.constant 0 : index
    %c0_9 = arith.constant 0 : index
    %c0_10 = arith.constant 0 : index
    %6 = vector.load %arg4[%c0_7, %c0_8, %c0_9, %c0_10] : memref<1x3x8x496xf32, #tpu.memory_space<vmem>>, vector<1x1x8x496xf32>
    %7 = vector.shape_cast %6 : vector<1x1x8x496xf32> to vector<8x496xf32>
    %8 = vector.shape_cast %5 : vector<8x496xf32> to vector<1x1x8x496xf32>
    tpu.vector_store %arg4[%c0_7, %c0_8, %c0_9, %c0_10], %8 {strides = array<i32>} : memref<1x3x8x496xf32, #tpu.memory_space<vmem>>, vector<1x1x8x496xf32>,
    %cst = arith.constant dense<0.000000e+00> : vector<8x496xf32>
    %9 = tpu.matmul %3, %5, %cst {dimension_numbers = #tpu.dot_dimension_numbers<[1], [0], [0], [1], [0, 0, 1, 1], [], []>} : vector<8x8xf32>, vector<8x496xf32>, vector<8x496xf32> -> vector<8x496xf32>
    %c0_11 = arith.constant 0 : index
    %c1 = arith.constant 1 : index
    %c0_12 = arith.constant 0 : index
    %c0_13 = arith.constant 0 : index
    %10 = vector.load %arg4[%c0_11, %c1, %c0_12, %c0_13] : memref<1x3x8x496xf32, #tpu.memory_space<vmem>>, vector<1x1x8x496xf32>
    %11 = vector.shape_cast %10 : vector<1x1x8x496xf32> to vector<8x496xf32>
    %12 = vector.shape_cast %9 : vector<8x496xf32> to vector<1x1x8x496xf32>
    tpu.vector_store %arg4[%c0_11, %c1, %c0_12, %c0_13], %12 {strides = array<i32>} : memref<1x3x8x496xf32, #tpu.memory_space<vmem>>, vector<1x1x8x496xf32>,
    %cst_14 = arith.constant dense<0.000000e+00> : vector<8x496xf32>
    %13 = tpu.matmul %3, %9, %cst_14 {dimension_numbers = #tpu.dot_dimension_numbers<[1], [0], [0], [1], [0, 0, 1, 1], [], []>} : vector<8x8xf32>, vector<8x496xf32>, vector<8x496xf32> -> vector<8x496xf32>
    %cst_15 = arith.constant 2.000000e+00 : f32
    %14 = vector.broadcast %cst_15 : f32 to vector<8x496xf32>
    %15 = arith.mulf %14, %13 : vector<8x496xf32>
    %16 = arith.subf %15, %5 : vector<8x496xf32>
    %c0_16 = arith.constant 0 : index
    %c2 = arith.constant 2 : index
    %c0_17 = arith.constant 0 : index
    %c0_18 = arith.constant 0 : index
    %17 = vector.load %arg4[%c0_16, %c2, %c0_17, %c0_18] : memref<1x3x8x496xf32, #tpu.memory_space<vmem>>, vector<1x1x8x496xf32>
    %18 = vector.shape_cast %17 : vector<1x1x8x496xf32> to vector<8x496xf32>
    %19 = vector.shape_cast %16 : vector<8x496xf32> to vector<1x1x8x496xf32>
    tpu.vector_store %arg4[%c0_16, %c2, %c0_17, %c0_18], %19 {strides = array<i32>} : memref<1x3x8x496xf32, #tpu.memory_space<vmem>>, vector<1x1x8x496xf32>,
    return
  }
  func.func @transform_0(%arg0: i32) -> (i32, i32, i32) {
    %c0_i32 = arith.constant 0 : i32
    %c0_i32_0 = arith.constant 0 : i32
    %c0_i32_1 = arith.constant 0 : i32
    return %arg0, %c0_i32, %c0_i32_0 : i32, i32, i32
  }
  func.func @transform_1(%arg0: i32) -> (i32, i32) {
    %c0_i32 = arith.constant 0 : i32
    %c0_i32_0 = arith.constant 0 : i32
    %c0_i32_1 = arith.constant 0 : i32
    return %c0_i32, %c0_i32_0 : i32, i32
  }
  func.func @transform_2(%arg0: i32) -> (i32, i32, i32) {
    %c0_i32 = arith.constant 0 : i32
    %c0_i32_0 = arith.constant 0 : i32
    %c0_i32_1 = arith.constant 0 : i32
    return %arg0, %c0_i32, %c0_i32_0 : i32, i32, i32
  }
  func.func @transform_3(%arg0: i32) -> (i32, i32, i32, i32) {
    %c0_i32 = arith.constant 0 : i32
    %c0_i32_0 = arith.constant 0 : i32
    %c0_i32_1 = arith.constant 0 : i32
    %c0_i32_2 = arith.constant 0 : i32
    return %arg0, %c0_i32, %c0_i32_0, %c0_i32_1 : i32, i32, i32, i32
  }
}

module attributes {stable_mosaic.version = 11 : i64} {
  func.func @_tconv_kernel(%arg0: i32, %arg1: memref<1x24x496xf32, #tpu.memory_space<vmem>>, %arg2: memref<3x16x24xf32, #tpu.memory_space<vmem>>, %arg3: memref<16x1xf32, #tpu.memory_space<vmem>>, %arg4: memref<1x8x480xf32, #tpu.memory_space<vmem>>) attributes {dimension_semantics = [#tpu.dimension_semantics<parallel>], iteration_bounds = array<i64: 2>, scalar_prefetch = 0 : i64, scratch_operands = 0 : i64, tpu.core_type = #tpu.core_type<tc>, window_params = [{transform_indices = @transform_0, window_bounds = array<i64: 1, 24, 496>}, {pipeline_mode = #tpu.pipeline_mode<synchronous>, transform_indices = @transform_1, window_bounds = array<i64: 3, 16, 24>}, {pipeline_mode = #tpu.pipeline_mode<synchronous>, transform_indices = @transform_2, window_bounds = array<i64: 16, 1>}, {transform_indices = @transform_3, window_bounds = array<i64: 1, 8, 480>}]} {
    %c0 = arith.constant 0 : index
    %c0_0 = arith.constant 0 : index
    %c0_1 = arith.constant 0 : index
    %0 = vector.load %arg2[%c0, %c0_0, %c0_1] : memref<3x16x24xf32, #tpu.memory_space<vmem>>, vector<1x16x24xf32>
    %1 = vector.shape_cast %0 : vector<1x16x24xf32> to vector<16x24xf32>
    %c0_2 = arith.constant 0 : index
    %c0_3 = arith.constant 0 : index
    %c0_4 = arith.constant 0 : index
    %2 = vector.load %arg1[%c0_2, %c0_3, %c0_4] : memref<1x24x496xf32, #tpu.memory_space<vmem>>, vector<1x24x480xf32>
    %3 = vector.shape_cast %2 : vector<1x24x480xf32> to vector<24x480xf32>
    %cst = arith.constant dense<0.000000e+00> : vector<16x480xf32>
    %4 = tpu.matmul %1, %3, %cst {dimension_numbers = #tpu.dot_dimension_numbers<[1], [0], [0], [1], [0, 0, 1, 1], [], []>} : vector<16x24xf32>, vector<24x480xf32>, vector<16x480xf32> -> vector<16x480xf32>
    %c1 = arith.constant 1 : index
    %c0_5 = arith.constant 0 : index
    %c0_6 = arith.constant 0 : index
    %5 = vector.load %arg2[%c1, %c0_5, %c0_6] : memref<3x16x24xf32, #tpu.memory_space<vmem>>, vector<1x16x24xf32>
    %6 = vector.shape_cast %5 : vector<1x16x24xf32> to vector<16x24xf32>
    %c0_7 = arith.constant 0 : index
    %c0_8 = arith.constant 0 : index
    %c8 = arith.constant 8 : index
    %7 = vector.load %arg1[%c0_7, %c0_8, %c8] : memref<1x24x496xf32, #tpu.memory_space<vmem>>, vector<1x24x480xf32>
    %8 = vector.shape_cast %7 : vector<1x24x480xf32> to vector<24x480xf32>
    %cst_9 = arith.constant dense<0.000000e+00> : vector<16x480xf32>
    %9 = tpu.matmul %6, %8, %cst_9 {dimension_numbers = #tpu.dot_dimension_numbers<[1], [0], [0], [1], [0, 0, 1, 1], [], []>} : vector<16x24xf32>, vector<24x480xf32>, vector<16x480xf32> -> vector<16x480xf32>
    %10 = arith.addf %4, %9 : vector<16x480xf32>
    %c2 = arith.constant 2 : index
    %c0_10 = arith.constant 0 : index
    %c0_11 = arith.constant 0 : index
    %11 = vector.load %arg2[%c2, %c0_10, %c0_11] : memref<3x16x24xf32, #tpu.memory_space<vmem>>, vector<1x16x24xf32>
    %12 = vector.shape_cast %11 : vector<1x16x24xf32> to vector<16x24xf32>
    %c0_12 = arith.constant 0 : index
    %c0_13 = arith.constant 0 : index
    %c16 = arith.constant 16 : index
    %13 = vector.load %arg1[%c0_12, %c0_13, %c16] : memref<1x24x496xf32, #tpu.memory_space<vmem>>, vector<1x24x480xf32>
    %14 = vector.shape_cast %13 : vector<1x24x480xf32> to vector<24x480xf32>
    %cst_14 = arith.constant dense<0.000000e+00> : vector<16x480xf32>
    %15 = tpu.matmul %12, %14, %cst_14 {dimension_numbers = #tpu.dot_dimension_numbers<[1], [0], [0], [1], [0, 0, 1, 1], [], []>} : vector<16x24xf32>, vector<24x480xf32>, vector<16x480xf32> -> vector<16x480xf32>
    %16 = arith.addf %10, %15 : vector<16x480xf32>
    %c0_15 = arith.constant 0 : index
    %c0_16 = arith.constant 0 : index
    %17 = vector.load %arg3[%c0_15, %c0_16] : memref<16x1xf32, #tpu.memory_space<vmem>>, vector<16x1xf32>
    %18 = vector.broadcast %17 : vector<16x1xf32> to vector<16x480xf32>
    %19 = arith.addf %16, %18 : vector<16x480xf32>
    %20 = vector.extract_strided_slice %19 {offsets = [8, 0], sizes = [8, 480], strides = [1, 1]} : vector<16x480xf32> to vector<8x480xf32>
    %21 = arith.negf %20 : vector<8x480xf32>
    %22 = math.exp %21 : vector<8x480xf32>
    %cst_17 = arith.constant 1.000000e+00 : f32
    %23 = vector.broadcast %cst_17 : f32 to vector<8x480xf32>
    %24 = arith.addf %23, %22 : vector<8x480xf32>
    %25 = arith.divf %23, %24 : vector<8x480xf32>
    %26 = vector.extract_strided_slice %19 {offsets = [0, 0], sizes = [8, 480], strides = [1, 1]} : vector<16x480xf32> to vector<8x480xf32>
    %cst_18 = arith.constant 0.000000e+00 : f32
    %27 = vector.broadcast %cst_18 : f32 to vector<8x480xf32>
    %28 = arith.cmpf ogt, %26, %27 : vector<8x480xf32>
    %cst_19 = arith.constant 0.00999999977 : f32
    %29 = vector.broadcast %cst_19 : f32 to vector<8x480xf32>
    %30 = arith.mulf %29, %26 : vector<8x480xf32>
    %31 = arith.select %28, %26, %30 : vector<8x480xi1>, vector<8x480xf32>
    %32 = arith.mulf %25, %31 : vector<8x480xf32>
    %c0_20 = arith.constant 0 : index
    %c0_21 = arith.constant 0 : index
    %c0_22 = arith.constant 0 : index
    %33 = vector.load %arg4[%c0_20, %c0_21, %c0_22] : memref<1x8x480xf32, #tpu.memory_space<vmem>>, vector<1x8x480xf32>
    %34 = vector.shape_cast %33 : vector<1x8x480xf32> to vector<8x480xf32>
    %35 = vector.shape_cast %32 : vector<8x480xf32> to vector<1x8x480xf32>
    tpu.vector_store %arg4[%c0_20, %c0_21, %c0_22], %35 {strides = array<i32>} : memref<1x8x480xf32, #tpu.memory_space<vmem>>, vector<1x8x480xf32>,
    return
  }
  func.func @transform_0(%arg0: i32) -> (i32, i32, i32) {
    %c0_i32 = arith.constant 0 : i32
    %c0_i32_0 = arith.constant 0 : i32
    %c0_i32_1 = arith.constant 0 : i32
    return %arg0, %c0_i32, %c0_i32_0 : i32, i32, i32
  }
  func.func @transform_1(%arg0: i32) -> (i32, i32, i32) {
    %c0_i32 = arith.constant 0 : i32
    %c0_i32_0 = arith.constant 0 : i32
    %c0_i32_1 = arith.constant 0 : i32
    %c0_i32_2 = arith.constant 0 : i32
    return %c0_i32, %c0_i32_0, %c0_i32_1 : i32, i32, i32
  }
  func.func @transform_2(%arg0: i32) -> (i32, i32) {
    %c0_i32 = arith.constant 0 : i32
    %c0_i32_0 = arith.constant 0 : i32
    %c0_i32_1 = arith.constant 0 : i32
    return %c0_i32, %c0_i32_0 : i32, i32
  }
  func.func @transform_3(%arg0: i32) -> (i32, i32, i32) {
    %c0_i32 = arith.constant 0 : i32
    %c0_i32_0 = arith.constant 0 : i32
    %c0_i32_1 = arith.constant 0 : i32
    return %arg0, %c0_i32, %c0_i32_0 : i32, i32, i32
  }
}

module attributes {stable_mosaic.version = 11 : i64} {
  func.func @_tatt_tail_kernel(%arg0: i32, %arg1: memref<1x8x60x8xf32, #tpu.memory_space<vmem>>, %arg2: memref<8x1x1xf32, #tpu.memory_space<vmem>>, %arg3: memref<1x1x8xf32, #tpu.memory_space<vmem>>, %arg4: memref<8x8xf32, #tpu.memory_space<vmem>>, %arg5: memref<60x60xf32, #tpu.memory_space<vmem>>, %arg6: memref<60x60xf32, #tpu.memory_space<vmem>>, %arg7: memref<1x60xf32, #tpu.memory_space<vmem>>, %arg8: memref<1x60xf32, #tpu.memory_space<vmem>>, %arg9: memref<60x60xf32, #tpu.memory_space<vmem>>, %arg10: memref<1x8x60x8xf32, #tpu.memory_space<vmem>>, %arg11: memref<8x60x8xf32, #tpu.memory_space<vmem>>, %arg12: memref<8x60x8xf32, #tpu.memory_space<vmem>>, %arg13: memref<1x60x60xf32, #tpu.memory_space<vmem>>, %arg14: memref<1x8x60x8xf32, #tpu.memory_space<vmem>>) attributes {dimension_semantics = [#tpu.dimension_semantics<parallel>], iteration_bounds = array<i64: 2>, scalar_prefetch = 0 : i64, scratch_operands = 0 : i64, tpu.core_type = #tpu.core_type<tc>, window_params = [{transform_indices = @transform_0, window_bounds = array<i64: 1, 8, 60, 8>}, {pipeline_mode = #tpu.pipeline_mode<synchronous>, transform_indices = @transform_1, window_bounds = array<i64: 8, 1, 1>}, {pipeline_mode = #tpu.pipeline_mode<synchronous>, transform_indices = @transform_2, window_bounds = array<i64: 1, 1, 8>}, {pipeline_mode = #tpu.pipeline_mode<synchronous>, transform_indices = @transform_3, window_bounds = array<i64: 8, 8>}, {pipeline_mode = #tpu.pipeline_mode<synchronous>, transform_indices = @transform_4, window_bounds = array<i64: 60, 60>}, {pipeline_mode = #tpu.pipeline_mode<synchronous>, transform_indices = @transform_5, window_bounds = array<i64: 60, 60>}, {pipeline_mode = #tpu.pipeline_mode<synchronous>, transform_indices = @transform_6, window_bounds = array<i64: 1, 60>}, {pipeline_mode = #tpu.pipeline_mode<synchronous>, transform_indices = @transform_7, window_bounds = array<i64: 1, 60>}, {pipeline_mode = #tpu.pipeline_mode<synchronous>, transform_indices = @transform_8, window_bounds = array<i64: 60, 60>}, {transform_indices = @transform_9, window_bounds = array<i64: 1, 8, 60, 8>}, {pipeline_mode = #tpu.pipeline_mode<synchronous>, transform_indices = @transform_10, window_bounds = array<i64: 8, 60, 8>}, {pipeline_mode = #tpu.pipeline_mode<synchronous>, transform_indices = @transform_11, window_bounds = array<i64: 8, 60, 8>}, {transform_indices = @transform_12, window_bounds = array<i64: 1, 60, 60>}, {transform_indices = @transform_13, window_bounds = array<i64: 1, 8, 60, 8>}]} {
    %c0 = arith.constant 0 : index
    %c0_0 = arith.constant 0 : index
    %c0_1 = arith.constant 0 : index
    %c0_2 = arith.constant 0 : index
    %0 = vector.load %arg1[%c0, %c0_0, %c0_1, %c0_2] : memref<1x8x60x8xf32, #tpu.memory_space<vmem>>, vector<1x8x60x8xf32>
    %1 = vector.shape_cast %0 : vector<1x8x60x8xf32> to vector<8x60x8xf32>
    %c0_3 = arith.constant 0 : index
    %c0_4 = arith.constant 0 : index
    %c0_5 = arith.constant 0 : index
    %2 = vector.load %arg2[%c0_3, %c0_4, %c0_5] : memref<8x1x1xf32, #tpu.memory_space<vmem>>, vector<8x1x1xf32>
    %3 = vector.broadcast %2 : vector<8x1x1xf32> to vector<8x60x8xf32>
    %4 = arith.mulf %1, %3 : vector<8x60x8xf32>
    %cst = arith.constant dense<0.000000e+00> : vector<60x8xf32>
    %5 = vector.multi_reduction <add>, %4, %cst [0] : vector<8x60x8xf32> to vector<60x8xf32>
    %c0_6 = arith.constant 0 : index
    %c0_7 = arith.constant 0 : index
    %c0_8 = arith.constant 0 : index
    %6 = vector.load %arg3[%c0_6, %c0_7, %c0_8] : memref<1x1x8xf32, #tpu.memory_space<vmem>>, vector<1x1x8xf32>
    %7 = vector.broadcast %6 : vector<1x1x8xf32> to vector<8x60x8xf32>
    %8 = arith.mulf %1, %7 : vector<8x60x8xf32>
    %cst_9 = arith.constant dense<0.000000e+00> : vector<8x60xf32>
    %9 = vector.multi_reduction <add>, %8, %cst_9 [2] : vector<8x60x8xf32> to vector<8x60xf32>
    %c0_10 = arith.constant 0 : index
    %c0_11 = arith.constant 0 : index
    %10 = vector.load %arg4[%c0_10, %c0_11] : memref<8x8xf32, #tpu.memory_space<vmem>>, vector<8x8xf32>
    %cst_12 = arith.constant dense<0.000000e+00> : vector<60x8xf32>
    %11 = tpu.matmul %5, %10, %cst_12 {dimension_numbers = #tpu.dot_dimension_numbers<[1], [0], [0], [1], [0, 0, 1, 1], [], []>} : vector<60x8xf32>, vector<8x8xf32>, vector<60x8xf32> -> vector<60x8xf32>
    %cst_13 = arith.constant dense<0.000000e+00> : vector<60x60xf32>
    %12 = tpu.matmul %11, %9, %cst_13 {dimension_numbers = #tpu.dot_dimension_numbers<[1], [0], [0], [1], [0, 0, 1, 1], [], []>} : vector<60x8xf32>, vector<8x60xf32>, vector<60x60xf32> -> vector<60x60xf32>
    %c0_14 = arith.constant 0 : index
    %c0_15 = arith.constant 0 : index
    %13 = vector.load %arg5[%c0_14, %c0_15] : memref<60x60xf32, #tpu.memory_space<vmem>>, vector<60x60xf32>
    %14 = arith.addf %12, %13 : vector<60x60xf32>
    %15 = arith.negf %14 : vector<60x60xf32>
    %16 = math.exp %15 : vector<60x60xf32>
    %cst_16 = arith.constant 1.000000e+00 : f32
    %17 = vector.broadcast %cst_16 : f32 to vector<60x60xf32>
    %18 = arith.addf %17, %16 : vector<60x60xf32>
    %19 = arith.divf %17, %18 : vector<60x60xf32>
    %c0_17 = arith.constant 0 : index
    %c0_18 = arith.constant 0 : index
    %20 = vector.load %arg6[%c0_17, %c0_18] : memref<60x60xf32, #tpu.memory_space<vmem>>, vector<60x60xf32>
    %cst_19 = arith.constant dense<0.000000e+00> : vector<60x60xf32>
    %21 = tpu.matmul %20, %19, %cst_19 {dimension_numbers = #tpu.dot_dimension_numbers<[1], [0], [0], [1], [0, 0, 1, 1], [], []>} : vector<60x60xf32>, vector<60x60xf32>, vector<60x60xf32> -> vector<60x60xf32>
    %c0_20 = arith.constant 0 : index
    %c0_21 = arith.constant 0 : index
    %22 = vector.load %arg7[%c0_20, %c0_21] : memref<1x60xf32, #tpu.memory_space<vmem>>, vector<1x60xf32>
    %23 = vector.broadcast %22 : vector<1x60xf32> to vector<60x60xf32>
    %24 = arith.mulf %21, %23 : vector<60x60xf32>
    %c0_22 = arith.constant 0 : index
    %c0_23 = arith.constant 0 : index
    %25 = vector.load %arg8[%c0_22, %c0_23] : memref<1x60xf32, #tpu.memory_space<vmem>>, vector<1x60xf32>
    %26 = vector.broadcast %25 : vector<1x60xf32> to vector<60x60xf32>
    %27 = arith.addf %24, %26 : vector<60x60xf32>
    %c0_24 = arith.constant 0 : index
    %c0_25 = arith.constant 0 : index
    %28 = vector.load %arg9[%c0_24, %c0_25] : memref<60x60xf32, #tpu.memory_space<vmem>>, vector<60x60xf32>
    %29 = arith.addf %27, %28 : vector<60x60xf32>
    %cst_26 = arith.constant dense<0xFF800000> : vector<60xf32>
    %30 = vector.multi_reduction <maximumf>, %29, %cst_26 [1] : vector<60x60xf32> to vector<60xf32>
    %31 = vector.shape_cast %30 : vector<60xf32> to vector<60x1xf32>
    %32 = vector.broadcast %31 : vector<60x1xf32> to vector<60x60xf32>
    %33 = arith.subf %29, %32 : vector<60x60xf32>
    %34 = math.exp %33 : vector<60x60xf32>
    %cst_27 = arith.constant dense<0.000000e+00> : vector<60xf32>
    %35 = vector.multi_reduction <add>, %34, %cst_27 [1] : vector<60x60xf32> to vector<60xf32>
    %36 = vector.shape_cast %35 : vector<60xf32> to vector<60x1xf32>
    %37 = tpu.reciprocal %36 {approx = true} : vector<60x1xf32> -> vector<60x1xf32>
    %38 = vector.broadcast %37 : vector<60x1xf32> to vector<60x60xf32>
    %39 = arith.mulf %34, %38 : vector<60x60xf32>
    %c0_28 = arith.constant 0 : index
    %c0_29 = arith.constant 0 : index
    %c0_30 = arith.constant 0 : index
    %40 = vector.load %arg13[%c0_28, %c0_29, %c0_30] : memref<1x60x60xf32, #tpu.memory_space<vmem>>, vector<1x60x60xf32>
    %41 = vector.shape_cast %40 : vector<1x60x60xf32> to vector<60x60xf32>
    %42 = vector.shape_cast %39 : vector<60x60xf32> to vector<1x60x60xf32>
    tpu.vector_store %arg13[%c0_28, %c0_29, %c0_30], %42 {strides = array<i32>} : memref<1x60x60xf32, #tpu.memory_space<vmem>>, vector<1x60x60xf32>,
    %43 = vector.shape_cast %39 : vector<60x60xf32> to vector<1x60x60xf32>
    %44 = vector.shape_cast %43 : vector<1x60x60xf32> to vector<1x60x60xf32>
    %45 = vector.broadcast %44 : vector<1x60x60xf32> to vector<8x60x60xf32>
    "tpu.trace_start"() <{level = 10 : i32, message = "cql,cln->cqn"}> : () -> ()
    %cst_31 = arith.constant dense<0.000000e+00> : vector<8x60x8xf32>
    %46 = tpu.matmul %45, %1, %cst_31 {dimension_numbers = #tpu.dot_dimension_numbers<[2], [1], [1], [2], [0, 0, 0, 1, 1, 2], [0], [0]>} : vector<8x60x60xf32>, vector<8x60x8xf32>, vector<8x60x8xf32> -> vector<8x60x8xf32>
    %cst_32 = arith.constant 0.000000e+00 : f32
    "tpu.trace_stop"() : () -> ()
    %47 = vector.broadcast %cst_32 : f32 to vector<8x60x8xf32>
    %48 = arith.cmpf ogt, %46, %47 : vector<8x60x8xf32>
    %cst_33 = arith.constant 0.00999999977 : f32
    %49 = vector.broadcast %cst_33 : f32 to vector<8x60x8xf32>
    %50 = arith.mulf %49, %46 : vector<8x60x8xf32>
    %51 = arith.select %48, %46, %50 : vector<8x60x8xi1>, vector<8x60x8xf32>
    %c0_34 = arith.constant 0 : index
    %c0_35 = arith.constant 0 : index
    %c0_36 = arith.constant 0 : index
    %c0_37 = arith.constant 0 : index
    %52 = vector.load %arg10[%c0_34, %c0_35, %c0_36, %c0_37] : memref<1x8x60x8xf32, #tpu.memory_space<vmem>>, vector<1x8x60x8xf32>
    %53 = vector.shape_cast %52 : vector<1x8x60x8xf32> to vector<8x60x8xf32>
    %54 = arith.addf %51, %53 : vector<8x60x8xf32>
    %55 = vector.shape_cast %54 : vector<8x60x8xf32> to vector<1x8x60x8xf32>
    %cst_38 = arith.constant dense<0.000000e+00> : vector<1xf32>
    %56 = vector.multi_reduction <add>, %55, %cst_38 [1, 2, 3] : vector<1x8x60x8xf32> to vector<1xf32>
    %57 = vector.shape_cast %56 : vector<1xf32> to vector<1x1x1x1xf32>
    %58 = vector.extract %57[0, 0, 0, 0] : f32 from vector<1x1x1x1xf32>
    %cst_39 = arith.constant 3.840000e+03 : f32
    %59 = arith.divf %58, %cst_39 : f32
    %60 = vector.broadcast %59 : f32 to vector<8x60x8xf32>
    %61 = arith.subf %54, %60 : vector<8x60x8xf32>
    %62 = arith.mulf %61, %61 : vector<8x60x8xf32>
    %63 = vector.shape_cast %62 : vector<8x60x8xf32> to vector<1x8x60x8xf32>
    %cst_40 = arith.constant dense<0.000000e+00> : vector<1xf32>
    %64 = vector.multi_reduction <add>, %63, %cst_40 [1, 2, 3] : vector<1x8x60x8xf32> to vector<1xf32>
    %65 = vector.shape_cast %64 : vector<1xf32> to vector<1x1x1x1xf32>
    %66 = vector.extract %65[0, 0, 0, 0] : f32 from vector<1x1x1x1xf32>
    %cst_41 = arith.constant 3.840000e+03 : f32
    %67 = arith.divf %66, %cst_41 : f32
    %68 = vector.broadcast %59 : f32 to vector<8x60x8xf32>
    %69 = arith.subf %54, %68 : vector<8x60x8xf32>
    %cst_42 = arith.constant 9.99999974E-6 : f32
    %70 = arith.addf %67, %cst_42 : f32
    %71 = math.rsqrt %70 : f32
    %72 = vector.broadcast %71 : f32 to vector<8x60x8xf32>
    %73 = arith.mulf %69, %72 : vector<8x60x8xf32>
    %c0_43 = arith.constant 0 : index
    %c0_44 = arith.constant 0 : index
    %c0_45 = arith.constant 0 : index
    %74 = vector.load %arg11[%c0_43, %c0_44, %c0_45] : memref<8x60x8xf32, #tpu.memory_space<vmem>>, vector<8x60x8xf32>
    %75 = arith.mulf %73, %74 : vector<8x60x8xf32>
    %c0_46 = arith.constant 0 : index
    %c0_47 = arith.constant 0 : index
    %c0_48 = arith.constant 0 : index
    %76 = vector.load %arg12[%c0_46, %c0_47, %c0_48] : memref<8x60x8xf32, #tpu.memory_space<vmem>>, vector<8x60x8xf32>
    %77 = arith.addf %75, %76 : vector<8x60x8xf32>
    %c0_49 = arith.constant 0 : index
    %c0_50 = arith.constant 0 : index
    %c0_51 = arith.constant 0 : index
    %c0_52 = arith.constant 0 : index
    %78 = vector.load %arg14[%c0_49, %c0_50, %c0_51, %c0_52] : memref<1x8x60x8xf32, #tpu.memory_space<vmem>>, vector<1x8x60x8xf32>
    %79 = vector.shape_cast %78 : vector<1x8x60x8xf32> to vector<8x60x8xf32>
    %80 = vector.shape_cast %77 : vector<8x60x8xf32> to vector<1x8x60x8xf32>
    tpu.vector_store %arg14[%c0_49, %c0_50, %c0_51, %c0_52], %80 {strides = array<i32>} : memref<1x8x60x8xf32, #tpu.memory_space<vmem>>, vector<1x8x60x8xf32>,
    return
  }
  func.func @transform_0(%arg0: i32) -> (i32, i32, i32, i32) {
    %c0_i32 = arith.constant 0 : i32
    %c0_i32_0 = arith.constant 0 : i32
    %c0_i32_1 = arith.constant 0 : i32
    %c0_i32_2 = arith.constant 0 : i32
    return %arg0, %c0_i32, %c0_i32_0, %c0_i32_1 : i32, i32, i32, i32
  }
  func.func @transform_1(%arg0: i32) -> (i32, i32, i32) {
    %c0_i32 = arith.constant 0 : i32
    %c0_i32_0 = arith.constant 0 : i32
    %c0_i32_1 = arith.constant 0 : i32
    %c0_i32_2 = arith.constant 0 : i32
    return %c0_i32, %c0_i32_0, %c0_i32_1 : i32, i32, i32
  }
  func.func @transform_2(%arg0: i32) -> (i32, i32, i32) {
    %c0_i32 = arith.constant 0 : i32
    %c0_i32_0 = arith.constant 0 : i32
    %c0_i32_1 = arith.constant 0 : i32
    %c0_i32_2 = arith.constant 0 : i32
    return %c0_i32, %c0_i32_0, %c0_i32_1 : i32, i32, i32
  }
  func.func @transform_3(%arg0: i32) -> (i32, i32) {
    %c0_i32 = arith.constant 0 : i32
    %c0_i32_0 = arith.constant 0 : i32
    %c0_i32_1 = arith.constant 0 : i32
    return %c0_i32, %c0_i32_0 : i32, i32
  }
  func.func @transform_4(%arg0: i32) -> (i32, i32) {
    %c0_i32 = arith.constant 0 : i32
    %c0_i32_0 = arith.constant 0 : i32
    %c0_i32_1 = arith.constant 0 : i32
    return %c0_i32, %c0_i32_0 : i32, i32
  }
  func.func @transform_5(%arg0: i32) -> (i32, i32) {
    %c0_i32 = arith.constant 0 : i32
    %c0_i32_0 = arith.constant 0 : i32
    %c0_i32_1 = arith.constant 0 : i32
    return %c0_i32, %c0_i32_0 : i32, i32
  }
  func.func @transform_6(%arg0: i32) -> (i32, i32) {
    %c0_i32 = arith.constant 0 : i32
    %c0_i32_0 = arith.constant 0 : i32
    %c0_i32_1 = arith.constant 0 : i32
    return %c0_i32, %c0_i32_0 : i32, i32
  }
  func.func @transform_7(%arg0: i32) -> (i32, i32) {
    %c0_i32 = arith.constant 0 : i32
    %c0_i32_0 = arith.constant 0 : i32
    %c0_i32_1 = arith.constant 0 : i32
    return %c0_i32, %c0_i32_0 : i32, i32
  }
  func.func @transform_8(%arg0: i32) -> (i32, i32) {
    %c0_i32 = arith.constant 0 : i32
    %c0_i32_0 = arith.constant 0 : i32
    %c0_i32_1 = arith.constant 0 : i32
    return %c0_i32, %c0_i32_0 : i32, i32
  }
  func.func @transform_9(%arg0: i32) -> (i32, i32, i32, i32) {
    %c0_i32 = arith.constant 0 : i32
    %c0_i32_0 = arith.constant 0 : i32
    %c0_i32_1 = arith.constant 0 : i32
    %c0_i32_2 = arith.constant 0 : i32
    return %arg0, %c0_i32, %c0_i32_0, %c0_i32_1 : i32, i32, i32, i32
  }
  func.func @transform_10(%arg0: i32) -> (i32, i32, i32) {
    %c0_i32 = arith.constant 0 : i32
    %c0_i32_0 = arith.constant 0 : i32
    %c0_i32_1 = arith.constant 0 : i32
    %c0_i32_2 = arith.constant 0 : i32
    return %c0_i32, %c0_i32_0, %c0_i32_1 : i32, i32, i32
  }
  func.func @transform_11(%arg0: i32) -> (i32, i32, i32) {
    %c0_i32 = arith.constant 0 : i32
    %c0_i32_0 = arith.constant 0 : i32
    %c0_i32_1 = arith.constant 0 : i32
    %c0_i32_2 = arith.constant 0 : i32
    return %c0_i32, %c0_i32_0, %c0_i32_1 : i32, i32, i32
  }
  func.func @transform_12(%arg0: i32) -> (i32, i32, i32) {
    %c0_i32 = arith.constant 0 : i32
    %c0_i32_0 = arith.constant 0 : i32
    %c0_i32_1 = arith.constant 0 : i32
    return %arg0, %c0_i32, %c0_i32_0 : i32, i32, i32
  }
  func.func @transform_13(%arg0: i32) -> (i32, i32, i32, i32) {
    %c0_i32 = arith.constant 0 : i32
    %c0_i32_0 = arith.constant 0 : i32
    %c0_i32_1 = arith.constant 0 : i32
    %c0_i32_2 = arith.constant 0 : i32
    return %arg0, %c0_i32, %c0_i32_0, %c0_i32_1 : i32, i32, i32, i32
  }
}

</mosaic_0001>

<bundles_post_ra>
// kernel: st_block_2_forward.9
= control target key start
LH: loop header
LB: loop body
LE: loop exit
PB: predicated region body
PF: predicated region fallthrough
CT: control target
= control target key end

     0   :  { %12 = vsyncpa [#allocation3], 0  ;;  %s2009_s0 = inlined_call_operand.hbm [shape: f32[2,4,496], index: 0, kind: input, shape index: {}]   ;;  %s2010_s1 = inlined_call_operand.hbm [shape: f32[8,4], index: 1, kind: input, shape index: {}]   ;;  %s2011_s2 = inlined_call_operand.hbm [shape: f32[8,1], index: 2, kind: input, shape index: {}]   ;;  %s2012_s3 = inlined_call_operand.hbm [shape: f32[3,8,4], index: 3, kind: input, shape index: {}]   ;;  %s2013_s4 = inlined_call_operand.hbm [shape: f32[8,1], index: 4, kind: input, shape index: {}]   ;;  %s2014_s5 = inlined_call_operand.hbm [shape: f32[2,8,480], index: 5, kind: output, shape index: {0}]   ;;  %s2015_s6 = inlined_call_operand.hbm [shape: f32[2,8,480], index: 6, kind: output, shape index: {1}]  }
   0x1   :  { %14 = vsyncpa [#allocation3 + $0x1], 0 }
   0x2   :  { %15 = vsyncpa [#allocation6], 0 }
   0x3   :  { %16 = vsyncpa [#allocation9], 0 }
   0x4   :  { %17 = vsyncpa [#allocation4], 0 }
   0x5   :  { %19 = vsyncpa [#allocation4 + $0x1], 0 }
   0x6   :  { %20 = vsyncpa [#allocation13], 0 }
   0x7   :  { %22 = vsyncpa [#allocation13 + $0x1], 0  ;;  %s1661_s21 = smov 0   ;;  %s1663_s22 = smov 0  }
   0x8   :  { %s1665_s23 = smov 0   ;;  %s1667_s24 = smov 0  }
   0x9 LB: > { %s1613_s25 = smov [#allocation5]   ;;  %s1682_s27 = sadd.s32 4294967295, %s1611_s24   ;;  %s1611_s24 = sphi %s1667_s24, %s2039_s24   ;;  %s1607_s23 = sphi %s1665_s23, %s2038_s23   ;;  %s1603_s22 = sphi %s1663_s22, %s2037_s22   ;;  %s1599_s21 = sphi %s1661_s21, %s2036_s21  }
   0xa   : > { %s208_s26 = sshll.u32 %s1613_s25, 4  ;;  %p1201_p0 = scmp.ge.s32.totalorder %s1611_s24, 1  ;;  %s209_s26 = int_to_ptr.vmem [resolvable:$true] %s208_s26 }
   0xb   : > { %p2016_p1 = scmp.eq.s32.totalorder %s1682_s27, 0  ;;  %p195_p2 = scmp.lt.s32.totalorder %s1611_s24, 3 }
   0xc   : > { %s1614_s29 = smov [#allocation8]   ;;  %s1615_s8 = smov [#allocation7]  }
   0xd   : > { %p1687_p3 = pnand %p1201_p0, %p195_p2  ;;  %s229_s30 = sshll.u32 %s1614_s29, 4  ;;  %s1694_s30 = int_to_ptr.vmem [resolvable:$true] %s229_s30 }
   0xe   : > { %s219_s9 = sshll.u32 %s1615_s8, 4  ;;  %s1363_s12 = scalar_lea.hbm %s2010_s1, 128  ;;  %s1702_s9 = int_to_ptr.vmem [resolvable:$true] %s219_s9 }
   0xf   : > { %s2019_s28 = scalar_select %p1687_p3, 1, 0 }
  0x10   : > { %p1283_p5 = pneg %p1687_p3  ;;  %p1364_p7 = scmp.ne.s32.totalorder %s2010_s1, %s1363_s12 }
  0x11   : > { %p1370_p11 = scmp.lt.u32.totalorder %s1363_s12, %s2010_s1 }
  0x12   : > { %p1698_p6 = pnand %p1283_p5, %p2016_p1 }
  0x14   : > { %p1712_p8 = pneg %p1698_p6 }
  0x16   : > { %p1366_p9 = pnand %p1712_p8, %p1364_p7 }
  0x18   : > { %p1367_p10 = pneg %p1366_p9 }
  0x1a   : > { %p1372_p12 = pnand %p1370_p11, %p1367_p10 }
  0x1c   : > { %1375 = shalt.err (!%p1372_p12)
}
  0x1d   : > { %s1376_s18 = scalar_lea.vmem %s209_s26, 128  ;;  %p1384_p5 = scmp.lt.s32.totalorder %s209_s26, %s209_s26 }
  0x1e   : > { %p1377_p13 = scmp.ne.s32.totalorder %s209_s26, %s1376_s18  ;;  %p1385_p4 = scmp.lt.s32.totalorder %s1376_s18, %s1376_s18 }
  0x20   : > { %p1379_p0 = pnand %p1377_p13, %p1712_p8  ;;  %p1386_p1 = por %p1385_p4, %p1384_p5 }
  0x22   : > { %p1380_p2 = pneg %p1379_p0 }
  0x24   : > { %p1387_p3 = pnand %p1386_p1, %p1380_p2 }
  0x26   : > { %1390 = shalt.err (!%p1387_p3)
}
  0x27   : > { %1286 = dma.hbm_to_vmem [thread:$0]  (!%p1698_p6), %s2010_s1, 128, %s209_s26, [#allocation6]  }
  0x28   : > { %s1391_s8 = scalar_lea.hbm %s2012_s3, 384 }
  0x29   : > { %p1392_p7 = scmp.ne.s32.totalorder %s2012_s3, %s1391_s8  ;;  %p1398_p1 = scmp.lt.u32.totalorder %s1391_s8, %s2012_s3 }
  0x2b   : > { %p1394_p9 = pnand %p1392_p7, %p1712_p8 }
  0x2d   : > { %p1395_p4 = pneg %p1394_p9 }
  0x2f   : > { %p1400_p3 = pnand %p1398_p1, %p1395_p4 }
  0x31   : > { %1403 = shalt.err (!%p1400_p3)
}
  0x32   : > { %s1404_s26 = scalar_lea.vmem %s1694_s30, 384  ;;  %p1412_p13 = scmp.lt.s32.totalorder %s1694_s30, %s1694_s30 }
  0x33   : > { %p1405_p10 = scmp.ne.s32.totalorder %s1694_s30, %s1404_s26  ;;  %p1413_p0 = scmp.lt.s32.totalorder %s1404_s26, %s1404_s26 }
  0x35   : > { %p1407_p11 = pnand %p1405_p10, %p1712_p8  ;;  %p1414_p2 = por %p1413_p0, %p1412_p13 }
  0x37   : > { %p1408_p12 = pneg %p1407_p11 }
  0x39   : > { %p1415_p5 = pnand %p1414_p2, %p1408_p12 }
  0x3b   : > { %1418 = shalt.err (!%p1415_p5)
}
  0x3c   : > { %s1616_s14 = smov 128   ;;  %s1617_s16 = smov 8  }
  0x3d   : > { %1292 = dma.hbm_to_vmem [thread:$0]  (!%p1698_p6), %s2012_s3, 384, %s1694_s30, [#allocation9], %s1616_s14, %s1616_s14, %s1617_s16  }
  0x3e   : > { %s1419_s25 = scalar_lea.hbm %s2011_s2, 128 }
  0x3f   : > { %p1420_p7 = scmp.ne.s32.totalorder %s2011_s2, %s1419_s25  ;;  %p1426_p1 = scmp.lt.u32.totalorder %s1419_s25, %s2011_s2 }
  0x41   : > { %p1422_p9 = pnand %p1420_p7, %p1712_p8 }
  0x43   : > { %p1423_p4 = pneg %p1422_p9 }
  0x45   : > { %p1428_p3 = pnand %p1426_p1, %p1423_p4 }
  0x47   : > { %1431 = shalt.err (!%p1428_p3)
}
  0x48   : > { %s1432_s30 = scalar_lea.vmem %s1702_s9, 128  ;;  %p1440_p13 = scmp.lt.s32.totalorder %s1702_s9, %s1702_s9 }
  0x49   : > { %p1433_p10 = scmp.ne.s32.totalorder %s1702_s9, %s1432_s30  ;;  %p1441_p0 = scmp.lt.s32.totalorder %s1432_s30, %s1432_s30 }
  0x4b   : > { %p1435_p11 = pnand %p1433_p10, %p1712_p8  ;;  %p1442_p2 = por %p1441_p0, %p1440_p13 }
  0x4d   : > { %p1436_p12 = pneg %p1435_p11 }
  0x4f   : > { %p1443_p5 = pnand %p1442_p2, %p1436_p12 }
  0x51   : > { %1446 = shalt.err (!%p1443_p5)
}
  0x52   : > { %1289 = dma.hbm_to_vmem [thread:$0]  (!%p1698_p6), %s2011_s2, 128, %s1702_s9, [#allocation6]  }
  0x53   : > { %s1618_s26 = smov [#allocation10]   ;;  %s1447_s18 = scalar_lea.hbm %s2013_s4, 128 }
  0x54   : > { %s243_s14 = sshll.u32 %s1618_s26, 4  ;;  %p1448_p7 = scmp.ne.s32.totalorder %s2013_s4, %s1447_s18  ;;  %s244_s14 = int_to_ptr.vmem [resolvable:$true] %s243_s14 }
  0x55   : > { %p1454_p1 = scmp.lt.u32.totalorder %s1447_s18, %s2013_s4 }
  0x56   : > { %p1450_p9 = pnand %p1448_p7, %p1712_p8 }
  0x58   : > { %p1451_p4 = pneg %p1450_p9 }
  0x5a   : > { %p1456_p3 = pnand %p1454_p1, %p1451_p4 }
  0x5c   : > { %1459 = shalt.err (!%p1456_p3)
}
  0x5d   : > { %s1460_s9 = scalar_lea.vmem %s244_s14, 128  ;;  %p1468_p13 = scmp.lt.s32.totalorder %s244_s14, %s244_s14 }
  0x5e   : > { %p1461_p10 = scmp.ne.s32.totalorder %s244_s14, %s1460_s9  ;;  %p1469_p0 = scmp.lt.s32.totalorder %s1460_s9, %s1460_s9 }
  0x60   : > { %p1463_p11 = pnand %p1461_p10, %p1712_p8  ;;  %p1470_p2 = por %p1469_p0, %p1468_p13 }
  0x62   : > { %p1464_p12 = pneg %p1463_p11 }
  0x64   : > { %p1471_p5 = pnand %p1470_p2, %p1464_p12 }
  0x66   : > { %1474 = shalt.err (!%p1471_p5)
}
  0x67   : > { %1295 = dma.hbm_to_vmem [thread:$0]  (!%p1698_p6), %s2013_s4, 128, %s244_s14, [#allocation9]  }
  0x68   : > { %s1200_s15 = sadd.s32 4294967294, %s1611_s24   ;;  %s1794_s7 = sadd.s32 1, %s1611_s24  }
  0x69   : > { %s32_s11 = ssub.s32 %s1611_s24, %s1794_s7  ;;  %s35_s30 = sadd.s32 1, %s1607_s23 }
  0x6a   : > { %p33_p8 = scmp.eq.s32.totalorder %s32_s11, 0  ;;  %p42_p7 = scmp.ne.s32.totalorder %s1607_s23, %s1603_s22 }
  0x6b   : > { %p43_p9 = scmp.eq.s32.totalorder %s1611_s24, 0  ;;  %p48_p4 = scmp.ne.s32.totalorder %s1603_s22, %s1599_s21 }
  0x6c   : > { %s1805_s12 = scalar_select %p33_p8, %s1607_s23, %s35_s30  }
  0x6d   : > { %p1807_p1 = por %p43_p9, %p42_p7  ;;  %p2023_p3 = scmp.eq.s32.totalorder %s1682_s27, 0 }
  0x6e   : > { %p156_p10 = scmp.eq.s32.totalorder %s1682_s27, 1  ;;  %p162_p11 = scmp.eq.s32.totalorder %s1200_s15, 1 }
  0x6f   : > { %p1813_p6 = por %p2023_p3, %p48_p4  ;;  %p1311_p12 = scmp.lt.s32.totalorder %s1611_s24, 2 }
  0x70   : > { %s254_s14 = sand.u32 1, %s1607_s23   ;;  %p1820_p13 = por %p156_p10, %p42_p7 }
  0x71   : > { %p1824_p0 = por %p162_p11, %p48_p4  ;;  %s1207_s18 = sshll.u32 %s254_s14, 4 }
  0x72   : > { %s2025_s16 = scalar_select %p1820_p13, 1, 0 }
  0x73   : > { %s2026_s17 = scalar_select %p1824_p0, 1, 0 }
  0x74   : > { %s1250_s19 = sshll.u32 %s1611_s24, 8  ;;  %s258_s9 = scalar_lea.vmem [#allocation2], %s1207_s18 }
  0x75   : > { %s1832_s29 = scalar_lea.hbm %s2009_s0, %s1250_s19  ;;  %s266_s8 = sshll.u32 %s258_s9, 4  ;;  %s1834_s8 = int_to_ptr.vmem [resolvable:$true] %s266_s8 }
  0x76   : > { %p1838_p2 = pnand %p1311_p12, %p1807_p1  ;;  %s255_s15 = scalar_lea.sflag [#allocation3], %s254_s14 }
  0x77   : > { %s1475_s11 = scalar_lea.hbm %s1832_s29, 256  ;;  %s1480_s19 = scalar_lea.hbm %s2009_s0, 512 }
  0x78   : > { %p1476_p5 = scmp.ne.s32.totalorder %s1832_s29, %s1475_s11  ;;  %p1477_p8 = pneg %p1838_p2 }
  0x79   : > { %p1481_p4 = scmp.lt.u32.totalorder %s1832_s29, %s2009_s0  ;;  %p1482_p1 = scmp.lt.u32.totalorder %s1480_s19, %s1475_s11 }
  0x7a   : > { %p1478_p7 = pnand %p1477_p8, %p1476_p5  ;;  %p1484_p10 = scmp.lt.u32.totalorder %s1475_s11, %s1832_s29 }
  0x7b   : > { %p1483_p3 = por %p1482_p1, %p1481_p4 }
  0x7c   : > { %p1479_p9 = pneg %p1478_p7 }
  0x7d   : > { %p1485_p11 = por %p1484_p10, %p1483_p3 }
  0x7f   : > { %p1486_p12 = pnand %p1485_p11, %p1479_p9 }
  0x81   : > { %1489 = shalt.err (!%p1486_p12)
}
  0x82   : > { %s1490_s14 = scalar_lea.vmem %s1834_s8, 256  ;;  %s1619_s25 = smov [#allocation2]  }
  0x83   : > { %p1491_p5 = scmp.ne.s32.totalorder %s1834_s8, %s1490_s14  ;;  %s1495_s9 = sshll.u32 %s1619_s25, 4  ;;  %s1496_s9 = int_to_ptr.vmem [resolvable:$false] %s1495_s9 }
  0x84   : > { %s1497_s30 = scalar_lea.vmem %s1496_s9, 512  ;;  %p1498_p13 = scmp.lt.s32.totalorder %s1834_s8, %s1496_s9 }
  0x85   : > { %p1493_p7 = pnand %p1491_p5, %p1477_p8  ;;  %p1499_p4 = scmp.lt.s32.totalorder %s1497_s30, %s1490_s14 }
  0x87   : > { %p1494_p0 = pneg %p1493_p7  ;;  %p1500_p1 = por %p1499_p4, %p1498_p13 }
  0x89   : > { %p1501_p3 = pnand %p1500_p1, %p1494_p0 }
  0x8b   : > { %1504 = shalt.err (!%p1501_p3)
}
  0x8c   : > { %1299 = dma.hbm_to_vmem [thread:$0]  (!%p1838_p2), %s1832_s29, 256, %s1834_s8, %s255_s15  }
  0x8d   : > { %p2028_p9 = scmp.ne.s32.totalorder %s2019_s28, 0 }
  0x8e   : > { %s1870_s11 = sand.u32 (!%p2028_p9), 1, %s1603_s22  }
  0x8f   : > { %275 = sbr.rel (%p2028_p9) target bundleno = 536 (0x218), region = 40  ;;  %s1211_s18 = sshll.u32 (!%p2028_p9), %s1870_s11, 4 }
  0x90   : > { %s278_s19 = scalar_lea.sflag (!%p2028_p9), [#allocation3], %s1870_s11  ;;  %s281_s13 = scalar_lea.vmem (!%p2028_p9), [#allocation2], %s1211_s18 }
  0x96   : > { %1578 = dma.done.wait (%p1813_p6), %s278_s19, 256  }
  0x97   : > { %1580 = vsyncadd (%p1813_p6), %s278_s19, 4294967040  ;;  %p2029_p13 = scmp.eq.s32.totalorder %s1682_s27, 0 }
  0x99   : > { %1582 = dma.done.wait (%p2029_p13), [#allocation6], 256   ;;  %p2030_p0 = pmov %p2029_p13 }
  0x9b   : > { %1584 = vsyncadd (%p2030_p0), [#allocation6], 4294967040  ;;  %p2031_p2 = pmov %p2030_p0 }
  0x9c   : > { %p2032_p8 = pmov %p2030_p0 }
  0x9d   : > { %1586 = dma.done.wait (%p2031_p2), [#allocation9], 512  }
  0x9e   : > { %1588 = vsyncadd (%p2032_p8), [#allocation9], 4294966784  ;;  %v1620_v0 = vmov 0.0   ;;  %v331_v1 = vld [vmem:[%s281_s13] sm:$0xff]  ;;  %v332_v2 = vld [vmem:[%s281_s13 + $0x8] sm:$0xff]  ;;  %s1621_s28 = smov 120  }
  0x9f   : > { %504 = vmatprep.mubr.f32.mxu1 %v1620_v0  ;;  %433 = vmatprep.mubr.f32.mxu0 %v1620_v0  ;;  %v342_v3 = vcombine.high %v331_v1, %v331_v1  ;;  %v343_v4 = vcombine.high %v332_v2, %v332_v2  ;;  %s1622_s26 = smov 112   ;;  %v334_v5 = vld [vmem:[#allocation7] sm:$0xff]  ;;  %v1623_v7 = vmov 0   ;;  %vm360_vm0 = vcmask 1043456   ;;  %v333_v12 = vld [vmem:[#allocation5] sm:$0xff]  ;;  %v520_v17 = vld [vmem:[#allocation8 + $0x8] sm:$0xff] }
  0xa0   : > { %344 = vrot.lane.b32.xlu1 %v331_v1, %s1621_s28  ;;  %v1000_v6 = vld [vmem:[#allocation10] sm:$0xff]  ;;  %1359 = vset.pattern.permute.xlu0 %v1623_v7  ;;  %vm352_vm1 = vcmask 982016   ;;  %vm356_vm2 = vcmask 31744   ;;  %vm839_vm3 = vcmask 916480   ;;  %v516_v22 = vld [vmem:[#allocation8] sm:$0xff]  ;;  %v824_v25 = vld [vmem:[#allocation8 + $0x10] sm:$0xff] }
  0xa1   : > { %346 = vrot.lane.b32.xlu0 %v342_v3, %s1621_s28  ;;  %1360 = vset.pattern.permute.xlu1 %v1623_v7  ;;  %s1216_s29 = sshll.u32 %s1870_s11, 5  ;;  %s1251_s8 = sshll.u32 %s1682_s27, 9  ;;  %vm514_vm4 = vcmask 785408  }
  0xa2   : > { %s323_s10 = scalar_lea.vmem [#allocation11], %s1216_s29  ;;  %s1930_s25 = scalar_lea.hbm %s2014_s5, %s1251_s8 }
  0xa3   : > { %s1046_s15 = sshll.u32 %s323_s10, 4  ;;  %s1027_s9 = scalar_lea.sflag [#allocation4], %s1870_s11  ;;  %s1932_s15 = int_to_ptr.vmem [resolvable:$true] %s1046_s15 }
  0xa4   : > { %350 = vrot.lane.b32.xlu1 %v343_v4, %s1621_s28  ;;  %s1505_s30 = scalar_lea.vmem %s1932_s15, 512  ;;  %p2033_p10 = scmp.ne.s32.totalorder %s2025_s16, 0 }
  0xa5   : > { %348 = vrot.lane.b32.xlu0 %v332_v2, %s1621_s28  ;;  %p1506_p6 = scmp.ne.s32.totalorder %s1932_s15, %s1505_s30  ;;  %s1624_s18 = smov [#allocation11]  }
  0xa6   : > { %s1509_s19 = sshll.u32 %s1624_s18, 4  ;;  %s1510_s19 = int_to_ptr.vmem [resolvable:$false] %s1509_s19 }
  0xa7   : > { %p1507_p11 = pnand %p1506_p6, %p2033_p10  ;;  %s1511_s13 = scalar_lea.vmem %s1510_s19, 1024 }
  0xa8   : > { %835 = vrot.lane.b32.xlu1 %v332_v2, %s1622_s26  ;;  %p1512_p5 = scmp.lt.s32.totalorder %s1932_s15, %s1510_s19  ;;  %p1513_p7 = scmp.lt.s32.totalorder %s1511_s13, %s1505_s30 }
  0xa9   : > { %833 = vrot.lane.b32.xlu0 %v342_v3, %s1622_s26  ;;  %p1508_p12 = pneg %p1507_p11 }
  0xaa   : > { %p1514_p4 = por %p1513_p7, %p1512_p5 }
  0xac   : > { %837 = vrot.lane.b32.xlu1 %v343_v4, %s1622_s26  ;;  %p1515_p1 = pnand %p1514_p4, %p1508_p12 }
  0xad   : > { %831 = vrot.lane.b32.xlu0 %v331_v1, %s1622_s26 }
  0xb0   : > { %337 = vperm.xlu1 %1360, %v334_v5  }
  0xb1   : > { %1003 = vperm.xlu0 %1359, %v1000_v6  }
 0x112   : > { %v345_v8 = vpop.permute.xlu1 %344 }
 0x113   : > { %v347_v9 = vpop.permute.xlu0 %346 }
 0x114   : > { %v353_v15 = vsel %vm352_vm1, %v345_v8, %v347_v9 }
 0x116   : > { %v351_v10 = vpop.permute.xlu1 %350 }
 0x117   : > { %1221 = vmatprep.subr.msk.mxu1 %vm360_vm0, %v351_v10  ;;  %v349_v11 = vpop.permute.xlu0 %348 }
 0x118   : > { %v354_v13 = vsel %vm352_vm1, %v347_v9, %v349_v11  ;;  %v355_v14 = vsel %vm352_vm1, %v349_v11, %v351_v10 }
 0x119   : > { %1218 = vmatprep.subr.msk.mxu0 %vm360_vm0, %v354_v13  ;;  %1222 = vmatpush1.msk.msra.mxu1 %vm360_vm0, %v355_v14 }
 0x11a   : > { %v836_v16 = vpop.permute.xlu1 %835  ;;  %1219 = vmatpush1.msk.msra.mxu0 %vm360_vm0, %v353_v15  ;;  %1223 = vmatmul.mubr.msk.f32.vlgmr.msra.gmra.mrb[0].mxu1 %vm356_vm2, %v333_v12 }
 0x11b   : > { %1227 = vmatprep.subr.msk.mxu1 %vm360_vm0, %v351_v10  ;;  %1220 = vmatmul.mubr.msk.f32.vlgmr.msra.gmra.mrb[0].mxu0 %vm356_vm2, %v333_v12  ;;  %v834_v18 = vpop.permute.xlu0 %833 }
 0x11c   : > { %1224 = vmatprep.subr.msk.mxu0 %vm360_vm0, %v354_v13  ;;  %1228 = vmatpush1.msk.msra.mxu1 %vm360_vm0, %v355_v14  ;;  %v841_v19 = vsel %vm839_vm3, %v834_v18, %v836_v16 }
 0x11d   : > { %1225 = vmatpush1.msk.msra.mxu0 %vm360_vm0, %v353_v15  ;;  %659 = vmatprep.mubr.f32.mxu1 %v1620_v0 }
 0x11e   : > { %588 = vmatprep.mubr.f32.mxu0 %v1620_v0  ;;  %1229 = vmatmul.mubr.msk.f32.vlgmr.msra.gmra.mrb[2].mxu1 %vm356_vm2, %v520_v17  ;;  %v838_v20 = vpop.permute.xlu1 %837 }
 0x11f   : > { %1226 = vmatmul.mubr.msk.f32.vlgmr.msra.gmra.mrb[2].mxu0 %vm356_vm2, %v520_v17  ;;  %1230 = vmatprep.subr.msk.mxu0 %vm360_vm0, %v342_v3  ;;  %v832_v21 = vpop.permute.xlu0 %831  ;;  %v842_v23 = vsel %vm839_vm3, %v836_v16, %v838_v20 }
 0x120   : > { %1233 = vmatprep.subr.msk.mxu1 %vm360_vm0, %v343_v4  ;;  %1231 = vmatpush1.msk.msra.mxu0 %vm360_vm0, %v331_v1  ;;  %v840_v24 = vsel %vm839_vm3, %v832_v21, %v834_v18 }
 0x121   : > { %1234 = vmatpush1.msk.msra.mxu1 %vm360_vm0, %v332_v2  ;;  %1236 = vmatprep.subr.msk.mxu0 %vm360_vm0, %v841_v19 }
 0x122   : > { %816 = vmatprep.mubr.f32.mxu1 %v1620_v0  ;;  %1239 = vmatprep.subr.msk.mxu1 %vm360_vm0, %v838_v20 }
 0x123   : > { %745 = vmatprep.mubr.f32.mxu0 %v1620_v0 }
 0x126   : > { %1235 = vmatmul.mubr.msk.f32.vlgmr.msra.gmra.mrb[2].mxu1 %vm356_vm2, %v516_v22 }
 0x127   : > { %1240 = vmatpush1.msk.msra.mxu1 %vm360_vm0, %v842_v23  ;;  %1232 = vmatmul.mubr.msk.f32.vlgmr.msra.gmra.mrb[2].mxu0 %vm356_vm2, %v516_v22 }
 0x128   : > { %1237 = vmatpush1.msk.msra.mxu0 %vm360_vm0, %v840_v24  ;;  %989 = vmatprep.mubr.f32.mxu1 %v1620_v0 }
 0x129   : > { %918 = vmatprep.mubr.f32.mxu0 %v1620_v0 }
 0x12e   : > { %1241 = vmatmul.mubr.msk.f32.vlgmr.msra.gmra.mrb[2].mxu1 %vm356_vm2, %v824_v25 }
 0x12f   : > { %1238 = vmatmul.mubr.msk.f32.vlgmr.msra.gmra.mrb[2].mxu0 %vm356_vm2, %v824_v25  ;;  %v338_v26 = vpop.permute.xlu1 %337 }
 0x1ed   : > { %v506_v27 = vpop.f32.mrb[0].mxu1 }
 0x1ee   : > { %v435_v28 = vpop.f32.mrb[0].mxu0  ;;  %v507_v29 = vadd.f32 %v506_v27, %v338_v26  ;;  %v508_v30 = vpop.f32.mrb[1].mxu1 }
 0x1ef   : > { %v436_v31 = vadd.f32 %v435_v28, %v338_v26  ;;  %v437_v32 = vpop.f32.mrb[1].mxu0  ;;  %v509_v33 = vadd.f32 %v508_v30, %v338_v26 }
 0x1f0   : > { %513 = vst [vmem:[%s323_s10 + $0x10] sm:$0xff] %v507_v29  ;;  %v438_v34 = vadd.f32 %v437_v32, %v338_v26 }
 0x1f1   : > { %511 = vst [vmem:[%s323_s10] sm:$0xff] %v436_v31  ;;  %515 = vst.msk [vmem:[%s323_s10 + $0x18] sm:$0xff] %vm514_vm4, %v509_v33 }
 0x1f2   : > { %512 = vst [vmem:[%s323_s10 + $0x8] sm:$0xff] %v438_v34 }
 0x1f3   : > { %1518 = shalt.err (!%p1515_p1)
}
 0x1f4   : > { %s1519_s28 = scalar_lea.hbm %s1930_s25, 512  ;;  %s1523_s20 = scalar_lea.hbm %s2014_s5, 1024 }
 0x1f5   : > { %p1520_p3 = scmp.ne.s32.totalorder %s1930_s25, %s1519_s28  ;;  %p1524_p0 = scmp.lt.u32.totalorder %s1930_s25, %s2014_s5 }
 0x1f6   : > { %p1525_p2 = scmp.lt.u32.totalorder %s1523_s20, %s1519_s28  ;;  %p1527_p6 = scmp.lt.u32.totalorder %s1519_s28, %s1930_s25 }
 0x1f7   : > { %p1521_p9 = pnand %p1520_p3, %p2033_p10 }
 0x1f8   : > { %p1526_p8 = por %p1525_p2, %p1524_p0 }
 0x1f9   : > { %p1522_p13 = pneg %p1521_p9 }
 0x1fa   : > { %p1528_p11 = por %p1527_p6, %p1526_p8 }
 0x1fc   : > { %p1529_p12 = pnand %p1528_p11, %p1522_p13 }
 0x1fe   : > { %1532 = shalt.err (!%p1529_p12)
}
 0x1ff   : > { %1279 = dma.vmem_to_hbm [thread:$0]  (%p2033_p10), %s1932_s15, 512, %s1930_s25, %s1027_s9   ;;  %v1004_v35 = vpop.permute.xlu0 %1003 }
 0x200   : > { %s330_s30 = scalar_lea.vmem [#allocation12], %s1216_s29  ;;  %s1964_s9 = scalar_lea.hbm %s2015_s6, %s1251_s8 }
 0x201   : > { %v991_v36 = vpop.f32.mrb[2].mxu1  ;;  %s1060_s19 = sshll.u32 %s330_s30, 4  ;;  %s1032_s29 = scalar_lea.sflag [#allocation13], %s1870_s11  ;;  %s1966_s19 = int_to_ptr.vmem [resolvable:$true] %s1060_s19 }
 0x202   : > { %v1008_v37 = vadd.f32 %v1004_v35, %v991_v36  ;;  %v920_v38 = vpop.f32.mrb[2].mxu0  ;;  %v993_v39 = vpop.f32.mrb[3].mxu1  ;;  %s1533_s13 = scalar_lea.vmem %s1966_s19, 512  ;;  %s1625_s27 = smov [#allocation12]  }
 0x203   : > { %v1006_v40 = vadd.f32 %v1004_v35, %v920_v38  ;;  %v1009_v41 = vadd.f32 %v1004_v35, %v993_v39  ;;  %v922_v42 = vpop.f32.mrb[3].mxu0  ;;  %p1534_p5 = scmp.ne.s32.totalorder %s1966_s19, %s1533_s13  ;;  %s1537_s28 = sshll.u32 %s1625_s27, 4  ;;  %s1538_s28 = int_to_ptr.vmem [resolvable:$false] %s1537_s28 }
 0x204   : > { %vm1012_vm5 = vcmp.gt.f32.partialorder %v1008_v37, 0.0  ;;  %v1016_v43 = vmul.f32 0.01, %v1008_v37  ;;  %v1007_v44 = vadd.f32 %v1004_v35, %v922_v42  ;;  %s1539_s8 = scalar_lea.vmem %s1538_s28, 1024  ;;  %p1540_p1 = scmp.lt.s32.totalorder %s1966_s19, %s1538_s28 }
 0x205   : > { %vm1010_vm6 = vcmp.gt.f32.partialorder %v1006_v40, 0.0  ;;  %v1014_v45 = vmul.f32 0.01, %v1006_v40  ;;  %vm1013_vm7 = vcmp.gt.f32.partialorder %v1009_v41, 0.0  ;;  %v1017_v46 = vmul.f32 0.01, %v1009_v41  ;;  %p1535_p7 = pnand %p1534_p5, %p2033_p10  ;;  %p1541_p3 = scmp.lt.s32.totalorder %s1539_s8, %s1533_s13 }
 0x206   : > { %v1020_v47 = vsel %vm1012_vm5, %v1008_v37, %v1016_v43  ;;  %vm1011_vm8 = vcmp.gt.f32.partialorder %v1007_v44, 0.0  ;;  %v1015_v48 = vmul.f32 0.01, %v1007_v44 }
 0x207   : > { %1024 = vst [vmem:[%s330_s30 + $0x10] sm:$0xff] %v1020_v47  ;;  %v1018_v49 = vsel %vm1010_vm6, %v1006_v40, %v1014_v45  ;;  %v1021_v50 = vsel %vm1013_vm7, %v1009_v41, %v1017_v46  ;;  %p1536_p4 = pneg %p1535_p7  ;;  %p1542_p9 = por %p1541_p3, %p1540_p1 }
 0x208   : > { %1022 = vst [vmem:[%s330_s30] sm:$0xff] %v1018_v49  ;;  %1025 = vst.msk [vmem:[%s330_s30 + $0x18] sm:$0xff] %vm514_vm4, %v1021_v50  ;;  %v1019_v51 = vsel %vm1011_vm8, %v1007_v44, %v1015_v48 }
 0x209   : > { %1023 = vst [vmem:[%s330_s30 + $0x8] sm:$0xff] %v1019_v51  ;;  %p1543_p13 = pnand %p1542_p9, %p1536_p4 }
 0x20b   : > { %1546 = shalt.err (!%p1543_p13)
}
 0x20c   : > { %s1547_s11 = scalar_lea.hbm %s1964_s9, 512  ;;  %s1551_s20 = scalar_lea.hbm %s2015_s6, 1024 }
 0x20d   : > { %p1548_p0 = scmp.ne.s32.totalorder %s1964_s9, %s1547_s11  ;;  %p1552_p6 = scmp.lt.u32.totalorder %s1964_s9, %s2015_s6 }
 0x20e   : > { %p1553_p11 = scmp.lt.u32.totalorder %s1551_s20, %s1547_s11  ;;  %p1555_p5 = scmp.lt.u32.totalorder %s1547_s11, %s1964_s9 }
 0x20f   : > { %p1549_p2 = pnand %p1548_p0, %p2033_p10 }
 0x210   : > { %p1554_p12 = por %p1553_p11, %p1552_p6 }
 0x211   : > { %p1550_p8 = pneg %p1549_p2 }
 0x212   : > { %p1556_p7 = por %p1555_p5, %p1554_p12 }
 0x214   : > { %p1557_p4 = pnand %p1556_p7, %p1550_p8 }
 0x216   : > { %1560 = shalt.err (!%p1557_p4)
}
 0x217   : > { %1280 = dma.vmem_to_hbm [thread:$0]  (%p2033_p10), %s1966_s19, 512, %s1964_s9, %s1032_s29  }
 0x218 PF: > { %s1072_s30 = sand.u32 1, %s1599_s21   ;;  %p2034_p1 = scmp.ne.s32.totalorder %s2026_s17, 0 }
 0x219   : > { %p2035_p3 = scmp.ge.s32.totalorder %s1611_s24, 2  ;;  %s1073_s15 = scalar_lea.sflag [#allocation4], %s1072_s30 }
 0x21b   : > { %p1301_p9 = pnand %p2035_p3, %p2034_p1 }
 0x21d   : > { %1590 = dma.done.wait (!%p1301_p9), %s1073_s15, 512  }
 0x21e   : > { %1592 = vsyncadd (!%p1301_p9), %s1073_s15, 4294966784  ;;  %s1082_s25 = scalar_lea.sflag [#allocation13], %s1072_s30 }
 0x21f   : > { %1594 = dma.done.wait (!%p1301_p9), %s1082_s25, 512  }
 0x220   : > { %1596 = vsyncadd (!%p1301_p9), %s1082_s25, 4294966784  ;;  %p25_p10 = scmp.ge.s32.totalorder %s1794_s7, 4   ;;  %s2036_s21 = smov %s1603_s22 }
 0x221   : > { %s2037_s22 = smov %s1607_s23  ;;  %s2038_s23 = smov %s1805_s12 }
 0x222   : > { %s2039_s24 = smov %s1794_s7  ;;  %27 = sbr.rel (!%p25_p10) target bundleno = 9 (0x9), region = 120 }
 0x229   :  { %1087 = vsyncpa [#allocation3], 1 }
 0x22a   :  { %1089 = vsyncpa [#allocation3 + $0x1], 1 }
 0x22b   :  { %1090 = vsyncpa [#allocation6], 1 }
 0x22c   :  { %1091 = vsyncpa [#allocation9], 1 }
 0x22d   :  { %1092 = vsyncpa [#allocation4], 1 }
 0x22e   :  { %1094 = vsyncpa [#allocation4 + $0x1], 1 }
 0x22f   :  { %1095 = vsyncpa [#allocation13], 1 }
 0x230   :  { %1097 = vsyncpa [#allocation13 + $0x1], 1 }

// kernel: st_block_2_forward.10
= control target key start
LH: loop header
LB: loop body
LE: loop exit
PB: predicated region body
PF: predicated region fallthrough
CT: control target
= control target key end

     0   :  { %8 = vsyncpa [#allocation3], 0  ;;  %s1123_s0 = inlined_call_operand.hbm [shape: f32[2,96,32], index: 0, kind: input, shape index: {}]   ;;  %s1124_s1 = inlined_call_operand.hbm [shape: f32[16,96], index: 1, kind: input, shape index: {}]   ;;  %s1125_s2 = inlined_call_operand.hbm [shape: f32[16,1], index: 2, kind: input, shape index: {}]   ;;  %s1126_s3 = inlined_call_operand.hbm [shape: f32[2,16,32], index: 3, kind: output, shape index: {}]  }
   0x1   :  { %10 = vsyncpa [#allocation3 + $0x1], 0 }
   0x2   :  { %11 = vsyncpa [#allocation6], 0 }
   0x3   :  { %12 = vsyncpa [#allocation4], 0 }
   0x4   :  { %14 = vsyncpa [#allocation4 + $0x1], 0  ;;  %s844_s12 = smov 0   ;;  %s846_s13 = smov 0  }
   0x5   :  { %s848_s14 = smov 0   ;;  %s850_s15 = smov 0  }
   0x6   :  { %s852_s16 = smov 0   ;;  %s854_s17 = smov 0  }
   0x7 LB: > { %s465_s18 = sadd.s32 4294967295, %s813_s17   ;;  %s466_s19 = sadd.s32 4294967294, %s813_s17   ;;  %s813_s17 = sphi %s854_s17, %s20_s17   ;;  %s809_s16 = sphi %s852_s16, %s1148_s16   ;;  %s805_s15 = sphi %s850_s15, %s1147_s15   ;;  %s801_s14 = sphi %s848_s14, %s1146_s14   ;;  %s797_s13 = sphi %s846_s13, %s1145_s13   ;;  %s793_s12 = sphi %s844_s12, %s1144_s12  }
   0x8   : > { %p54_p0 = scmp.ne.s32.totalorder %s797_s13, %s793_s12  ;;  %p878_p1 = scmp.eq.s32.totalorder %s465_s18, 0 }
   0x9   : > { %p882_p2 = scmp.eq.s32.totalorder %s465_s18, 1  ;;  %p128_p3 = scmp.eq.s32.totalorder %s466_s19, 1 }
   0xa   : > { %s1131_s20 = scalar_select %p878_p1, 1, 0 }
   0xb   : > { %p888_p4 = por %p878_p1, %p54_p0  ;;  %p467_p5 = scmp.ge.s32.totalorder %s813_s17, 1 }
   0xc   : > { %p893_p6 = por %p128_p3, %p54_p0  ;;  %p135_p7 = scmp.lt.s32.totalorder %s813_s17, 3 }
   0xd   : > { %s1133_s22 = scalar_select %p888_p4, 1, 0 }
   0xe   : > { %s1134_s23 = scalar_select %p893_p6, 1, 0 }
   0xf   : > { %p898_p8 = pnand %p467_p5, %p135_p7  ;;  %s815_s25 = smov [#allocation5]  }
  0x10   : > { %s147_s26 = sshll.u32 %s815_s25, 4  ;;  %s816_s28 = smov [#allocation7]   ;;  %s902_s26 = int_to_ptr.vmem [resolvable:$true] %s147_s26 }
  0x11   : > { %p564_p9 = pneg %p898_p8  ;;  %s160_s29 = sshll.u32 %s816_s28, 4  ;;  %s913_s29 = int_to_ptr.vmem [resolvable:$true] %s160_s29 }
  0x12   : > { %s641_s5 = scalar_lea.hbm %s1124_s1, 256 }
  0x13   : > { %p909_p11 = pnand %p564_p9, %p878_p1  ;;  %p642_p12 = scmp.ne.s32.totalorder %s1124_s1, %s641_s5 }
  0x14   : > { %p648_p5 = scmp.lt.u32.totalorder %s641_s5, %s1124_s1 }
  0x15   : > { %p643_p13 = pneg %p909_p11 }
  0x17   : > { %p644_p0 = pnand %p643_p13, %p642_p12 }
  0x19   : > { %p645_p3 = pneg %p644_p0 }
  0x1b   : > { %p650_p7 = pnand %p648_p5, %p645_p3 }
  0x1d   : > { %653 = shalt.err (!%p650_p7)
}
  0x1e   : > { %s654_s10 = scalar_lea.vmem %s902_s26, 256  ;;  %p662_p1 = scmp.lt.s32.totalorder %s902_s26, %s902_s26 }
  0x1f   : > { %p655_p9 = scmp.ne.s32.totalorder %s902_s26, %s654_s10  ;;  %p663_p12 = scmp.lt.s32.totalorder %s654_s10, %s654_s10 }
  0x21   : > { %p657_p10 = pnand %p655_p9, %p643_p13  ;;  %p664_p0 = por %p663_p12, %p662_p1 }
  0x23   : > { %p658_p6 = pneg %p657_p10 }
  0x25   : > { %p665_p4 = pnand %p664_p0, %p658_p6 }
  0x27   : > { %668 = shalt.err (!%p665_p4)
}
  0x28   : > { %s817_s11 = smov 128   ;;  %s818_s18 = smov 8  }
  0x29   : > { %567 = dma.hbm_to_vmem [thread:$0]  (!%p909_p11), %s1124_s1, 256, %s902_s26, [#allocation6], %s817_s11, %s817_s11, %s818_s18  }
  0x2a   : > { %s669_s4 = scalar_lea.hbm %s1125_s2, 256 }
  0x2b   : > { %p670_p1 = scmp.ne.s32.totalorder %s1125_s2, %s669_s4  ;;  %p676_p10 = scmp.lt.u32.totalorder %s669_s4, %s1125_s2 }
  0x2d   : > { %p672_p4 = pnand %p670_p1, %p643_p13 }
  0x2f   : > { %p673_p6 = pneg %p672_p4 }
  0x31   : > { %p678_p3 = pnand %p676_p10, %p673_p6 }
  0x33   : > { %681 = shalt.err (!%p678_p3)
}
  0x34   : > { %s682_s26 = scalar_lea.vmem %s913_s29, 256  ;;  %p690_p12 = scmp.lt.s32.totalorder %s913_s29, %s913_s29 }
  0x35   : > { %p683_p5 = scmp.ne.s32.totalorder %s913_s29, %s682_s26  ;;  %p691_p0 = scmp.lt.s32.totalorder %s682_s26, %s682_s26 }
  0x37   : > { %p685_p7 = pnand %p683_p5, %p643_p13  ;;  %p692_p1 = por %p691_p0, %p690_p12 }
  0x39   : > { %p686_p9 = pneg %p685_p7 }
  0x3b   : > { %p693_p4 = pnand %p692_p1, %p686_p9 }
  0x3d   : > { %696 = shalt.err (!%p693_p4)
}
  0x3e   : > { %570 = dma.hbm_to_vmem [thread:$0]  (!%p909_p11), %s1125_s2, 256, %s913_s29, [#allocation6], %s817_s11, %s817_s11, %s818_s18  }
  0x3f   : > { %s32_s27 = sadd.s32 1, %s809_s16  ;;  %s41_s19 = sadd.s32 1, %s801_s14 }
  0x40   : > { %p34_p13 = scmp.ge.s32.totalorder %s32_s27, 2  ;;  %p48_p6 = scmp.ne.s32.totalorder %s801_s14, %s797_s13 }
  0x41   : > { %p49_p10 = scmp.eq.s32.totalorder %s813_s17, 0  ;;  %p581_p3 = scmp.lt.s32.totalorder %s813_s17, 2 }
  0x42   : > { %s1150_s27 = smov (%p34_p13, %s32_s27), 0  ;;  %p983_p7 = por %p882_p2, %p48_p6 }
  0x43   : > { %p50_p5 = por %p49_p10, %p48_p6  ;;  %s36_s28 = ssub.s32 %s809_s16, %s1150_s27 }
  0x44   : > { %s1137_s25 = scalar_select %p983_p7, 1, 0 }
  0x45   : > { %s174_s30 = sand.u32 1, %s801_s14   ;;  %p39_p9 = scmp.eq.s32.totalorder %s36_s28, 0 }
  0x46   : > { %s549_s29 = smul.u32 96, %s174_s30  ;;  %p990_p11 = pnand %p581_p3, %p50_p5 }
  0x47   : > { %s995_s5 = scalar_select %p39_p9, %s801_s14, %s41_s19  }
  0x48   : > { %s550_s6 = smul.u32 1536, %s809_s16  ;;  %s178_s7 = scalar_lea.vmem [#allocation2], %s549_s29 }
  0x49   : > { %s186_s8 = sshll.u32 %s178_s7, 4  ;;  %s1005_s10 = scalar_lea.sflag [#allocation3], %s174_s30  ;;  %s1003_s8 = int_to_ptr.vmem [resolvable:$true] %s186_s8 }
  0x4a   : > { %s1001_s9 = scalar_lea.hbm %s1123_s0, %s550_s6  ;;  %p699_p12 = pneg %p990_p11 }
  0x4b   : > { %s697_s28 = scalar_lea.hbm %s1001_s9, 1536  ;;  %s702_s6 = scalar_lea.hbm %s1123_s0, 3072 }
  0x4c   : > { %p698_p2 = scmp.ne.s32.totalorder %s1001_s9, %s697_s28  ;;  %p703_p4 = scmp.lt.u32.totalorder %s1001_s9, %s1123_s0 }
  0x4d   : > { %p704_p13 = scmp.lt.u32.totalorder %s702_s6, %s697_s28  ;;  %p706_p10 = scmp.lt.u32.totalorder %s697_s28, %s1001_s9 }
  0x4e   : > { %p700_p0 = pnand %p699_p12, %p698_p2 }
  0x4f   : > { %p705_p6 = por %p704_p13, %p703_p4 }
  0x50   : > { %p701_p1 = pneg %p700_p0 }
  0x51   : > { %p707_p3 = por %p706_p10, %p705_p6 }
  0x53   : > { %p708_p5 = pnand %p707_p3, %p701_p1 }
  0x55   : > { %711 = shalt.err (!%p708_p5)
}
  0x56   : > { %s712_s30 = scalar_lea.vmem %s1003_s8, 1536  ;;  %s819_s26 = smov [#allocation2]  }
  0x57   : > { %p713_p9 = scmp.ne.s32.totalorder %s1003_s8, %s712_s30  ;;  %s717_s19 = sshll.u32 %s819_s26, 4  ;;  %s718_s19 = int_to_ptr.vmem [resolvable:$false] %s717_s19 }
  0x58   : > { %s719_s29 = scalar_lea.vmem %s718_s19, 3072  ;;  %p720_p7 = scmp.lt.s32.totalorder %s1003_s8, %s718_s19 }
  0x59   : > { %p715_p2 = pnand %p713_p9, %p699_p12  ;;  %p721_p4 = scmp.lt.s32.totalorder %s719_s29, %s712_s30 }
  0x5b   : > { %p716_p0 = pneg %p715_p2  ;;  %p722_p13 = por %p721_p4, %p720_p7 }
  0x5d   : > { %p723_p6 = pnand %p722_p13, %p716_p0 }
  0x5f   : > { %726 = shalt.err (!%p723_p6)
}
  0x60   : > { %574 = dma.hbm_to_vmem [thread:$0]  (!%p990_p11), %s1001_s9, 1536, %s1003_s8, %s1005_s10, %s817_s11, %s817_s11, %s818_s18  }
  0x61   : > { %198 = sbr.rel (%p898_p8) target bundleno = 365 (0x16d), region = 32  ;;  %s1039_s28 = sand.u32 (!%p898_p8), 1, %s797_s13  }
  0x62   : > { %s551_s6 = smul.u32 (!%p898_p8), 96, %s1039_s28  ;;  %s201_s7 = scalar_lea.sflag (!%p898_p8), [#allocation3], %s1039_s28 }
  0x63   : > { %p1139_p7 = scmp.ne.s32.totalorder (!%p898_p8), %s1133_s22, 0 }
  0x64   : > { %s1043_s21 = scalar_lea.vmem (!%p898_p8), [#allocation2], %s551_s6 }
  0x68   : > { %780 = dma.done.wait (%p1139_p7), %s201_s7, 1536  }
  0x69   : > { %782 = vsyncadd (%p1139_p7), %s201_s7, 4294965760  ;;  %p1140_p11 = scmp.ne.s32.totalorder %s1131_s20, 0 }
  0x6b   : > { %784 = dma.done.wait (%p1140_p11), [#allocation6], 512  }
  0x6c   : > { %786 = vsyncadd (%p1140_p11), [#allocation6], 4294966784  ;;  %v820_v0 = vmov 0   ;;  %v237_v1 = vld [vmem:[%s1043_s21] sm:$0xff]  ;;  %v238_v2 = vld [vmem:[%s1043_s21 + $0x8] sm:$0xff]  ;;  %vm261_vm0 = vcmask 785408  }
  0x6d   : > { %640 = vset.pattern.permute.xlu0 %v820_v0  ;;  %v239_v3 = vld [vmem:[%s1043_s21 + $0x10] sm:$0xff]  ;;  %v525_v4 = vpack.c.bf16 %v238_v2, %v237_v1  ;;  %v240_v5 = vld [vmem:[%s1043_s21 + $0x18] sm:$0xff]  ;;  %v241_v7 = vld [vmem:[%s1043_s21 + $0x20] sm:$0xff]  ;;  %s475_s20 = sshll.u32 %s1039_s28, 4  ;;  %s483_s11 = sshll.u32 %s805_s15, 8  ;;  %vm343_vm1 = vcmask 261120  }
  0x6e   : > { %v529_v6 = vpack.c.bf16 %v240_v5, %v239_v3  ;;  %v242_v8 = vld [vmem:[%s1043_s21 + $0x28] sm:$0xff]  ;;  %v235_v9 = vld [vmem:[#allocation5] sm:$0xff]  ;;  %v249_v10 = vld [vmem:[#allocation7] sm:$0xff]  ;;  %s234_s22 = scalar_lea.vmem [#allocation8], %s475_s20  ;;  %s1074_s8 = scalar_lea.hbm %s1126_s3, %s483_s11 }
  0x6f   : > { %526 = vmatprep.subr.bf16.mxu0 %v525_v4  ;;  %v533_v11 = vpack.c.bf16 %v242_v8, %v241_v7  ;;  %522 = vmatprep.mubr.msk.f32.mxu0 %vm261_vm0, %v235_v9  ;;  %v243_v12 = vld [vmem:[%s1043_s21 + $0x30] sm:$0xff]  ;;  %v244_v13 = vld [vmem:[%s1043_s21 + $0x38] sm:$0xff]  ;;  %v245_v16 = vld [vmem:[%s1043_s21 + $0x40] sm:$0xff]  ;;  %s361_s24 = sshll.u32 %s234_s22, 4  ;;  %s347_s9 = scalar_lea.sflag [#allocation4], %s1039_s28  ;;  %s1069_s24 = int_to_ptr.vmem [resolvable:$true] %s361_s24 }
  0x70   : > { %528 = vmatpush3.bf16.msra.mxu0 %v525_v4  ;;  %253 = vperm.xlu0 %640, %v249_v10   ;;  %v250_v14 = vld [vmem:[#allocation7 + $0x8] sm:$0xff]  ;;  %v537_v15 = vpack.c.bf16 %v244_v13, %v243_v12  ;;  %v246_v17 = vld [vmem:[%s1043_s21 + $0x48] sm:$0xff]  ;;  %v247_v19 = vld [vmem:[%s1043_s21 + $0x50] sm:$0xff]  ;;  %s727_s15 = scalar_lea.vmem %s1069_s24, 256  ;;  %p1141_p12 = scmp.ne.s32.totalorder %s1137_s25, 0 }
  0x71   : > { %530 = vmatprep.subr.bf16.mxu0 %v529_v6  ;;  %v541_v18 = vpack.c.bf16 %v246_v17, %v245_v16  ;;  %v248_v20 = vld [vmem:[%s1043_s21 + $0x58] sm:$0xff]  ;;  %v236_v22 = vld [vmem:[#allocation5 + $0x8] sm:$0xff]  ;;  %p728_p8 = scmp.ne.s32.totalorder %s1069_s24, %s727_s15  ;;  %s821_s10 = smov [#allocation8]  }
  0x72   : > { %v545_v21 = vpack.c.bf16 %v248_v20, %v247_v19  ;;  %s731_s30 = sshll.u32 %s821_s10, 4  ;;  %s732_s30 = int_to_ptr.vmem [resolvable:$false] %s731_s30 }
  0x73   : > { %p729_p1 = pnand %p728_p8, %p1141_p12  ;;  %s733_s26 = scalar_lea.vmem %s732_s30, 512 }
  0x74   : > { %532 = vmatpush3.bf16.msra.mxu0 %v529_v6  ;;  %258 = vperm.xlu0 %640, %v250_v14   ;;  %p734_p3 = scmp.lt.s32.totalorder %s1069_s24, %s732_s30  ;;  %p735_p5 = scmp.lt.s32.totalorder %s733_s26, %s727_s15 }
  0x75   : > { %534 = vmatprep.subr.bf16.mxu0 %v533_v11  ;;  %p730_p10 = pneg %p729_p1 }
  0x76   : > { %p736_p9 = por %p735_p5, %p734_p3 }
  0x78   : > { %536 = vmatpush3.bf16.msra.mxu0 %v533_v11  ;;  %p737_p2 = pnand %p736_p9, %p730_p10 }
  0x79   : > { %538 = vmatprep.subr.bf16.mxu0 %v537_v15 }
  0x7c   : > { %540 = vmatpush3.bf16.msra.mxu0 %v537_v15 }
  0x7d   : > { %542 = vmatprep.subr.bf16.mxu0 %v541_v18 }
  0x80   : > { %544 = vmatpush3.bf16.msra.mxu0 %v541_v18 }
  0x81   : > { %546 = vmatprep.subr.bf16.mxu0 %v545_v21 }
  0x84   : > { %548 = vmatpush3.bf16.msra.mxu0 %v545_v21 }
  0x87   : > { %523 = vmatmul.mubr.msk.f32.vlgmr.msra.gmra.mrb[0].mxu0 %vm261_vm0, %v236_v22 }
  0xef   : > { %v254_v23 = vpop.permute.xlu0 %253 }
  0xf3   : > { %v259_v24 = vpop.permute.xlu0 %258 }
 0x15a   : > { %v524_v25 = vpop.f32.mrb[0].mxu0 }
 0x15b   : > { %v340_v26 = vadd.f32 %v524_v25, %v259_v24  ;;  %v334_v27 = vpop.f32.mrb[1].mxu0 }
 0x15c   : > { %v335_v28 = vadd.f32 %v334_v27, %v254_v23 }
 0x15d   : > { %345 = vst.msk [vmem:[%s234_s22 + $0x8] sm:$0xff] %vm343_vm1, %v340_v26 }
 0x15e   : > { %344 = vst.msk [vmem:[%s234_s22] sm:$0xff] %vm343_vm1, %v335_v28 }
 0x15f   : > { %740 = shalt.err (!%p737_p2)
}
 0x160   : > { %s741_s19 = scalar_lea.hbm %s1074_s8, 256  ;;  %s745_s7 = scalar_lea.hbm %s1126_s3, 512 }
 0x161   : > { %p742_p0 = scmp.ne.s32.totalorder %s1074_s8, %s741_s19  ;;  %p746_p6 = scmp.lt.u32.totalorder %s1074_s8, %s1126_s3 }
 0x162   : > { %p747_p7 = scmp.lt.u32.totalorder %s745_s7, %s741_s19  ;;  %p749_p8 = scmp.lt.u32.totalorder %s741_s19, %s1074_s8 }
 0x163   : > { %p743_p4 = pnand %p742_p0, %p1141_p12 }
 0x164   : > { %p748_p11 = por %p747_p7, %p746_p6 }
 0x165   : > { %p744_p13 = pneg %p743_p4 }
 0x166   : > { %p750_p1 = por %p749_p8, %p748_p11 }
 0x168   : > { %p751_p10 = pnand %p750_p1, %p744_p13 }
 0x16a   : > { %754 = shalt.err (!%p751_p10)
}
 0x16b   : > { %s822_s22 = smov 128   ;;  %s823_s11 = smov 8  }
 0x16c   : > { %562 = dma.vmem_to_hbm [thread:$0]  (%p1141_p12), %s1069_s24, 256, %s1074_s8, %s347_s9, %s822_s22, %s822_s22, %s823_s11  }
 0x16d PF: > { %s376_s18 = sand.u32 1, %s793_s12   ;;  %p1142_p3 = scmp.ne.s32.totalorder %s1134_s23, 0 }
 0x16e   : > { %p1143_p5 = scmp.ge.s32.totalorder %s813_s17, 2  ;;  %s377_s4 = scalar_lea.sflag [#allocation4], %s376_s18 }
 0x170   : > { %p576_p9 = pnand %p1143_p5, %p1142_p3 }
 0x172   : > { %788 = dma.done.wait (!%p576_p9), %s377_s4, 256  }
 0x173   : > { %790 = vsyncadd (!%p576_p9), %s377_s4, 4294967040  ;;  %s20_s17 = sadd.s32 1, %s813_s17   ;;  %s1144_s12 = smov %s797_s13 }
 0x174   : > { %p17_p2 = scmp.ge.s32.totalorder %s20_s17, 4   ;;  %s1145_s13 = smov %s801_s14 }
 0x175   : > { %s1146_s14 = smov %s995_s5  ;;  %s1147_s15 = smov %s809_s16 }
 0x176   : > { %s1148_s16 = smov %s1150_s27  ;;  %19 = sbr.rel (!%p17_p2) target bundleno = 7 (0x7), region = 85 }
 0x17d   :  { %382 = vsyncpa [#allocation3], 1 }
 0x17e   :  { %384 = vsyncpa [#allocation3 + $0x1], 1 }
 0x17f   :  { %385 = vsyncpa [#allocation6], 1 }
 0x180   :  { %386 = vsyncpa [#allocation4], 1 }
 0x181   :  { %388 = vsyncpa [#allocation4 + $0x1], 1 }

// kernel: st_block_2_forward.11
= control target key start
LH: loop header
LB: loop body
LE: loop exit
PB: predicated region body
PF: predicated region fallthrough
CT: control target
= control target key end

     0   :  { %7 = vsyncpa [#allocation3], 0  ;;  %s2247_s0 = inlined_call_operand.vmem [shape: f32[2,16,8,2], index: 0, kind: input, shape index: {}]   ;;  %s2248_s1 = inlined_call_operand.vmem [shape: f32[2,16,8,2], index: 1, kind: input, shape index: {}]   ;;  %s2249_s2 = inlined_call_operand.hbm [shape: f32[2,4,8,8], index: 2, kind: output, shape index: {}]  }
   0x1   :  { %9 = vsyncpa [#allocation3 + $0x1], 0  ;;  %s2001_s9 = smov 0   ;;  %s2003_s10 = smov 0  }
   0x2   :  { %s2005_s11 = smov 0   ;;  %s2007_s12 = smov 0  }
   0x3 LB: > { %s2022_s13 = sadd.s32 4294967295, %s1979_s12   ;;  %s1633_s14 = sadd.s32 4294967294, %s1979_s12   ;;  %s1979_s12 = sphi %s2007_s12, %s2255_s12   ;;  %s1975_s11 = sphi %s2005_s11, %s2254_s11   ;;  %s1971_s10 = sphi %s2003_s10, %s2253_s10   ;;  %s1967_s9 = sphi %s2001_s9, %s2252_s9  }
   0x4   : > { %s2026_s15 = sadd.s32 1, %s1979_s12   ;;  %s74_s16 = sadd.s32 1, %s1975_s11 }
   0x5   : > { %s71_s17 = ssub.s32 %s1979_s12, %s2026_s15  ;;  %p84_p0 = scmp.ne.s32.totalorder %s1975_s11, %s1971_s10 }
   0x6   : > { %p72_p1 = scmp.eq.s32.totalorder %s71_s17, 0  ;;  %p85_p2 = scmp.eq.s32.totalorder %s2022_s13, 1 }
   0x7   : > { %p90_p3 = scmp.ne.s32.totalorder %s1971_s10, %s1967_s9  ;;  %p91_p4 = scmp.eq.s32.totalorder %s1633_s14, 1 }
   0x8   : > { %s2037_s18 = scalar_select %p72_p1, %s1975_s11, %s74_s16  }
   0x9   : > { %p2039_p5 = por %p85_p2, %p84_p0  ;;  %p2043_p6 = por %p91_p4, %p90_p3 }
   0xa   : > { %p1636_p7 = scmp.ge.s32.totalorder %s1979_s12, 1  ;;  %p125_p8 = scmp.lt.s32.totalorder %s1979_s12, 3 }
   0xc   : > { %p126_p9 = pnand %p1636_p7, %p125_p8 }
   0xd   : > { %p152_p10 = scmp.lt.s32.totalorder (!%p126_p9), %s2022_s13, 1  ;;  %v1981_v0 = vmov (!%p126_p9), 0.0   ;;  %vm1982_vm0 = vmmov (!%p126_p9), 0   ;;  %vm194_vm1 = vcmask (!%p126_p9), 15360   ;;  %vm1507_vm2 = vcmask (!%p126_p9), 64512   ;;  %s149_s29 = sand.u32 (!%p126_p9), 1, %s1971_s10  }
   0xe   : > { %129 = sbr.rel (%p126_p9) target bundleno = 318 (0x13e), region = 28  ;;  %1730 = vmatprep.subr.mxu0 (!%p126_p9), %v1981_v0  ;;  %1735 = vmatprep.subr.mxu1 (!%p126_p9), %v1981_v0  ;;  %s1637_s30 = sshll.u32 (!%p126_p9), %s149_s29, 5 }
   0xf   : > { %1732 = vmatprep.mubr.msk.f32.mxu0 (!%p126_p9), %vm1982_vm0, %v1981_v0  ;;  %1737 = vmatprep.mubr.msk.f32.mxu1 (!%p126_p9), %vm1982_vm0, %v1981_v0  ;;  %s151_s3 = scalar_lea.vmem (!%p126_p9), [#allocation2], %s1637_s30  ;;  %s1697_s4 = sshll.u32 (!%p126_p9), %s2022_s13, 9 }
  0x10   : > { %s1559_s5 = sshll.u32 (!%p126_p9), %s151_s3, 4  ;;  %s2198_s8 = scalar_lea.hbm (!%p126_p9), %s2249_s2, %s1697_s4  ;;  %s2200_s5 = int_to_ptr.vmem [resolvable:$true] %s1559_s5 }
  0x11   : > { %s1917_s14 = scalar_lea.vmem (!%p126_p9), %s2200_s5, 512  ;;  %s1983_s16 = smov (!%p126_p9), [#allocation2]  }
  0x12   : > { %p1918_p11 = scmp.ne.s32.totalorder (!%p126_p9), %s2200_s5, %s1917_s14  ;;  %s1921_s17 = sshll.u32 (!%p126_p9), %s1983_s16, 4  ;;  %s1922_s17 = int_to_ptr.vmem [resolvable:$false] %s1921_s17 }
  0x13   : > { %p1924_p0 = scmp.lt.s32.totalorder (!%p126_p9), %s2200_s5, %s1922_s17 }
  0x14   : > { %p1919_p12 = pnand (!%p126_p9), %p1918_p11, %p2039_p5 }
  0x15   : > { %s153_s21 = scalar_select %p152_p10, %s2022_s13, 1 }
  0x16   : > { %s2206_s13 = scalar_lea.sflag [#allocation3], %s149_s29  ;;  %p1920_p13 = pneg %p1919_p12 }
  0x17   : > { %s1695_s22 = sshll.u32 %s153_s21, 7  ;;  %s1923_s21 = scalar_lea.vmem %s1922_s17, 1024 }
  0x18   : > { %s2060_s25 = scalar_lea.vmem %s2248_s1, %s1695_s22  ;;  %s2065_s28 = scalar_lea.vmem %s2247_s0, %s1695_s22 }
  0x19   : > { %v178_v1 = vld [vmem:[%s2060_s25] sm:$0xff]  ;;  %v179_v2 = vld [vmem:[%s2060_s25 + $0x8] sm:$0xff]  ;;  %v180_v5 = vld [vmem:[%s2060_s25 + $0x10] sm:$0xff]  ;;  %p1925_p1 = scmp.lt.s32.totalorder %s1923_s21, %s1917_s14 }
  0x1a   : > { %1731 = vmatpush3.xpose.msk.msra.mxu0 %vm194_vm1, %v178_v1  ;;  %1736 = vmatpush3.xpose.msk.msra.mxu1 %vm194_vm1, %v179_v2  ;;  %v162_v3 = vld [vmem:[%s2065_s28] sm:$0xff]  ;;  %v163_v4 = vld [vmem:[%s2065_s28 + $0x8] sm:$0xff]  ;;  %v181_v6 = vld [vmem:[%s2060_s25 + $0x18] sm:$0xff] }
  0x1b   : > { %1740 = vmatprep.subr.mxu0 %v1981_v0  ;;  %1745 = vmatprep.subr.mxu1 %v1981_v0  ;;  %v164_v7 = vld [vmem:[%s2065_s28 + $0x10] sm:$0xff]  ;;  %v165_v8 = vld [vmem:[%s2065_s28 + $0x18] sm:$0xff]  ;;  %v182_v9 = vld [vmem:[%s2060_s25 + $0x20] sm:$0xff]  ;;  %p1926_p2 = por %p1925_p1, %p1924_p0 }
  0x1c   : > { %v183_v10 = vld [vmem:[%s2060_s25 + $0x28] sm:$0xff]  ;;  %v166_v11 = vld [vmem:[%s2065_s28 + $0x20] sm:$0xff]  ;;  %v184_v13 = vld [vmem:[%s2060_s25 + $0x30] sm:$0xff] }
  0x1d   : > { %1733 = vmatmul.mubr.msk.f32.vlgmr.msra.gmra.mrb[0].mxu0 %vm194_vm1, %v162_v3  ;;  %1738 = vmatmul.mubr.msk.f32.vlgmr.msra.gmra.mrb[0].mxu1 %vm194_vm1, %v163_v4  ;;  %v167_v12 = vld [vmem:[%s2065_s28 + $0x28] sm:$0xff]  ;;  %v185_v14 = vld [vmem:[%s2060_s25 + $0x38] sm:$0xff]  ;;  %v168_v15 = vld [vmem:[%s2065_s28 + $0x30] sm:$0xff]  ;;  %p1927_p3 = pnand %p1926_p2, %p1920_p13 }
  0x1e   : > { %1741 = vmatpush3.xpose.msk.msra.mxu0 %vm194_vm1, %v180_v5  ;;  %1746 = vmatpush3.xpose.msk.msra.mxu1 %vm194_vm1, %v181_v6  ;;  %v169_v16 = vld [vmem:[%s2065_s28 + $0x38] sm:$0xff]  ;;  %v186_v17 = vld [vmem:[%s2060_s25 + $0x40] sm:$0xff]  ;;  %v187_v18 = vld [vmem:[%s2060_s25 + $0x48] sm:$0xff] }
  0x1f   : > { %1742 = vmatprep.mubr.msk.f32.mxu0 %vm1982_vm0, %v1981_v0  ;;  %1747 = vmatprep.mubr.msk.f32.mxu1 %vm1982_vm0, %v1981_v0  ;;  %v170_v19 = vld [vmem:[%s2065_s28 + $0x40] sm:$0xff]  ;;  %v171_v20 = vld [vmem:[%s2065_s28 + $0x48] sm:$0xff]  ;;  %v188_v21 = vld [vmem:[%s2060_s25 + $0x50] sm:$0xff] }
  0x20   : > { %1750 = vmatprep.subr.mxu0 %v1981_v0  ;;  %1755 = vmatprep.subr.mxu1 %v1981_v0  ;;  %v189_v22 = vld [vmem:[%s2060_s25 + $0x58] sm:$0xff]  ;;  %v172_v23 = vld [vmem:[%s2065_s28 + $0x50] sm:$0xff]  ;;  %v190_v25 = vld [vmem:[%s2060_s25 + $0x60] sm:$0xff] }
  0x21   : > { %1743 = vmatmul.mubr.msk.f32.vlgmr.msra.gmra.mrb[2].mxu0 %vm194_vm1, %v164_v7  ;;  %1748 = vmatmul.mubr.msk.f32.vlgmr.msra.gmra.mrb[2].mxu1 %vm194_vm1, %v165_v8  ;;  %v173_v24 = vld [vmem:[%s2065_s28 + $0x58] sm:$0xff]  ;;  %v191_v26 = vld [vmem:[%s2060_s25 + $0x68] sm:$0xff]  ;;  %v174_v27 = vld [vmem:[%s2065_s28 + $0x60] sm:$0xff] }
  0x22   : > { %1751 = vmatpush3.xpose.msk.msra.mxu0 %vm194_vm1, %v182_v9  ;;  %1756 = vmatpush3.xpose.msk.msra.mxu1 %vm194_vm1, %v183_v10  ;;  %v175_v28 = vld [vmem:[%s2065_s28 + $0x68] sm:$0xff]  ;;  %v192_v29 = vld [vmem:[%s2060_s25 + $0x70] sm:$0xff]  ;;  %v193_v30 = vld [vmem:[%s2060_s25 + $0x78] sm:$0xff] }
  0x23   : > { %1752 = vmatprep.mubr.msk.f32.mxu0 %vm1982_vm0, %v1981_v0  ;;  %1757 = vmatprep.mubr.msk.f32.mxu1 %vm1982_vm0, %v1981_v0  ;;  %v176_v31 = vld [vmem:[%s2065_s28 + $0x70] sm:$0xff]  ;;  %v177_v32 = vld [vmem:[%s2065_s28 + $0x78] sm:$0xff] }
  0x24   : > { %1760 = vmatprep.subr.mxu0 %v1981_v0  ;;  %1765 = vmatprep.subr.mxu1 %v1981_v0 }
  0x25   : > { %1753 = vmatmul.mubr.msk.f32.vlgmr.msra.gmra.mrb[4].mxu0 %vm194_vm1, %v166_v11  ;;  %1758 = vmatmul.mubr.msk.f32.vlgmr.msra.gmra.mrb[4].mxu1 %vm194_vm1, %v167_v12 }
  0x26   : > { %1761 = vmatpush3.xpose.msk.msra.mxu0 %vm194_vm1, %v184_v13  ;;  %1766 = vmatpush3.xpose.msk.msra.mxu1 %vm194_vm1, %v185_v14 }
  0x27   : > { %1762 = vmatprep.mubr.msk.f32.mxu0 %vm1982_vm0, %v1981_v0  ;;  %1767 = vmatprep.mubr.msk.f32.mxu1 %vm1982_vm0, %v1981_v0 }
  0x28   : > { %1770 = vmatprep.subr.mxu0 %v1981_v0  ;;  %1775 = vmatprep.subr.mxu1 %v1981_v0 }
  0x29   : > { %1763 = vmatmul.mubr.msk.f32.vlgmr.msra.gmra.mrb[6].mxu0 %vm194_vm1, %v168_v15  ;;  %1768 = vmatmul.mubr.msk.f32.vlgmr.msra.gmra.mrb[6].mxu1 %vm194_vm1, %v169_v16 }
  0x2a   : > { %1771 = vmatpush3.xpose.msk.msra.mxu0 %vm194_vm1, %v186_v17  ;;  %1776 = vmatpush3.xpose.msk.msra.mxu1 %vm194_vm1, %v187_v18 }
  0x2b   : > { %1772 = vmatprep.mubr.msk.f32.mxu0 %vm1982_vm0, %v1981_v0  ;;  %1777 = vmatprep.mubr.msk.f32.mxu1 %vm1982_vm0, %v1981_v0 }
  0x2c   : > { %1780 = vmatprep.subr.mxu0 %v1981_v0  ;;  %1785 = vmatprep.subr.mxu1 %v1981_v0 }
  0x2d   : > { %1773 = vmatmul.mubr.msk.f32.vlgmr.msra.gmra.mrb[8].mxu0 %vm194_vm1, %v170_v19  ;;  %1778 = vmatmul.mubr.msk.f32.vlgmr.msra.gmra.mrb[8].mxu1 %vm194_vm1, %v171_v20 }
  0x2e   : > { %1781 = vmatpush3.xpose.msk.msra.mxu0 %vm194_vm1, %v188_v21  ;;  %1786 = vmatpush3.xpose.msk.msra.mxu1 %vm194_vm1, %v189_v22 }
  0x2f   : > { %1782 = vmatprep.mubr.msk.f32.mxu0 %vm1982_vm0, %v1981_v0  ;;  %1787 = vmatprep.mubr.msk.f32.mxu1 %vm1982_vm0, %v1981_v0 }
  0x30   : > { %1790 = vmatprep.subr.mxu0 %v1981_v0  ;;  %1795 = vmatprep.subr.mxu1 %v1981_v0 }
  0x31   : > { %1783 = vmatmul.mubr.msk.f32.vlgmr.msra.gmra.mrb[10].mxu0 %vm194_vm1, %v172_v23  ;;  %1788 = vmatmul.mubr.msk.f32.vlgmr.msra.gmra.mrb[10].mxu1 %vm194_vm1, %v173_v24 }
  0x32   : > { %1791 = vmatpush3.xpose.msk.msra.mxu0 %vm194_vm1, %v190_v25  ;;  %1796 = vmatpush3.xpose.msk.msra.mxu1 %vm194_vm1, %v191_v26 }
  0x33   : > { %1792 = vmatprep.mubr.msk.f32.mxu0 %vm1982_vm0, %v1981_v0  ;;  %1797 = vmatprep.mubr.msk.f32.mxu1 %vm1982_vm0, %v1981_v0 }
  0x34   : > { %1800 = vmatprep.subr.mxu0 %v1981_v0  ;;  %1805 = vmatprep.subr.mxu1 %v1981_v0 }
  0x35   : > { %1793 = vmatmul.mubr.msk.f32.vlgmr.msra.gmra.mrb[12].mxu0 %vm194_vm1, %v174_v27  ;;  %1798 = vmatmul.mubr.msk.f32.vlgmr.msra.gmra.mrb[12].mxu1 %vm194_vm1, %v175_v28 }
  0x36   : > { %1801 = vmatpush3.xpose.msk.msra.mxu0 %vm194_vm1, %v192_v29  ;;  %1806 = vmatpush3.xpose.msk.msra.mxu1 %vm194_vm1, %v193_v30 }
  0x37   : > { %1802 = vmatprep.mubr.msk.f32.mxu0 %vm1982_vm0, %v1981_v0  ;;  %1807 = vmatprep.mubr.msk.f32.mxu1 %vm1982_vm0, %v1981_v0 }
  0x39   : > { %1803 = vmatmul.mubr.msk.f32.vlgmr.msra.gmra.mrb[14].mxu0 %vm194_vm1, %v176_v31  ;;  %1808 = vmatmul.mubr.msk.f32.vlgmr.msra.gmra.mrb[14].mxu1 %vm194_vm1, %v177_v32 }
  0xf0   : > { %v267_v33 = vpop.f32.mrb[0].mxu0  ;;  %v343_v34 = vpop.f32.mrb[0].mxu1 }
  0xf1   : > { %v1674_v35 = vmul.f32 -1.442695, %v267_v33  ;;  %v1675_v36 = vmul.f32 -1.442695, %v343_v34  ;;  %v1734_v37 = vpop.f32.mrb[1].mxu0  ;;  %v1739_v38 = vpop.f32.mrb[1].mxu1 }
  0xf3   : > { %1853 = vpow2.f32 %v1674_v35 }
  0xf4   : > { %1855 = vpow2.f32 %v1675_v36  ;;  %v419_v39 = vpop.f32.mrb[2].mxu0  ;;  %v495_v40 = vpop.f32.mrb[2].mxu1 }
  0xf5   : > { %v1676_v41 = vmul.f32 -1.442695, %v419_v39  ;;  %v1677_v42 = vmul.f32 -1.442695, %v495_v40  ;;  %v1744_v43 = vpop.f32.mrb[3].mxu0  ;;  %v1749_v44 = vpop.f32.mrb[3].mxu1 }
  0xf7   : > { %1857 = vpow2.f32 %v1676_v41 }
  0xf8   : > { %1859 = vpow2.f32 %v1677_v42  ;;  %v571_v45 = vpop.f32.mrb[4].mxu0  ;;  %v647_v46 = vpop.f32.mrb[4].mxu1 }
  0xf9   : > { %v1678_v47 = vmul.f32 -1.442695, %v571_v45  ;;  %v1679_v48 = vmul.f32 -1.442695, %v647_v46  ;;  %v1754_v49 = vpop.f32.mrb[5].mxu0  ;;  %v1759_v50 = vpop.f32.mrb[5].mxu1 }
  0xfb   : > { %1861 = vpow2.f32 %v1678_v47 }
  0xfc   : > { %1863 = vpow2.f32 %v1679_v48  ;;  %v723_v51 = vpop.f32.mrb[6].mxu0  ;;  %v799_v52 = vpop.f32.mrb[6].mxu1 }
  0xfd   : > { %v1854_v53 = vpop.eup %1853  ;;  %v1680_v54 = vmul.f32 -1.442695, %v723_v51  ;;  %v1764_v55 = vpop.f32.mrb[7].mxu0  ;;  %v1681_v59 = vmul.f32 -1.442695, %v799_v52 }
  0xfe   : > { %v1769_v56 = vpop.f32.mrb[7].mxu1  ;;  %v1856_v57 = vpop.eup %1855  ;;  %v1459_v58 = vadd.f32 1.0, %v1854_v53 }
  0xff   : > { %v1460_v60 = vadd.f32 1.0, %v1856_v57  ;;  %1865 = vpow2.f32 %v1680_v54 }
 0x100   : > { %1867 = vrcp.f32 %v1459_v58  ;;  %v875_v61 = vpop.f32.mrb[8].mxu0  ;;  %v951_v62 = vpop.f32.mrb[8].mxu1 }
 0x101   : > { %v1858_v63 = vpop.eup %1857  ;;  %1869 = vrcp.f32 %v1460_v60  ;;  %v1682_v0 = vmul.f32 -1.442695, %v875_v61  ;;  %v1774_v1 = vpop.f32.mrb[9].mxu0  ;;  %v1683_v5 = vmul.f32 -1.442695, %v951_v62 }
 0x102   : > { %v1779_v2 = vpop.f32.mrb[9].mxu1  ;;  %v1860_v3 = vpop.eup %1859  ;;  %v1461_v4 = vadd.f32 1.0, %v1858_v63  ;;  %1871 = vpow2.f32 %v1681_v59 }
 0x103   : > { %v1462_v6 = vadd.f32 1.0, %v1860_v3  ;;  %1873 = vpow2.f32 %v1682_v0 }
 0x104   : > { %1875 = vrcp.f32 %v1461_v4  ;;  %v1027_v7 = vpop.f32.mrb[10].mxu0  ;;  %v1103_v8 = vpop.f32.mrb[10].mxu1 }
 0x105   : > { %v1862_v9 = vpop.eup %1861  ;;  %1877 = vrcp.f32 %v1462_v6  ;;  %v1684_v10 = vmul.f32 -1.442695, %v1027_v7  ;;  %v1784_v11 = vpop.f32.mrb[11].mxu0  ;;  %v1685_v15 = vmul.f32 -1.442695, %v1103_v8 }
 0x106   : > { %v1789_v12 = vpop.f32.mrb[11].mxu1  ;;  %v1864_v13 = vpop.eup %1863  ;;  %v1463_v14 = vadd.f32 1.0, %v1862_v9  ;;  %1879 = vpow2.f32 %v1683_v5 }
 0x107   : > { %v1464_v16 = vadd.f32 1.0, %v1864_v13  ;;  %1881 = vpow2.f32 %v1684_v10 }
 0x108   : > { %1883 = vrcp.f32 %v1463_v14  ;;  %v1179_v17 = vpop.f32.mrb[12].mxu0  ;;  %v1255_v18 = vpop.f32.mrb[12].mxu1 }
 0x109   : > { %v1866_v19 = vpop.eup %1865  ;;  %1885 = vrcp.f32 %v1464_v16  ;;  %v1686_v20 = vmul.f32 -1.442695, %v1179_v17  ;;  %v1687_v21 = vmul.f32 -1.442695, %v1255_v18  ;;  %v1794_v22 = vpop.f32.mrb[13].mxu0 }
 0x10a   : > { %v1799_v23 = vpop.f32.mrb[13].mxu1  ;;  %v1868_v24 = vpop.eup %1867  ;;  %v1465_v25 = vadd.f32 1.0, %v1866_v19  ;;  %1887 = vpow2.f32 %v1685_v15 }
 0x10b   : > { %v1870_v26 = vpop.eup %1869  ;;  %1889 = vpow2.f32 %v1686_v20  ;;  %v1508_v45 = vsel %vm1507_vm2, %v1868_v24, 0.0 }
 0x10c   : > { %v1872_v27 = vpop.eup %1871  ;;  %1891 = vrcp.f32 %v1465_v25  ;;  %v1331_v28 = vpop.f32.mrb[14].mxu0  ;;  %v1515_v48 = vsel %vm1507_vm2, %v1870_v26, 0.0 }
 0x10d   : > { %v1407_v29 = vpop.f32.mrb[14].mxu1  ;;  %v1874_v30 = vpop.eup %1873  ;;  %v1466_v31 = vadd.f32 1.0, %v1872_v27  ;;  %1893 = vpow2.f32 %v1687_v21  ;;  %v1688_v32 = vmul.f32 -1.442695, %v1331_v28 }
 0x10e   : > { %v1804_v33 = vpop.f32.mrb[15].mxu0  ;;  %v1876_v34 = vpop.eup %1875  ;;  %v1467_v35 = vadd.f32 1.0, %v1874_v30  ;;  %v1689_v36 = vmul.f32 -1.442695, %v1407_v29 }
 0x10f   : > { %v1809_v37 = vpop.f32.mrb[15].mxu1  ;;  %v1878_v38 = vpop.eup %1877  ;;  %1895 = vrcp.f32 %v1466_v31  ;;  %v1522_v57 = vsel %vm1507_vm2, %v1876_v34, 0.0 }
 0x110   : > { %v1880_v39 = vpop.eup %1879  ;;  %1897 = vrcp.f32 %v1467_v35  ;;  %v1529_v63 = vsel %vm1507_vm2, %v1878_v38, 0.0 }
 0x111   : > { %v1882_v40 = vpop.eup %1881  ;;  %v1468_v41 = vadd.f32 1.0, %v1880_v39  ;;  %1899 = vpow2.f32 %v1688_v32 }
 0x112   : > { %v1884_v42 = vpop.eup %1883  ;;  %v1469_v43 = vadd.f32 1.0, %v1882_v40  ;;  %1901 = vpow2.f32 %v1689_v36 }
 0x113   : > { %v1886_v44 = vpop.eup %1885  ;;  %v1509_v46 = vsel %vm1507_vm2, %v1884_v42, 0.0  ;;  %1903 = vrcp.f32 %v1468_v41 }
 0x114   : > { %v1888_v47 = vpop.eup %1887  ;;  %v1510_v49 = vadd.f32 %v1509_v46, %v1508_v45  ;;  %v1516_v50 = vsel %vm1507_vm2, %v1886_v44, 0.0  ;;  %1905 = vrcp.f32 %v1469_v43 }
 0x115   : > { %v1890_v51 = vpop.eup %1889  ;;  %v1517_v52 = vadd.f32 %v1516_v50, %v1515_v48  ;;  %v1470_v53 = vadd.f32 1.0, %v1888_v47 }
 0x116   : > { %v1892_v54 = vpop.eup %1891  ;;  %v1471_v55 = vadd.f32 1.0, %v1890_v51 }
 0x117   : > { %v1894_v56 = vpop.eup %1893  ;;  %v1523_v58 = vsel %vm1507_vm2, %v1892_v54, 0.0  ;;  %1907 = vrcp.f32 %v1470_v53 }
 0x118   : > { %v1524_v59 = vadd.f32 %v1523_v58, %v1522_v57  ;;  %1909 = vrcp.f32 %v1471_v55  ;;  %v1472_v60 = vadd.f32 1.0, %v1894_v56 }
 0x119   : > { %v1896_v61 = vpop.eup %1895 }
 0x11a   : > { %v1898_v62 = vpop.eup %1897  ;;  %v1530_v0 = vsel %vm1507_vm2, %v1896_v61, 0.0  ;;  %1911 = vrcp.f32 %v1472_v60 }
 0x11b   : > { %v1900_v1 = vpop.eup %1899  ;;  %v1531_v2 = vadd.f32 %v1530_v0, %v1529_v63  ;;  %v1511_v3 = vsel %vm1507_vm2, %v1898_v62, 0.0 }
 0x11c   : > { %v1902_v4 = vpop.eup %1901  ;;  %v1512_v5 = vadd.f32 %v1511_v3, %v1510_v49  ;;  %v1473_v6 = vadd.f32 1.0, %v1900_v1 }
 0x11d   : > { %v1904_v7 = vpop.eup %1903  ;;  %v1474_v8 = vadd.f32 1.0, %v1902_v4 }
 0x11e   : > { %v1906_v9 = vpop.eup %1905  ;;  %v1518_v10 = vsel %vm1507_vm2, %v1904_v7, 0.0  ;;  %1913 = vrcp.f32 %v1473_v6 }
 0x11f   : > { %v1519_v11 = vadd.f32 %v1518_v10, %v1517_v52  ;;  %v1525_v12 = vsel %vm1507_vm2, %v1906_v9, 0.0  ;;  %1915 = vrcp.f32 %v1474_v8 }
 0x120   : > { %v1526_v13 = vadd.f32 %v1525_v12, %v1524_v59 }
 0x121   : > { %v1908_v14 = vpop.eup %1907 }
 0x122   : > { %v1910_v15 = vpop.eup %1909  ;;  %v1532_v16 = vsel %vm1507_vm2, %v1908_v14, 0.0 }
 0x123   : > { %v1533_v17 = vadd.f32 %v1532_v16, %v1531_v2  ;;  %v1513_v18 = vsel %vm1507_vm2, %v1910_v15, 0.0 }
 0x124   : > { %v1912_v19 = vpop.eup %1911  ;;  %v1514_v20 = vadd.f32 %v1513_v18, %v1512_v5 }
 0x125   : > { %v1520_v21 = vsel %vm1507_vm2, %v1912_v19, 0.0 }
 0x126   : > { %v1537_v22 = vmul.f32 0.25, %v1514_v20  ;;  %v1521_v23 = vadd.f32 %v1520_v21, %v1519_v11 }
 0x128   : > { %v1914_v24 = vpop.eup %1913  ;;  %v1538_v25 = vmul.f32 0.25, %v1521_v23  ;;  %1541 = vst.msk [vmem:[%s151_s3] sm:$0xff] %vm1507_vm2, %v1537_v22 }
 0x129   : > { %v1916_v26 = vpop.eup %1915  ;;  %v1527_v27 = vsel %vm1507_vm2, %v1914_v24, 0.0 }
 0x12a   : > { %v1528_v28 = vadd.f32 %v1527_v27, %v1526_v13  ;;  %v1534_v29 = vsel %vm1507_vm2, %v1916_v26, 0.0  ;;  %1542 = vst.msk [vmem:[%s151_s3 + $0x8] sm:$0xff] %vm1507_vm2, %v1538_v25 }
 0x12b   : > { %v1535_v30 = vadd.f32 %v1534_v29, %v1533_v17 }
 0x12c   : > { %v1539_v31 = vmul.f32 0.25, %v1528_v28 }
 0x12d   : > { %v1540_v32 = vmul.f32 0.25, %v1535_v30 }
 0x12e   : > { %1543 = vst.msk [vmem:[%s151_s3 + $0x10] sm:$0xff] %vm1507_vm2, %v1539_v31 }
 0x12f   : > { %1544 = vst.msk [vmem:[%s151_s3 + $0x18] sm:$0xff] %vm1507_vm2, %v1540_v32 }
 0x130   : > { %1930 = shalt.err (!%p1927_p3)
}
 0x131   : > { %s1931_s22 = scalar_lea.hbm %s2198_s8, 512  ;;  %s1935_s25 = scalar_lea.hbm %s2249_s2, 1024 }
 0x132   : > { %p1932_p4 = scmp.ne.s32.totalorder %s2198_s8, %s1931_s22  ;;  %p1936_p9 = scmp.lt.u32.totalorder %s2198_s8, %s2249_s2 }
 0x133   : > { %p1937_p10 = scmp.lt.u32.totalorder %s1935_s25, %s1931_s22  ;;  %p1939_p12 = scmp.lt.u32.totalorder %s1931_s22, %s2198_s8 }
 0x134   : > { %p1933_p7 = pnand %p1932_p4, %p2039_p5 }
 0x135   : > { %p1938_p11 = por %p1937_p10, %p1936_p9 }
 0x136   : > { %p1934_p8 = pneg %p1933_p7 }
 0x137   : > { %p1940_p13 = por %p1939_p12, %p1938_p11 }
 0x139   : > { %p1941_p0 = pnand %p1940_p13, %p1934_p8 }
 0x13b   : > { %1944 = shalt.err (!%p1941_p0)
}
 0x13c   : > { %s1984_s28 = smov 128   ;;  %s1985_s29 = smov 8  }
 0x13d   : > { %1810 = dma.vmem_to_hbm [thread:$0]  (%p2039_p5), %s2200_s5, 512, %s2198_s8, %s2206_s13, %s1984_s28, %s1984_s28, %s1985_s29  }
 0x13e PF: > { %p1816_p1 = scmp.ge.s32.totalorder %s1979_s12, 2  ;;  %s1574_s30 = sand.u32 1, %s1967_s9  }
 0x13f   : > { %s1575_s3 = scalar_lea.sflag [#allocation3], %s1574_s30 }
 0x140   : > { %p1813_p2 = pnand %p1816_p1, %p2043_p6 }
 0x142   : > { %1962 = dma.done.wait (!%p1813_p2), %s1575_s3, 512  }
 0x143   : > { %1964 = vsyncadd (!%p1813_p2), %s1575_s3, 4294966784  ;;  %p12_p3 = scmp.ge.s32.totalorder %s2026_s15, 4   ;;  %s2252_s9 = smov %s1971_s10 }
 0x144   : > { %s2253_s10 = smov %s1975_s11  ;;  %s2254_s11 = smov %s2037_s18 }
 0x145   : > { %s2255_s12 = smov %s2026_s15  ;;  %14 = sbr.rel (!%p12_p3) target bundleno = 3 (0x3), region = 66 }
 0x14c   :  { %1580 = vsyncpa [#allocation3], 1 }
 0x14d   :  { %1582 = vsyncpa [#allocation3 + $0x1], 1 }

// kernel: st_block_2_forward.12
= control target key start
LH: loop header
LB: loop body
LE: loop exit
PB: predicated region body
PF: predicated region fallthrough
CT: control target
= control target key end

     0   :  { %8 = vsyncpa [#allocation3], 0  ;;  %s1024_s0 = inlined_call_operand.hbm [shape: f32[2,8,96], index: 0, kind: input, shape index: {}]   ;;  %s1025_s1 = inlined_call_operand.hbm [shape: f32[16,8], index: 1, kind: input, shape index: {}]   ;;  %s1026_s2 = inlined_call_operand.hbm [shape: f32[16,1], index: 2, kind: input, shape index: {}]   ;;  %s1027_s3 = inlined_call_operand.hbm [shape: f32[2,16,96], index: 3, kind: output, shape index: {}]  }
   0x1   :  { %10 = vsyncpa [#allocation3 + $0x1], 0 }
   0x2   :  { %11 = vsyncpa [#allocation6], 0 }
   0x3   :  { %12 = vsyncpa [#allocation4], 0 }
   0x4   :  { %14 = vsyncpa [#allocation4 + $0x1], 0  ;;  %s771_s12 = smov 0   ;;  %s773_s13 = smov 0  }
   0x5   :  { %s775_s14 = smov 0   ;;  %s777_s15 = smov 0  }
   0x6   :  { %s779_s16 = smov 0   ;;  %s781_s17 = smov 0  }
   0x7 LB: > { %s450_s18 = sadd.s32 4294967295, %s740_s17   ;;  %s451_s19 = sadd.s32 4294967294, %s740_s17   ;;  %s740_s17 = sphi %s781_s17, %s20_s17   ;;  %s736_s16 = sphi %s779_s16, %s1049_s16   ;;  %s732_s15 = sphi %s777_s15, %s1048_s15   ;;  %s728_s14 = sphi %s775_s14, %s1047_s14   ;;  %s724_s13 = sphi %s773_s13, %s1046_s13   ;;  %s720_s12 = sphi %s771_s12, %s1045_s12  }
   0x8   : > { %p54_p0 = scmp.ne.s32.totalorder %s724_s13, %s720_s12  ;;  %p805_p1 = scmp.eq.s32.totalorder %s450_s18, 0 }
   0x9   : > { %p809_p2 = scmp.eq.s32.totalorder %s450_s18, 1  ;;  %p128_p3 = scmp.eq.s32.totalorder %s451_s19, 1 }
   0xa   : > { %s1032_s20 = scalar_select %p805_p1, 1, 0 }
   0xb   : > { %p815_p4 = por %p805_p1, %p54_p0  ;;  %p452_p5 = scmp.ge.s32.totalorder %s740_s17, 1 }
   0xc   : > { %p820_p6 = por %p128_p3, %p54_p0  ;;  %p135_p7 = scmp.lt.s32.totalorder %s740_s17, 3 }
   0xd   : > { %s1034_s22 = scalar_select %p815_p4, 1, 0 }
   0xe   : > { %s1035_s23 = scalar_select %p820_p6, 1, 0 }
   0xf   : > { %p825_p8 = pnand %p452_p5, %p135_p7  ;;  %s742_s25 = smov [#allocation5]  }
  0x10   : > { %s147_s26 = sshll.u32 %s742_s25, 4  ;;  %s743_s28 = smov [#allocation7]   ;;  %s829_s26 = int_to_ptr.vmem [resolvable:$true] %s147_s26 }
  0x11   : > { %p491_p9 = pneg %p825_p8  ;;  %s160_s29 = sshll.u32 %s743_s28, 4  ;;  %s840_s29 = int_to_ptr.vmem [resolvable:$true] %s160_s29 }
  0x12   : > { %s568_s5 = scalar_lea.hbm %s1025_s1, 256 }
  0x13   : > { %p836_p11 = pnand %p491_p9, %p805_p1  ;;  %p569_p12 = scmp.ne.s32.totalorder %s1025_s1, %s568_s5 }
  0x14   : > { %p575_p5 = scmp.lt.u32.totalorder %s568_s5, %s1025_s1 }
  0x15   : > { %p570_p13 = pneg %p836_p11 }
  0x17   : > { %p571_p0 = pnand %p570_p13, %p569_p12 }
  0x19   : > { %p572_p3 = pneg %p571_p0 }
  0x1b   : > { %p577_p7 = pnand %p575_p5, %p572_p3 }
  0x1d   : > { %580 = shalt.err (!%p577_p7)
}
  0x1e   : > { %s581_s10 = scalar_lea.vmem %s829_s26, 256  ;;  %p589_p1 = scmp.lt.s32.totalorder %s829_s26, %s829_s26 }
  0x1f   : > { %p582_p9 = scmp.ne.s32.totalorder %s829_s26, %s581_s10  ;;  %p590_p12 = scmp.lt.s32.totalorder %s581_s10, %s581_s10 }
  0x21   : > { %p584_p10 = pnand %p582_p9, %p570_p13  ;;  %p591_p0 = por %p590_p12, %p589_p1 }
  0x23   : > { %p585_p6 = pneg %p584_p10 }
  0x25   : > { %p592_p4 = pnand %p591_p0, %p585_p6 }
  0x27   : > { %595 = shalt.err (!%p592_p4)
}
  0x28   : > { %s744_s11 = smov 128   ;;  %s745_s18 = smov 8  }
  0x29   : > { %494 = dma.hbm_to_vmem [thread:$0]  (!%p836_p11), %s1025_s1, 256, %s829_s26, [#allocation6], %s744_s11, %s744_s11, %s745_s18  }
  0x2a   : > { %s596_s4 = scalar_lea.hbm %s1026_s2, 256 }
  0x2b   : > { %p597_p1 = scmp.ne.s32.totalorder %s1026_s2, %s596_s4  ;;  %p603_p10 = scmp.lt.u32.totalorder %s596_s4, %s1026_s2 }
  0x2d   : > { %p599_p4 = pnand %p597_p1, %p570_p13 }
  0x2f   : > { %p600_p6 = pneg %p599_p4 }
  0x31   : > { %p605_p3 = pnand %p603_p10, %p600_p6 }
  0x33   : > { %608 = shalt.err (!%p605_p3)
}
  0x34   : > { %s609_s26 = scalar_lea.vmem %s840_s29, 256  ;;  %p617_p12 = scmp.lt.s32.totalorder %s840_s29, %s840_s29 }
  0x35   : > { %p610_p5 = scmp.ne.s32.totalorder %s840_s29, %s609_s26  ;;  %p618_p0 = scmp.lt.s32.totalorder %s609_s26, %s609_s26 }
  0x37   : > { %p612_p7 = pnand %p610_p5, %p570_p13  ;;  %p619_p1 = por %p618_p0, %p617_p12 }
  0x39   : > { %p613_p9 = pneg %p612_p7 }
  0x3b   : > { %p620_p4 = pnand %p619_p1, %p613_p9 }
  0x3d   : > { %623 = shalt.err (!%p620_p4)
}
  0x3e   : > { %497 = dma.hbm_to_vmem [thread:$0]  (!%p836_p11), %s1026_s2, 256, %s840_s29, [#allocation6], %s744_s11, %s744_s11, %s745_s18  }
  0x3f   : > { %s32_s19 = sadd.s32 1, %s736_s16  ;;  %s41_s25 = sadd.s32 1, %s728_s14 }
  0x40   : > { %p34_p13 = scmp.ge.s32.totalorder %s32_s19, 2  ;;  %p48_p6 = scmp.ne.s32.totalorder %s728_s14, %s724_s13 }
  0x41   : > { %p49_p10 = scmp.eq.s32.totalorder %s740_s17, 0  ;;  %p508_p3 = scmp.lt.s32.totalorder %s740_s17, 2 }
  0x42   : > { %s1051_s19 = smov (%p34_p13, %s32_s19), 0  ;;  %p904_p7 = por %p809_p2, %p48_p6 }
  0x43   : > { %p50_p5 = por %p49_p10, %p48_p6  ;;  %s36_s28 = ssub.s32 %s736_s16, %s1051_s19 }
  0x44   : > { %s1038_s27 = scalar_select %p904_p7, 1, 0 }
  0x45   : > { %s174_s30 = sand.u32 1, %s728_s14   ;;  %p39_p9 = scmp.eq.s32.totalorder %s36_s28, 0 }
  0x46   : > { %s456_s29 = sshll.u32 %s174_s30, 3  ;;  %s457_s11 = sshll.u32 %s736_s16, 7 }
  0x47   : > { %s913_s18 = scalar_select %p39_p9, %s728_s14, %s41_s25  }
  0x48   : > { %s918_s6 = scalar_lea.hbm %s1024_s0, %s457_s11  ;;  %s178_s21 = scalar_lea.vmem [#allocation2], %s456_s29 }
  0x49   : > { %s186_s7 = sshll.u32 %s178_s21, 4  ;;  %p922_p2 = pnand %p508_p3, %p50_p5  ;;  %s926_s7 = int_to_ptr.vmem [resolvable:$true] %s186_s7 }
  0x4a   : > { %s175_s26 = scalar_lea.sflag [#allocation3], %s174_s30  ;;  %s624_s9 = scalar_lea.hbm %s918_s6, 128 }
  0x4b   : > { %p625_p11 = scmp.ne.s32.totalorder %s918_s6, %s624_s9  ;;  %p626_p12 = pneg %p922_p2 }
  0x4c   : > { %s629_s28 = scalar_lea.hbm %s1024_s0, 256  ;;  %p630_p4 = scmp.lt.u32.totalorder %s918_s6, %s1024_s0 }
  0x4d   : > { %p627_p0 = pnand %p626_p12, %p625_p11  ;;  %p631_p13 = scmp.lt.u32.totalorder %s629_s28, %s624_s9 }
  0x4e   : > { %p633_p10 = scmp.lt.u32.totalorder %s624_s9, %s918_s6 }
  0x4f   : > { %p628_p1 = pneg %p627_p0  ;;  %p632_p6 = por %p631_p13, %p630_p4 }
  0x51   : > { %p634_p3 = por %p633_p10, %p632_p6 }
  0x53   : > { %p635_p5 = pnand %p634_p3, %p628_p1 }
  0x55   : > { %638 = shalt.err (!%p635_p5)
}
  0x56   : > { %s639_s30 = scalar_lea.vmem %s926_s7, 128  ;;  %s746_s4 = smov [#allocation2]  }
  0x57   : > { %p640_p9 = scmp.ne.s32.totalorder %s926_s7, %s639_s30  ;;  %s644_s5 = sshll.u32 %s746_s4, 4  ;;  %s645_s5 = int_to_ptr.vmem [resolvable:$false] %s644_s5 }
  0x58   : > { %s646_s21 = scalar_lea.vmem %s645_s5, 256  ;;  %p647_p7 = scmp.lt.s32.totalorder %s926_s7, %s645_s5 }
  0x59   : > { %p642_p11 = pnand %p640_p9, %p626_p12  ;;  %p648_p4 = scmp.lt.s32.totalorder %s646_s21, %s639_s30 }
  0x5b   : > { %p643_p0 = pneg %p642_p11  ;;  %p649_p13 = por %p648_p4, %p647_p7 }
  0x5d   : > { %p650_p6 = pnand %p649_p13, %p643_p0 }
  0x5f   : > { %653 = shalt.err (!%p650_p6)
}
  0x60   : > { %501 = dma.hbm_to_vmem [thread:$0]  (!%p922_p2), %s918_s6, 128, %s926_s7, %s175_s26  }
  0x61   : > { %195 = sbr.rel (%p825_p8) target bundleno = 341 (0x155), region = 32  ;;  %s956_s9 = sand.u32 (!%p825_p8), 1, %s724_s13  }
  0x62   : > { %s459_s10 = sshll.u32 (!%p825_p8), %s956_s9, 3  ;;  %s198_s25 = scalar_lea.sflag (!%p825_p8), [#allocation3], %s956_s9 }
  0x63   : > { %s201_s28 = scalar_lea.vmem (!%p825_p8), [#allocation2], %s459_s10  ;;  %p1040_p7 = scmp.ne.s32.totalorder (!%p825_p8), %s1034_s22, 0 }
  0x68   : > { %707 = dma.done.wait (%p1040_p7), %s198_s25, 128  }
  0x69   : > { %709 = vsyncadd (%p1040_p7), %s198_s25, 4294967168  ;;  %p1041_p12 = scmp.ne.s32.totalorder %s1032_s20, 0 }
  0x6b   : > { %711 = dma.done.wait (%p1041_p12), [#allocation6], 512  }
  0x6c   : > { %713 = vsyncadd (%p1041_p12), [#allocation6], 4294966784  ;;  %v747_v0 = vmov 0   ;;  %vm247_vm0 = vcmask 64512   ;;  %v234_v1 = vld [vmem:[%s201_s28] sm:$0xff]  ;;  %v232_v2 = vld [vmem:[#allocation5] sm:$0xff] }
  0x6d   : > { %567 = vset.pattern.permute.xlu0 %v747_v0  ;;  %v233_v3 = vld [vmem:[#allocation5 + $0x8] sm:$0xff]  ;;  %474 = vmatprep.subr.mxu0 %v234_v1  ;;  %v235_v4 = vld [vmem:[#allocation7] sm:$0xff]  ;;  %v236_v5 = vld [vmem:[#allocation7 + $0x8] sm:$0xff]  ;;  %s462_s22 = sshll.u32 %s956_s9, 4  ;;  %s470_s6 = sshll.u32 %s732_s15, 8  ;;  %vm329_vm1 = vcmask 785408  }
  0x6e   : > { %476 = vmatprep.mubr.msk.f32.mxu0 %vm247_vm0, %v232_v2  ;;  %475 = vmatpush3.msra.mxu0 %v234_v1  ;;  %s231_s20 = scalar_lea.vmem [#allocation8], %s462_s22  ;;  %s975_s26 = scalar_lea.hbm %s1027_s3, %s470_s6 }
  0x6f   : > { %239 = vperm.xlu0 %567, %v235_v4   ;;  %477 = vmatmul.mubr.msk.f32.vlgmr.msra.gmra.mrb[0].mxu0 %vm247_vm0, %v233_v3  ;;  %s347_s24 = sshll.u32 %s231_s20, 4  ;;  %s333_s29 = scalar_lea.sflag [#allocation4], %s956_s9  ;;  %s970_s24 = int_to_ptr.vmem [resolvable:$true] %s347_s24 }
  0x70   : > { %s654_s15 = scalar_lea.vmem %s970_s24, 256  ;;  %p1042_p2 = scmp.ne.s32.totalorder %s1038_s27, 0 }
  0x71   : > { %p655_p8 = scmp.ne.s32.totalorder %s970_s24, %s654_s15  ;;  %s748_s11 = smov [#allocation8]  }
  0x72   : > { %s658_s30 = sshll.u32 %s748_s11, 4  ;;  %s659_s30 = int_to_ptr.vmem [resolvable:$false] %s658_s30 }
  0x73   : > { %244 = vperm.xlu0 %567, %v236_v5   ;;  %p656_p1 = pnand %p655_p8, %p1042_p2  ;;  %s660_s4 = scalar_lea.vmem %s659_s30, 512 }
  0x74   : > { %p661_p3 = scmp.lt.s32.totalorder %s970_s24, %s659_s30  ;;  %p662_p5 = scmp.lt.s32.totalorder %s660_s4, %s654_s15 }
  0x75   : > { %p657_p10 = pneg %p656_p1 }
  0x76   : > { %p663_p9 = por %p662_p5, %p661_p3 }
  0x78   : > { %p664_p11 = pnand %p663_p9, %p657_p10 }
  0xee   : > { %v240_v6 = vpop.permute.xlu0 %239 }
  0xf2   : > { %v245_v7 = vpop.permute.xlu0 %244 }
 0x142   : > { %v478_v8 = vpop.f32.mrb[0].mxu0 }
 0x143   : > { %v326_v9 = vadd.f32 %v478_v8, %v245_v7  ;;  %v320_v10 = vpop.f32.mrb[1].mxu0 }
 0x144   : > { %v321_v11 = vadd.f32 %v320_v10, %v240_v6 }
 0x145   : > { %331 = vst.msk [vmem:[%s231_s20 + $0x8] sm:$0xff] %vm329_vm1, %v326_v9 }
 0x146   : > { %330 = vst.msk [vmem:[%s231_s20] sm:$0xff] %vm329_vm1, %v321_v11 }
 0x147   : > { %667 = shalt.err (!%p664_p11)
}
 0x148   : > { %s668_s5 = scalar_lea.hbm %s975_s26, 256  ;;  %s672_s25 = scalar_lea.hbm %s1027_s3, 512 }
 0x149   : > { %p669_p0 = scmp.ne.s32.totalorder %s975_s26, %s668_s5  ;;  %p673_p6 = scmp.lt.u32.totalorder %s975_s26, %s1027_s3 }
 0x14a   : > { %p674_p7 = scmp.lt.u32.totalorder %s672_s25, %s668_s5  ;;  %p676_p8 = scmp.lt.u32.totalorder %s668_s5, %s975_s26 }
 0x14b   : > { %p670_p4 = pnand %p669_p0, %p1042_p2 }
 0x14c   : > { %p675_p12 = por %p674_p7, %p673_p6 }
 0x14d   : > { %p671_p13 = pneg %p670_p4 }
 0x14e   : > { %p677_p1 = por %p676_p8, %p675_p12 }
 0x150   : > { %p678_p10 = pnand %p677_p1, %p671_p13 }
 0x152   : > { %681 = shalt.err (!%p678_p10)
}
 0x153   : > { %s749_s20 = smov 128   ;;  %s750_s6 = smov 8  }
 0x154   : > { %489 = dma.vmem_to_hbm [thread:$0]  (%p1042_p2), %s970_s24, 256, %s975_s26, %s333_s29, %s749_s20, %s749_s20, %s750_s6  }
 0x155 PF: > { %s362_s7 = sand.u32 1, %s720_s12   ;;  %p1043_p3 = scmp.ne.s32.totalorder %s1035_s23, 0 }
 0x156   : > { %p1044_p5 = scmp.ge.s32.totalorder %s740_s17, 2  ;;  %s363_s8 = scalar_lea.sflag [#allocation4], %s362_s7 }
 0x158   : > { %p503_p9 = pnand %p1044_p5, %p1043_p3 }
 0x15a   : > { %715 = dma.done.wait (!%p503_p9), %s363_s8, 256  }
 0x15b   : > { %717 = vsyncadd (!%p503_p9), %s363_s8, 4294967040  ;;  %s20_s17 = sadd.s32 1, %s740_s17   ;;  %s1045_s12 = smov %s724_s13 }
 0x15c   : > { %p17_p11 = scmp.ge.s32.totalorder %s20_s17, 4   ;;  %s1046_s13 = smov %s728_s14 }
 0x15d   : > { %s1047_s14 = smov %s913_s18  ;;  %s1048_s15 = smov %s736_s16 }
 0x15e   : > { %s1049_s16 = smov %s1051_s19  ;;  %19 = sbr.rel (!%p17_p11) target bundleno = 7 (0x7), region = 85 }
 0x165   :  { %368 = vsyncpa [#allocation3], 1 }
 0x166   :  { %370 = vsyncpa [#allocation3 + $0x1], 1 }
 0x167   :  { %371 = vsyncpa [#allocation6], 1 }
 0x168   :  { %372 = vsyncpa [#allocation4], 1 }
 0x169   :  { %374 = vsyncpa [#allocation4 + $0x1], 1 }

// kernel: st_block_2_forward.14
= control target key start
LH: loop header
LB: loop body
LE: loop exit
PB: predicated region body
PF: predicated region fallthrough
CT: control target
= control target key end

     0   :  { %9 = vsyncpa [#allocation5], 0  ;;  %s2512_s0 = inlined_call_operand.vmem [shape: f32[16,16,8], index: 0, kind: input, shape index: {}]   ;;  %s2513_s1 = inlined_call_operand.vmem [shape: f32[8,32], index: 1, kind: input, shape index: {}]   ;;  %s2514_s2 = inlined_call_operand.vmem [shape: f32[8,32], index: 2, kind: input, shape index: {}]   ;;  %s2515_s3 = inlined_call_operand.vmem [shape: f32[1,32], index: 3, kind: input, shape index: {}]   ;;  %s2516_s4 = inlined_call_operand.hbm [shape: f32[16,8], index: 4, kind: output, shape index: {}]  }
   0x1   :  { %11 = vsyncpa [#allocation5 + $0x1], 0  ;;  %s2242_s15 = smov 0   ;;  %s2244_s16 = smov 0  }
   0x2   :  { %s2246_s17 = smov 0   ;;  %s2248_s18 = smov 0  }
   0x3 LB: > { %s1857_s19 = sadd.s32 4294967295, %s2193_s18   ;;  %s1858_s20 = sadd.s32 4294967294, %s2193_s18   ;;  %s2193_s18 = sphi %s2248_s18, %s2522_s18   ;;  %s2189_s17 = sphi %s2246_s17, %s2521_s17   ;;  %s2185_s16 = sphi %s2244_s16, %s2520_s16   ;;  %s2181_s15 = sphi %s2242_s15, %s2519_s15  }
   0x4   : > { %s2265_s21 = sadd.s32 1, %s2193_s18   ;;  %s24_s22 = sadd.s32 1, %s2189_s17 }
   0x5   : > { %s21_s23 = ssub.s32 %s2193_s18, %s2265_s21  ;;  %p31_p0 = scmp.ne.s32.totalorder %s2189_s17, %s2185_s16 }
   0x6   : > { %p22_p1 = scmp.eq.s32.totalorder %s21_s23, 0  ;;  %p32_p2 = scmp.eq.s32.totalorder %s2193_s18, 0 }
   0x7   : > { %p124_p3 = scmp.eq.s32.totalorder %s1857_s19, 1  ;;  %p129_p4 = scmp.ne.s32.totalorder %s2185_s16, %s2181_s15 }
   0x8   : > { %s2278_s24 = scalar_select %p22_p1, %s2189_s17, %s24_s22  }
   0x9   : > { %p33_p5 = por %p32_p2, %p31_p0  ;;  %p2280_p6 = por %p124_p3, %p31_p0 }
   0xa   : > { %p130_p7 = scmp.eq.s32.totalorder %s1858_s20, 1  ;;  %p1860_p9 = scmp.ge.s32.totalorder %s2193_s18, 2 }
   0xc   : > { %p2284_p8 = por %p130_p7, %p129_p4  ;;  %155 = sbr.rel (%p1860_p9) target bundleno = 31 (0x1f), region = 28 }
  0x13   : > { %158 = sbr.rel (!%p33_p5) target bundleno = 31 (0x1f), region = 32  ;;  %s160_s27 = sand.u32 (%p33_p5), 1, %s2189_s17  }
  0x14   : > { %s1862_s28 = sshll.u32 (%p33_p5), %s2193_s18, 3  ;;  %s1861_s29 = sshll.u32 (%p33_p5), %s160_s27, 7 }
  0x15   : > { %s2296_s6 = scalar_lea.vmem (%p33_p5), %s2512_s0, %s1862_s28  ;;  %s162_s7 = scalar_lea.vmem (%p33_p5), [#allocation3], %s1861_s29 }
  0x16   : > { %v222_v0 = vld [vmem:[%s2296_s6] sm:$0xff] (%p33_p5)  ;;  %v224_v1 = vld [vmem:[%s2296_s6 + $0x10] sm:$0xff] (%p33_p5) }
  0x17   : > { %v226_v2 = vld [vmem:[%s2296_s6 + $0x20] sm:$0xff] (%p33_p5)  ;;  %223 = vst [vmem:[%s162_s7] sm:$0xff] (%p33_p5), %v222_v0  ;;  %225 = vst [vmem:[%s162_s7 + $0x8] sm:$0xff] (%p33_p5), %v224_v1  ;;  %v228_v3 = vld [vmem:[%s2296_s6 + $0x30] sm:$0xff] (%p33_p5) }
  0x18   : > { %227 = vst [vmem:[%s162_s7 + $0x10] sm:$0xff] (%p33_p5), %v226_v2  ;;  %v230_v4 = vld [vmem:[%s2296_s6 + $0x40] sm:$0xff] (%p33_p5)  ;;  %v232_v5 = vld [vmem:[%s2296_s6 + $0x50] sm:$0xff] (%p33_p5)  ;;  %229 = vst [vmem:[%s162_s7 + $0x18] sm:$0xff] (%p33_p5), %v228_v3 }
  0x19   : > { %231 = vst [vmem:[%s162_s7 + $0x20] sm:$0xff] (%p33_p5), %v230_v4  ;;  %233 = vst [vmem:[%s162_s7 + $0x28] sm:$0xff] (%p33_p5), %v232_v5  ;;  %v234_v6 = vld [vmem:[%s2296_s6 + $0x60] sm:$0xff] (%p33_p5)  ;;  %v236_v7 = vld [vmem:[%s2296_s6 + $0x70] sm:$0xff] (%p33_p5) }
  0x1a   : > { %v238_v8 = vld [vmem:[%s2296_s6 + $0x80] sm:$0xff]  ;;  %235 = vst [vmem:[%s162_s7 + $0x30] sm:$0xff] %v234_v6  ;;  %237 = vst [vmem:[%s162_s7 + $0x38] sm:$0xff] %v236_v7  ;;  %v240_v9 = vld [vmem:[%s2296_s6 + $0x90] sm:$0xff] }
  0x1b   : > { %239 = vst [vmem:[%s162_s7 + $0x40] sm:$0xff] %v238_v8  ;;  %v242_v10 = vld [vmem:[%s2296_s6 + $0xa0] sm:$0xff]  ;;  %v244_v11 = vld [vmem:[%s2296_s6 + $0xb0] sm:$0xff]  ;;  %241 = vst [vmem:[%s162_s7 + $0x48] sm:$0xff] %v240_v9 }
  0x1c   : > { %243 = vst [vmem:[%s162_s7 + $0x50] sm:$0xff] %v242_v10  ;;  %245 = vst [vmem:[%s162_s7 + $0x58] sm:$0xff] %v244_v11  ;;  %v246_v12 = vld [vmem:[%s2296_s6 + $0xc0] sm:$0xff]  ;;  %v248_v13 = vld [vmem:[%s2296_s6 + $0xd0] sm:$0xff] }
  0x1d   : > { %v250_v14 = vld [vmem:[%s2296_s6 + $0xe0] sm:$0xff]  ;;  %247 = vst [vmem:[%s162_s7 + $0x60] sm:$0xff] %v246_v12  ;;  %249 = vst [vmem:[%s162_s7 + $0x68] sm:$0xff] %v248_v13  ;;  %v252_v15 = vld [vmem:[%s2296_s6 + $0xf0] sm:$0xff] }
  0x1e   : > { %251 = vst [vmem:[%s162_s7 + $0x70] sm:$0xff] %v250_v14  ;;  %253 = vst [vmem:[%s162_s7 + $0x78] sm:$0xff] %v252_v15 }
  0x1f PF: > { %p1863_p10 = scmp.ge.s32.totalorder %s2193_s18, 1  ;;  %p258_p11 = scmp.lt.s32.totalorder %s2193_s18, 3 }
  0x21   : > { %p259_p12 = pnand %p1863_p10, %p258_p11 }
  0x22   : > { %v2319_v16 = vld [vmem:[%s2513_s1] sm:$0xff] (!%p259_p12)  ;;  %s2322_s10 = sand.u32 (!%p259_p12), 1, %s2185_s16   ;;  %v2207_v17 = vmov (!%p259_p12), 0.0   ;;  %vm299_vm0 = vcmask (!%p259_p12), 64512   ;;  %vm2208_vm1 = vmmov (!%p259_p12), 0   ;;  %vm373_vm2 = vcmask (!%p259_p12), 261120  }
  0x23   : > { %262 = sbr.rel (%p259_p12) target bundleno = 1115 (0x45b), region = 70  ;;  %1954 = vmatprep.subr.mxu0 (!%p259_p12), %v2207_v17  ;;  %1959 = vmatprep.subr.mxu1 (!%p259_p12), %v2207_v17  ;;  %s1864_s11 = sshll.u32 (!%p259_p12), %s2322_s10, 7  ;;  %v1866_v34 = vld [vmem:[%s2515_s3] ss:$0 sm:$0xff] (!%p259_p12) }
  0x24   : > { %s1865_s12 = sshll.u32 (!%p259_p12), %s2322_s10, 3  ;;  %1955 = vmatpush3.msra.mxu0 (!%p259_p12), %v2319_v16  ;;  %1960 = vmatpush3.msra.mxu1 (!%p259_p12), %v2319_v16  ;;  %s2334_s13 = scalar_lea.vmem (!%p259_p12), [#allocation3], %s1864_s11 }
  0x25   : > { %1956 = vmatprep.mubr.msk.f32.mxu0 (!%p259_p12), %vm2208_vm1, %v2207_v17  ;;  %1961 = vmatprep.mubr.msk.f32.mxu1 (!%p259_p12), %vm2208_vm1, %v2207_v17  ;;  %v290_v18 = vld [vmem:[%s2334_s13] sm:$0xff] (!%p259_p12)  ;;  %v1868_v19 = vld [vmem:[%s2334_s13 + $0x8] sm:$0xff] (!%p259_p12)  ;;  %v1871_v20 = vld [vmem:[%s2334_s13 + $0x10] sm:$0xff] (!%p259_p12)  ;;  %s2445_s22 = scalar_lea.vmem (!%p259_p12), [#allocation4], %s1865_s12  ;;  %s2447_s23 = smov (!%p259_p12), 0  }
  0x26   : > { %1964 = vmatprep.subr.mxu0 (!%p259_p12), %v2207_v17  ;;  %1969 = vmatprep.subr.mxu1 (!%p259_p12), %v2207_v17  ;;  %v1874_v21 = vld [vmem:[%s2334_s13 + $0x18] sm:$0xff] (!%p259_p12)  ;;  %v1877_v22 = vld [vmem:[%s2334_s13 + $0x20] sm:$0xff] (!%p259_p12)  ;;  %v1880_v23 = vld [vmem:[%s2334_s13 + $0x28] sm:$0xff] (!%p259_p12) }
  0x27   : > { %1957 = vmatmul.mubr.msk.f32.vlgmr.msra.gmra.mrb[0].mxu0 (!%p259_p12), %vm299_vm0, %v290_v18  ;;  %1962 = vmatmul.mubr.msk.f32.vlgmr.msra.gmra.mrb[0].mxu1 (!%p259_p12), %vm299_vm0, %v1868_v19  ;;  %v1883_v24 = vld [vmem:[%s2334_s13 + $0x30] sm:$0xff] (!%p259_p12)  ;;  %v1886_v25 = vld [vmem:[%s2334_s13 + $0x38] sm:$0xff] (!%p259_p12)  ;;  %v1889_v26 = vld [vmem:[%s2334_s13 + $0x40] sm:$0xff] (!%p259_p12)  ;;  %v2195_v19 = vmov (!%p259_p12), 0.0  }
  0x28   : > { %1965 = vmatpush3.msra.mxu0 (!%p259_p12), %v2319_v16  ;;  %1970 = vmatpush3.msra.mxu1 (!%p259_p12), %v2319_v16  ;;  %v1892_v27 = vld [vmem:[%s2334_s13 + $0x48] sm:$0xff] (!%p259_p12)  ;;  %v1895_v28 = vld [vmem:[%s2334_s13 + $0x50] sm:$0xff] (!%p259_p12)  ;;  %v1898_v29 = vld [vmem:[%s2334_s13 + $0x58] sm:$0xff] (!%p259_p12) }
  0x29   : > { %1966 = vmatprep.mubr.msk.f32.mxu0 (!%p259_p12), %vm2208_vm1, %v2207_v17  ;;  %1971 = vmatprep.mubr.msk.f32.mxu1 (!%p259_p12), %vm2208_vm1, %v2207_v17  ;;  %v1901_v30 = vld [vmem:[%s2334_s13 + $0x60] sm:$0xff] (!%p259_p12)  ;;  %v1904_v31 = vld [vmem:[%s2334_s13 + $0x68] sm:$0xff] (!%p259_p12)  ;;  %v1907_v32 = vld [vmem:[%s2334_s13 + $0x70] sm:$0xff] (!%p259_p12) }
  0x2a   : > { %1974 = vmatprep.subr.mxu0 %v2207_v17  ;;  %1979 = vmatprep.subr.mxu1 %v2207_v17  ;;  %v1910_v33 = vld [vmem:[%s2334_s13 + $0x78] sm:$0xff] }
  0x2b   : > { %1967 = vmatmul.mubr.msk.f32.vlgmr.msra.gmra.mrb[2].mxu0 %vm299_vm0, %v1871_v20  ;;  %1972 = vmatmul.mubr.msk.f32.vlgmr.msra.gmra.mrb[2].mxu1 %vm299_vm0, %v1874_v21  ;;  %v2199_v20 = vmov 0.0  }
  0x2c   : > { %1975 = vmatpush3.msra.mxu0 %v2319_v16  ;;  %1980 = vmatpush3.msra.mxu1 %v2319_v16 }
  0x2d   : > { %1976 = vmatprep.mubr.msk.f32.mxu0 %vm2208_vm1, %v2207_v17  ;;  %1981 = vmatprep.mubr.msk.f32.mxu1 %vm2208_vm1, %v2207_v17 }
  0x2e   : > { %1984 = vmatprep.subr.mxu0 %v2207_v17  ;;  %1989 = vmatprep.subr.mxu1 %v2207_v17 }
  0x2f   : > { %1977 = vmatmul.mubr.msk.f32.vlgmr.msra.gmra.mrb[4].mxu0 %vm299_vm0, %v1877_v22  ;;  %1982 = vmatmul.mubr.msk.f32.vlgmr.msra.gmra.mrb[4].mxu1 %vm299_vm0, %v1880_v23 }
  0x30   : > { %1985 = vmatpush3.msra.mxu0 %v2319_v16  ;;  %1990 = vmatpush3.msra.mxu1 %v2319_v16 }
  0x31   : > { %1986 = vmatprep.mubr.msk.f32.mxu0 %vm2208_vm1, %v2207_v17  ;;  %1991 = vmatprep.mubr.msk.f32.mxu1 %vm2208_vm1, %v2207_v17 }
  0x32   : > { %1994 = vmatprep.subr.mxu0 %v2207_v17  ;;  %1999 = vmatprep.subr.mxu1 %v2207_v17 }
  0x33   : > { %1987 = vmatmul.mubr.msk.f32.vlgmr.msra.gmra.mrb[6].mxu0 %vm299_vm0, %v1883_v24  ;;  %1992 = vmatmul.mubr.msk.f32.vlgmr.msra.gmra.mrb[6].mxu1 %vm299_vm0, %v1886_v25 }
  0x34   : > { %1995 = vmatpush3.msra.mxu0 %v2319_v16  ;;  %2000 = vmatpush3.msra.mxu1 %v2319_v16 }
  0x35   : > { %1996 = vmatprep.mubr.msk.f32.mxu0 %vm2208_vm1, %v2207_v17  ;;  %2001 = vmatprep.mubr.msk.f32.mxu1 %vm2208_vm1, %v2207_v17 }
  0x36   : > { %2004 = vmatprep.subr.mxu0 %v2207_v17  ;;  %2009 = vmatprep.subr.mxu1 %v2207_v17 }
  0x37   : > { %1997 = vmatmul.mubr.msk.f32.vlgmr.msra.gmra.mrb[8].mxu0 %vm299_vm0, %v1889_v26  ;;  %2002 = vmatmul.mubr.msk.f32.vlgmr.msra.gmra.mrb[8].mxu1 %vm299_vm0, %v1892_v27 }
  0x38   : > { %2005 = vmatpush3.msra.mxu0 %v2319_v16  ;;  %2010 = vmatpush3.msra.mxu1 %v2319_v16 }
  0x39   : > { %2006 = vmatprep.mubr.msk.f32.mxu0 %vm2208_vm1, %v2207_v17  ;;  %2011 = vmatprep.mubr.msk.f32.mxu1 %vm2208_vm1, %v2207_v17 }
  0x3a   : > { %2014 = vmatprep.subr.mxu0 %v2207_v17  ;;  %2019 = vmatprep.subr.mxu1 %v2207_v17 }
  0x3b   : > { %2007 = vmatmul.mubr.msk.f32.vlgmr.msra.gmra.mrb[10].mxu0 %vm299_vm0, %v1895_v28  ;;  %2012 = vmatmul.mubr.msk.f32.vlgmr.msra.gmra.mrb[10].mxu1 %vm299_vm0, %v1898_v29 }
  0x3c   : > { %2015 = vmatpush3.msra.mxu0 %v2319_v16  ;;  %2020 = vmatpush3.msra.mxu1 %v2319_v16 }
  0x3d   : > { %2016 = vmatprep.mubr.msk.f32.mxu0 %vm2208_vm1, %v2207_v17  ;;  %2021 = vmatprep.mubr.msk.f32.mxu1 %vm2208_vm1, %v2207_v17 }
  0x3e   : > { %2024 = vmatprep.subr.mxu0 %v2207_v17  ;;  %2029 = vmatprep.subr.mxu1 %v2207_v17 }
  0x3f   : > { %2017 = vmatmul.mubr.msk.f32.vlgmr.msra.gmra.mrb[12].mxu0 %vm299_vm0, %v1901_v30  ;;  %2022 = vmatmul.mubr.msk.f32.vlgmr.msra.gmra.mrb[12].mxu1 %vm299_vm0, %v1904_v31 }
  0x40   : > { %2025 = vmatpush3.msra.mxu0 %v2319_v16  ;;  %2030 = vmatpush3.msra.mxu1 %v2319_v16 }
  0x41   : > { %2026 = vmatprep.mubr.msk.f32.mxu0 %vm2208_vm1, %v2207_v17  ;;  %2031 = vmatprep.mubr.msk.f32.mxu1 %vm2208_vm1, %v2207_v17 }
  0x43   : > { %2027 = vmatmul.mubr.msk.f32.vlgmr.msra.gmra.mrb[14].mxu0 %vm299_vm0, %v1907_v32  ;;  %2032 = vmatmul.mubr.msk.f32.vlgmr.msra.gmra.mrb[14].mxu1 %vm299_vm0, %v1910_v33 }
  0xfa   : > { %v369_v35 = vpop.f32.mrb[0].mxu0  ;;  %v454_v36 = vpop.f32.mrb[0].mxu1 }
  0xfb   : > { %v370_v37 = vadd.f32 %v1866_v34, %v369_v35  ;;  %v455_v38 = vadd.f32 %v1866_v34, %v454_v36  ;;  %v1958_v39 = vpop.f32.mrb[1].mxu0  ;;  %v1963_v40 = vpop.f32.mrb[1].mxu1 }
  0xfd   : > { %374 = vst.msk [vmem:[#allocation2] sm:$0xff] %vm373_vm2, %v370_v37  ;;  %459 = vst.msk [vmem:[#allocation2 + $0x8] sm:$0xff] %vm373_vm2, %v455_v38 }
  0xfe   : > { %v539_v41 = vpop.f32.mrb[2].mxu0  ;;  %v624_v42 = vpop.f32.mrb[2].mxu1 }
  0xff   : > { %v540_v43 = vadd.f32 %v1866_v34, %v539_v41  ;;  %v625_v44 = vadd.f32 %v1866_v34, %v624_v42  ;;  %v1968_v45 = vpop.f32.mrb[3].mxu0  ;;  %v1973_v46 = vpop.f32.mrb[3].mxu1 }
 0x101   : > { %544 = vst.msk [vmem:[#allocation2 + $0x10] sm:$0xff] %vm373_vm2, %v540_v43  ;;  %629 = vst.msk [vmem:[#allocation2 + $0x18] sm:$0xff] %vm373_vm2, %v625_v44 }
 0x102   : > { %v709_v47 = vpop.f32.mrb[4].mxu0  ;;  %v794_v48 = vpop.f32.mrb[4].mxu1 }
 0x103   : > { %v710_v49 = vadd.f32 %v1866_v34, %v709_v47  ;;  %v795_v50 = vadd.f32 %v1866_v34, %v794_v48  ;;  %v1978_v51 = vpop.f32.mrb[5].mxu0  ;;  %v1983_v52 = vpop.f32.mrb[5].mxu1 }
 0x105   : > { %714 = vst.msk [vmem:[#allocation2 + $0x20] sm:$0xff] %vm373_vm2, %v710_v49  ;;  %799 = vst.msk [vmem:[#allocation2 + $0x28] sm:$0xff] %vm373_vm2, %v795_v50 }
 0x106   : > { %v879_v53 = vpop.f32.mrb[6].mxu0  ;;  %v964_v54 = vpop.f32.mrb[6].mxu1 }
 0x107   : > { %v880_v55 = vadd.f32 %v1866_v34, %v879_v53  ;;  %v965_v56 = vadd.f32 %v1866_v34, %v964_v54  ;;  %v1988_v57 = vpop.f32.mrb[7].mxu0  ;;  %v1993_v58 = vpop.f32.mrb[7].mxu1 }
 0x109   : > { %884 = vst.msk [vmem:[#allocation2 + $0x30] sm:$0xff] %vm373_vm2, %v880_v55  ;;  %969 = vst.msk [vmem:[#allocation2 + $0x38] sm:$0xff] %vm373_vm2, %v965_v56 }
 0x10a   : > { %v1049_v59 = vpop.f32.mrb[8].mxu0  ;;  %v1134_v60 = vpop.f32.mrb[8].mxu1 }
 0x10b   : > { %v1050_v61 = vadd.f32 %v1866_v34, %v1049_v59  ;;  %v1135_v62 = vadd.f32 %v1866_v34, %v1134_v60  ;;  %v1998_v63 = vpop.f32.mrb[9].mxu0  ;;  %v2003_v0 = vpop.f32.mrb[9].mxu1 }
 0x10d   : > { %1054 = vst.msk [vmem:[#allocation2 + $0x40] sm:$0xff] %vm373_vm2, %v1050_v61  ;;  %1139 = vst.msk [vmem:[#allocation2 + $0x48] sm:$0xff] %vm373_vm2, %v1135_v62 }
 0x10e   : > { %v1219_v1 = vpop.f32.mrb[10].mxu0  ;;  %v1304_v2 = vpop.f32.mrb[10].mxu1 }
 0x10f   : > { %v1220_v3 = vadd.f32 %v1866_v34, %v1219_v1  ;;  %v1305_v4 = vadd.f32 %v1866_v34, %v1304_v2  ;;  %v2008_v5 = vpop.f32.mrb[11].mxu0  ;;  %v2013_v6 = vpop.f32.mrb[11].mxu1 }
 0x111   : > { %1224 = vst.msk [vmem:[#allocation2 + $0x50] sm:$0xff] %vm373_vm2, %v1220_v3  ;;  %1309 = vst.msk [vmem:[#allocation2 + $0x58] sm:$0xff] %vm373_vm2, %v1305_v4 }
 0x112   : > { %v1389_v7 = vpop.f32.mrb[12].mxu0  ;;  %v1474_v8 = vpop.f32.mrb[12].mxu1 }
 0x113   : > { %v1390_v9 = vadd.f32 %v1866_v34, %v1389_v7  ;;  %v1475_v10 = vadd.f32 %v1866_v34, %v1474_v8  ;;  %v2018_v11 = vpop.f32.mrb[13].mxu0  ;;  %v2023_v12 = vpop.f32.mrb[13].mxu1 }
 0x115   : > { %1394 = vst.msk [vmem:[#allocation2 + $0x60] sm:$0xff] %vm373_vm2, %v1390_v9  ;;  %1479 = vst.msk [vmem:[#allocation2 + $0x68] sm:$0xff] %vm373_vm2, %v1475_v10 }
 0x116   : > { %v1559_v13 = vpop.f32.mrb[14].mxu0  ;;  %v1644_v14 = vpop.f32.mrb[14].mxu1 }
 0x117   : > { %v1560_v15 = vadd.f32 %v1866_v34, %v1559_v13  ;;  %v1645_v16 = vadd.f32 %v1866_v34, %v1644_v14  ;;  %v2028_v17 = vpop.f32.mrb[15].mxu0  ;;  %v2033_v18 = vpop.f32.mrb[15].mxu1 }
 0x119   : > { %1564 = vst.msk [vmem:[#allocation2 + $0x70] sm:$0xff] %vm373_vm2, %v1560_v15  ;;  %1649 = vst.msk [vmem:[#allocation2 + $0x78] sm:$0xff] %vm373_vm2, %v1645_v16 }
 0x11a LB: >> { %v1658_v21 = vld [vmem:[%s2514_s2] sm:$0xff]  ;;  %v2209_v22 = vmov 0.0   ;;  %vm2210_vm3 = vmmov 0   ;;  %s2211_s29 = smov 104   ;;  %s1913_s30 = sshll.u32 %s2205_s23, 3  ;;  %s2205_s23 = sphi %s2447_s23, %s1655_s23   ;;  %v2201_v20 = vphi %v2199_v20, %v2200_v20   ;;  %v2197_v19 = vphi %v2195_v19, %v1754_v19  }
 0x11b   : >> { %2034 = vmatprep.subr.mxu0 %v2209_v22  ;;  %2036 = vmatprep.mubr.msk.f32.mxu0 %vm2210_vm3, %v2209_v22  ;;  %s1660_s5 = scalar_lea.vmem [#allocation2], %s1913_s30  ;;  %s2212_s6 = smov 112  }
 0x11c   : >> { %1663 = vrot.lane.b32.xlu0 %v2201_v20, %s2211_s29  ;;  %2035 = vmatpush3.msra.mxu0 %v1658_v21  ;;  %s2213_s7 = smov 8   ;;  %s2214_s8 = smov 16  }
 0x11d   : >> { %s1655_s23 = sadd.s32 1, %s2205_s23  }
 0x11e   : >> { %p1652_p13 = scmp.ge.s32.totalorder %s1655_s23, 16  }
 0x11f   : > { %s2215_s9 = smov (%p1652_p13), 104   ;;  %s1917_s11 = sshll.u32 (%p1652_p13), %s1857_s19, 7 }
 0x120   : >> { %v1661_v24 = vld [vmem:[%s1660_s5] sm:$0xff]  ;;  %s1780_s12 = sshll.u32 (%p1652_p13), %s2445_s22, 4  ;;  %s2466_s20 = scalar_lea.hbm (%p1652_p13), %s2516_s4, %s1917_s11  ;;  %s2468_s12 = int_to_ptr.vmem [resolvable:$true] %s1780_s12 }
 0x121   : > { %s1767_s23 = scalar_lea.sflag (%p1652_p13), [#allocation5], %s2322_s10  ;;  %s2119_s27 = scalar_lea.vmem (%p1652_p13), %s2468_s12, 128 }
 0x122   : > { %p2120_p0 = scmp.ne.s32.totalorder (%p1652_p13), %s2468_s12, %s2119_s27  ;;  %s2216_s19 = smov (%p1652_p13), [#allocation4]  }
 0x123   : > { %s2123_s28 = sshll.u32 (%p1652_p13), %s2216_s19, 4  ;;  %s2124_s28 = int_to_ptr.vmem [resolvable:$false] %s2123_s28 }
 0x124   : > { %p2121_p1 = pnand (%p1652_p13), %p2120_p0, %p2280_p6  ;;  %s2125_s29 = scalar_lea.vmem (%p1652_p13), %s2124_s28, 256 }
 0x125   : > { %p2126_p3 = scmp.lt.s32.totalorder (%p1652_p13), %s2468_s12, %s2124_s28  ;;  %p2127_p4 = scmp.lt.s32.totalorder (%p1652_p13), %s2125_s29, %s2119_s27 }
 0x126   : > { %p2122_p2 = pneg (%p1652_p13), %p2121_p1 }
 0x127   : > { %p2128_p5 = por (%p1652_p13), %p2127_p4, %p2126_p3 }
 0x129   : > { %p2129_p7 = pnand (%p1652_p13), %p2128_p5, %p2122_p2 }
 0x18e   : >> { %v1664_v23 = vpop.permute.xlu0 %1663 }
 0x18f   : >> { %2037 = vmatmul.mubr.msk.f32.vlgmr.msra.gmra.mrb[0].mxu0 %vm299_vm0, %v1664_v23 }
 0x262   : >> { %v1733_v25 = vpop.f32.mrb[0].mxu0 }
 0x263   : >> { %v1734_v26 = vadd.f32 %v1733_v25, %v1661_v24  ;;  %v2038_v27 = vpop.f32.mrb[1].mxu0 }
 0x265   : >> { %2111 = vtanh.f32 %v1734_v26  ;;  %v1915_v29 = vmul.f32 -1.442695, %v1734_v26 }
 0x267   : >> { %2113 = vpow2.f32 %v1915_v29 }
 0x26f   : >> { %v2112_v28 = vpop.eup %2111 }
 0x270   : >> { %1746 = vrot.lane.b32.xlu0 %v2112_v28, %s2212_s6 }
 0x271   : >> { %v2114_v30 = vpop.eup %2113 }
 0x272   : >> { %v1740_v31 = vadd.f32 1.0, %v2114_v30 }
 0x274   : >> { %2115 = vrcp.f32 %v1740_v31 }
 0x27e   : >> { %v2116_v32 = vpop.eup %2115 }
 0x27f   : >> { %v1744_v35 = vmul.f32 %v2197_v19, %v2116_v32 }
 0x2e2   : >> { %v1747_v33 = vpop.permute.xlu0 %1746 }
 0x2e3   : >> { %v1749_v34 = vmul.f32 %v2116_v32, %v1747_v33 }
 0x2e5   : >> { %1751 = vrot.lane.b32.xlu1 %v1749_v34, %s2213_s7 }
 0x357   : >> { %v1752_v36 = vpop.permute.xlu1 %1751 }
 0x358   : >> { %v1754_v19 = vadd.f32 %v1752_v36, %v1744_v35  }
 0x35a   : >> { %2117 = vtanh.f32 %v1754_v19 }
 0x364   : >> { %v2118_v37 = vpop.eup %2117 }
 0x365   : >> { %1757 = vrot.lane.b32.xlu1 %v2118_v37, %s2214_s8 }
 0x3d4   : > { %1654 = sbr.rel (!%p1652_p13) target bundleno = 282 (0x11a), region = 152 }
 0x3d7   : >> { %v1758_v38 = vpop.permute.xlu1 %1757 }
 0x3d8   : >> { %v1760_v39 = vmul.f32 %v2116_v32, %v1758_v38  }
 0x3da   : >> { %v2200_v20 = vmov %v1760_v39   ;;  %1762 = vrot.lane.b32.xlu0 (%p1652_p13), %v1760_v39, %s2215_s9 }
 0x44c   : > { %v1763_v40 = vpop.permute.xlu0 %1762 }
 0x44d   : > { %1765 = vst.msk [vmem:[%s2445_s22] sm:$0xff] %vm299_vm0, %v1763_v40 }
 0x44e   : > { %2132 = shalt.err (!%p2129_p7)
}
 0x44f   : > { %s2133_s10 = scalar_lea.hbm %s2466_s20, 128  ;;  %s2137_s5 = scalar_lea.hbm %s2516_s4, 256 }
 0x450   : > { %p2134_p10 = scmp.ne.s32.totalorder %s2466_s20, %s2133_s10  ;;  %p2138_p13 = scmp.lt.u32.totalorder %s2466_s20, %s2516_s4 }
 0x451   : > { %p2139_p0 = scmp.lt.u32.totalorder %s2137_s5, %s2133_s10  ;;  %p2141_p2 = scmp.lt.u32.totalorder %s2133_s10, %s2466_s20 }
 0x452   : > { %p2135_p11 = pnand %p2134_p10, %p2280_p6 }
 0x453   : > { %p2140_p1 = por %p2139_p0, %p2138_p13 }
 0x454   : > { %p2136_p12 = pneg %p2135_p11 }
 0x455   : > { %p2142_p3 = por %p2141_p2, %p2140_p1 }
 0x457   : > { %p2143_p4 = pnand %p2142_p3, %p2136_p12 }
 0x459   : > { %2146 = shalt.err (!%p2143_p4)
}
 0x45a   : > { %2039 = dma.vmem_to_hbm [thread:$0]  (%p2280_p6), %s2468_s12, 128, %s2466_s20, %s1767_s23  }
 0x45b PF: > { %s1792_s8 = sand.u32 1, %s2181_s15   ;;  %p2042_p5 = pnand %p1860_p9, %p2284_p8 }
 0x45c   : > { %s1793_s9 = scalar_lea.sflag [#allocation5], %s1792_s8 }
 0x45d   : > { %2176 = dma.done.wait (!%p2042_p5), %s1793_s9, 128  }
 0x45e   : > { %2178 = vsyncadd (!%p2042_p5), %s1793_s9, 4294967168  ;;  %p14_p7 = scmp.ge.s32.totalorder %s2265_s21, 4   ;;  %s2519_s15 = smov %s2185_s16 }
 0x45f   : > { %s2520_s16 = smov %s2189_s17  ;;  %s2521_s17 = smov %s2278_s24 }
 0x460   : > { %s2522_s18 = smov %s2265_s21  ;;  %16 = sbr.rel (!%p14_p7) target bundleno = 3 (0x3), region = 163 }
 0x467   :  { %1798 = vsyncpa [#allocation5], 1 }
 0x468   :  { %1800 = vsyncpa [#allocation5 + $0x1], 1 }

// kernel: st_block_2_forward.15
= control target key start
LH: loop header
LB: loop body
LE: loop exit
PB: predicated region body
PF: predicated region fallthrough
CT: control target
= control target key end

     0   :  { %8 = vsyncpa [#allocation3], 0  ;;  %s1219_s0 = inlined_call_operand.hbm [shape: f32[2,8,8], index: 0, kind: input, shape index: {}]   ;;  %s1220_s1 = inlined_call_operand.hbm [shape: f32[8,8], index: 1, kind: input, shape index: {}]   ;;  %s1221_s2 = inlined_call_operand.hbm [shape: f32[2,8,496], index: 2, kind: input, shape index: {}]   ;;  %s1222_s3 = inlined_call_operand.hbm [shape: f32[2,3,8,496], index: 3, kind: output, shape index: {}]  }
   0x1   :  { %10 = vsyncpa [#allocation3 + $0x1], 0 }
   0x2   :  { %11 = vsyncpa [#allocation6], 0 }
   0x3   :  { %12 = vsyncpa [#allocation4], 0 }
   0x4   :  { %14 = vsyncpa [#allocation4 + $0x1], 0  ;;  %s956_s12 = smov 0   ;;  %s958_s13 = smov 0  }
   0x5   :  { %s960_s14 = smov 0   ;;  %s962_s15 = smov 0  }
   0x6 LB: > { %s977_s16 = sadd.s32 1, %s927_s15   ;;  %s27_s17 = sadd.s32 1, %s923_s14  ;;  %s927_s15 = sphi %s962_s15, %s1245_s15   ;;  %s923_s14 = sphi %s960_s14, %s1244_s14   ;;  %s919_s13 = sphi %s958_s13, %s1243_s13   ;;  %s915_s12 = sphi %s956_s12, %s1242_s12  }
   0x7   : > { %s24_s18 = ssub.s32 %s927_s15, %s977_s16  ;;  %p34_p0 = scmp.ne.s32.totalorder %s923_s14, %s919_s13 }
   0x8   : > { %p25_p1 = scmp.eq.s32.totalorder %s24_s18, 0  ;;  %p35_p2 = scmp.eq.s32.totalorder %s927_s15, 0 }
   0x9   : > { %p726_p4 = scmp.lt.s32.totalorder %s927_s15, 2  ;;  %s148_s20 = sand.u32 1, %s927_s15  }
   0xa   : > { %s988_s19 = scalar_select %p25_p1, %s923_s14, %s27_s17  }
   0xb   : > { %p36_p5 = por %p35_p2, %p34_p0  ;;  %s150_s21 = sand.u32 1, %s923_s14  }
   0xc   : > { %s673_s22 = sshll.u32 %s150_s21, 3  ;;  %s674_s23 = sshll.u32 %s927_s15, 7 }
   0xd   : > { %s999_s26 = scalar_lea.hbm %s1219_s0, %s674_s23  ;;  %s152_s27 = scalar_lea.vmem [#allocation2], %s673_s22 }
   0xe   : > { %s159_s28 = sshll.u32 %s152_s27, 4  ;;  %p1001_p6 = pnand %p726_p4, %p36_p5  ;;  %s1005_s28 = int_to_ptr.vmem [resolvable:$true] %s159_s28 }
   0xf   : > { %s1007_s30 = sshll.u32 %s150_s21, 5  ;;  %s1009_s4 = scalar_lea.sflag [#allocation3], %s148_s20 }
  0x10   : > { %s765_s5 = scalar_lea.hbm %s999_s26, 128  ;;  %p767_p8 = pneg %p1001_p6 }
  0x11   : > { %p766_p7 = scmp.ne.s32.totalorder %s999_s26, %s765_s5  ;;  %s770_s8 = scalar_lea.hbm %s1219_s0, 256 }
  0x12   : > { %p771_p11 = scmp.lt.u32.totalorder %s999_s26, %s1219_s0  ;;  %p772_p12 = scmp.lt.u32.totalorder %s770_s8, %s765_s5 }
  0x13   : > { %p768_p9 = pnand %p767_p8, %p766_p7  ;;  %p774_p1 = scmp.lt.u32.totalorder %s765_s5, %s999_s26 }
  0x14   : > { %p773_p13 = por %p772_p12, %p771_p11 }
  0x15   : > { %p769_p10 = pneg %p768_p9 }
  0x16   : > { %p775_p2 = por %p774_p1, %p773_p13 }
  0x18   : > { %p776_p4 = pnand %p775_p2, %p769_p10 }
  0x1a   : > { %779 = shalt.err (!%p776_p4)
}
  0x1b   : > { %s780_s11 = scalar_lea.vmem %s1005_s28, 128  ;;  %s929_s17 = smov [#allocation2]  }
  0x1c   : > { %p781_p5 = scmp.ne.s32.totalorder %s1005_s28, %s780_s11  ;;  %s785_s18 = sshll.u32 %s929_s17, 4  ;;  %s786_s18 = int_to_ptr.vmem [resolvable:$false] %s785_s18 }
  0x1d   : > { %s787_s20 = scalar_lea.vmem %s786_s18, 256  ;;  %p788_p3 = scmp.lt.s32.totalorder %s1005_s28, %s786_s18 }
  0x1e   : > { %p783_p7 = pnand %p781_p5, %p767_p8  ;;  %p789_p11 = scmp.lt.s32.totalorder %s787_s20, %s780_s11 }
  0x20   : > { %p784_p9 = pneg %p783_p7  ;;  %p790_p12 = por %p789_p11, %p788_p3 }
  0x22   : > { %p791_p13 = pnand %p790_p12, %p784_p9 }
  0x24   : > { %794 = shalt.err (!%p791_p13)
}
  0x25   : > { %717 = dma.hbm_to_vmem [thread:$0]  (!%p1001_p6), %s999_s26, 128, %s1005_s28, %s1009_s4  }
  0x26   : > { %s1038_s21 = sadd.s32 4294967295, %s927_s15   ;;  %s669_s22 = sadd.s32 4294967294, %s927_s15  }
  0x27   : > { %p40_p3 = scmp.ne.s32.totalorder %s919_s13, %s915_s12  ;;  %p1223_p10 = scmp.eq.s32.totalorder %s1038_s21, 0 }
  0x28   : > { %p111_p1 = scmp.eq.s32.totalorder %s1038_s21, 1  ;;  %p117_p2 = scmp.eq.s32.totalorder %s669_s22, 1 }
  0x29   : > { %p670_p4 = scmp.ge.s32.totalorder %s927_s15, 1  ;;  %p1048_p5 = por %p1223_p10, %p40_p3 }
  0x2a   : > { %p1055_p7 = por %p111_p1, %p34_p0  ;;  %p1059_p9 = por %p117_p2, %p40_p3 }
  0x2b   : > { %s1229_s23 = scalar_select %p1048_p5, 1, 0 }
  0x2c   : > { %s1230_s24 = scalar_select %p1055_p7, 1, 0 }
  0x2d   : > { %s1231_s25 = scalar_select %p1059_p9, 1, 0 }
  0x2e   : > { %p124_p11 = scmp.lt.s32.totalorder %s927_s15, 3  ;;  %s930_s27 = smov [#allocation5]  }
  0x2f   : > { %s137_s28 = sshll.u32 %s930_s27, 4  ;;  %s697_s5 = sshll.u32 %s927_s15, 9  ;;  %s1068_s28 = int_to_ptr.vmem [resolvable:$true] %s137_s28 }
  0x30   : > { %p1064_p12 = pnand %p670_p4, %p124_p11  ;;  %s1076_s8 = scalar_lea.hbm %s1221_s2, %s697_s5 }
  0x31   : > { %s170_s9 = scalar_lea.vmem [#allocation7], %s1007_s30  ;;  %s795_s17 = scalar_lea.hbm %s1076_s8, 512 }
  0x32   : > { %s1232_s26 = scalar_select %p1064_p12, 1, 0 }
  0x33   : > { %p710_p0 = pneg %p1064_p12  ;;  %s178_s10 = sshll.u32 %s170_s9, 4  ;;  %s179_s10 = int_to_ptr.vmem [resolvable:$true] %s178_s10 }
  0x34   : > { %p796_p3 = scmp.ne.s32.totalorder %s1076_s8, %s795_s17  ;;  %s800_s22 = scalar_lea.hbm %s1221_s2, 1024 }
  0x35   : > { %p1081_p13 = pnand %p710_p0, %p1223_p10  ;;  %p801_p4 = scmp.lt.u32.totalorder %s1076_s8, %s1221_s2 }
  0x36   : > { %p798_p1 = pnand %p796_p3, %p767_p8  ;;  %p802_p11 = scmp.lt.u32.totalorder %s800_s22, %s795_s17 }
  0x37   : > { %s1233_s11 = scalar_select %p1081_p13, 1, 0 }
  0x38   : > { %p799_p2 = pneg %p798_p1  ;;  %p803_p0 = por %p802_p11, %p801_p4 }
  0x39   : > { %p804_p10 = scmp.lt.u32.totalorder %s795_s17, %s1076_s8 }
  0x3b   : > { %p805_p9 = por %p804_p10, %p803_p0 }
  0x3d   : > { %p806_p7 = pnand %p805_p9, %p799_p2 }
  0x3f   : > { %809 = shalt.err (!%p806_p7)
}
  0x40   : > { %s810_s30 = scalar_lea.vmem %s179_s10, 512  ;;  %s931_s6 = smov [#allocation7]  }
  0x41   : > { %p811_p5 = scmp.ne.s32.totalorder %s179_s10, %s810_s30  ;;  %s815_s7 = sshll.u32 %s931_s6, 4  ;;  %s816_s7 = int_to_ptr.vmem [resolvable:$false] %s815_s7 }
  0x42   : > { %s817_s9 = scalar_lea.vmem %s816_s7, 1024  ;;  %p818_p12 = scmp.lt.s32.totalorder %s179_s10, %s816_s7 }
  0x43   : > { %p813_p3 = pnand %p811_p5, %p767_p8  ;;  %p819_p13 = scmp.lt.s32.totalorder %s817_s9, %s810_s30 }
  0x45   : > { %p814_p1 = pneg %p813_p3  ;;  %p820_p4 = por %p819_p13, %p818_p12 }
  0x47   : > { %p821_p11 = pnand %p820_p4, %p814_p1 }
  0x49   : > { %824 = shalt.err (!%p821_p11)
}
  0x4a   : > { %720 = dma.hbm_to_vmem [thread:$0]  (!%p1001_p6), %s1076_s8, 512, %s179_s10, %s1009_s4  }
  0x4b   : > { %s825_s20 = scalar_lea.hbm %s1220_s1, 128  ;;  %p1234_p10 = scmp.ne.s32.totalorder %s1233_s11, 0 }
  0x4c   : > { %p826_p8 = scmp.ne.s32.totalorder %s1220_s1, %s825_s20  ;;  %p832_p12 = scmp.lt.u32.totalorder %s825_s20, %s1220_s1 }
  0x4d   : > { %p827_p5 = pneg %p1234_p10 }
  0x4f   : > { %p828_p7 = pnand %p827_p5, %p826_p8 }
  0x51   : > { %p829_p9 = pneg %p828_p7 }
  0x53   : > { %p834_p13 = pnand %p832_p12, %p829_p9 }
  0x55   : > { %837 = shalt.err (!%p834_p13)
}
  0x56   : > { %s838_s29 = scalar_lea.vmem %s1068_s28, 128  ;;  %p846_p3 = scmp.lt.s32.totalorder %s1068_s28, %s1068_s28 }
  0x57   : > { %p839_p6 = scmp.ne.s32.totalorder %s1068_s28, %s838_s29  ;;  %p847_p1 = scmp.lt.s32.totalorder %s838_s29, %s838_s29 }
  0x59   : > { %p841_p2 = pnand %p839_p6, %p827_p5  ;;  %p848_p4 = por %p847_p1, %p846_p3 }
  0x5b   : > { %p842_p0 = pneg %p841_p2 }
  0x5d   : > { %p849_p11 = pnand %p848_p4, %p842_p0 }
  0x5f   : > { %852 = shalt.err (!%p849_p11)
}
  0x60   : > { %713 = dma.hbm_to_vmem [thread:$0]  (!%p1234_p10), %s1220_s1, 128, %s1068_s28, [#allocation6]  }
  0x61   : > { %p1235_p8 = scmp.ne.s32.totalorder %s1232_s26, 0 }
  0x62   : > { %s189_s10 = sand.u32 (!%p1235_p8), 1, %s1038_s21   ;;  %s1130_s6 = sand.u32 (!%p1235_p8), 1, %s919_s13  }
  0x63   : > { %187 = sbr.rel (%p1235_p8) target bundleno = 565 (0x235), region = 32  ;;  %s679_s7 = sshll.u32 (!%p1235_p8), %s1130_s6, 3 }
  0x64   : > { %s190_s9 = scalar_lea.sflag (!%p1235_p8), [#allocation3], %s189_s10  ;;  %s193_s17 = scalar_lea.vmem (!%p1235_p8), [#allocation2], %s679_s7 }
  0x65   : > { %p1236_p5 = scmp.ne.s32.totalorder (!%p1235_p8), %s1229_s23, 0 }
  0x6a   : > { %898 = dma.done.wait (%p1236_p5), %s190_s9, 128  }
  0x6b   : > { %900 = vsyncadd (%p1236_p5), %s190_s9, 4294967168  ;;  %p1237_p10 = scmp.eq.s32.totalorder %s1038_s21, 0 }
  0x6d   : > { %902 = dma.done.wait (%p1237_p10), [#allocation6], 128   ;;  %p1238_p7 = pmov %p1237_p10 }
  0x6e   : > { %s681_s26 = sshll.u32 %s1130_s6, 5 }
  0x6f   : > { %904 = vsyncadd (%p1238_p7), [#allocation6], 4294967168  ;;  %s206_s28 = scalar_lea.vmem [#allocation7], %s681_s26 }
  0x70   : > { %906 = dma.done.wait (%p1236_p5), %s190_s9, 512  }
  0x71   : > { %908 = vsyncadd (%p1236_p5), %s190_s9, 4294966784  ;;  %v932_v0 = vmov 0.0   ;;  %s698_s11 = smul.u32 96, %s1130_s6  ;;  %v238_v1 = vld [vmem:[%s206_s28 + $0x8] sm:$0xff]  ;;  %v240_v2 = vld [vmem:[%s206_s28 + $0x18] sm:$0xff]  ;;  %vm244_vm0 = vcmask 916480  }
  0x72   : > { %314 = vmatprep.mubr.f32.mxu0 %v932_v0  ;;  %385 = vmatprep.mubr.f32.mxu1 %v932_v0  ;;  %v237_v3 = vld [vmem:[%s206_s28] sm:$0xff]  ;;  %v239_v4 = vld [vmem:[%s206_s28 + $0x10] sm:$0xff]  ;;  %v235_v6 = vld [vmem:[#allocation5] sm:$0xff]  ;;  %vm246_vm1 = vcmask 64512   ;;  %s699_s23 = smul.u32 1536, %s1038_s21  ;;  %s553_s5 = scalar_lea.sflag [#allocation4], %s1130_s6 }
  0x73   : > { %s1147_s18 = scalar_lea.vmem [#allocation8], %s698_s11  ;;  %250 = vmatprep.subr.mxu0 %v238_v1  ;;  %321 = vmatprep.subr.mxu1 %v240_v2  ;;  %v234_v5 = vld [vmem:[%s193_s17] sm:$0xff]  ;;  %p1239_p12 = scmp.ne.s32.totalorder %s1230_s24, 0 }
  0x74   : > { %242 = vst [vmem:[%s1147_s18 + $0x8] sm:$0xff] %v238_v1  ;;  %245 = vst.msk [vmem:[%s1147_s18 + $0x18] sm:$0xff] %vm244_vm0, %v240_v2  ;;  %251 = vmatpush1.msra.mxu0 %v237_v3  ;;  %322 = vmatpush1.msra.mxu1 %v239_v4  ;;  %v236_v7 = vmul.f32 %v235_v6, %v234_v5  ;;  %s566_s20 = sshll.u32 %s1147_s18, 4  ;;  %s1168_s21 = scalar_lea.hbm %s1222_s3, %s699_s23  ;;  %s1170_s20 = int_to_ptr.vmem [resolvable:$true] %s566_s20 }
  0x75   : > { %241 = vst [vmem:[%s1147_s18] sm:$0xff] %v237_v3  ;;  %243 = vst [vmem:[%s1147_s18 + $0x10] sm:$0xff] %v239_v4  ;;  %s853_s30 = scalar_lea.vmem %s1170_s20, 1536  ;;  %s933_s29 = smov [#allocation8]  }
  0x76   : > { %682 = vmatmul.mubr.msk.f32.vlgmr.msra.gmra.mrb[0].mxu0 %vm246_vm1, %v236_v7  ;;  %683 = vmatmul.mubr.msk.f32.vlgmr.msra.gmra.mrb[0].mxu1 %vm246_vm1, %v236_v7  ;;  %p854_p9 = scmp.ne.s32.totalorder %s1170_s20, %s853_s30  ;;  %s857_s4 = sshll.u32 %s933_s29, 4  ;;  %s858_s4 = int_to_ptr.vmem [resolvable:$false] %s857_s4 }
  0x77   : > { %461 = vmatprep.mubr.f32.mxu0 %v932_v0  ;;  %532 = vmatprep.mubr.f32.mxu1 %v932_v0  ;;  %s859_s8 = scalar_lea.vmem %s858_s4, 3072  ;;  %p860_p2 = scmp.lt.s32.totalorder %s1170_s20, %s858_s4 }
  0x78   : > { %p855_p13 = pnand %p854_p9, %p1239_p12  ;;  %p861_p0 = scmp.lt.s32.totalorder %s859_s8, %s853_s30 }
  0x7a   : > { %p856_p6 = pneg %p855_p13  ;;  %p862_p3 = por %p861_p0, %p860_p2 }
  0x7c   : > { %p863_p1 = pnand %p862_p3, %p856_p6 }
 0x149   : > { %v316_v8 = vpop.f32.mrb[0].mxu0  ;;  %v387_v9 = vpop.f32.mrb[0].mxu1 }
 0x14a   : > { %684 = vst [vmem:[%s1147_s18 + $0x20] sm:$0xff] %v316_v8  ;;  %686 = vst [vmem:[%s1147_s18 + $0x30] sm:$0xff] %v387_v9  ;;  %v318_v10 = vpop.f32.mrb[1].mxu0  ;;  %v389_v11 = vpop.f32.mrb[1].mxu1 }
 0x14b   : > { %685 = vst [vmem:[%s1147_s18 + $0x28] sm:$0xff] %v318_v10  ;;  %687 = vst.msk [vmem:[%s1147_s18 + $0x38] sm:$0xff] %vm244_vm0, %v389_v11  ;;  %397 = vmatprep.subr.mxu0 %v318_v10  ;;  %468 = vmatprep.subr.mxu1 %v389_v11 }
 0x14c   : > { %398 = vmatpush1.msra.mxu0 %v316_v8  ;;  %469 = vmatpush1.msra.mxu1 %v387_v9 }
 0x14d   : > { %688 = vmatmul.mubr.msk.f32.vlgmr.msra.gmra.mrb[2].mxu0 %vm246_vm1, %v236_v7  ;;  %689 = vmatmul.mubr.msk.f32.vlgmr.msra.gmra.mrb[2].mxu1 %vm246_vm1, %v236_v7 }
 0x220   : > { %v463_v12 = vpop.f32.mrb[2].mxu0  ;;  %v534_v13 = vpop.f32.mrb[2].mxu1 }
 0x221   : > { %v539_v14 = vmul.f32 2.0, %v463_v12  ;;  %v541_v15 = vmul.f32 2.0, %v534_v13  ;;  %v465_v16 = vpop.f32.mrb[3].mxu0  ;;  %v536_v17 = vpop.f32.mrb[3].mxu1 }
 0x222   : > { %v540_v18 = vmul.f32 2.0, %v465_v16  ;;  %v542_v19 = vmul.f32 2.0, %v536_v17 }
 0x223   : > { %v543_v20 = vsub.f32 %v539_v14, %v237_v3  ;;  %v545_v21 = vsub.f32 %v541_v15, %v239_v4 }
 0x224   : > { %v544_v22 = vsub.f32 %v540_v18, %v238_v1  ;;  %v546_v23 = vsub.f32 %v542_v19, %v240_v2 }
 0x225   : > { %690 = vst [vmem:[%s1147_s18 + $0x40] sm:$0xff] %v543_v20  ;;  %692 = vst [vmem:[%s1147_s18 + $0x50] sm:$0xff] %v545_v21 }
 0x226   : > { %691 = vst [vmem:[%s1147_s18 + $0x48] sm:$0xff] %v544_v22  ;;  %693 = vst.msk [vmem:[%s1147_s18 + $0x58] sm:$0xff] %vm244_vm0, %v546_v23 }
 0x227   : > { %866 = shalt.err (!%p863_p1)
}
 0x228   : > { %s867_s10 = scalar_lea.hbm %s1168_s21, 1536  ;;  %s871_s17 = scalar_lea.hbm %s1222_s3, 3072 }
 0x229   : > { %p868_p4 = scmp.ne.s32.totalorder %s1168_s21, %s867_s10  ;;  %p872_p5 = scmp.lt.u32.totalorder %s1168_s21, %s1222_s3 }
 0x22a   : > { %p873_p10 = scmp.lt.u32.totalorder %s871_s17, %s867_s10  ;;  %p875_p9 = scmp.lt.u32.totalorder %s867_s10, %s1168_s21 }
 0x22b   : > { %p869_p11 = pnand %p868_p4, %p1239_p12 }
 0x22c   : > { %p874_p7 = por %p873_p10, %p872_p5 }
 0x22d   : > { %p870_p8 = pneg %p869_p11 }
 0x22e   : > { %p876_p13 = por %p875_p9, %p874_p7 }
 0x230   : > { %p877_p6 = pnand %p876_p13, %p870_p8 }
 0x232   : > { %880 = shalt.err (!%p877_p6)
}
 0x233   : > { %s934_s11 = smov 512   ;;  %s935_s18 = smov 32  }
 0x234   : > { %708 = dma.vmem_to_hbm [thread:$0]  (%p1239_p12), %s1170_s20, 1536, %s1168_s21, %s553_s5, %s934_s11, %s934_s11, %s935_s18  }
 0x235 PF: > { %s581_s23 = sand.u32 1, %s915_s12   ;;  %p1240_p2 = scmp.ne.s32.totalorder %s1231_s25, 0 }
 0x236   : > { %p1241_p0 = scmp.ge.s32.totalorder %s927_s15, 2  ;;  %s582_s22 = scalar_lea.sflag [#allocation4], %s581_s23 }
 0x238   : > { %p722_p3 = pnand %p1241_p0, %p1240_p2 }
 0x23a   : > { %910 = dma.done.wait (!%p722_p3), %s582_s22, 1536  }
 0x23b   : > { %912 = vsyncadd (!%p722_p3), %s582_s22, 4294965760  ;;  %p17_p1 = scmp.ge.s32.totalorder %s977_s16, 4   ;;  %s1242_s12 = smov %s919_s13 }
 0x23c   : > { %s1243_s13 = smov %s923_s14  ;;  %s1244_s14 = smov %s988_s19 }
 0x23d   : > { %s1245_s15 = smov %s977_s16  ;;  %19 = sbr.rel (!%p17_p1) target bundleno = 6 (0x6), region = 94 }
 0x244   :  { %587 = vsyncpa [#allocation3], 1 }
 0x245   :  { %589 = vsyncpa [#allocation3 + $0x1], 1 }
 0x246   :  { %590 = vsyncpa [#allocation6], 1 }
 0x247   :  { %591 = vsyncpa [#allocation4], 1 }
 0x248   :  { %593 = vsyncpa [#allocation4 + $0x1], 1 }

// kernel: st_block_2_forward.13
= control target key start
LH: loop header
LB: loop body
LE: loop exit
PB: predicated region body
PF: predicated region fallthrough
CT: control target
= control target key end

     0   :  { %s5093_s9 = smov 0   ;;  %s5639_s0 = inlined_call_operand.vmem [shape: f32[2,48,8,2], index: 0, kind: input, shape index: {}]   ;;  %s5640_s1 = inlined_call_operand.vmem [shape: f32[2,48,8,2], index: 1, kind: input, shape index: {}]   ;;  %s5641_s2 = inlined_call_operand.vmem [shape: f32[2,12,8,8], index: 2, kind: output, shape index: {}]  }
   0x1 LB: > { %s4374_s10 = sadd.s32 4294967295, %s5074_s9   ;;  %p4378_p0 = scmp.ge.s32.totalorder %s5074_s9, 1  ;;  %s5074_s9 = sphi %s5093_s9, %s12_s9  }
   0x2   : > { %p122_p1 = scmp.lt.s32.totalorder %s5074_s9, 3 }
   0x4   : > { %p123_p2 = pnand %p4378_p0, %p122_p1 }
   0x5   : > { %p149_p3 = scmp.lt.s32.totalorder (!%p123_p2), %s4374_s10, 1  ;;  %v5076_v0 = vmov (!%p123_p2), 0.0   ;;  %vm5077_vm0 = vmmov (!%p123_p2), 0   ;;  %vm260_vm1 = vcmask (!%p123_p2), 15360   ;;  %vm4197_vm2 = vcmask (!%p123_p2), 64512  }
   0x6   : > { %126 = sbr.rel (%p123_p2) target bundleno = 360 (0x168), region = 28  ;;  %4624 = vmatprep.subr.mxu0 (!%p123_p2), %v5076_v0  ;;  %4629 = vmatprep.subr.mxu1 (!%p123_p2), %v5076_v0 }
   0x7   : > { %4626 = vmatprep.mubr.msk.f32.mxu0 (!%p123_p2), %vm5077_vm0, %v5076_v0  ;;  %4631 = vmatprep.mubr.msk.f32.mxu1 (!%p123_p2), %vm5077_vm0, %v5076_v0 }
   0xd   : > { %s5643_s10 = smov (!%p149_p3, %s4374_s10), 1 }
   0xe   : > { %s4864_s11 = smul.u32 384, %s5643_s10 }
   0xf   : > { %s4865_s18 = smul.u32 96, %s5643_s10 }
  0x10   : > { %s5113_s14 = scalar_lea.vmem %s5640_s1, %s4864_s11  ;;  %s5118_s17 = scalar_lea.vmem %s5639_s0, %s4864_s11 }
  0x11   : > { %v212_v1 = vld [vmem:[%s5113_s14] sm:$0xff]  ;;  %v213_v2 = vld [vmem:[%s5113_s14 + $0x8] sm:$0xff]  ;;  %v214_v5 = vld [vmem:[%s5113_s14 + $0x10] sm:$0xff]  ;;  %s5588_s21 = scalar_lea.vmem %s5641_s2, %s4865_s18 }
  0x12   : > { %4625 = vmatpush3.xpose.msk.msra.mxu0 %vm260_vm1, %v212_v1  ;;  %4630 = vmatpush3.xpose.msk.msra.mxu1 %vm260_vm1, %v213_v2  ;;  %v164_v3 = vld [vmem:[%s5118_s17] sm:$0xff]  ;;  %v165_v4 = vld [vmem:[%s5118_s17 + $0x8] sm:$0xff]  ;;  %v215_v6 = vld [vmem:[%s5113_s14 + $0x18] sm:$0xff] }
  0x13   : > { %4634 = vmatprep.subr.mxu0 %v5076_v0  ;;  %4639 = vmatprep.subr.mxu1 %v5076_v0  ;;  %v166_v7 = vld [vmem:[%s5118_s17 + $0x10] sm:$0xff]  ;;  %v167_v8 = vld [vmem:[%s5118_s17 + $0x18] sm:$0xff]  ;;  %v216_v9 = vld [vmem:[%s5113_s14 + $0x20] sm:$0xff] }
  0x14   : > { %v217_v10 = vld [vmem:[%s5113_s14 + $0x28] sm:$0xff]  ;;  %v168_v11 = vld [vmem:[%s5118_s17 + $0x20] sm:$0xff]  ;;  %v218_v13 = vld [vmem:[%s5113_s14 + $0x30] sm:$0xff] }
  0x15   : > { %4627 = vmatmul.mubr.msk.f32.vlgmr.msra.gmra.mrb[0].mxu0 %vm260_vm1, %v164_v3  ;;  %4632 = vmatmul.mubr.msk.f32.vlgmr.msra.gmra.mrb[0].mxu1 %vm260_vm1, %v165_v4  ;;  %v169_v12 = vld [vmem:[%s5118_s17 + $0x28] sm:$0xff]  ;;  %v219_v14 = vld [vmem:[%s5113_s14 + $0x38] sm:$0xff]  ;;  %v170_v15 = vld [vmem:[%s5118_s17 + $0x30] sm:$0xff] }
  0x16   : > { %4635 = vmatpush3.xpose.msk.msra.mxu0 %vm260_vm1, %v214_v5  ;;  %4640 = vmatpush3.xpose.msk.msra.mxu1 %vm260_vm1, %v215_v6  ;;  %v171_v16 = vld [vmem:[%s5118_s17 + $0x38] sm:$0xff]  ;;  %v220_v17 = vld [vmem:[%s5113_s14 + $0x40] sm:$0xff]  ;;  %v221_v18 = vld [vmem:[%s5113_s14 + $0x48] sm:$0xff] }
  0x17   : > { %4636 = vmatprep.mubr.msk.f32.mxu0 %vm5077_vm0, %v5076_v0  ;;  %4641 = vmatprep.mubr.msk.f32.mxu1 %vm5077_vm0, %v5076_v0  ;;  %v172_v19 = vld [vmem:[%s5118_s17 + $0x40] sm:$0xff]  ;;  %v173_v20 = vld [vmem:[%s5118_s17 + $0x48] sm:$0xff]  ;;  %v222_v21 = vld [vmem:[%s5113_s14 + $0x50] sm:$0xff] }
  0x18   : > { %4644 = vmatprep.subr.mxu0 %v5076_v0  ;;  %4649 = vmatprep.subr.mxu1 %v5076_v0  ;;  %v223_v22 = vld [vmem:[%s5113_s14 + $0x58] sm:$0xff]  ;;  %v174_v23 = vld [vmem:[%s5118_s17 + $0x50] sm:$0xff]  ;;  %v224_v25 = vld [vmem:[%s5113_s14 + $0x60] sm:$0xff] }
  0x19   : > { %4637 = vmatmul.mubr.msk.f32.vlgmr.msra.gmra.mrb[2].mxu0 %vm260_vm1, %v166_v7  ;;  %4642 = vmatmul.mubr.msk.f32.vlgmr.msra.gmra.mrb[2].mxu1 %vm260_vm1, %v167_v8  ;;  %v175_v24 = vld [vmem:[%s5118_s17 + $0x58] sm:$0xff]  ;;  %v225_v26 = vld [vmem:[%s5113_s14 + $0x68] sm:$0xff]  ;;  %v176_v27 = vld [vmem:[%s5118_s17 + $0x60] sm:$0xff] }
  0x1a   : > { %4645 = vmatpush3.xpose.msk.msra.mxu0 %vm260_vm1, %v216_v9  ;;  %4650 = vmatpush3.xpose.msk.msra.mxu1 %vm260_vm1, %v217_v10  ;;  %v177_v28 = vld [vmem:[%s5118_s17 + $0x68] sm:$0xff]  ;;  %v226_v29 = vld [vmem:[%s5113_s14 + $0x70] sm:$0xff]  ;;  %v227_v30 = vld [vmem:[%s5113_s14 + $0x78] sm:$0xff] }
  0x1b   : > { %4646 = vmatprep.mubr.msk.f32.mxu0 %vm5077_vm0, %v5076_v0  ;;  %4651 = vmatprep.mubr.msk.f32.mxu1 %vm5077_vm0, %v5076_v0  ;;  %v178_v31 = vld [vmem:[%s5118_s17 + $0x70] sm:$0xff]  ;;  %v179_v32 = vld [vmem:[%s5118_s17 + $0x78] sm:$0xff]  ;;  %v228_v33 = vld [vmem:[%s5113_s14 + $0x80] sm:$0xff] }
  0x1c   : > { %4654 = vmatprep.subr.mxu0 %v5076_v0  ;;  %4659 = vmatprep.subr.mxu1 %v5076_v0  ;;  %v229_v34 = vld [vmem:[%s5113_s14 + $0x88] sm:$0xff]  ;;  %v180_v35 = vld [vmem:[%s5118_s17 + $0x80] sm:$0xff]  ;;  %v230_v37 = vld [vmem:[%s5113_s14 + $0x90] sm:$0xff] }
  0x1d   : > { %4647 = vmatmul.mubr.msk.f32.vlgmr.msra.gmra.mrb[4].mxu0 %vm260_vm1, %v168_v11  ;;  %4652 = vmatmul.mubr.msk.f32.vlgmr.msra.gmra.mrb[4].mxu1 %vm260_vm1, %v169_v12  ;;  %v181_v36 = vld [vmem:[%s5118_s17 + $0x88] sm:$0xff]  ;;  %v231_v38 = vld [vmem:[%s5113_s14 + $0x98] sm:$0xff]  ;;  %v182_v39 = vld [vmem:[%s5118_s17 + $0x90] sm:$0xff] }
  0x1e   : > { %4655 = vmatpush3.xpose.msk.msra.mxu0 %vm260_vm1, %v218_v13  ;;  %4660 = vmatpush3.xpose.msk.msra.mxu1 %vm260_vm1, %v219_v14  ;;  %v183_v40 = vld [vmem:[%s5118_s17 + $0x98] sm:$0xff]  ;;  %v232_v41 = vld [vmem:[%s5113_s14 + $0xa0] sm:$0xff]  ;;  %v233_v42 = vld [vmem:[%s5113_s14 + $0xa8] sm:$0xff] }
  0x1f   : > { %4656 = vmatprep.mubr.msk.f32.mxu0 %vm5077_vm0, %v5076_v0  ;;  %4661 = vmatprep.mubr.msk.f32.mxu1 %vm5077_vm0, %v5076_v0  ;;  %v184_v43 = vld [vmem:[%s5118_s17 + $0xa0] sm:$0xff]  ;;  %v185_v44 = vld [vmem:[%s5118_s17 + $0xa8] sm:$0xff]  ;;  %v234_v45 = vld [vmem:[%s5113_s14 + $0xb0] sm:$0xff] }
  0x20   : > { %4664 = vmatprep.subr.mxu0 %v5076_v0  ;;  %4669 = vmatprep.subr.mxu1 %v5076_v0  ;;  %v235_v46 = vld [vmem:[%s5113_s14 + $0xb8] sm:$0xff]  ;;  %v186_v47 = vld [vmem:[%s5118_s17 + $0xb0] sm:$0xff]  ;;  %v236_v49 = vld [vmem:[%s5113_s14 + $0xc0] sm:$0xff] }
  0x21   : > { %4657 = vmatmul.mubr.msk.f32.vlgmr.msra.gmra.mrb[6].mxu0 %vm260_vm1, %v170_v15  ;;  %4662 = vmatmul.mubr.msk.f32.vlgmr.msra.gmra.mrb[6].mxu1 %vm260_vm1, %v171_v16  ;;  %v187_v48 = vld [vmem:[%s5118_s17 + $0xb8] sm:$0xff]  ;;  %v237_v50 = vld [vmem:[%s5113_s14 + $0xc8] sm:$0xff]  ;;  %v188_v51 = vld [vmem:[%s5118_s17 + $0xc0] sm:$0xff] }
  0x22   : > { %4665 = vmatpush3.xpose.msk.msra.mxu0 %vm260_vm1, %v220_v17  ;;  %4670 = vmatpush3.xpose.msk.msra.mxu1 %vm260_vm1, %v221_v18  ;;  %v189_v52 = vld [vmem:[%s5118_s17 + $0xc8] sm:$0xff]  ;;  %v238_v53 = vld [vmem:[%s5113_s14 + $0xd0] sm:$0xff]  ;;  %v239_v54 = vld [vmem:[%s5113_s14 + $0xd8] sm:$0xff] }
  0x23   : > { %4666 = vmatprep.mubr.msk.f32.mxu0 %vm5077_vm0, %v5076_v0  ;;  %4671 = vmatprep.mubr.msk.f32.mxu1 %vm5077_vm0, %v5076_v0  ;;  %v190_v55 = vld [vmem:[%s5118_s17 + $0xd0] sm:$0xff]  ;;  %v191_v56 = vld [vmem:[%s5118_s17 + $0xd8] sm:$0xff]  ;;  %v240_v57 = vld [vmem:[%s5113_s14 + $0xe0] sm:$0xff] }
  0x24   : > { %4674 = vmatprep.subr.mxu0 %v5076_v0  ;;  %4679 = vmatprep.subr.mxu1 %v5076_v0  ;;  %v241_v58 = vld [vmem:[%s5113_s14 + $0xe8] sm:$0xff]  ;;  %v192_v59 = vld [vmem:[%s5118_s17 + $0xe0] sm:$0xff]  ;;  %v242_v61 = vld [vmem:[%s5113_s14 + $0xf0] sm:$0xff] }
  0x25   : > { %4667 = vmatmul.mubr.msk.f32.vlgmr.msra.gmra.mrb[8].mxu0 %vm260_vm1, %v172_v19  ;;  %4672 = vmatmul.mubr.msk.f32.vlgmr.msra.gmra.mrb[8].mxu1 %vm260_vm1, %v173_v20  ;;  %v193_v60 = vld [vmem:[%s5118_s17 + $0xe8] sm:$0xff]  ;;  %v243_v62 = vld [vmem:[%s5113_s14 + $0xf8] sm:$0xff]  ;;  %v194_v63 = vld [vmem:[%s5118_s17 + $0xf0] sm:$0xff] }
  0x26   : > { %4675 = vmatpush3.xpose.msk.msra.mxu0 %vm260_vm1, %v222_v21  ;;  %4680 = vmatpush3.xpose.msk.msra.mxu1 %vm260_vm1, %v223_v22  ;;  %v195_v1 = vld [vmem:[%s5118_s17 + $0xf8] sm:$0xff]  ;;  %v244_v2 = vld [vmem:[%s5113_s14 + $0x100] sm:$0xff]  ;;  %v245_v3 = vld [vmem:[%s5113_s14 + $0x108] sm:$0xff] }
  0x27   : > { %4676 = vmatprep.mubr.msk.f32.mxu0 %vm5077_vm0, %v5076_v0  ;;  %4681 = vmatprep.mubr.msk.f32.mxu1 %vm5077_vm0, %v5076_v0  ;;  %v196_v4 = vld [vmem:[%s5118_s17 + $0x100] sm:$0xff]  ;;  %v197_v5 = vld [vmem:[%s5118_s17 + $0x108] sm:$0xff]  ;;  %v246_v6 = vld [vmem:[%s5113_s14 + $0x110] sm:$0xff] }
  0x28   : > { %4684 = vmatprep.subr.mxu0 %v5076_v0  ;;  %4689 = vmatprep.subr.mxu1 %v5076_v0  ;;  %v247_v7 = vld [vmem:[%s5113_s14 + $0x118] sm:$0xff]  ;;  %v198_v8 = vld [vmem:[%s5118_s17 + $0x110] sm:$0xff]  ;;  %v248_v10 = vld [vmem:[%s5113_s14 + $0x120] sm:$0xff] }
  0x29   : > { %4677 = vmatmul.mubr.msk.f32.vlgmr.msra.gmra.mrb[10].mxu0 %vm260_vm1, %v174_v23  ;;  %4682 = vmatmul.mubr.msk.f32.vlgmr.msra.gmra.mrb[10].mxu1 %vm260_vm1, %v175_v24  ;;  %v199_v9 = vld [vmem:[%s5118_s17 + $0x118] sm:$0xff]  ;;  %v249_v11 = vld [vmem:[%s5113_s14 + $0x128] sm:$0xff]  ;;  %v200_v12 = vld [vmem:[%s5118_s17 + $0x120] sm:$0xff] }
  0x2a   : > { %4685 = vmatpush3.xpose.msk.msra.mxu0 %vm260_vm1, %v224_v25  ;;  %4690 = vmatpush3.xpose.msk.msra.mxu1 %vm260_vm1, %v225_v26  ;;  %v201_v13 = vld [vmem:[%s5118_s17 + $0x128] sm:$0xff]  ;;  %v250_v14 = vld [vmem:[%s5113_s14 + $0x130] sm:$0xff]  ;;  %v251_v15 = vld [vmem:[%s5113_s14 + $0x138] sm:$0xff] }
  0x2b   : > { %4686 = vmatprep.mubr.msk.f32.mxu0 %vm5077_vm0, %v5076_v0  ;;  %4691 = vmatprep.mubr.msk.f32.mxu1 %vm5077_vm0, %v5076_v0  ;;  %v202_v16 = vld [vmem:[%s5118_s17 + $0x130] sm:$0xff]  ;;  %v203_v17 = vld [vmem:[%s5118_s17 + $0x138] sm:$0xff]  ;;  %v252_v18 = vld [vmem:[%s5113_s14 + $0x140] sm:$0xff] }
  0x2c   : > { %4694 = vmatprep.subr.mxu0 %v5076_v0  ;;  %4699 = vmatprep.subr.mxu1 %v5076_v0  ;;  %v253_v19 = vld [vmem:[%s5113_s14 + $0x148] sm:$0xff]  ;;  %v204_v20 = vld [vmem:[%s5118_s17 + $0x140] sm:$0xff]  ;;  %v254_v22 = vld [vmem:[%s5113_s14 + $0x150] sm:$0xff] }
  0x2d   : > { %4687 = vmatmul.mubr.msk.f32.vlgmr.msra.gmra.mrb[12].mxu0 %vm260_vm1, %v176_v27  ;;  %4692 = vmatmul.mubr.msk.f32.vlgmr.msra.gmra.mrb[12].mxu1 %vm260_vm1, %v177_v28  ;;  %v205_v21 = vld [vmem:[%s5118_s17 + $0x148] sm:$0xff]  ;;  %v255_v23 = vld [vmem:[%s5113_s14 + $0x158] sm:$0xff]  ;;  %v206_v24 = vld [vmem:[%s5118_s17 + $0x150] sm:$0xff] }
  0x2e   : > { %4695 = vmatpush3.xpose.msk.msra.mxu0 %vm260_vm1, %v226_v29  ;;  %4700 = vmatpush3.xpose.msk.msra.mxu1 %vm260_vm1, %v227_v30  ;;  %v207_v25 = vld [vmem:[%s5118_s17 + $0x158] sm:$0xff]  ;;  %v256_v26 = vld [vmem:[%s5113_s14 + $0x160] sm:$0xff]  ;;  %v257_v27 = vld [vmem:[%s5113_s14 + $0x168] sm:$0xff] }
  0x2f   : > { %4696 = vmatprep.mubr.msk.f32.mxu0 %vm5077_vm0, %v5076_v0  ;;  %4701 = vmatprep.mubr.msk.f32.mxu1 %vm5077_vm0, %v5076_v0  ;;  %v208_v28 = vld [vmem:[%s5118_s17 + $0x160] sm:$0xff]  ;;  %v209_v29 = vld [vmem:[%s5118_s17 + $0x168] sm:$0xff]  ;;  %v258_v30 = vld [vmem:[%s5113_s14 + $0x170] sm:$0xff] }
  0x30   : > { %4704 = vmatprep.subr.mxu0 %v5076_v0  ;;  %4709 = vmatprep.subr.mxu1 %v5076_v0 }
  0x31   : > { %4697 = vmatmul.mubr.msk.f32.vlgmr.msra.gmra.mrb[14].mxu0 %vm260_vm1, %v178_v31  ;;  %4702 = vmatmul.mubr.msk.f32.vlgmr.msra.gmra.mrb[14].mxu1 %vm260_vm1, %v179_v32  ;;  %v259_v31 = vld [vmem:[%s5113_s14 + $0x178] sm:$0xff]  ;;  %v210_v32 = vld [vmem:[%s5118_s17 + $0x170] sm:$0xff] }
  0x32   : > { %4705 = vmatpush3.xpose.msk.msra.mxu0 %vm260_vm1, %v228_v33  ;;  %4710 = vmatpush3.xpose.msk.msra.mxu1 %vm260_vm1, %v229_v34  ;;  %v211_v33 = vld [vmem:[%s5118_s17 + $0x178] sm:$0xff] }
  0x33   : > { %4706 = vmatprep.mubr.msk.f32.mxu0 %vm5077_vm0, %v5076_v0  ;;  %4711 = vmatprep.mubr.msk.f32.mxu1 %vm5077_vm0, %v5076_v0 }
  0x34   : > { %4714 = vmatprep.subr.mxu0 %v5076_v0  ;;  %4719 = vmatprep.subr.mxu1 %v5076_v0 }
  0x35   : > { %4707 = vmatmul.mubr.msk.f32.vlgmr.msra.gmra.mrb[16].mxu0 %vm260_vm1, %v180_v35  ;;  %4712 = vmatmul.mubr.msk.f32.vlgmr.msra.gmra.mrb[16].mxu1 %vm260_vm1, %v181_v36 }
  0x36   : > { %4715 = vmatpush3.xpose.msk.msra.mxu0 %vm260_vm1, %v230_v37  ;;  %4720 = vmatpush3.xpose.msk.msra.mxu1 %vm260_vm1, %v231_v38 }
  0x37   : > { %4716 = vmatprep.mubr.msk.f32.mxu0 %vm5077_vm0, %v5076_v0  ;;  %4721 = vmatprep.mubr.msk.f32.mxu1 %vm5077_vm0, %v5076_v0 }
  0x38   : > { %4724 = vmatprep.subr.mxu0 %v5076_v0  ;;  %4729 = vmatprep.subr.mxu1 %v5076_v0 }
  0x39   : > { %4717 = vmatmul.mubr.msk.f32.vlgmr.msra.gmra.mrb[18].mxu0 %vm260_vm1, %v182_v39  ;;  %4722 = vmatmul.mubr.msk.f32.vlgmr.msra.gmra.mrb[18].mxu1 %vm260_vm1, %v183_v40 }
  0x3a   : > { %4725 = vmatpush3.xpose.msk.msra.mxu0 %vm260_vm1, %v232_v41  ;;  %4730 = vmatpush3.xpose.msk.msra.mxu1 %vm260_vm1, %v233_v42 }
  0x3b   : > { %4726 = vmatprep.mubr.msk.f32.mxu0 %vm5077_vm0, %v5076_v0  ;;  %4731 = vmatprep.mubr.msk.f32.mxu1 %vm5077_vm0, %v5076_v0 }
  0x3c   : > { %4734 = vmatprep.subr.mxu0 %v5076_v0  ;;  %4739 = vmatprep.subr.mxu1 %v5076_v0 }
  0x3d   : > { %4727 = vmatmul.mubr.msk.f32.vlgmr.msra.gmra.mrb[20].mxu0 %vm260_vm1, %v184_v43  ;;  %4732 = vmatmul.mubr.msk.f32.vlgmr.msra.gmra.mrb[20].mxu1 %vm260_vm1, %v185_v44 }
  0x3e   : > { %4735 = vmatpush3.xpose.msk.msra.mxu0 %vm260_vm1, %v234_v45  ;;  %4740 = vmatpush3.xpose.msk.msra.mxu1 %vm260_vm1, %v235_v46 }
  0x3f   : > { %4736 = vmatprep.mubr.msk.f32.mxu0 %vm5077_vm0, %v5076_v0  ;;  %4741 = vmatprep.mubr.msk.f32.mxu1 %vm5077_vm0, %v5076_v0 }
  0x40   : > { %4744 = vmatprep.subr.mxu0 %v5076_v0  ;;  %4749 = vmatprep.subr.mxu1 %v5076_v0 }
  0x41   : > { %4737 = vmatmul.mubr.msk.f32.vlgmr.msra.gmra.mrb[22].mxu0 %vm260_vm1, %v186_v47  ;;  %4742 = vmatmul.mubr.msk.f32.vlgmr.msra.gmra.mrb[22].mxu1 %vm260_vm1, %v187_v48 }
  0x42   : > { %4745 = vmatpush3.xpose.msk.msra.mxu0 %vm260_vm1, %v236_v49  ;;  %4750 = vmatpush3.xpose.msk.msra.mxu1 %vm260_vm1, %v237_v50 }
  0x43   : > { %4746 = vmatprep.mubr.msk.f32.mxu0 %vm5077_vm0, %v5076_v0  ;;  %4751 = vmatprep.mubr.msk.f32.mxu1 %vm5077_vm0, %v5076_v0 }
  0x44   : > { %4754 = vmatprep.subr.mxu0 %v5076_v0  ;;  %4759 = vmatprep.subr.mxu1 %v5076_v0 }
  0x45   : > { %4747 = vmatmul.mubr.msk.f32.vlgmr.msra.gmra.mrb[24].mxu0 %vm260_vm1, %v188_v51  ;;  %4752 = vmatmul.mubr.msk.f32.vlgmr.msra.gmra.mrb[24].mxu1 %vm260_vm1, %v189_v52 }
  0x46   : > { %4755 = vmatpush3.xpose.msk.msra.mxu0 %vm260_vm1, %v238_v53  ;;  %4760 = vmatpush3.xpose.msk.msra.mxu1 %vm260_vm1, %v239_v54 }
  0x47   : > { %4756 = vmatprep.mubr.msk.f32.mxu0 %vm5077_vm0, %v5076_v0  ;;  %4761 = vmatprep.mubr.msk.f32.mxu1 %vm5077_vm0, %v5076_v0 }
  0x48   : > { %4764 = vmatprep.subr.mxu0 %v5076_v0  ;;  %4769 = vmatprep.subr.mxu1 %v5076_v0 }
  0x49   : > { %4757 = vmatmul.mubr.msk.f32.vlgmr.msra.gmra.mrb[26].mxu0 %vm260_vm1, %v190_v55  ;;  %4762 = vmatmul.mubr.msk.f32.vlgmr.msra.gmra.mrb[26].mxu1 %vm260_vm1, %v191_v56 }
  0x4a   : > { %4765 = vmatpush3.xpose.msk.msra.mxu0 %vm260_vm1, %v240_v57  ;;  %4770 = vmatpush3.xpose.msk.msra.mxu1 %vm260_vm1, %v241_v58 }
  0x4b   : > { %4766 = vmatprep.mubr.msk.f32.mxu0 %vm5077_vm0, %v5076_v0  ;;  %4771 = vmatprep.mubr.msk.f32.mxu1 %vm5077_vm0, %v5076_v0 }
  0x4c   : > { %4774 = vmatprep.subr.mxu0 %v5076_v0  ;;  %4779 = vmatprep.subr.mxu1 %v5076_v0 }
  0x4d   : > { %4767 = vmatmul.mubr.msk.f32.vlgmr.msra.gmra.mrb[28].mxu0 %vm260_vm1, %v192_v59  ;;  %4772 = vmatmul.mubr.msk.f32.vlgmr.msra.gmra.mrb[28].mxu1 %vm260_vm1, %v193_v60 }
  0x4e   : > { %4775 = vmatpush3.xpose.msk.msra.mxu0 %vm260_vm1, %v242_v61  ;;  %4780 = vmatpush3.xpose.msk.msra.mxu1 %vm260_vm1, %v243_v62 }
  0x4f   : > { %4776 = vmatprep.mubr.msk.f32.mxu0 %vm5077_vm0, %v5076_v0  ;;  %4781 = vmatprep.mubr.msk.f32.mxu1 %vm5077_vm0, %v5076_v0 }
  0x50   : > { %4784 = vmatprep.subr.mxu0 %v5076_v0  ;;  %4789 = vmatprep.subr.mxu1 %v5076_v0 }
  0x51   : > { %4777 = vmatmul.mubr.msk.f32.vlgmr.msra.gmra.mrb[30].mxu0 %vm260_vm1, %v194_v63  ;;  %4782 = vmatmul.mubr.msk.f32.vlgmr.msra.gmra.mrb[30].mxu1 %vm260_vm1, %v195_v1 }
  0x52   : > { %4785 = vmatpush3.xpose.msk.msra.mxu0 %vm260_vm1, %v244_v2  ;;  %4790 = vmatpush3.xpose.msk.msra.mxu1 %vm260_vm1, %v245_v3 }
  0x53   : > { %4786 = vmatprep.mubr.msk.f32.mxu0 %vm5077_vm0, %v5076_v0  ;;  %4791 = vmatprep.mubr.msk.f32.mxu1 %vm5077_vm0, %v5076_v0 }
  0x54   : > { %4794 = vmatprep.subr.mxu0 %v5076_v0  ;;  %4799 = vmatprep.subr.mxu1 %v5076_v0 }
  0x55   : > { %4787 = vmatmul.mubr.msk.f32.vlgmr.msra.gmra.mrb[32].mxu0 %vm260_vm1, %v196_v4  ;;  %4792 = vmatmul.mubr.msk.f32.vlgmr.msra.gmra.mrb[32].mxu1 %vm260_vm1, %v197_v5 }
  0x56   : > { %4795 = vmatpush3.xpose.msk.msra.mxu0 %vm260_vm1, %v246_v6  ;;  %4800 = vmatpush3.xpose.msk.msra.mxu1 %vm260_vm1, %v247_v7 }
  0x57   : > { %4796 = vmatprep.mubr.msk.f32.mxu0 %vm5077_vm0, %v5076_v0  ;;  %4801 = vmatprep.mubr.msk.f32.mxu1 %vm5077_vm0, %v5076_v0 }
  0x58   : > { %4804 = vmatprep.subr.mxu0 %v5076_v0  ;;  %4809 = vmatprep.subr.mxu1 %v5076_v0 }
  0x59   : > { %4797 = vmatmul.mubr.msk.f32.vlgmr.msra.gmra.mrb[34].mxu0 %vm260_vm1, %v198_v8  ;;  %4802 = vmatmul.mubr.msk.f32.vlgmr.msra.gmra.mrb[34].mxu1 %vm260_vm1, %v199_v9 }
  0x5a   : > { %4805 = vmatpush3.xpose.msk.msra.mxu0 %vm260_vm1, %v248_v10  ;;  %4810 = vmatpush3.xpose.msk.msra.mxu1 %vm260_vm1, %v249_v11 }
  0x5b   : > { %4806 = vmatprep.mubr.msk.f32.mxu0 %vm5077_vm0, %v5076_v0  ;;  %4811 = vmatprep.mubr.msk.f32.mxu1 %vm5077_vm0, %v5076_v0 }
  0x5c   : > { %4814 = vmatprep.subr.mxu0 %v5076_v0  ;;  %4819 = vmatprep.subr.mxu1 %v5076_v0 }
  0x5d   : > { %4807 = vmatmul.mubr.msk.f32.vlgmr.msra.gmra.mrb[36].mxu0 %vm260_vm1, %v200_v12  ;;  %4812 = vmatmul.mubr.msk.f32.vlgmr.msra.gmra.mrb[36].mxu1 %vm260_vm1, %v201_v13 }
  0x5e   : > { %4815 = vmatpush3.xpose.msk.msra.mxu0 %vm260_vm1, %v250_v14  ;;  %4820 = vmatpush3.xpose.msk.msra.mxu1 %vm260_vm1, %v251_v15 }
  0x5f   : > { %4816 = vmatprep.mubr.msk.f32.mxu0 %vm5077_vm0, %v5076_v0  ;;  %4821 = vmatprep.mubr.msk.f32.mxu1 %vm5077_vm0, %v5076_v0 }
  0x60   : > { %4824 = vmatprep.subr.mxu0 %v5076_v0  ;;  %4829 = vmatprep.subr.mxu1 %v5076_v0 }
  0x61   : > { %4817 = vmatmul.mubr.msk.f32.vlgmr.msra.gmra.mrb[38].mxu0 %vm260_vm1, %v202_v16  ;;  %4822 = vmatmul.mubr.msk.f32.vlgmr.msra.gmra.mrb[38].mxu1 %vm260_vm1, %v203_v17 }
  0x62   : > { %4825 = vmatpush3.xpose.msk.msra.mxu0 %vm260_vm1, %v252_v18  ;;  %4830 = vmatpush3.xpose.msk.msra.mxu1 %vm260_vm1, %v253_v19 }
  0x63   : > { %4826 = vmatprep.mubr.msk.f32.mxu0 %vm5077_vm0, %v5076_v0  ;;  %4831 = vmatprep.mubr.msk.f32.mxu1 %vm5077_vm0, %v5076_v0 }
  0x64   : > { %4834 = vmatprep.subr.mxu0 %v5076_v0  ;;  %4839 = vmatprep.subr.mxu1 %v5076_v0 }
  0x65   : > { %4827 = vmatmul.mubr.msk.f32.vlgmr.msra.gmra.mrb[40].mxu0 %vm260_vm1, %v204_v20  ;;  %4832 = vmatmul.mubr.msk.f32.vlgmr.msra.gmra.mrb[40].mxu1 %vm260_vm1, %v205_v21 }
  0x66   : > { %4835 = vmatpush3.xpose.msk.msra.mxu0 %vm260_vm1, %v254_v22  ;;  %4840 = vmatpush3.xpose.msk.msra.mxu1 %vm260_vm1, %v255_v23 }
  0x67   : > { %4836 = vmatprep.mubr.msk.f32.mxu0 %vm5077_vm0, %v5076_v0  ;;  %4841 = vmatprep.mubr.msk.f32.mxu1 %vm5077_vm0, %v5076_v0 }
  0x68   : > { %4844 = vmatprep.subr.mxu0 %v5076_v0  ;;  %4849 = vmatprep.subr.mxu1 %v5076_v0 }
  0x69   : > { %4837 = vmatmul.mubr.msk.f32.vlgmr.msra.gmra.mrb[42].mxu0 %vm260_vm1, %v206_v24  ;;  %4842 = vmatmul.mubr.msk.f32.vlgmr.msra.gmra.mrb[42].mxu1 %vm260_vm1, %v207_v25 }
  0x6a   : > { %4845 = vmatpush3.xpose.msk.msra.mxu0 %vm260_vm1, %v256_v26  ;;  %4850 = vmatpush3.xpose.msk.msra.mxu1 %vm260_vm1, %v257_v27 }
  0x6b   : > { %4846 = vmatprep.mubr.msk.f32.mxu0 %vm5077_vm0, %v5076_v0  ;;  %4851 = vmatprep.mubr.msk.f32.mxu1 %vm5077_vm0, %v5076_v0 }
  0x6c   : > { %4854 = vmatprep.subr.mxu0 %v5076_v0  ;;  %4859 = vmatprep.subr.mxu1 %v5076_v0 }
  0x6d   : > { %4847 = vmatmul.mubr.msk.f32.vlgmr.msra.gmra.mrb[44].mxu0 %vm260_vm1, %v208_v28  ;;  %4852 = vmatmul.mubr.msk.f32.vlgmr.msra.gmra.mrb[44].mxu1 %vm260_vm1, %v209_v29 }
  0x6e   : > { %4855 = vmatpush3.xpose.msk.msra.mxu0 %vm260_vm1, %v258_v30  ;;  %4860 = vmatpush3.xpose.msk.msra.mxu1 %vm260_vm1, %v259_v31 }
  0x6f   : > { %4856 = vmatprep.mubr.msk.f32.mxu0 %vm5077_vm0, %v5076_v0  ;;  %4861 = vmatprep.mubr.msk.f32.mxu1 %vm5077_vm0, %v5076_v0 }
  0x71   : > { %4857 = vmatmul.mubr.msk.f32.vlgmr.msra.gmra.mrb[46].mxu0 %vm260_vm1, %v210_v32  ;;  %4862 = vmatmul.mubr.msk.f32.vlgmr.msra.gmra.mrb[46].mxu1 %vm260_vm1, %v211_v33 }
  0xe8   : > { %v333_v34 = vpop.f32.mrb[0].mxu0  ;;  %v409_v35 = vpop.f32.mrb[0].mxu1 }
  0xe9   : > { %v4478_v36 = vmul.f32 -1.442695, %v333_v34  ;;  %v4479_v37 = vmul.f32 -1.442695, %v409_v35  ;;  %v4628_v38 = vpop.f32.mrb[1].mxu0  ;;  %v4633_v39 = vpop.f32.mrb[1].mxu1 }
  0xeb   : > { %4876 = vpow2.f32 %v4478_v36 }
  0xec   : > { %4878 = vpow2.f32 %v4479_v37  ;;  %v485_v40 = vpop.f32.mrb[2].mxu0  ;;  %v561_v41 = vpop.f32.mrb[2].mxu1 }
  0xed   : > { %v4480_v42 = vmul.f32 -1.442695, %v485_v40  ;;  %v4481_v43 = vmul.f32 -1.442695, %v561_v41  ;;  %v4638_v44 = vpop.f32.mrb[3].mxu0  ;;  %v4643_v45 = vpop.f32.mrb[3].mxu1 }
  0xef   : > { %4880 = vpow2.f32 %v4480_v42 }
  0xf0   : > { %4882 = vpow2.f32 %v4481_v43  ;;  %v637_v0 = vpop.f32.mrb[4].mxu0  ;;  %v713_v46 = vpop.f32.mrb[4].mxu1 }
  0xf1   : > { %v4482_v47 = vmul.f32 -1.442695, %v637_v0  ;;  %v4483_v48 = vmul.f32 -1.442695, %v713_v46  ;;  %v4648_v49 = vpop.f32.mrb[5].mxu0  ;;  %v4653_v50 = vpop.f32.mrb[5].mxu1 }
  0xf3   : > { %4884 = vpow2.f32 %v4482_v47 }
  0xf4   : > { %4886 = vpow2.f32 %v4483_v48  ;;  %v789_v51 = vpop.f32.mrb[6].mxu0  ;;  %v865_v52 = vpop.f32.mrb[6].mxu1 }
  0xf5   : > { %v4877_v53 = vpop.eup %4876  ;;  %v4484_v54 = vmul.f32 -1.442695, %v789_v51  ;;  %v4658_v55 = vpop.f32.mrb[7].mxu0  ;;  %v4485_v59 = vmul.f32 -1.442695, %v865_v52 }
  0xf6   : > { %v4663_v56 = vpop.f32.mrb[7].mxu1  ;;  %v4879_v57 = vpop.eup %4878  ;;  %v4053_v58 = vadd.f32 1.0, %v4877_v53 }
  0xf7   : > { %4888 = vpow2.f32 %v4484_v54  ;;  %v4054_v60 = vadd.f32 1.0, %v4879_v57 }
  0xf8   : > { %v941_v61 = vpop.f32.mrb[8].mxu0  ;;  %v1017_v62 = vpop.f32.mrb[8].mxu1  ;;  %4890 = vrcp.f32 %v4053_v58 }
  0xf9   : > { %v4881_v63 = vpop.eup %4880  ;;  %v4486_v1 = vmul.f32 -1.442695, %v941_v61  ;;  %v4668_v2 = vpop.f32.mrb[9].mxu0  ;;  %4892 = vpow2.f32 %v4485_v59  ;;  %v4487_v6 = vmul.f32 -1.442695, %v1017_v62 }
  0xfa   : > { %v4673_v3 = vpop.f32.mrb[9].mxu1  ;;  %v4883_v4 = vpop.eup %4882  ;;  %v4055_v5 = vadd.f32 1.0, %v4881_v63 }
  0xfb   : > { %4894 = vpow2.f32 %v4486_v1  ;;  %v4056_v7 = vadd.f32 1.0, %v4883_v4 }
  0xfc   : > { %4896 = vrcp.f32 %v4054_v60  ;;  %v1093_v8 = vpop.f32.mrb[10].mxu0  ;;  %v1169_v9 = vpop.f32.mrb[10].mxu1 }
  0xfd   : > { %v4885_v10 = vpop.eup %4884  ;;  %4898 = vrcp.f32 %v4055_v5  ;;  %v4488_v11 = vmul.f32 -1.442695, %v1093_v8  ;;  %v4678_v12 = vpop.f32.mrb[11].mxu0  ;;  %v4489_v16 = vmul.f32 -1.442695, %v1169_v9 }
  0xfe   : > { %v4683_v13 = vpop.f32.mrb[11].mxu1  ;;  %v4887_v14 = vpop.eup %4886  ;;  %v4057_v15 = vadd.f32 1.0, %v4885_v10  ;;  %4900 = vpow2.f32 %v4487_v6 }
  0xff   : > { %4902 = vpow2.f32 %v4488_v11  ;;  %v4058_v17 = vadd.f32 1.0, %v4887_v14 }
 0x100   : > { %4904 = vrcp.f32 %v4056_v7  ;;  %v1245_v18 = vpop.f32.mrb[12].mxu0  ;;  %v1321_v19 = vpop.f32.mrb[12].mxu1 }
 0x101   : > { %v4889_v20 = vpop.eup %4888  ;;  %4906 = vrcp.f32 %v4057_v15  ;;  %v4490_v21 = vmul.f32 -1.442695, %v1245_v18  ;;  %v4491_v22 = vmul.f32 -1.442695, %v1321_v19  ;;  %v4688_v23 = vpop.f32.mrb[13].mxu0 }
 0x102   : > { %v4693_v24 = vpop.f32.mrb[13].mxu1  ;;  %v4059_v25 = vadd.f32 1.0, %v4889_v20  ;;  %4908 = vpow2.f32 %v4489_v16  ;;  %v5450_v26 = vpop.eup %4890 }
 0x103   : > { %4910 = vpow2.f32 %v4490_v21  ;;  %v4893_v27 = vpop.eup %4892 }
 0x104   : > { %4912 = vrcp.f32 %v4058_v17  ;;  %v1397_v28 = vpop.f32.mrb[14].mxu0  ;;  %v1473_v29 = vpop.f32.mrb[14].mxu1  ;;  %v4060_v31 = vadd.f32 1.0, %v4893_v27 }
 0x105   : > { %v4895_v30 = vpop.eup %4894  ;;  %4914 = vpow2.f32 %v4491_v22  ;;  %v4492_v32 = vmul.f32 -1.442695, %v1397_v28  ;;  %v4698_v33 = vpop.f32.mrb[15].mxu0  ;;  %v4493_v36 = vmul.f32 -1.442695, %v1473_v29 }
 0x106   : > { %v5452_v34 = vpop.eup %4896  ;;  %4916 = vrcp.f32 %v4059_v25  ;;  %v4061_v35 = vadd.f32 1.0, %v4895_v30  ;;  %v4703_v37 = vpop.f32.mrb[15].mxu1 }
 0x107   : > { %v5454_v38 = vpop.eup %4898  ;;  %4918 = vrcp.f32 %v4060_v31 }
 0x108   : > { %v4901_v39 = vpop.eup %4900  ;;  %4920 = vrcp.f32 %v4061_v35  ;;  %v1549_v40 = vpop.f32.mrb[16].mxu0 }
 0x109   : > { %v1625_v41 = vpop.f32.mrb[16].mxu1  ;;  %v4903_v42 = vpop.eup %4902  ;;  %v4062_v43 = vadd.f32 1.0, %v4901_v39  ;;  %4922 = vpow2.f32 %v4492_v32  ;;  %v4494_v44 = vmul.f32 -1.442695, %v1549_v40 }
 0x10a   : > { %v4708_v45 = vpop.f32.mrb[17].mxu0  ;;  %v5456_v0 = vpop.eup %4904  ;;  %v4063_v46 = vadd.f32 1.0, %v4903_v42  ;;  %4924 = vpow2.f32 %v4493_v36  ;;  %v4495_v47 = vmul.f32 -1.442695, %v1625_v41  ;;  %v4198_v36 = vsel %vm4197_vm2, %v5450_v26, 0.0 }
 0x10b   : > { %v4713_v48 = vpop.f32.mrb[17].mxu1  ;;  %v5458_v49 = vpop.eup %4906  ;;  %4926 = vrcp.f32 %v4062_v43  ;;  %v4205_v45 = vsel %vm4197_vm2, %v5452_v34, 0.0 }
 0x10c   : > { %v4909_v50 = vpop.eup %4908  ;;  %4928 = vrcp.f32 %v4063_v46  ;;  %v1701_v51 = vpop.f32.mrb[18].mxu0 }
 0x10d   : > { %v1777_v52 = vpop.f32.mrb[18].mxu1  ;;  %v4911_v53 = vpop.eup %4910  ;;  %v4064_v54 = vadd.f32 1.0, %v4909_v50  ;;  %4930 = vpow2.f32 %v4494_v44  ;;  %v4496_v55 = vmul.f32 -1.442695, %v1701_v51 }
 0x10e   : > { %v4718_v56 = vpop.f32.mrb[19].mxu0  ;;  %v5460_v57 = vpop.eup %4912  ;;  %v4065_v58 = vadd.f32 1.0, %v4911_v53  ;;  %4932 = vpow2.f32 %v4495_v47  ;;  %v4497_v61 = vmul.f32 -1.442695, %v1777_v52 }
 0x10f   : > { %v4723_v59 = vpop.f32.mrb[19].mxu1  ;;  %v4915_v60 = vpop.eup %4914  ;;  %4934 = vrcp.f32 %v4064_v54 }
 0x110   : > { %v5462_v62 = vpop.eup %4916  ;;  %4936 = vrcp.f32 %v4065_v58  ;;  %v4066_v63 = vadd.f32 1.0, %v4915_v60  ;;  %v1853_v1 = vpop.f32.mrb[20].mxu0 }
 0x111   : > { %v1929_v2 = vpop.f32.mrb[20].mxu1  ;;  %v5464_v3 = vpop.eup %4918  ;;  %4938 = vpow2.f32 %v4496_v55  ;;  %v4498_v4 = vmul.f32 -1.442695, %v1853_v1 }
 0x112   : > { %v4499_v5 = vmul.f32 -1.442695, %v1929_v2  ;;  %v4728_v6 = vpop.f32.mrb[21].mxu0  ;;  %v4733_v7 = vpop.f32.mrb[21].mxu1  ;;  %4940 = vrcp.f32 %v4066_v63 }
 0x113   : > { %v5466_v8 = vpop.eup %4920  ;;  %4942 = vpow2.f32 %v4497_v61  ;;  %v4212_v61 = vsel %vm4197_vm2, %v5454_v38, 0.0 }
 0x114   : > { %v4923_v9 = vpop.eup %4922  ;;  %4944 = vpow2.f32 %v4498_v4  ;;  %v2005_v12 = vpop.f32.mrb[22].mxu0 }
 0x115   : > { %v4925_v10 = vpop.eup %4924  ;;  %v4067_v11 = vadd.f32 1.0, %v4923_v9  ;;  %v2081_v13 = vpop.f32.mrb[22].mxu1  ;;  %4946 = vpow2.f32 %v4499_v5  ;;  %v4500_v16 = vmul.f32 -1.442695, %v2005_v12  ;;  %v4219_v5 = vsel %vm4197_vm2, %v5456_v0, 0.0 }
 0x116   : > { %v5468_v14 = vpop.eup %4926  ;;  %v4068_v15 = vadd.f32 1.0, %v4925_v10  ;;  %v4501_v17 = vmul.f32 -1.442695, %v2081_v13  ;;  %v4738_v18 = vpop.f32.mrb[23].mxu0  ;;  %v4226_v0 = vsel %vm4197_vm2, %v5458_v49, 0.0 }
 0x117   : > { %v5470_v19 = vpop.eup %4928  ;;  %4948 = vrcp.f32 %v4067_v11  ;;  %v4743_v20 = vpop.f32.mrb[23].mxu1 }
 0x118   : > { %v4931_v21 = vpop.eup %4930  ;;  %4950 = vrcp.f32 %v4068_v15  ;;  %v2157_v24 = vpop.f32.mrb[24].mxu0 }
 0x119   : > { %v4933_v22 = vpop.eup %4932  ;;  %v4069_v23 = vadd.f32 1.0, %v4931_v21  ;;  %4952 = vpow2.f32 %v4500_v16  ;;  %v2233_v25 = vpop.f32.mrb[24].mxu1  ;;  %v4502_v29 = vmul.f32 -1.442695, %v2157_v24  ;;  %v4233_v24 = vsel %vm4197_vm2, %v5460_v57, 0.0 }
 0x11a   : > { %v5472_v27 = vpop.eup %4934  ;;  %v4070_v28 = vadd.f32 1.0, %v4933_v22  ;;  %4954 = vpow2.f32 %v4501_v17  ;;  %v4503_v30 = vmul.f32 -1.442695, %v2233_v25  ;;  %v4748_v31 = vpop.f32.mrb[25].mxu0  ;;  %v4240_v57 = vsel %vm4197_vm2, %v5462_v62, 0.0 }
 0x11b   : > { %v4937_v32 = vpop.eup %4936  ;;  %4956 = vrcp.f32 %v4069_v23  ;;  %v4753_v33 = vpop.f32.mrb[25].mxu1 }
 0x11c   : > { %v4939_v35 = vpop.eup %4938  ;;  %v4199_v37 = vsel %vm4197_vm2, %v4937_v32, 0.0  ;;  %4958 = vrcp.f32 %v4070_v28  ;;  %v2309_v42 = vpop.f32.mrb[26].mxu0 }
 0x11d   : > { %v4941_v39 = vpop.eup %4940  ;;  %v5477_v40 = vadd.f32 %v4199_v37, %v4198_v36  ;;  %v4071_v41 = vadd.f32 1.0, %v4939_v35  ;;  %4960 = vpow2.f32 %v4502_v29  ;;  %v2385_v43 = vpop.f32.mrb[26].mxu1  ;;  %v4504_v47 = vmul.f32 -1.442695, %v2309_v42 }
 0x11e   : > { %v4943_v44 = vpop.eup %4942  ;;  %v4206_v46 = vsel %vm4197_vm2, %v4941_v39, 0.0  ;;  %4962 = vpow2.f32 %v4503_v30  ;;  %v4758_v48 = vpop.f32.mrb[27].mxu0  ;;  %v4505_v55 = vmul.f32 -1.442695, %v2385_v43 }
 0x11f   : > { %v4945_v26 = vpop.eup %4944  ;;  %v5482_v50 = vadd.f32 %v4206_v46, %v4205_v45  ;;  %4964 = vrcp.f32 %v4071_v41  ;;  %v4072_v51 = vadd.f32 1.0, %v4943_v44  ;;  %v4763_v52 = vpop.f32.mrb[27].mxu1 }
 0x120   : > { %v4947_v53 = vpop.eup %4946  ;;  %v4073_v54 = vadd.f32 1.0, %v4945_v26  ;;  %4966 = vpow2.f32 %v4504_v47  ;;  %v2461_v59 = vpop.f32.mrb[28].mxu0  ;;  %v4254_v52 = vsel %vm4197_vm2, %v5466_v8, 0.0 }
 0x121   : > { %v4949_v56 = vpop.eup %4948  ;;  %4968 = vrcp.f32 %v4072_v51  ;;  %v4074_v58 = vadd.f32 1.0, %v4947_v53  ;;  %v2537_v34 = vpop.f32.mrb[28].mxu1  ;;  %v4506_v1 = vmul.f32 -1.442695, %v2461_v59  ;;  %v4247_v51 = vsel %vm4197_vm2, %v5464_v3, 0.0 }
 0x122   : > { %v4951_v60 = vpop.eup %4950  ;;  %v4213_v63 = vsel %vm4197_vm2, %v4949_v56, 0.0  ;;  %4970 = vrcp.f32 %v4073_v54  ;;  %v4768_v2 = vpop.f32.mrb[29].mxu0  ;;  %v4507_v38 = vmul.f32 -1.442695, %v2537_v34  ;;  %v4261_v54 = vsel %vm4197_vm2, %v5468_v14, 0.0 }
 0x123   : > { %v4953_v4 = vpop.eup %4952  ;;  %v5489_v6 = vadd.f32 %v4213_v63, %v4212_v61  ;;  %v4220_v7 = vsel %vm4197_vm2, %v4951_v60, 0.0  ;;  %4972 = vrcp.f32 %v4074_v58  ;;  %v4773_v9 = vpop.f32.mrb[29].mxu1 }
 0x124   : > { %v4955_v10 = vpop.eup %4954  ;;  %v5492_v11 = vadd.f32 %v4220_v7, %v4219_v5  ;;  %v4075_v12 = vadd.f32 1.0, %v4953_v4  ;;  %4974 = vpow2.f32 %v4505_v55  ;;  %v2613_v16 = vpop.f32.mrb[30].mxu0 }
 0x125   : > { %v4957_v13 = vpop.eup %4956  ;;  %v4076_v15 = vadd.f32 1.0, %v4955_v10  ;;  %4976 = vpow2.f32 %v4506_v1  ;;  %v2689_v17 = vpop.f32.mrb[30].mxu1  ;;  %v4508_v21 = vmul.f32 -1.442695, %v2613_v16  ;;  %v4268_v10 = vsel %vm4197_vm2, %v5470_v19, 0.0 }
 0x126   : > { %v4959_v18 = vpop.eup %4958  ;;  %v4227_v20 = vsel %vm4197_vm2, %v4957_v13, 0.0  ;;  %4978 = vrcp.f32 %v4075_v12  ;;  %v4778_v22 = vpop.f32.mrb[31].mxu0  ;;  %v4509_v49 = vmul.f32 -1.442695, %v2689_v17  ;;  %v4275_v12 = vsel %vm4197_vm2, %v5472_v27, 0.0 }
 0x127   : > { %v4961_v23 = vpop.eup %4960  ;;  %v5499_v25 = vadd.f32 %v4227_v20, %v4226_v0  ;;  %v4234_v28 = vsel %vm4197_vm2, %v4959_v18, 0.0  ;;  %4980 = vrcp.f32 %v4076_v15  ;;  %v4783_v29 = vpop.f32.mrb[31].mxu1 }
 0x128   : > { %v4963_v30 = vpop.eup %4962  ;;  %v5502_v31 = vadd.f32 %v4234_v28, %v4233_v24  ;;  %v4077_v32 = vadd.f32 1.0, %v4961_v23  ;;  %4982 = vpow2.f32 %v4507_v38  ;;  %v2765_v36 = vpop.f32.mrb[32].mxu0 }
 0x129   : > { %v4965_v33 = vpop.eup %4964  ;;  %v4078_v35 = vadd.f32 1.0, %v4963_v30  ;;  %4984 = vpow2.f32 %v4508_v21  ;;  %v2841_v37 = vpop.f32.mrb[32].mxu1  ;;  %v4510_v42 = vmul.f32 -1.442695, %v2765_v36 }
 0x12a   : > { %v4967_v39 = vpop.eup %4966  ;;  %v4241_v41 = vsel %vm4197_vm2, %v4965_v33, 0.0  ;;  %4986 = vrcp.f32 %v4077_v32  ;;  %v4788_v43 = vpop.f32.mrb[33].mxu0  ;;  %v4511_v47 = vmul.f32 -1.442695, %v2841_v37 }
 0x12b   : > { %v4969_v44 = vpop.eup %4968  ;;  %v5507_v45 = vadd.f32 %v4241_v41, %v4240_v57  ;;  %4988 = vrcp.f32 %v4078_v35  ;;  %v4079_v46 = vadd.f32 1.0, %v4967_v39  ;;  %v4793_v48 = vpop.f32.mrb[33].mxu1 }
 0x12c   : > { %v4971_v26 = vpop.eup %4970  ;;  %v4248_v62 = vsel %vm4197_vm2, %v4969_v44, 0.0  ;;  %4990 = vpow2.f32 %v4509_v49  ;;  %v2917_v58 = vpop.f32.mrb[34].mxu0 }
 0x12d   : > { %v4973_v53 = vpop.eup %4972  ;;  %v5516_v55 = vadd.f32 %v4248_v62, %v4247_v51  ;;  %v4255_v56 = vsel %vm4197_vm2, %v4971_v26, 0.0  ;;  %4992 = vrcp.f32 %v4079_v46  ;;  %v2993_v59 = vpop.f32.mrb[34].mxu1  ;;  %v4512_v8 = vmul.f32 -1.442695, %v2917_v58 }
 0x12e   : > { %v4975_v34 = vpop.eup %4974  ;;  %v5519_v60 = vadd.f32 %v4255_v56, %v4254_v52  ;;  %v4262_v3 = vsel %vm4197_vm2, %v4973_v53, 0.0  ;;  %4994 = vpow2.f32 %v4510_v42  ;;  %v4798_v61 = vpop.f32.mrb[35].mxu0  ;;  %v4513_v4 = vmul.f32 -1.442695, %v2993_v59 }
 0x12f   : > { %v4803_v63 = vpop.f32.mrb[35].mxu1  ;;  %v4977_v1 = vpop.eup %4976  ;;  %v5522_v2 = vadd.f32 %v4262_v3, %v4261_v54  ;;  %v4080_v14 = vadd.f32 1.0, %v4975_v34  ;;  %4996 = vpow2.f32 %v4511_v47 }
 0x130   : > { %v4979_v5 = vpop.eup %4978  ;;  %v4081_v7 = vadd.f32 1.0, %v4977_v1  ;;  %4998 = vpow2.f32 %v4512_v8  ;;  %v3069_v13 = vpop.f32.mrb[36].mxu0 }
 0x131   : > { %v4981_v9 = vpop.eup %4980  ;;  %v4269_v38 = vsel %vm4197_vm2, %v4979_v5, 0.0  ;;  %5000 = vrcp.f32 %v4080_v14  ;;  %v3145_v15 = vpop.f32.mrb[36].mxu1  ;;  %v4514_v0 = vmul.f32 -1.442695, %v3069_v13 }
 0x132   : > { %v4983_v16 = vpop.eup %4982  ;;  %v5529_v17 = vadd.f32 %v4269_v38, %v4268_v10  ;;  %v4276_v18 = vsel %vm4197_vm2, %v4981_v9, 0.0  ;;  %5002 = vrcp.f32 %v4081_v7  ;;  %v4808_v20 = vpop.f32.mrb[37].mxu0  ;;  %v4515_v27 = vmul.f32 -1.442695, %v3145_v15 }
 0x133   : > { %v4813_v21 = vpop.f32.mrb[37].mxu1  ;;  %v4985_v22 = vpop.eup %4984  ;;  %v5532_v23 = vadd.f32 %v4276_v18, %v4275_v12  ;;  %v4082_v19 = vadd.f32 1.0, %v4983_v16  ;;  %5004 = vpow2.f32 %v4513_v4 }
 0x134   : > { %v4987_v24 = vpop.eup %4986  ;;  %v4083_v28 = vadd.f32 1.0, %v4985_v22  ;;  %5006 = vpow2.f32 %v4514_v0  ;;  %v3221_v32 = vpop.f32.mrb[38].mxu0 }
 0x135   : > { %v4989_v29 = vpop.eup %4988  ;;  %v4201_v30 = vsel %vm4197_vm2, %v4987_v24, 0.0  ;;  %5008 = vrcp.f32 %v4082_v19  ;;  %v3297_v49 = vpop.f32.mrb[38].mxu1  ;;  %v4516_v37 = vmul.f32 -1.442695, %v3221_v32 }
 0x136   : > { %v4991_v33 = vpop.eup %4990  ;;  %v5536_v35 = vadd.f32 %v4201_v30, %v5477_v40  ;;  %v4208_v36 = vsel %vm4197_vm2, %v4989_v29, 0.0  ;;  %5010 = vrcp.f32 %v4083_v28  ;;  %v4818_v39 = vpop.f32.mrb[39].mxu0  ;;  %v4517_v44 = vmul.f32 -1.442695, %v3297_v49 }
 0x137   : > { %v4823_v57 = vpop.f32.mrb[39].mxu1  ;;  %v4993_v41 = vpop.eup %4992  ;;  %v5540_v42 = vadd.f32 %v4208_v36, %v5482_v50  ;;  %v4084_v43 = vadd.f32 1.0, %v4991_v33  ;;  %5012 = vpow2.f32 %v4515_v27 }
 0x138   : > { %v4995_v46 = vpop.eup %4994  ;;  %v4215_v47 = vsel %vm4197_vm2, %v4993_v41, 0.0  ;;  %5014 = vpow2.f32 %v4516_v37  ;;  %v3373_v51 = vpop.f32.mrb[40].mxu0 }
 0x139   : > { %v4997_v48 = vpop.eup %4996  ;;  %v5544_v40 = vadd.f32 %v4215_v47, %v5489_v6  ;;  %5016 = vrcp.f32 %v4084_v43  ;;  %v4085_v26 = vadd.f32 1.0, %v4995_v46  ;;  %v3449_v52 = vpop.f32.mrb[40].mxu1  ;;  %v4518_v50 = vmul.f32 -1.442695, %v3373_v51 }
 0x13a   : > { %v4999_v62 = vpop.eup %4998  ;;  %v4086_v53 = vadd.f32 1.0, %v4997_v48  ;;  %5018 = vpow2.f32 %v4517_v44  ;;  %v4828_v54 = vpop.f32.mrb[41].mxu0  ;;  %v4519_v59 = vmul.f32 -1.442695, %v3449_v52 }
 0x13b   : > { %v5001_v56 = vpop.eup %5000  ;;  %5020 = vrcp.f32 %v4085_v26  ;;  %v4087_v58 = vadd.f32 1.0, %v4999_v62  ;;  %v4833_v34 = vpop.f32.mrb[41].mxu1 }
 0x13c   : > { %v5003_v3 = vpop.eup %5002  ;;  %v4222_v8 = vsel %vm4197_vm2, %v5001_v56, 0.0  ;;  %5022 = vrcp.f32 %v4086_v53  ;;  %v3525_v1 = vpop.f32.mrb[42].mxu0 }
 0x13d   : > { %v5005_v6 = vpop.eup %5004  ;;  %v5548_v61 = vadd.f32 %v4222_v8, %v5492_v11  ;;  %v4229_v63 = vsel %vm4197_vm2, %v5003_v3, 0.0  ;;  %5024 = vrcp.f32 %v4087_v58  ;;  %v3601_v14 = vpop.f32.mrb[42].mxu1  ;;  %v4520_v9 = vmul.f32 -1.442695, %v3525_v1 }
 0x13e   : > { %v5007_v4 = vpop.eup %5006  ;;  %v5552_v5 = vadd.f32 %v4229_v63, %v5499_v25  ;;  %v4088_v7 = vadd.f32 1.0, %v5005_v6  ;;  %5026 = vpow2.f32 %v4518_v50  ;;  %v4838_v10 = vpop.f32.mrb[43].mxu0  ;;  %v4521_v15 = vmul.f32 -1.442695, %v3601_v14 }
 0x13f   : > { %v4843_v12 = vpop.f32.mrb[43].mxu1  ;;  %v5009_v38 = vpop.eup %5008  ;;  %v4089_v13 = vadd.f32 1.0, %v5007_v4  ;;  %5028 = vpow2.f32 %v4519_v59 }
 0x140   : > { %v5011_v11 = vpop.eup %5010  ;;  %v4236_v16 = vsel %vm4197_vm2, %v5009_v38, 0.0  ;;  %5030 = vrcp.f32 %v4088_v7  ;;  %v3677_v20 = vpop.f32.mrb[44].mxu0 }
 0x141   : > { %v5013_v18 = vpop.eup %5012  ;;  %v5556_v0 = vadd.f32 %v4236_v16, %v5502_v31  ;;  %v4243_v25 = vsel %vm4197_vm2, %v5011_v11, 0.0  ;;  %5032 = vrcp.f32 %v4089_v13  ;;  %v3753_v21 = vpop.f32.mrb[44].mxu1  ;;  %v4522_v24 = vmul.f32 -1.442695, %v3677_v20 }
 0x142   : > { %v5015_v22 = vpop.eup %5014  ;;  %v5560_v19 = vadd.f32 %v4243_v25, %v5507_v45  ;;  %v4090_v27 = vadd.f32 1.0, %v5013_v18  ;;  %5034 = vpow2.f32 %v4520_v9  ;;  %v4848_v28 = vpop.f32.mrb[45].mxu0  ;;  %v4523_v33 = vmul.f32 -1.442695, %v3753_v21 }
 0x143   : > { %v4853_v29 = vpop.f32.mrb[45].mxu1  ;;  %v5017_v30 = vpop.eup %5016  ;;  %v4091_v32 = vadd.f32 1.0, %v5015_v22  ;;  %5036 = vpow2.f32 %v4521_v15 }
 0x144   : > { %v5019_v49 = vpop.eup %5018  ;;  %v4250_v31 = vsel %vm4197_vm2, %v5017_v30, 0.0  ;;  %5038 = vrcp.f32 %v4090_v27  ;;  %v3829_v39 = vpop.f32.mrb[46].mxu0 }
 0x145   : > { %v5021_v36 = vpop.eup %5020  ;;  %v5564_v37 = vadd.f32 %v4250_v31, %v5516_v55  ;;  %5040 = vrcp.f32 %v4091_v32  ;;  %v4092_v45 = vadd.f32 1.0, %v5019_v49  ;;  %v3905_v57 = vpop.f32.mrb[46].mxu1  ;;  %v4524_v44 = vmul.f32 -1.442695, %v3829_v39 }
 0x146   : > { %v5023_v41 = vpop.eup %5022  ;;  %v4257_v43 = vsel %vm4197_vm2, %v5021_v36, 0.0  ;;  %5042 = vpow2.f32 %v4522_v24  ;;  %v4525_v46 = vmul.f32 -1.442695, %v3905_v57  ;;  %v4858_v47 = vpop.f32.mrb[47].mxu0 }
 0x147   : > { %v5025_v48 = vpop.eup %5024  ;;  %v5568_v26 = vadd.f32 %v4257_v43, %v5519_v60  ;;  %v4264_v51 = vsel %vm4197_vm2, %v5023_v41, 0.0  ;;  %5044 = vrcp.f32 %v4092_v45  ;;  %v4863_v55 = vpop.f32.mrb[47].mxu1 }
 0x148   : > { %v5027_v52 = vpop.eup %5026  ;;  %v5572_v62 = vadd.f32 %v4264_v51, %v5522_v2  ;;  %v4271_v53 = vsel %vm4197_vm2, %v5025_v48, 0.0  ;;  %5046 = vpow2.f32 %v4523_v33 }
 0x149   : > { %v5029_v50 = vpop.eup %5028  ;;  %v5576_v54 = vadd.f32 %v4271_v53, %v5529_v17  ;;  %v4093_v56 = vadd.f32 1.0, %v5027_v52  ;;  %5048 = vpow2.f32 %v4524_v44 }
 0x14a   : > { %v5031_v58 = vpop.eup %5030  ;;  %v4094_v60 = vadd.f32 1.0, %v5029_v50  ;;  %5050 = vpow2.f32 %v4525_v46 }
 0x14b   : > { %v5033_v59 = vpop.eup %5032  ;;  %v4278_v34 = vsel %vm4197_vm2, %v5031_v58, 0.0  ;;  %5052 = vrcp.f32 %v4093_v56 }
 0x14c   : > { %v5035_v3 = vpop.eup %5034  ;;  %v5581_v2 = vadd.f32 %v4278_v34, %v5532_v23  ;;  %v4203_v8 = vsel %vm4197_vm2, %v5033_v59, 0.0  ;;  %5054 = vrcp.f32 %v4094_v60 }
 0x14d   : > { %v5037_v6 = vpop.eup %5036  ;;  %v4204_v17 = vadd.f32 %v4203_v8, %v5536_v35  ;;  %v4095_v63 = vadd.f32 1.0, %v5035_v3 }
 0x14e   : > { %v5039_v1 = vpop.eup %5038  ;;  %v4096_v14 = vadd.f32 1.0, %v5037_v6 }
 0x14f   : > { %v5041_v4 = vpop.eup %5040  ;;  %v4283_v7 = vmul.f32 0.25, %v4204_v17  ;;  %v4210_v23 = vsel %vm4197_vm2, %v5039_v1, 0.0  ;;  %5056 = vrcp.f32 %v4095_v63 }
 0x150   : > { %v5043_v9 = vpop.eup %5042  ;;  %v4211_v10 = vadd.f32 %v4210_v23, %v5540_v42  ;;  %v4217_v35 = vsel %vm4197_vm2, %v5041_v4, 0.0  ;;  %5058 = vrcp.f32 %v4096_v14 }
 0x151   : > { %v5045_v12 = vpop.eup %5044  ;;  %4295 = vst.msk [vmem:[%s5588_s21] sm:$0xff] %vm4197_vm2, %v4283_v7  ;;  %v4218_v38 = vadd.f32 %v4217_v35, %v5544_v40  ;;  %v4097_v13 = vadd.f32 1.0, %v5043_v9 }
 0x152   : > { %v5047_v15 = vpop.eup %5046  ;;  %v4284_v11 = vmul.f32 0.25, %v4211_v10  ;;  %v4224_v16 = vsel %vm4197_vm2, %v5045_v12, 0.0 }
 0x153   : > { %v5049_v18 = vpop.eup %5048  ;;  %v4285_v25 = vmul.f32 0.25, %v4218_v38  ;;  %v4225_v42 = vadd.f32 %v4224_v16, %v5548_v61  ;;  %5060 = vrcp.f32 %v4097_v13  ;;  %v4098_v20 = vadd.f32 1.0, %v5047_v15 }
 0x154   : > { %v5051_v21 = vpop.eup %5050  ;;  %4296 = vst.msk [vmem:[%s5588_s21 + $0x8] sm:$0xff] %vm4197_vm2, %v4284_v11  ;;  %v4099_v22 = vadd.f32 1.0, %v5049_v18 }
 0x155   : > { %v5053_v27 = vpop.eup %5052  ;;  %4297 = vst.msk [vmem:[%s5588_s21 + $0x10] sm:$0xff] %vm4197_vm2, %v4285_v25  ;;  %v4286_v40 = vmul.f32 0.25, %v4225_v42  ;;  %5062 = vrcp.f32 %v4098_v20  ;;  %v4100_v24 = vadd.f32 1.0, %v5051_v21 }
 0x156   : > { %v5055_v28 = vpop.eup %5054  ;;  %v4231_v29 = vsel %vm4197_vm2, %v5053_v27, 0.0  ;;  %5064 = vrcp.f32 %v4099_v22 }
 0x157   : > { %4298 = vst.msk [vmem:[%s5588_s21 + $0x18] sm:$0xff] %vm4197_vm2, %v4286_v40  ;;  %v4232_v61 = vadd.f32 %v4231_v29, %v5552_v5  ;;  %v4238_v30 = vsel %vm4197_vm2, %v5055_v28, 0.0  ;;  %5066 = vrcp.f32 %v4100_v24 }
 0x158   : > { %v4239_v32 = vadd.f32 %v4238_v30, %v5556_v0 }
 0x159   : > { %v5057_v49 = vpop.eup %5056  ;;  %v4287_v31 = vmul.f32 0.25, %v4232_v61 }
 0x15a   : > { %v5059_v33 = vpop.eup %5058  ;;  %v4288_v36 = vmul.f32 0.25, %v4239_v32  ;;  %v4245_v45 = vsel %vm4197_vm2, %v5057_v49, 0.0 }
 0x15b   : > { %4299 = vst.msk [vmem:[%s5588_s21 + $0x20] sm:$0xff] %vm4197_vm2, %v4287_v31  ;;  %v4246_v39 = vadd.f32 %v4245_v45, %v5560_v19  ;;  %v4252_v57 = vsel %vm4197_vm2, %v5059_v33, 0.0 }
 0x15c   : > { %4300 = vst.msk [vmem:[%s5588_s21 + $0x28] sm:$0xff] %vm4197_vm2, %v4288_v36  ;;  %v4253_v5 = vadd.f32 %v4252_v57, %v5564_v37 }
 0x15d   : > { %v5061_v41 = vpop.eup %5060  ;;  %v4289_v0 = vmul.f32 0.25, %v4246_v39 }
 0x15e   : > { %v4290_v43 = vmul.f32 0.25, %v4253_v5  ;;  %v4259_v44 = vsel %vm4197_vm2, %v5061_v41, 0.0 }
 0x15f   : > { %v5063_v46 = vpop.eup %5062  ;;  %4301 = vst.msk [vmem:[%s5588_s21 + $0x30] sm:$0xff] %vm4197_vm2, %v4289_v0  ;;  %v4260_v47 = vadd.f32 %v4259_v44, %v5568_v26 }
 0x160   : > { %v5065_v19 = vpop.eup %5064  ;;  %4302 = vst.msk [vmem:[%s5588_s21 + $0x38] sm:$0xff] %vm4197_vm2, %v4290_v43  ;;  %v4266_v48 = vsel %vm4197_vm2, %v5063_v46, 0.0 }
 0x161   : > { %v5067_v37 = vpop.eup %5066  ;;  %v4291_v51 = vmul.f32 0.25, %v4260_v47  ;;  %v4267_v55 = vadd.f32 %v4266_v48, %v5572_v62  ;;  %v4273_v52 = vsel %vm4197_vm2, %v5065_v19, 0.0 }
 0x162   : > { %v4274_v53 = vadd.f32 %v4273_v52, %v5576_v54  ;;  %v4280_v50 = vsel %vm4197_vm2, %v5067_v37, 0.0 }
 0x163   : > { %4303 = vst.msk [vmem:[%s5588_s21 + $0x40] sm:$0xff] %vm4197_vm2, %v4291_v51  ;;  %v4292_v26 = vmul.f32 0.25, %v4267_v55  ;;  %v4281_v56 = vadd.f32 %v4280_v50, %v5581_v2 }
 0x164   : > { %v4293_v58 = vmul.f32 0.25, %v4274_v53 }
 0x165   : > { %4304 = vst.msk [vmem:[%s5588_s21 + $0x48] sm:$0xff] %vm4197_vm2, %v4292_v26  ;;  %v4294_v60 = vmul.f32 0.25, %v4281_v56 }
 0x166   : > { %4305 = vst.msk [vmem:[%s5588_s21 + $0x50] sm:$0xff] %vm4197_vm2, %v4293_v58 }
 0x167   : > { %4306 = vst.msk [vmem:[%s5588_s21 + $0x58] sm:$0xff] %vm4197_vm2, %v4294_v60 }
 0x168 PF: > { %s12_s9 = sadd.s32 1, %s5074_s9  }
 0x169   : > { %p9_p4 = scmp.ge.s32.totalorder %s12_s9, 4  }
 0x16b   :  { %11 = sbr.rel (!%p9_p4) target bundleno = 1 (0x1), region = 61 }

// kernel: st_block_2_forward.16
= control target key start
LH: loop header
LB: loop body
LE: loop exit
PB: predicated region body
PF: predicated region fallthrough
CT: control target
= control target key end

     0   :  { %8 = vsyncpa [#allocation3], 0  ;;  %s1751_s0 = inlined_call_operand.hbm [shape: f32[2,24,496], index: 0, kind: input, shape index: {}]   ;;  %s1752_s1 = inlined_call_operand.hbm [shape: f32[3,16,24], index: 1, kind: input, shape index: {}]   ;;  %s1753_s2 = inlined_call_operand.hbm [shape: f32[16,1], index: 2, kind: input, shape index: {}]   ;;  %s1754_s3 = inlined_call_operand.hbm [shape: f32[2,8,480], index: 3, kind: output, shape index: {}]  }
   0x1   :  { %10 = vsyncpa [#allocation3 + $0x1], 0 }
   0x2   :  { %11 = vsyncpa [#allocation6], 0 }
   0x3   :  { %12 = vsyncpa [#allocation4], 0 }
   0x4   :  { %14 = vsyncpa [#allocation4 + $0x1], 0  ;;  %s1398_s12 = smov 0   ;;  %s1400_s13 = smov 0  }
   0x5   :  { %s1402_s14 = smov 0   ;;  %s1404_s15 = smov 0  }
   0x6 LB: > { %s1419_s16 = sadd.s32 4294967295, %s1364_s15   ;;  %s1000_s17 = sadd.s32 4294967294, %s1364_s15   ;;  %s1364_s15 = sphi %s1404_s15, %s1774_s15   ;;  %s1360_s14 = sphi %s1402_s14, %s1773_s14   ;;  %s1356_s13 = sphi %s1400_s13, %s1772_s13   ;;  %s1352_s12 = sphi %s1398_s12, %s1771_s12  }
   0x7   : > { %p40_p0 = scmp.ne.s32.totalorder %s1356_s13, %s1352_s12  ;;  %p1755_p1 = scmp.eq.s32.totalorder %s1419_s16, 0 }
   0x8   : > { %p112_p3 = scmp.eq.s32.totalorder %s1000_s17, 1  ;;  %p1001_p5 = scmp.ge.s32.totalorder %s1364_s15, 1 }
   0x9   : > { %p1428_p4 = por %p1755_p1, %p40_p0  ;;  %p119_p7 = scmp.lt.s32.totalorder %s1364_s15, 3 }
   0xa   : > { %p1433_p6 = por %p112_p3, %p40_p0  ;;  %s1366_s21 = smov [#allocation5]  }
   0xb   : > { %s1758_s18 = scalar_select %p1428_p4, 1, 0 }
   0xc   : > { %s1759_s19 = scalar_select %p1433_p6, 1, 0 }
   0xd   : > { %p1438_p8 = pnand %p1001_p5, %p119_p7  ;;  %s131_s22 = sshll.u32 %s1366_s21, 4  ;;  %s1442_s22 = int_to_ptr.vmem [resolvable:$true] %s131_s22 }
   0xe   : > { %s1367_s24 = smov [#allocation7]   ;;  %s1208_s28 = scalar_lea.hbm %s1752_s1, 768 }
   0xf   : > { %p1087_p9 = pneg %p1438_p8  ;;  %s144_s25 = sshll.u32 %s1367_s24, 4  ;;  %s1453_s25 = int_to_ptr.vmem [resolvable:$true] %s144_s25 }
  0x10   : > { %p1209_p12 = scmp.ne.s32.totalorder %s1752_s1, %s1208_s28  ;;  %p1215_p5 = scmp.lt.u32.totalorder %s1208_s28, %s1752_s1 }
  0x11   : > { %p1449_p11 = pnand %p1087_p9, %p1755_p1 }
  0x13   : > { %p1210_p13 = pneg %p1449_p11 }
  0x15   : > { %p1211_p0 = pnand %p1210_p13, %p1209_p12 }
  0x17   : > { %p1212_p3 = pneg %p1211_p0 }
  0x19   : > { %p1217_p7 = pnand %p1215_p5, %p1212_p3 }
  0x1b   : > { %1220 = shalt.err (!%p1217_p7)
}
  0x1c   : > { %s1221_s6 = scalar_lea.vmem %s1442_s22, 768  ;;  %p1229_p2 = scmp.lt.s32.totalorder %s1442_s22, %s1442_s22 }
  0x1d   : > { %p1222_p9 = scmp.ne.s32.totalorder %s1442_s22, %s1221_s6  ;;  %p1230_p12 = scmp.lt.s32.totalorder %s1221_s6, %s1221_s6 }
  0x1f   : > { %p1224_p10 = pnand %p1222_p9, %p1210_p13  ;;  %p1231_p0 = por %p1230_p12, %p1229_p2 }
  0x21   : > { %p1225_p1 = pneg %p1224_p10 }
  0x23   : > { %p1232_p6 = pnand %p1231_p0, %p1225_p1 }
  0x25   : > { %1235 = shalt.err (!%p1232_p6)
}
  0x26   : > { %s1368_s7 = smov 128   ;;  %s1369_s8 = smov 8  }
  0x27   : > { %1090 = dma.hbm_to_vmem [thread:$0]  (!%p1449_p11), %s1752_s1, 768, %s1442_s22, [#allocation6], %s1368_s7, %s1368_s7, %s1369_s8  }
  0x28   : > { %s1236_s21 = scalar_lea.hbm %s1753_s2, 256 }
  0x29   : > { %p1237_p2 = scmp.ne.s32.totalorder %s1753_s2, %s1236_s21  ;;  %p1243_p10 = scmp.lt.u32.totalorder %s1236_s21, %s1753_s2 }
  0x2b   : > { %p1239_p1 = pnand %p1237_p2, %p1210_p13 }
  0x2d   : > { %p1240_p6 = pneg %p1239_p1 }
  0x2f   : > { %p1245_p3 = pnand %p1243_p10, %p1240_p6 }
  0x31   : > { %1248 = shalt.err (!%p1245_p3)
}
  0x32   : > { %s1249_s22 = scalar_lea.vmem %s1453_s25, 256  ;;  %p1257_p12 = scmp.lt.s32.totalorder %s1453_s25, %s1453_s25 }
  0x33   : > { %p1250_p5 = scmp.ne.s32.totalorder %s1453_s25, %s1249_s22  ;;  %p1258_p0 = scmp.lt.s32.totalorder %s1249_s22, %s1249_s22 }
  0x35   : > { %p1252_p7 = pnand %p1250_p5, %p1210_p13  ;;  %p1259_p2 = por %p1258_p0, %p1257_p12 }
  0x37   : > { %p1253_p9 = pneg %p1252_p7 }
  0x39   : > { %p1260_p1 = pnand %p1259_p2, %p1253_p9 }
  0x3b   : > { %1263 = shalt.err (!%p1260_p1)
}
  0x3c   : > { %1093 = dma.hbm_to_vmem [thread:$0]  (!%p1449_p11), %s1753_s2, 256, %s1453_s25, [#allocation6], %s1368_s7, %s1368_s7, %s1369_s8  }
  0x3d   : > { %s1508_s4 = sadd.s32 1, %s1364_s15   ;;  %s27_s23 = sadd.s32 1, %s1360_s14 }
  0x3e   : > { %s24_s5 = ssub.s32 %s1364_s15, %s1508_s4  ;;  %p34_p13 = scmp.ne.s32.totalorder %s1360_s14, %s1356_s13 }
  0x3f   : > { %p25_p6 = scmp.eq.s32.totalorder %s24_s5, 0  ;;  %p35_p10 = scmp.eq.s32.totalorder %s1364_s15, 0 }
  0x40   : > { %p1762_p3 = scmp.eq.s32.totalorder %s1419_s16, 1  ;;  %p1104_p7 = scmp.lt.s32.totalorder %s1364_s15, 2 }
  0x41   : > { %s1524_s9 = scalar_select %p25_p6, %s1360_s14, %s27_s23  }
  0x42   : > { %p1518_p5 = por %p1762_p3, %p34_p13  ;;  %p36_p9 = por %p35_p10, %p34_p13 }
  0x43   : > { %s158_s10 = sand.u32 1, %s1360_s14   ;;  %s1073_s25 = smul.u32 1536, %s1364_s15 }
  0x44   : > { %s1763_s6 = scalar_select %p1518_p5, 1, 0 }
  0x45   : > { %s1072_s11 = smul.u32 96, %s158_s10  ;;  %p1528_p11 = pnand %p1104_p7, %p36_p9 }
  0x46   : > { %s1535_s21 = scalar_lea.hbm %s1751_s0, %s1073_s25  ;;  %s1539_s27 = scalar_lea.sflag [#allocation3], %s158_s10 }
  0x47   : > { %s162_s24 = scalar_lea.vmem [#allocation2], %s1072_s11  ;;  %s1264_s28 = scalar_lea.hbm %s1535_s21, 1536 }
  0x48   : > { %s169_s26 = sshll.u32 %s162_s24, 4  ;;  %p1265_p12 = scmp.ne.s32.totalorder %s1535_s21, %s1264_s28  ;;  %s1537_s26 = int_to_ptr.vmem [resolvable:$true] %s169_s26 }
  0x49   : > { %p1266_p0 = pneg %p1528_p11  ;;  %s1269_s30 = scalar_lea.hbm %s1751_s0, 3072 }
  0x4a   : > { %p1270_p13 = scmp.lt.u32.totalorder %s1535_s21, %s1751_s0  ;;  %p1271_p6 = scmp.lt.u32.totalorder %s1269_s30, %s1264_s28 }
  0x4b   : > { %p1267_p2 = pnand %p1266_p0, %p1265_p12  ;;  %p1273_p3 = scmp.lt.u32.totalorder %s1264_s28, %s1535_s21 }
  0x4c   : > { %p1272_p10 = por %p1271_p6, %p1270_p13 }
  0x4d   : > { %p1268_p1 = pneg %p1267_p2 }
  0x4e   : > { %p1274_p7 = por %p1273_p3, %p1272_p10 }
  0x50   : > { %p1275_p9 = pnand %p1274_p7, %p1268_p1 }
  0x52   : > { %1278 = shalt.err (!%p1275_p9)
}
  0x53   : > { %s1279_s10 = scalar_lea.vmem %s1537_s26, 1536  ;;  %s1370_s11 = smov [#allocation2]  }
  0x54   : > { %p1280_p12 = scmp.ne.s32.totalorder %s1537_s26, %s1279_s10  ;;  %s1284_s25 = sshll.u32 %s1370_s11, 4  ;;  %s1285_s25 = int_to_ptr.vmem [resolvable:$false] %s1284_s25 }
  0x55   : > { %s1286_s8 = scalar_lea.vmem %s1285_s25, 3072  ;;  %p1287_p4 = scmp.lt.s32.totalorder %s1537_s26, %s1285_s25 }
  0x56   : > { %p1282_p2 = pnand %p1280_p12, %p1266_p0  ;;  %p1288_p13 = scmp.lt.s32.totalorder %s1286_s8, %s1279_s10 }
  0x58   : > { %p1283_p5 = pneg %p1282_p2  ;;  %p1289_p6 = por %p1288_p13, %p1287_p4 }
  0x5a   : > { %p1290_p10 = pnand %p1289_p6, %p1283_p5 }
  0x5c   : > { %1293 = shalt.err (!%p1290_p10)
}
  0x5d   : > { %s1371_s17 = smov 512   ;;  %s1372_s24 = smov 32  }
  0x5e   : > { %1097 = dma.hbm_to_vmem [thread:$0]  (!%p1528_p11), %s1535_s21, 1536, %s1537_s26, %s1539_s27, %s1371_s17, %s1371_s17, %s1372_s24  }
  0x5f   : > { %181 = sbr.rel (%p1438_p8) target bundleno = 518 (0x206), region = 32  ;;  %s1570_s28 = sand.u32 (!%p1438_p8), 1, %s1356_s13  }
  0x60   : > { %s1074_s22 = smul.u32 (!%p1438_p8), 96, %s1570_s28  ;;  %s184_s29 = scalar_lea.sflag (!%p1438_p8), [#allocation3], %s1570_s28 }
  0x61   : > { %p1765_p4 = scmp.ne.s32.totalorder (!%p1438_p8), %s1758_s18, 0 }
  0x62   : > { %s1574_s30 = scalar_lea.vmem (!%p1438_p8), [#allocation2], %s1074_s22 }
  0x66   : > { %1339 = dma.done.wait (%p1765_p4), %s184_s29, 1536  }
  0x67   : > { %1341 = vsyncadd (%p1765_p4), %s184_s29, 4294965760  ;;  %p1766_p5 = scmp.eq.s32.totalorder %s1419_s16, 0 }
  0x69   : > { %1343 = dma.done.wait (%p1766_p5), [#allocation6], 1024   ;;  %p1767_p8 = pmov %p1766_p5 }
  0x6a   : > { %v1585_v0 = vld [vmem:[%s1574_s30 + $0x8] sm:$0xff]  ;;  %v1588_v1 = vld [vmem:[%s1574_s30 + $0x10] sm:$0xff]  ;;  %v1598_v5 = vld [vmem:[%s1574_s30] sm:$0xff]  ;;  %s1373_s18 = smov 120   ;;  %v1374_v14 = vmov 0.0   ;;  %s1375_s20 = smov 112  }
  0x6b   : > { %1345 = vsyncadd (%p1767_p8), [#allocation6], 4294966272  ;;  %v1591_v2 = vld [vmem:[%s1574_s30 + $0x30] sm:$0xff]  ;;  %v1150_v4 = vpack.i.bf16 %v1588_v1, %v1585_v0  ;;  %v1601_v6 = vld [vmem:[%s1574_s30 + $0x18] sm:$0xff]  ;;  %441 = vmatprep.mubr.f32.mxu1 %v1374_v14  ;;  %364 = vmatprep.mubr.f32.mxu0 %v1374_v14  ;;  %v1376_v21 = vmov 0   ;;  %vm271_vm0 = vcmask 982016  }
  0x6c   : > { %v1046_v3 = vpack.c.bf16 %v1591_v2, %v1588_v1  ;;  %v1604_v7 = vld [vmem:[%s1574_s30 + $0x20] sm:$0xff]  ;;  %v1160_v8 = vpack.i.bf16 %v1601_v6, %v1598_v5  ;;  %v1611_v10 = vld [vmem:[%s1574_s30 + $0x28] sm:$0xff]  ;;  %v1614_v11 = vld [vmem:[%s1574_s30 + $0x38] sm:$0xff]  ;;  %1191 = vset.pattern.permute.xlu1 %v1376_v21  ;;  %1190 = vset.pattern.permute.xlu0 %v1376_v21  ;;  %vm293_vm1 = vcmask 195584   ;;  %vm641_vm2 = vcmask 916480   ;;  %s1009_s7 = sshll.u32 %s1570_s28, 5 }
  0x6d   : > { %v1042_v9 = vpack.c.bf16 %v1604_v7, %v1598_v5  ;;  %1151 = vrot.lane.b32.xlu0 %v1150_v4, %s1373_s18  ;;  %v1155_v12 = vpack.i.bf16 %v1591_v2, %v1611_v10  ;;  %v1165_v13 = vpack.i.bf16 %v1614_v11, %v1604_v7  ;;  %v1040_v15 = vpack.c.bf16 %v1611_v10, %v1585_v0  ;;  %v1627_v17 = vld [vmem:[%s1574_s30 + $0x48] sm:$0xff]  ;;  %v1630_v18 = vld [vmem:[%s1574_s30 + $0x50] sm:$0xff]  ;;  %v1635_v19 = vld [vmem:[%s1574_s30 + $0x40] sm:$0xff]  ;;  %s1031_s21 = sshll.u32 %s1419_s16, 9  ;;  %s217_s26 = scalar_lea.vmem [#allocation8], %s1009_s7 }
  0x6e   : > { %1161 = vrot.lane.b32.xlu1 %v1160_v8, %s1373_s18  ;;  %v1044_v16 = vpack.c.bf16 %v1614_v11, %v1601_v6  ;;  %v1638_v20 = vld [vmem:[%s1574_s30 + $0x58] sm:$0xff]  ;;  %v831_v23 = vld [vmem:[#allocation7] sm:$0xff]  ;;  %v218_v2 = vld [vmem:[#allocation5] sm:$0xff]  ;;  %s911_s27 = sshll.u32 %s217_s26, 4  ;;  %vm894_vm7 = vcmask 785408   ;;  %s1707_s10 = scalar_lea.hbm %s1754_s3, %s1031_s21  ;;  %s1709_s27 = int_to_ptr.vmem [resolvable:$true] %s911_s27 }
  0x6f   : > { %v832_v22 = vld [vmem:[#allocation7 + $0x8] sm:$0xff]  ;;  %v233_v52 = vld [vmem:[#allocation5 + $0x10] sm:$0xff]  ;;  %s897_s16 = scalar_lea.sflag [#allocation4], %s1570_s28  ;;  %s1294_s11 = scalar_lea.vmem %s1709_s27, 512 }
  0x70   : > { %v234_v58 = vld [vmem:[#allocation5 + $0x18] sm:$0xff]  ;;  %p1295_p11 = scmp.ne.s32.totalorder %s1709_s27, %s1294_s11  ;;  %p1768_p0 = scmp.ne.s32.totalorder %s1763_s6, 0 }
  0x71   : > { %1156 = vrot.lane.b32.xlu0 %v1155_v12, %s1373_s18  ;;  %s1377_s25 = smov [#allocation8]  }
  0x72   : > { %1166 = vrot.lane.b32.xlu1 %v1165_v13, %s1373_s18  ;;  %p1296_p1 = pnand %p1295_p11, %p1768_p0  ;;  %s1298_s8 = sshll.u32 %s1377_s25, 4  ;;  %s1299_s8 = int_to_ptr.vmem [resolvable:$false] %s1298_s8 }
  0x73   : > { %s1300_s17 = scalar_lea.vmem %s1299_s8, 1024  ;;  %p1301_p7 = scmp.lt.s32.totalorder %s1709_s27, %s1299_s8 }
  0x74   : > { %p1297_p3 = pneg %p1296_p1  ;;  %p1302_p9 = scmp.lt.s32.totalorder %s1300_s17, %s1294_s11 }
  0x75   : > { %265 = vrot.lane.b32.xlu0 %v1627_v17, %s1373_s18 }
  0x76   : > { %267 = vrot.lane.b32.xlu1 %v1630_v18, %s1373_s18  ;;  %p1303_p12 = por %p1302_p9, %p1301_p7 }
  0x78   : > { %p1304_p2 = pnand %p1303_p12, %p1297_p3 }
  0x79   : > { %263 = vrot.lane.b32.xlu0 %v1635_v19, %s1373_s18 }
  0x7a   : > { %269 = vrot.lane.b32.xlu1 %v1638_v20, %s1373_s18 }
  0x7d   : > { %1171 = vrot.lane.b32.xlu0 %v1150_v4, %s1375_s20 }
  0x7e   : > { %1176 = vrot.lane.b32.xlu1 %v1155_v12, %s1375_s20 }
  0x81   : > { %1181 = vrot.lane.b32.xlu0 %v1160_v8, %s1375_s20 }
  0x82   : > { %1186 = vrot.lane.b32.xlu1 %v1165_v13, %s1375_s20 }
  0x85   : > { %635 = vrot.lane.b32.xlu0 %v1627_v17, %s1375_s20 }
  0x86   : > { %637 = vrot.lane.b32.xlu1 %v1630_v18, %s1375_s20 }
  0x89   : > { %633 = vrot.lane.b32.xlu0 %v1635_v19, %s1375_s20 }
  0x8a   : > { %639 = vrot.lane.b32.xlu1 %v1638_v20, %s1375_s20 }
  0x8d   : > { %840 = vperm.xlu0 %1190, %v832_v22   ;;  %v615_v22 = vld [vmem:[#allocation5 + $0x20] sm:$0xff] }
  0x8e   : > { %835 = vperm.xlu1 %1191, %v831_v23  }
  0xdf   : > { %v1152_v24 = vpop.permute.xlu0 %1151 }
  0xe0   : > { %v1162_v25 = vpop.permute.xlu1 %1161  ;;  %v1154_v26 = vunpack.i.h.bf16 %v1152_v24  ;;  %v1153_v27 = vunpack.i.l.bf16 %v1152_v24  ;;  %v616_v24 = vld [vmem:[#allocation5 + $0x28] sm:$0xff] }
  0xe1   : > { %v1164_v28 = vunpack.i.h.bf16 %v1162_v25  ;;  %v1163_v29 = vunpack.i.l.bf16 %v1162_v25 }
  0xe2   : > { %v273_v36 = vsel %vm271_vm0, %v1153_v27, %v1154_v26 }
  0xe3   : > { %v1157_v30 = vpop.permute.xlu0 %1156  ;;  %v274_v38 = vsel %vm271_vm0, %v1154_v26, %v1164_v28  ;;  %v272_v39 = vsel %vm271_vm0, %v1163_v29, %v1153_v27 }
  0xe4   : > { %v1159_v31 = vunpack.i.h.bf16 %v1157_v30  ;;  %v1158_v32 = vunpack.i.l.bf16 %v1157_v30  ;;  %v1167_v33 = vpop.permute.xlu1 %1166 }
  0xe5   : > { %v1169_v34 = vunpack.i.h.bf16 %v1167_v33  ;;  %v1168_v35 = vunpack.i.l.bf16 %v1167_v33 }
  0xe6   : > { %v276_v37 = vsel %vm271_vm0, %v1158_v32, %v1159_v31 }
  0xe7   : > { %v266_v40 = vpop.permute.xlu0 %265  ;;  %v1036_v41 = vpack.c.bf16 %v1169_v34, %v1164_v28  ;;  %v1032_v42 = vpack.c.bf16 %v276_v37, %v273_v36  ;;  %v277_v43 = vsel %vm271_vm0, %v1159_v31, %v1169_v34  ;;  %v275_v44 = vsel %vm271_vm0, %v1168_v35, %v1158_v32 }
  0xe8   : > { %v268_v45 = vpop.permute.xlu1 %267  ;;  %v1038_v46 = vpack.c.bf16 %v277_v43, %v274_v38  ;;  %v1034_v47 = vpack.c.bf16 %v275_v44, %v272_v39 }
  0xe9   : > { %1037 = vmatprep.subr.bf16.mxu1 %v1036_v41  ;;  %1033 = vmatprep.subr.bf16.mxu0 %v1032_v42  ;;  %v279_v48 = vsel %vm271_vm0, %v266_v40, %v268_v45 }
  0xea   : > { %1039 = vmatpush1.bf16.msra.mxu1 %v1038_v46  ;;  %1035 = vmatpush1.bf16.msra.mxu0 %v1034_v47 }
  0xeb   : > { %v264_v49 = vpop.permute.xlu0 %263  ;;  %304 = vmatprep.subr.mxu0 %v279_v48 }
  0xec   : > { %v270_v50 = vpop.permute.xlu1 %269  ;;  %v278_v51 = vsel %vm271_vm0, %v264_v49, %v266_v40 }
  0xed   : > { %381 = vmatprep.subr.mxu1 %v270_v50  ;;  %v280_v53 = vsel %vm271_vm0, %v268_v45, %v270_v50 }
  0xee   : > { %382 = vmatpush1.msra.mxu1 %v280_v53  ;;  %305 = vmatpush1.msra.mxu0 %v278_v51 }
  0xef   : > { %1012 = vmatmul.mubr.msk.f32.vlgmr.msra.gmra.mrb[0].mxu1 %vm293_vm1, %v233_v52  ;;  %v1172_v54 = vpop.permute.xlu0 %1171  ;;  %1010 = vmatmul.mubr.msk.f32.vlgmr.msra.gmra.mrb[0].mxu0 %vm293_vm1, %v233_v52 }
  0xf0   : > { %v1174_v55 = vunpack.i.h.bf16 %v1172_v54  ;;  %v1173_v56 = vunpack.i.l.bf16 %v1172_v54  ;;  %v1177_v57 = vpop.permute.xlu1 %1176  ;;  %1041 = vmatprep.subr.bf16.mxu0 %v1040_v15  ;;  %1045 = vmatprep.subr.bf16.mxu1 %v1044_v16 }
  0xf1   : > { %v1179_v59 = vunpack.i.h.bf16 %v1177_v57  ;;  %v1178_v60 = vunpack.i.l.bf16 %v1177_v57  ;;  %1043 = vmatpush1.bf16.msra.mxu0 %v1042_v9  ;;  %447 = vmatprep.mubr.f32.mxu1 %v1374_v14 }
  0xf2   : > { %1047 = vmatpush1.bf16.msra.mxu1 %v1046_v3  ;;  %370 = vmatprep.mubr.f32.mxu0 %v1374_v14  ;;  %v643_v61 = vsel %vm641_vm2, %v1173_v56, %v1174_v55 }
  0xf3   : > { %1013 = vmatmul.mubr.msk.f32.gmra.mrb[2].mxu1 %vm293_vm1, %v234_v58  ;;  %v1182_v62 = vpop.permute.xlu0 %1181  ;;  %1011 = vmatmul.mubr.msk.f32.gmra.mrb[2].mxu0 %vm293_vm1, %v234_v58  ;;  %v646_v63 = vsel %vm641_vm2, %v1178_v60, %v1179_v59 }
  0xf4   : > { %v1184_v0 = vunpack.i.h.bf16 %v1182_v62  ;;  %v1183_v4 = vunpack.i.l.bf16 %v1182_v62  ;;  %v1187_v5 = vpop.permute.xlu1 %1186  ;;  %464 = vmatprep.subr.mxu0 %v1627_v17  ;;  %541 = vmatprep.subr.mxu1 %v1638_v20  ;;  %v1048_v1 = vpack.c.bf16 %v646_v63, %v643_v61  ;;  %v219_v17 = vld [vmem:[#allocation5 + $0x8] sm:$0xff] }
  0xf5   : > { %v1189_v3 = vunpack.i.h.bf16 %v1187_v5  ;;  %v1188_v6 = vunpack.i.l.bf16 %v1187_v5  ;;  %465 = vmatpush1.msra.mxu0 %v1635_v19  ;;  %601 = vmatprep.mubr.f32.mxu1 %v1374_v14 }
  0xf6   : > { %v644_v7 = vsel %vm641_vm2, %v1174_v55, %v1184_v0  ;;  %v642_v8 = vsel %vm641_vm2, %v1183_v4, %v1173_v56  ;;  %542 = vmatpush1.msra.mxu1 %v1630_v18  ;;  %1049 = vmatprep.subr.bf16.mxu0 %v1048_v1 }
  0xf7   : > { %v1052_v9 = vpack.c.bf16 %v1189_v3, %v1184_v0  ;;  %v645_v10 = vsel %vm641_vm2, %v1188_v6, %v1178_v60  ;;  %v647_v11 = vsel %vm641_vm2, %v1179_v59, %v1189_v3  ;;  %524 = vmatprep.mubr.f32.mxu0 %v1374_v14  ;;  %1016 = vmatmul.mubr.msk.f32.vlgmr.msra.gmra.mrb[0].mxu1 %vm293_vm1, %v218_v2  ;;  %v636_v12 = vpop.permute.xlu0 %635 }
  0xf8   : > { %v1050_v13 = vpack.c.bf16 %v645_v10, %v642_v8  ;;  %v1054_v15 = vpack.c.bf16 %v647_v11, %v644_v7  ;;  %v638_v16 = vpop.permute.xlu1 %637  ;;  %1014 = vmatmul.mubr.msk.f32.vlgmr.msra.gmra.mrb[0].mxu0 %vm293_vm1, %v218_v2  ;;  %607 = vmatprep.mubr.f32.mxu1 %v1374_v14 }
  0xf9   : > { %1053 = vmatprep.subr.bf16.mxu1 %v1052_v9  ;;  %530 = vmatprep.mubr.f32.mxu0 %v1374_v14  ;;  %v649_v18 = vsel %vm641_vm2, %v636_v12, %v638_v16 }
  0xfa   : > { %1051 = vmatpush1.bf16.msra.mxu0 %v1050_v13  ;;  %1055 = vmatpush1.bf16.msra.mxu1 %v1054_v15 }
  0xfb   : > { %1017 = vmatmul.mubr.msk.f32.gmra.mrb[2].mxu1 %vm293_vm1, %v219_v17  ;;  %673 = vmatprep.subr.mxu0 %v649_v18  ;;  %v634_v19 = vpop.permute.xlu0 %633 }
  0xfc   : > { %v648_v20 = vsel %vm641_vm2, %v634_v19, %v636_v12  ;;  %v640_v21 = vpop.permute.xlu1 %639  ;;  %1015 = vmatmul.mubr.msk.f32.gmra.mrb[2].mxu0 %vm293_vm1, %v219_v17  ;;  %810 = vmatprep.mubr.f32.mxu1 %v1374_v14 }
  0xfd   : > { %v650_v23 = vsel %vm641_vm2, %v638_v16, %v640_v21  ;;  %750 = vmatprep.subr.mxu1 %v640_v21  ;;  %733 = vmatprep.mubr.f32.mxu0 %v1374_v14 }
  0xfe   : > { %674 = vmatpush1.msra.mxu0 %v648_v20  ;;  %751 = vmatpush1.msra.mxu1 %v650_v23 }
  0xff   : > { %1020 = vmatmul.mubr.msk.f32.vlgmr.msra.gmra.mrb[0].mxu1 %vm293_vm1, %v615_v22 }
 0x100   : > { %1018 = vmatmul.mubr.msk.f32.vlgmr.msra.gmra.mrb[0].mxu0 %vm293_vm1, %v615_v22  ;;  %816 = vmatprep.mubr.f32.mxu1 %v1374_v14 }
 0x101   : > { %739 = vmatprep.mubr.f32.mxu0 %v1374_v14 }
 0x103   : > { %1021 = vmatmul.mubr.msk.f32.gmra.mrb[2].mxu1 %vm293_vm1, %v616_v24 }
 0x104   : > { %1019 = vmatmul.mubr.msk.f32.gmra.mrb[2].mxu0 %vm293_vm1, %v616_v24 }
 0x10c   : > { %v841_v29 = vpop.permute.xlu0 %840 }
 0x10d   : > { %v836_v45 = vpop.permute.xlu1 %835 }
 0x1d2   : > { %v812_v25 = vpop.f32.mrb[0].mxu1 }
 0x1d3   : > { %v735_v26 = vpop.f32.mrb[0].mxu0  ;;  %v814_v27 = vpop.f32.mrb[1].mxu1  ;;  %v845_v50 = vadd.f32 %v836_v45, %v812_v25 }
 0x1d4   : > { %v737_v28 = vpop.f32.mrb[1].mxu0  ;;  %v843_v51 = vadd.f32 %v836_v45, %v735_v26  ;;  %v846_v52 = vadd.f32 %v836_v45, %v814_v27 }
 0x1d5   : > { %v844_v53 = vadd.f32 %v836_v45, %v737_v28  ;;  %v881_v54 = vmul.f32 0.01, %v845_v50  ;;  %vm877_vm3 = vcmp.gt.f32.partialorder %v845_v50, 0.0 }
 0x1d6   : > { %v818_v30 = vpop.f32.mrb[2].mxu1  ;;  %v879_v55 = vmul.f32 0.01, %v843_v51  ;;  %vm875_vm4 = vcmp.gt.f32.partialorder %v843_v51, 0.0  ;;  %v882_v56 = vmul.f32 0.01, %v846_v52 }
 0x1d7   : > { %v741_v31 = vpop.f32.mrb[2].mxu0  ;;  %v849_v32 = vadd.f32 %v841_v29, %v818_v30  ;;  %v820_v34 = vpop.f32.mrb[3].mxu1  ;;  %vm878_vm5 = vcmp.gt.f32.partialorder %v846_v52, 0.0  ;;  %v880_v57 = vmul.f32 0.01, %v844_v53  ;;  %v885_v59 = vsel %vm877_vm3, %v845_v50, %v881_v54 }
 0x1d8   : > { %v847_v33 = vadd.f32 %v841_v29, %v741_v31  ;;  %v743_v35 = vpop.f32.mrb[3].mxu0  ;;  %v850_v36 = vadd.f32 %v841_v29, %v820_v34  ;;  %vm876_vm6 = vcmp.gt.f32.partialorder %v844_v53, 0.0  ;;  %v883_v61 = vsel %vm875_vm4, %v843_v51, %v879_v55 }
 0x1d9   : > { %v848_v37 = vadd.f32 %v841_v29, %v743_v35  ;;  %v1024_v38 = vmul.f32 -1.442695, %v849_v32  ;;  %v886_v0 = vsel %vm878_vm5, %v846_v52, %v882_v56  ;;  %v884_v1 = vsel %vm876_vm6, %v844_v53, %v880_v57 }
 0x1da   : > { %v1022_v39 = vmul.f32 -1.442695, %v847_v33  ;;  %v1025_v14 = vmul.f32 -1.442695, %v850_v36 }
 0x1db   : > { %v1023_v40 = vmul.f32 -1.442695, %v848_v37  ;;  %1192 = vpow2.f32 %v1024_v38 }
 0x1dc   : > { %1194 = vpow2.f32 %v1022_v39 }
 0x1dd   : > { %1196 = vpow2.f32 %v1025_v14 }
 0x1de   : > { %1198 = vpow2.f32 %v1023_v40 }
 0x1e5   : > { %v1193_v41 = vpop.eup %1192 }
 0x1e6   : > { %v1195_v42 = vpop.eup %1194  ;;  %v865_v43 = vadd.f32 1.0, %v1193_v41 }
 0x1e7   : > { %v1197_v44 = vpop.eup %1196  ;;  %v863_v46 = vadd.f32 1.0, %v1195_v42 }
 0x1e8   : > { %v1199_v47 = vpop.eup %1198  ;;  %1200 = vrcp.f32 %v865_v43  ;;  %v866_v48 = vadd.f32 1.0, %v1197_v44 }
 0x1e9   : > { %1202 = vrcp.f32 %v863_v46  ;;  %v864_v49 = vadd.f32 1.0, %v1199_v47 }
 0x1ea   : > { %1204 = vrcp.f32 %v866_v48 }
 0x1eb   : > { %1206 = vrcp.f32 %v864_v49 }
 0x1f2   : > { %v1201_v58 = vpop.eup %1200 }
 0x1f3   : > { %v1203_v60 = vpop.eup %1202  ;;  %v889_v62 = vmul.f32 %v1201_v58, %v885_v59 }
 0x1f4   : > { %v1205_v63 = vpop.eup %1204  ;;  %v887_v4 = vmul.f32 %v1203_v60, %v883_v61 }
 0x1f5   : > { %v1207_v5 = vpop.eup %1206  ;;  %v890_v2 = vmul.f32 %v1205_v63, %v886_v0  ;;  %893 = vst [vmem:[%s217_s26 + $0x10] sm:$0xff] %v889_v62 }
 0x1f6   : > { %v888_v3 = vmul.f32 %v1207_v5, %v884_v1  ;;  %891 = vst [vmem:[%s217_s26] sm:$0xff] %v887_v4 }
 0x1f7   : > { %895 = vst.msk [vmem:[%s217_s26 + $0x18] sm:$0xff] %vm894_vm7, %v890_v2 }
 0x1f8   : > { %892 = vst [vmem:[%s217_s26 + $0x8] sm:$0xff] %v888_v3 }
 0x1f9   : > { %1307 = shalt.err (!%p1304_p2)
}
 0x1fa   : > { %s1308_s24 = scalar_lea.hbm %s1707_s10, 512  ;;  %s1312_s29 = scalar_lea.hbm %s1754_s3, 1024 }
 0x1fb   : > { %p1309_p13 = scmp.ne.s32.totalorder %s1707_s10, %s1308_s24  ;;  %p1313_p4 = scmp.lt.u32.totalorder %s1707_s10, %s1754_s3 }
 0x1fc   : > { %p1314_p5 = scmp.lt.u32.totalorder %s1312_s29, %s1308_s24  ;;  %p1316_p11 = scmp.lt.u32.totalorder %s1308_s24, %s1707_s10 }
 0x1fd   : > { %p1310_p6 = pnand %p1309_p13, %p1768_p0 }
 0x1fe   : > { %p1315_p8 = por %p1314_p5, %p1313_p4 }
 0x1ff   : > { %p1311_p10 = pneg %p1310_p6 }
 0x200   : > { %p1317_p1 = por %p1316_p11, %p1315_p8 }
 0x202   : > { %p1318_p3 = pnand %p1317_p1, %p1311_p10 }
 0x204   : > { %1321 = shalt.err (!%p1318_p3)
}
 0x205   : > { %1085 = dma.vmem_to_hbm [thread:$0]  (%p1768_p0), %s1709_s27, 512, %s1707_s10, %s897_s16  }
 0x206 PF: > { %s923_s20 = sand.u32 1, %s1352_s12   ;;  %p1769_p7 = scmp.ne.s32.totalorder %s1759_s19, 0 }
 0x207   : > { %p1770_p9 = scmp.ge.s32.totalorder %s1364_s15, 2  ;;  %s924_s7 = scalar_lea.sflag [#allocation4], %s923_s20 }
 0x209   : > { %p1099_p12 = pnand %p1770_p9, %p1769_p7 }
 0x20b   : > { %1347 = dma.done.wait (!%p1099_p12), %s924_s7, 512  }
 0x20c   : > { %1349 = vsyncadd (!%p1099_p12), %s924_s7, 4294966784  ;;  %p17_p2 = scmp.ge.s32.totalorder %s1508_s4, 4   ;;  %s1771_s12 = smov %s1356_s13 }
 0x20d   : > { %s1772_s13 = smov %s1360_s14  ;;  %s1773_s14 = smov %s1524_s9 }
 0x20e   : > { %s1774_s15 = smov %s1508_s4  ;;  %19 = sbr.rel (!%p17_p2) target bundleno = 6 (0x6), region = 87 }
 0x215   :  { %929 = vsyncpa [#allocation3], 1 }
 0x216   :  { %931 = vsyncpa [#allocation3 + $0x1], 1 }
 0x217   :  { %932 = vsyncpa [#allocation6], 1 }
 0x218   :  { %933 = vsyncpa [#allocation4], 1 }
 0x219   :  { %935 = vsyncpa [#allocation4 + $0x1], 1 }

// kernel: st_block_2_forward.17
= control target key start
LH: loop header
LB: loop body
LE: loop exit
PB: predicated region body
PF: predicated region fallthrough
CT: control target
= control target key end

     0   :  { %s9599_s0 = inlined_call_operand.hbm [shape: f32[2,8,60,8], index: 0, kind: input, shape index: {}]   ;;  %s9600_s1 = inlined_call_operand.hbm [shape: f32[8,1,1], index: 1, kind: input, shape index: {}]   ;;  %s9601_s2 = inlined_call_operand.hbm [shape: f32[1,1,8], index: 2, kind: input, shape index: {}]   ;;  %s9602_s3 = inlined_call_operand.hbm [shape: f32[8,8], index: 3, kind: input, shape index: {}]   ;;  %s9603_s4 = inlined_call_operand.hbm [shape: f32[60,60], index: 4, kind: input, shape index: {}]   ;;  %s9604_s5 = inlined_call_operand.hbm [shape: f32[60,60], index: 5, kind: input, shape index: {}]   ;;  %s9605_s6 = inlined_call_operand.hbm [shape: f32[1,60], index: 6, kind: input, shape index: {}]   ;;  %s9606_s7 = inlined_call_operand.hbm [shape: f32[1,60], index: 7, kind: input, shape index: {}]   ;;  %s9607_s8 = inlined_call_operand.hbm [shape: f32[60,60], index: 8, kind: input, shape index: {}]   ;;  %s9608_s9 = inlined_call_operand.hbm [shape: f32[2,8,60,8], index: 9, kind: input, shape index: {}]   ;;  %s9609_s10 = inlined_call_operand.hbm [shape: f32[8,60,8], index: 10, kind: input, shape index: {}]   ;;  %s9610_s11 = inlined_call_operand.hbm [shape: f32[8,60,8], index: 11, kind: input, shape index: {}]   ;;  %s9611_s12 = inlined_call_operand.hbm [shape: f32[2,60,60], index: 12, kind: output, shape index: {0}]   ;;  %s9612_s13 = inlined_call_operand.hbm [shape: f32[2,8,60,8], index: 13, kind: output, shape index: {1}]  }
   0x1   :  { %9690 = sst [smem:[#allocation73_spill]] %s9599_s0 }
   0x2   :  { %9691 = sst [smem:[#allocation74_spill]] %s9600_s1 }
   0x3   :  { %9692 = sst [smem:[#allocation75_spill]] %s9601_s2 }
   0x4   :  { %9693 = sst [smem:[#allocation76_spill]] %s9602_s3 }
   0x5   :  { %9694 = sst [smem:[#allocation77_spill]] %s9603_s4 }
   0x6   :  { %9695 = sst [smem:[#allocation78_spill]] %s9604_s5 }
   0x7   :  { %9696 = sst [smem:[#allocation79_spill]] %s9605_s6 }
   0x8   :  { %9697 = sst [smem:[#allocation80_spill]] %s9606_s7 }
   0x9   :  { %9698 = sst [smem:[#allocation81_spill]] %s9608_s9 }
   0xa   :  { %9699 = sst [smem:[#allocation82_spill]] %s9611_s12 }
   0xb   :  { %9700 = sst [smem:[#allocation83_spill]] %s9612_s13 }
   0xc   :  { %19 = vsyncpa [#allocation3], 0 }
   0xd   :  { %21 = vsyncpa [#allocation3 + $0x1], 0 }
   0xe   :  { %22 = vsyncpa [#allocation6], 0 }
   0xf   :  { %23 = vsyncpa [#allocation9], 0 }
  0x10   :  { %24 = vsyncpa [#allocation12], 0 }
  0x11   :  { %25 = vsyncpa [#allocation15], 0 }
  0x12   :  { %26 = vsyncpa [#allocation18], 0 }
  0x13   :  { %28 = vsyncpa [#allocation18 + $0x1], 0 }
  0x14   :  { %29 = vsyncpa [#allocation21], 0 }
  0x15   :  { %30 = vsyncpa [#allocation4], 0 }
  0x16   :  { %32 = vsyncpa [#allocation4 + $0x1], 0 }
  0x17   :  { %33 = vsyncpa [#allocation24], 0 }
  0x18   :  { %35 = vsyncpa [#allocation24 + $0x1], 0  ;;  %s6146_s25 = smov 0   ;;  %s6148_s26 = smov 0  }
  0x19   :  { %s6150_s27 = smov 0   ;;  %s6152_s28 = smov 0  }
  0x1a LB: > { %s6054_s29 = smov [#allocation5]   ;;  %s6167_s14 = sadd.s32 4294967295, %s6052_s28   ;;  %s6052_s28 = sphi %s6152_s28, %s10004_s28   ;;  %s6048_s27 = sphi %s6150_s27, %s10003_s27   ;;  %s6044_s26 = sphi %s6148_s26, %s10002_s26   ;;  %s6040_s25 = sphi %s6146_s25, %s10001_s25  }
  0x1b   : > { %s372_s30 = sshll.u32 %s6054_s29, 4  ;;  %p4510_p0 = scmp.ge.s32.totalorder %s6052_s28, 1  ;;  %s6172_s30 = int_to_ptr.vmem [resolvable:$true] %s372_s30 }
  0x1c   : > { %p9618_p1 = scmp.eq.s32.totalorder %s6167_s14, 0  ;;  %p360_p2 = scmp.lt.s32.totalorder %s6052_s28, 3 }
  0x1d   : > { %s6055_s16 = smov [#allocation8]   ;;  %s6056_s19 = smov [#allocation11]  }
  0x1e   : > { %p6174_p3 = pnand %p4510_p0, %p360_p2  ;;  %s397_s17 = sshll.u32 %s6055_s16, 4  ;;  %s6187_s17 = int_to_ptr.vmem [resolvable:$true] %s397_s17 }
  0x1f   : > { %s6189_s20 = sshll.u32 %s6056_s19, 4  ;;  %s9704_s1 = sld [smem:[#allocation74_spill]]  ;;  %s421_s20 = int_to_ptr.vmem [resolvable:$true] %s6189_s20 }
  0x20   : > { %s9701_s15 = scalar_select %p6174_p3, 1, 0 }
  0x21   : > { %p5337_p5 = pneg %p6174_p3 }
  0x22   : > { %9702 = sst [smem:[#allocation35_spill]] %s9701_s15 }
  0x23   : > { %p6183_p6 = pnand %p5337_p5, %p9618_p1 }
  0x25   : > { %s5586_s23 = scalar_lea.hbm %s9704_s1, 128  ;;  %p6199_p8 = pneg %p6183_p6 }
  0x26   : > { %p5587_p7 = scmp.ne.s32.totalorder %s9704_s1, %s5586_s23  ;;  %p5593_p11 = scmp.lt.u32.totalorder %s5586_s23, %s9704_s1 }
  0x28   : > { %p5589_p9 = pnand %p6199_p8, %p5587_p7 }
  0x2a   : > { %p5590_p10 = pneg %p5589_p9 }
  0x2c   : > { %p5595_p12 = pnand %p5593_p11, %p5590_p10 }
  0x2e   : > { %5598 = shalt.err (!%p5595_p12)
}
  0x2f   : > { %s5599_s21 = scalar_lea.vmem %s6172_s30, 128  ;;  %p5607_p5 = scmp.lt.s32.totalorder %s6172_s30, %s6172_s30 }
  0x30   : > { %p5600_p13 = scmp.ne.s32.totalorder %s6172_s30, %s5599_s21  ;;  %p5608_p4 = scmp.lt.s32.totalorder %s5599_s21, %s5599_s21 }
  0x32   : > { %p5602_p0 = pnand %p5600_p13, %p6199_p8  ;;  %p5609_p7 = por %p5608_p4, %p5607_p5 }
  0x34   : > { %p5603_p2 = pneg %p5602_p0 }
  0x36   : > { %p5610_p9 = pnand %p5609_p7, %p5603_p2 }
  0x38   : > { %5613 = shalt.err (!%p5610_p9)
}
  0x39   : > { %s6057_s22 = smov 16   ;;  %s6058_s13 = smov 1  }
  0x3a   : > { %5340 = dma.hbm_to_vmem [thread:$0]  (!%p6183_p6), %s9704_s1, 128, %s6172_s30, [#allocation6], %s6057_s22, %s6057_s22, %s6058_s13  }
  0x3b   : > { %s9706_s3 = sld [smem:[#allocation76_spill]] }
  0x41   : > { %s5614_s12 = scalar_lea.hbm %s9706_s3, 128 }
  0x42   : > { %p5615_p4 = scmp.ne.s32.totalorder %s9706_s3, %s5614_s12  ;;  %p5621_p12 = scmp.lt.u32.totalorder %s5614_s12, %s9706_s3 }
  0x44   : > { %p5617_p10 = pnand %p5615_p4, %p6199_p8 }
  0x46   : > { %p5618_p11 = pneg %p5617_p10 }
  0x48   : > { %p5623_p13 = pnand %p5621_p12, %p5618_p11 }
  0x4a   : > { %5626 = shalt.err (!%p5623_p13)
}
  0x4b   : > { %s5627_s30 = scalar_lea.vmem %s6187_s17, 128  ;;  %p5635_p7 = scmp.lt.s32.totalorder %s6187_s17, %s6187_s17 }
  0x4c   : > { %p5628_p0 = scmp.ne.s32.totalorder %s6187_s17, %s5627_s30  ;;  %p5636_p9 = scmp.lt.s32.totalorder %s5627_s30, %s5627_s30 }
  0x4e   : > { %p5630_p2 = pnand %p5628_p0, %p6199_p8  ;;  %p5637_p4 = por %p5636_p9, %p5635_p7 }
  0x50   : > { %p5631_p5 = pneg %p5630_p2 }
  0x52   : > { %p5638_p10 = pnand %p5637_p4, %p5631_p5 }
  0x54   : > { %5641 = shalt.err (!%p5638_p10)
}
  0x55   : > { %5346 = dma.hbm_to_vmem [thread:$0]  (!%p6183_p6), %s9706_s3, 128, %s6187_s17, [#allocation9]  }
  0x56   : > { %s9707_s5 = sld [smem:[#allocation78_spill]] }
  0x5c   : > { %s5642_s22 = scalar_lea.hbm %s9707_s5, 1024 }
  0x5d   : > { %p5643_p11 = scmp.ne.s32.totalorder %s9707_s5, %s5642_s22  ;;  %p5649_p0 = scmp.lt.u32.totalorder %s5642_s22, %s9707_s5 }
  0x5f   : > { %p5645_p12 = pnand %p5643_p11, %p6199_p8 }
  0x61   : > { %p5646_p13 = pneg %p5645_p12 }
  0x63   : > { %p5651_p2 = pnand %p5649_p0, %p5646_p13 }
  0x65   : > { %5654 = shalt.err (!%p5651_p2)
}
  0x66   : > { %s5655_s19 = scalar_lea.vmem %s421_s20, 1024  ;;  %p5663_p4 = scmp.lt.s32.totalorder %s421_s20, %s421_s20 }
  0x67   : > { %p5656_p5 = scmp.ne.s32.totalorder %s421_s20, %s5655_s19  ;;  %p5664_p10 = scmp.lt.s32.totalorder %s5655_s19, %s5655_s19 }
  0x69   : > { %p5658_p7 = pnand %p5656_p5, %p6199_p8  ;;  %p5665_p1 = por %p5664_p10, %p5663_p4 }
  0x6b   : > { %p5659_p9 = pneg %p5658_p7 }
  0x6d   : > { %p5666_p3 = pnand %p5665_p1, %p5659_p9 }
  0x6f   : > { %5669 = shalt.err (!%p5666_p3)
}
  0x70   : > { %s9620_s17 = smov 128   ;;  %s9622_s21 = smov 8  }
  0x71   : > { %5352 = dma.hbm_to_vmem [thread:$0]  (!%p6183_p6), %s9707_s5, 1024, %s421_s20, [#allocation12], %s9620_s17, %s9620_s17, %s9622_s21  }
  0x72   : > { %s6061_s9 = smov [#allocation14]   ;;  %s6062_s15 = smov [#allocation19]  }
  0x73   : > { %s445_s12 = sshll.u32 %s6061_s9, 4  ;;  %s468_s22 = sshll.u32 %s6062_s15, 4  ;;  %s446_s12 = int_to_ptr.vmem [resolvable:$true] %s445_s12  ;;  %s469_s22 = int_to_ptr.vmem [resolvable:$true] %s468_s22 }
  0x74   : > { %s9708_s7 = sld [smem:[#allocation80_spill]] }
  0x7a   : > { %s5670_s24 = scalar_lea.hbm %s9708_s7, 16 }
  0x7b   : > { %p5671_p1 = scmp.ne.s32.totalorder %s9708_s7, %s5670_s24  ;;  %p5677_p12 = scmp.lt.u32.totalorder %s5670_s24, %s9708_s7 }
  0x7d   : > { %p5673_p3 = pnand %p5671_p1, %p6199_p8 }
  0x7f   : > { %p5674_p11 = pneg %p5673_p3 }
  0x81   : > { %p5679_p13 = pnand %p5677_p12, %p5674_p11 }
  0x83   : > { %5682 = shalt.err (!%p5679_p13)
}
  0x84   : > { %s5683_s20 = scalar_lea.vmem %s446_s12, 16  ;;  %s5690_s30 = scalar_lea.vmem %s446_s12, 32 }
  0x85   : > { %p5684_p0 = scmp.ne.s32.totalorder %s446_s12, %s5683_s20  ;;  %p5691_p7 = scmp.lt.s32.totalorder %s446_s12, %s446_s12 }
  0x86   : > { %p5692_p9 = scmp.lt.s32.totalorder %s5690_s30, %s5683_s20 }
  0x87   : > { %p5686_p2 = pnand %p5684_p0, %p6199_p8 }
  0x88   : > { %p5693_p4 = por %p5692_p9, %p5691_p7 }
  0x89   : > { %p5687_p5 = pneg %p5686_p2 }
  0x8b   : > { %p5694_p10 = pnand %p5693_p4, %p5687_p5 }
  0x8d   : > { %5697 = shalt.err (!%p5694_p10)
}
  0x8e   : > { %5358 = dma.hbm_to_vmem [thread:$0]  (!%p6183_p6), %s9708_s7, 16, %s446_s12, [#allocation15]  }
  0x8f   : > { %s5698_s15 = scalar_lea.hbm %s9609_s10, 8192 }
  0x90   : > { %p5699_p1 = scmp.ne.s32.totalorder %s9609_s10, %s5698_s15  ;;  %p5705_p12 = scmp.lt.u32.totalorder %s5698_s15, %s9609_s10 }
  0x92   : > { %p5701_p3 = pnand %p5699_p1, %p6199_p8 }
  0x94   : > { %p5702_p11 = pneg %p5701_p3 }
  0x96   : > { %p5707_p13 = pnand %p5705_p12, %p5702_p11 }
  0x98   : > { %5710 = shalt.err (!%p5707_p13)
}
  0x99   : > { %s5711_s19 = scalar_lea.vmem %s469_s22, 8192  ;;  %p5719_p7 = scmp.lt.s32.totalorder %s469_s22, %s469_s22 }
  0x9a   : > { %p5712_p0 = scmp.ne.s32.totalorder %s469_s22, %s5711_s19  ;;  %p5720_p9 = scmp.lt.s32.totalorder %s5711_s19, %s5711_s19 }
  0x9c   : > { %p5714_p2 = pnand %p5712_p0, %p6199_p8  ;;  %p5721_p4 = por %p5720_p9, %p5719_p7 }
  0x9e   : > { %p5715_p5 = pneg %p5714_p2 }
  0xa0   : > { %p5722_p10 = pnand %p5721_p4, %p5715_p5 }
  0xa2   : > { %5725 = shalt.err (!%p5722_p10)
}
  0xa3   : > { %5364 = dma.hbm_to_vmem [thread:$0]  (!%p6183_p6), %s9609_s10, 8192, %s469_s22, [#allocation18], %s9620_s17, %s9620_s17, %s9622_s21  }
  0xa4   : > { %s6063_s30 = smov [#allocation7]   ;;  %s6064_s9 = smov [#allocation10]  }
  0xa5   : > { %s386_s0 = sshll.u32 %s6063_s30, 4  ;;  %s407_s1 = sshll.u32 %s6064_s9, 4  ;;  %s387_s0 = int_to_ptr.vmem [resolvable:$true] %s386_s0  ;;  %s408_s1 = int_to_ptr.vmem [resolvable:$true] %s407_s1 }
  0xa6   : > { %s9709_s2 = sld [smem:[#allocation75_spill]] }
  0xac   : > { %s5726_s13 = scalar_lea.hbm %s9709_s2, 16 }
  0xad   : > { %p5727_p1 = scmp.ne.s32.totalorder %s9709_s2, %s5726_s13  ;;  %p5733_p12 = scmp.lt.u32.totalorder %s5726_s13, %s9709_s2 }
  0xaf   : > { %p5729_p3 = pnand %p5727_p1, %p6199_p8 }
  0xb1   : > { %p5730_p11 = pneg %p5729_p3 }
  0xb3   : > { %p5735_p13 = pnand %p5733_p12, %p5730_p11 }
  0xb5   : > { %5738 = shalt.err (!%p5735_p13)
}
  0xb6   : > { %s5739_s22 = scalar_lea.vmem %s387_s0, 16  ;;  %s5746_s12 = scalar_lea.vmem %s387_s0, 32 }
  0xb7   : > { %p5740_p0 = scmp.ne.s32.totalorder %s387_s0, %s5739_s22  ;;  %p5747_p7 = scmp.lt.s32.totalorder %s387_s0, %s387_s0 }
  0xb8   : > { %p5748_p9 = scmp.lt.s32.totalorder %s5746_s12, %s5739_s22 }
  0xb9   : > { %p5742_p2 = pnand %p5740_p0, %p6199_p8 }
  0xba   : > { %p5749_p4 = por %p5748_p9, %p5747_p7 }
  0xbb   : > { %p5743_p5 = pneg %p5742_p2 }
  0xbd   : > { %p5750_p10 = pnand %p5749_p4, %p5743_p5 }
  0xbf   : > { %5753 = shalt.err (!%p5750_p10)
}
  0xc0   : > { %5343 = dma.hbm_to_vmem [thread:$0]  (!%p6183_p6), %s9709_s2, 16, %s387_s0, [#allocation6]  }
  0xc1   : > { %s9710_s4 = sld [smem:[#allocation77_spill]] }
  0xc7   : > { %s5754_s15 = scalar_lea.hbm %s9710_s4, 1024 }
  0xc8   : > { %p5755_p1 = scmp.ne.s32.totalorder %s9710_s4, %s5754_s15  ;;  %p5761_p12 = scmp.lt.u32.totalorder %s5754_s15, %s9710_s4 }
  0xca   : > { %p5757_p3 = pnand %p5755_p1, %p6199_p8 }
  0xcc   : > { %p5758_p11 = pneg %p5757_p3 }
  0xce   : > { %p5763_p13 = pnand %p5761_p12, %p5758_p11 }
  0xd0   : > { %5766 = shalt.err (!%p5763_p13)
}
  0xd1   : > { %s5767_s19 = scalar_lea.vmem %s408_s1, 1024  ;;  %p5775_p7 = scmp.lt.s32.totalorder %s408_s1, %s408_s1 }
  0xd2   : > { %p5768_p0 = scmp.ne.s32.totalorder %s408_s1, %s5767_s19  ;;  %p5776_p9 = scmp.lt.s32.totalorder %s5767_s19, %s5767_s19 }
  0xd4   : > { %p5770_p2 = pnand %p5768_p0, %p6199_p8  ;;  %p5777_p4 = por %p5776_p9, %p5775_p7 }
  0xd6   : > { %p5771_p5 = pneg %p5770_p2 }
  0xd8   : > { %p5778_p10 = pnand %p5777_p4, %p5771_p5 }
  0xda   : > { %5781 = shalt.err (!%p5778_p10)
}
  0xdb   : > { %5349 = dma.hbm_to_vmem [thread:$0]  (!%p6183_p6), %s9710_s4, 1024, %s408_s1, [#allocation9], %s9620_s17, %s9620_s17, %s9622_s21  }
  0xdc   : > { %s6065_s12 = smov [#allocation13]   ;;  %s6066_s30 = smov [#allocation16]  }
  0xdd   : > { %s434_s20 = sshll.u32 %s6065_s12, 4  ;;  %s455_s9 = sshll.u32 %s6066_s30, 4  ;;  %s435_s20 = int_to_ptr.vmem [resolvable:$true] %s434_s20  ;;  %s456_s9 = int_to_ptr.vmem [resolvable:$true] %s455_s9 }
  0xde   : > { %s9711_s6 = sld [smem:[#allocation79_spill]] }
  0xe4   : > { %s5782_s13 = scalar_lea.hbm %s9711_s6, 16 }
  0xe5   : > { %p5783_p1 = scmp.ne.s32.totalorder %s9711_s6, %s5782_s13  ;;  %p5789_p12 = scmp.lt.u32.totalorder %s5782_s13, %s9711_s6 }
  0xe7   : > { %p5785_p3 = pnand %p5783_p1, %p6199_p8 }
  0xe9   : > { %p5786_p11 = pneg %p5785_p3 }
  0xeb   : > { %p5791_p13 = pnand %p5789_p12, %p5786_p11 }
  0xed   : > { %5794 = shalt.err (!%p5791_p13)
}
  0xee   : > { %s5795_s1 = scalar_lea.vmem %s435_s20, 16  ;;  %s5802_s0 = scalar_lea.vmem %s435_s20, 32 }
  0xef   : > { %p5796_p0 = scmp.ne.s32.totalorder %s435_s20, %s5795_s1  ;;  %p5803_p7 = scmp.lt.s32.totalorder %s435_s20, %s435_s20 }
  0xf0   : > { %p5804_p9 = scmp.lt.s32.totalorder %s5802_s0, %s5795_s1 }
  0xf1   : > { %p5798_p2 = pnand %p5796_p0, %p6199_p8 }
  0xf2   : > { %p5805_p4 = por %p5804_p9, %p5803_p7 }
  0xf3   : > { %p5799_p5 = pneg %p5798_p2 }
  0xf5   : > { %p5806_p10 = pnand %p5805_p4, %p5799_p5 }
  0xf7   : > { %5809 = shalt.err (!%p5806_p10)
}
  0xf8   : > { %5355 = dma.hbm_to_vmem [thread:$0]  (!%p6183_p6), %s9711_s6, 16, %s435_s20, [#allocation12]  }
  0xf9   : > { %s5810_s15 = scalar_lea.hbm %s9607_s8, 1024 }
  0xfa   : > { %p5811_p1 = scmp.ne.s32.totalorder %s9607_s8, %s5810_s15  ;;  %p5817_p12 = scmp.lt.u32.totalorder %s5810_s15, %s9607_s8 }
  0xfc   : > { %p5813_p3 = pnand %p5811_p1, %p6199_p8 }
  0xfe   : > { %p5814_p11 = pneg %p5813_p3 }
 0x100   : > { %p5819_p13 = pnand %p5817_p12, %p5814_p11 }
 0x102   : > { %5822 = shalt.err (!%p5819_p13)
}
 0x103   : > { %s5823_s19 = scalar_lea.vmem %s456_s9, 1024  ;;  %p5831_p7 = scmp.lt.s32.totalorder %s456_s9, %s456_s9 }
 0x104   : > { %p5824_p0 = scmp.ne.s32.totalorder %s456_s9, %s5823_s19  ;;  %p5832_p9 = scmp.lt.s32.totalorder %s5823_s19, %s5823_s19 }
 0x106   : > { %p5826_p2 = pnand %p5824_p0, %p6199_p8  ;;  %p5833_p4 = por %p5832_p9, %p5831_p7 }
 0x108   : > { %p5827_p5 = pneg %p5826_p2 }
 0x10a   : > { %p5834_p10 = pnand %p5833_p4, %p5827_p5 }
 0x10c   : > { %5837 = shalt.err (!%p5834_p10)
}
 0x10d   : > { %5361 = dma.hbm_to_vmem [thread:$0]  (!%p6183_p6), %s9607_s8, 1024, %s456_s9, [#allocation15], %s9620_s17, %s9620_s17, %s9622_s21  }
 0x10e   : > { %s6067_s0 = smov [#allocation20]   ;;  %s5838_s3 = scalar_lea.hbm %s9610_s11, 8192 }
 0x10f   : > { %s481_s22 = sshll.u32 %s6067_s0, 4  ;;  %p5839_p1 = scmp.ne.s32.totalorder %s9610_s11, %s5838_s3  ;;  %s482_s22 = int_to_ptr.vmem [resolvable:$true] %s481_s22 }
 0x110   : > { %p5845_p12 = scmp.lt.u32.totalorder %s5838_s3, %s9610_s11 }
 0x111   : > { %p5841_p3 = pnand %p5839_p1, %p6199_p8 }
 0x113   : > { %p5842_p11 = pneg %p5841_p3 }
 0x115   : > { %p5847_p13 = pnand %p5845_p12, %p5842_p11 }
 0x117   : > { %5850 = shalt.err (!%p5847_p13)
}
 0x118   : > { %s5851_s9 = scalar_lea.vmem %s482_s22, 8192  ;;  %p5859_p7 = scmp.lt.s32.totalorder %s482_s22, %s482_s22 }
 0x119   : > { %p5852_p0 = scmp.ne.s32.totalorder %s482_s22, %s5851_s9  ;;  %p5860_p9 = scmp.lt.s32.totalorder %s5851_s9, %s5851_s9 }
 0x11b   : > { %p5854_p2 = pnand %p5852_p0, %p6199_p8  ;;  %p5861_p4 = por %p5860_p9, %p5859_p7 }
 0x11d   : > { %p5855_p5 = pneg %p5854_p2 }
 0x11f   : > { %p5862_p10 = pnand %p5861_p4, %p5855_p5 }
 0x121   : > { %5865 = shalt.err (!%p5862_p10)
}
 0x122   : > { %5367 = dma.hbm_to_vmem [thread:$0]  (!%p6183_p6), %s9610_s11, 8192, %s482_s22, [#allocation21], %s9620_s17, %s9620_s17, %s9622_s21  }
 0x123   : > { %s4509_s18 = sadd.s32 4294967294, %s6052_s28   ;;  %s6405_s16 = sadd.s32 1, %s6052_s28  }
 0x124   : > { %s45_s20 = ssub.s32 %s6052_s28, %s6405_s16  ;;  %s48_s1 = sadd.s32 1, %s6048_s27 }
 0x125   : > { %p46_p8 = scmp.eq.s32.totalorder %s45_s20, 0  ;;  %p55_p1 = scmp.ne.s32.totalorder %s6048_s27, %s6044_s26 }
 0x126   : > { %p56_p3 = scmp.eq.s32.totalorder %s6052_s28, 0  ;;  %p61_p11 = scmp.ne.s32.totalorder %s6044_s26, %s6040_s25 }
 0x127   : > { %s6416_s0 = scalar_select %p46_p8, %s6048_s27, %s48_s1  }
 0x128   : > { %p6418_p12 = por %p56_p3, %p55_p1  ;;  %p9713_p13 = scmp.eq.s32.totalorder %s6167_s14, 0 }
 0x129   : > { %p321_p0 = scmp.eq.s32.totalorder %s6167_s14, 1  ;;  %p327_p2 = scmp.eq.s32.totalorder %s4509_s18, 1 }
 0x12a   : > { %p6424_p6 = por %p9713_p13, %p61_p11  ;;  %p5392_p5 = scmp.lt.s32.totalorder %s6052_s28, 2 }
 0x12b   : > { %s495_s30 = sand.u32 1, %s6048_s27   ;;  %p6431_p7 = por %p321_p0, %p55_p1 }
 0x12c   : > { %p6435_p9 = por %p327_p2, %p61_p11  ;;  %s4522_s13 = sshll.u32 %s495_s30, 9 }
 0x12d   : > { %s9715_s3 = scalar_select %p6431_p7, 1, 0 }
 0x12e   : > { %s9716_s15 = scalar_select %p6435_p9, 1, 0 }
 0x12f   : > { %s4667_s23 = sshll.u32 %s6052_s28, 13  ;;  %s9717_s29 = sld [smem:[#allocation73_spill]] }
 0x130   : > { %s499_s18 = scalar_lea.vmem [#allocation2], %s4522_s13  ;;  %p6449_p4 = pnand %p5392_p5, %p6418_p12 }
 0x131   : > { %s506_s20 = sshll.u32 %s499_s18, 4  ;;  %s9719_s2 = sld [smem:[#allocation81_spill]]  ;;  %s6445_s20 = int_to_ptr.vmem [resolvable:$true] %s506_s20 }
 0x132   : > { %s520_s9 = scalar_lea.vmem [#allocation17], %s4522_s13  ;;  %s6460_s5 = scalar_lea.sflag [#allocation3], %s495_s30 }
 0x133   : > { %s6458_s4 = sshll.u32 %s520_s9, 4  ;;  %p5868_p8 = pneg %p6449_p4  ;;  %s6492_s4 = int_to_ptr.vmem [resolvable:$true] %s6458_s4 }
 0x135   : > { %s6443_s19 = scalar_lea.hbm %s9717_s29, %s4667_s23  ;;  %s5871_s17 = scalar_lea.hbm %s9717_s29, 16384 }
 0x136   : > { %s5866_s18 = scalar_lea.hbm %s6443_s19, 8192  ;;  %p5872_p11 = scmp.lt.u32.totalorder %s6443_s19, %s9717_s29 }
 0x137   : > { %s6456_s24 = scalar_lea.hbm %s9719_s2, %s4667_s23  ;;  %p5867_p10 = scmp.ne.s32.totalorder %s6443_s19, %s5866_s18 }
 0x138   : > { %p5873_p12 = scmp.lt.u32.totalorder %s5871_s17, %s5866_s18  ;;  %p5875_p0 = scmp.lt.u32.totalorder %s5866_s18, %s6443_s19 }
 0x139   : > { %p5869_p1 = pnand %p5868_p8, %p5867_p10 }
 0x13a   : > { %p5874_p13 = por %p5873_p12, %p5872_p11 }
 0x13b   : > { %p5870_p3 = pneg %p5869_p1 }
 0x13c   : > { %p5876_p2 = por %p5875_p0, %p5874_p13 }
 0x13e   : > { %p5877_p5 = pnand %p5876_p2, %p5870_p3 }
 0x140   : > { %5880 = shalt.err (!%p5877_p5)
}
 0x141   : > { %s5881_s30 = scalar_lea.vmem %s6445_s20, 8192  ;;  %s6068_s6 = smov [#allocation2]  }
 0x142   : > { %p5882_p10 = scmp.ne.s32.totalorder %s6445_s20, %s5881_s30  ;;  %s5886_s13 = sshll.u32 %s6068_s6, 4  ;;  %s5887_s13 = int_to_ptr.vmem [resolvable:$false] %s5886_s13 }
 0x143   : > { %s5888_s9 = scalar_lea.vmem %s5887_s13, 16384  ;;  %p5889_p7 = scmp.lt.s32.totalorder %s6445_s20, %s5887_s13 }
 0x144   : > { %p5884_p1 = pnand %p5882_p10, %p5868_p8  ;;  %p5890_p11 = scmp.lt.s32.totalorder %s5888_s9, %s5881_s30 }
 0x146   : > { %p5885_p9 = pneg %p5884_p1  ;;  %p5891_p12 = por %p5890_p11, %p5889_p7 }
 0x148   : > { %p5892_p13 = pnand %p5891_p12, %p5885_p9 }
 0x14a   : > { %5895 = shalt.err (!%p5892_p13)
}
 0x14b   : > { %s9720_s18 = smov 8   ;;  %s9721_s12 = smov 128  }
 0x14c   : > { %5371 = dma.hbm_to_vmem [thread:$0]  (!%p6449_p4), %s6443_s19, 8192, %s6445_s20, %s6460_s5, %s9721_s12, %s9721_s12, %s9720_s18  }
 0x14d   : > { %s516_s17 = sand.u32 1, %s6052_s28   ;;  %s5896_s23 = scalar_lea.hbm %s6456_s24, 8192 }
 0x14e   : > { %s6495_s21 = scalar_lea.sflag [#allocation18], %s516_s17  ;;  %p5897_p7 = scmp.ne.s32.totalorder %s6456_s24, %s5896_s23 }
 0x14f   : > { %s5901_s13 = scalar_lea.hbm %s9719_s2, 16384  ;;  %p5902_p0 = scmp.lt.u32.totalorder %s6456_s24, %s9719_s2 }
 0x150   : > { %p5899_p9 = pnand %p5897_p7, %p5868_p8  ;;  %p5903_p2 = scmp.lt.u32.totalorder %s5901_s13, %s5896_s23 }
 0x151   : > { %p5905_p10 = scmp.lt.u32.totalorder %s5896_s23, %s6456_s24 }
 0x152   : > { %p5900_p3 = pneg %p5899_p9  ;;  %p5904_p5 = por %p5903_p2, %p5902_p0 }
 0x154   : > { %p5906_p1 = por %p5905_p10, %p5904_p5 }
 0x156   : > { %p5907_p11 = pnand %p5906_p1, %p5900_p3 }
 0x158   : > { %5910 = shalt.err (!%p5907_p11)
}
 0x159   : > { %s5911_s5 = scalar_lea.vmem %s6492_s4, 8192  ;;  %s6069_s19 = smov [#allocation17]  }
 0x15a   : > { %p5912_p12 = scmp.ne.s32.totalorder %s6492_s4, %s5911_s5  ;;  %s5916_s20 = sshll.u32 %s6069_s19, 4  ;;  %s5917_s20 = int_to_ptr.vmem [resolvable:$false] %s5916_s20 }
 0x15b   : > { %s5918_s7 = scalar_lea.vmem %s5917_s20, 16384  ;;  %p5919_p9 = scmp.lt.s32.totalorder %s6492_s4, %s5917_s20 }
 0x15c   : > { %p5914_p13 = pnand %p5912_p12, %p5868_p8  ;;  %p5920_p0 = scmp.lt.s32.totalorder %s5918_s7, %s5911_s5 }
 0x15e   : > { %p5915_p7 = pneg %p5914_p13  ;;  %p5921_p2 = por %p5920_p0, %p5919_p9 }
 0x160   : > { %p5922_p5 = pnand %p5921_p2, %p5915_p7 }
 0x162   : > { %5925 = shalt.err (!%p5922_p5)
}
 0x163   : > { %5374 = dma.hbm_to_vmem [thread:$0]  (!%p6449_p4), %s6456_s24, 8192, %s6492_s4, %s6495_s21, %s9721_s12, %s9721_s12, %s9720_s18  }
 0x164   : > { %s9722_s17 = sld [smem:[#allocation35_spill]] }
 0x16a   : > { %p9723_p8 = scmp.ne.s32.totalorder %s9722_s17, 0 }
 0x16c   : > { %539 = sbr.rel (%p9723_p8) target bundleno = 2645 (0xa55), region = 68 }
 0x173   : > { %s6527_s23 = sand.u32 1, %s6044_s26  }
 0x174   : > { %s6530_s30 = sshll.u32 %s6527_s23, 9  ;;  %s542_s1 = scalar_lea.sflag [#allocation3], %s6527_s23 }
 0x175   : > { %s6534_s6 = scalar_lea.vmem [#allocation2], %s6530_s30 }
 0x176   : > { %5999 = dma.done.wait (%p6424_p6), %s542_s1, 8192  }
 0x177   : > { %6001 = vsyncadd (%p6424_p6), %s542_s1, 4294959104  ;;  %p9724_p4 = scmp.eq.s32.totalorder %s6167_s14, 0 }
 0x179   : > { %6003 = dma.done.wait (%p9724_p4), [#allocation6], 144   ;;  %p9725_p3 = pmov %p9724_p4 }
 0x17b   : > { %6005 = vsyncadd (%p9725_p3), [#allocation6], 4294967152  ;;  %p9726_p10 = pmov %p9725_p3 }
 0x17c   : > { %p9727_p1 = pmov %p9725_p3 }
 0x17d   : > { %6007 = dma.done.wait (%p9726_p10), [#allocation9], 1152  }
 0x17e   : > { %6009 = vsyncadd (%p9727_p1), [#allocation9], 4294966144  ;;  %p9728_p11 = pmov %p9727_p1 }
 0x17f   : > { %p9729_p12 = pmov %p9727_p1 }
 0x180   : > { %6011 = dma.done.wait (%p9728_p11), [#allocation12], 1040  }
 0x181   : > { %6013 = vsyncadd (%p9729_p12), [#allocation12], 4294966256  ;;  %p9730_p13 = pmov %p9727_p1 }
 0x182   : > { %p9731_p7 = pmov %p9727_p1 }
 0x183   : > { %6015 = dma.done.wait (%p9730_p13), [#allocation15], 1040  }
 0x184   : > { %6017 = vsyncadd (%p9731_p7), [#allocation15], 4294966256  ;;  %s582_s4 = sand.u32 1, %s6167_s14   ;;  %s6558_s18 = scalar_lea.vmem [#allocation17], %s6530_s30 }
 0x185   : > { %s583_s24 = scalar_lea.sflag [#allocation18], %s582_s4 }
 0x186   : > { %6019 = dma.done.wait (%p6424_p6), %s583_s24, 8192  }
 0x187   : > { %6021 = vsyncadd (%p6424_p6), %s583_s24, 4294959104  ;;  %p9732_p9 = pmov %p9727_p1 }
 0x188   : > { %p9733_p0 = pmov %p9727_p1 }
 0x189   : > { %6023 = dma.done.wait (%p9732_p9), [#allocation18], 8192  }
 0x18a   : > { %6025 = vsyncadd (%p9733_p0), [#allocation18], 4294959104  ;;  %p9734_p2 = pmov %p9733_p0 }
 0x18b   : > { %p9735_p5 = pmov %p9733_p0 }
 0x18c   : > { %6027 = dma.done.wait (%p9734_p2), [#allocation21], 8192  }
 0x18d   : > { %6029 = vsyncadd (%p9735_p5), [#allocation21], 4294959104  ;;  %v6070_v0 = vmov 0   ;;  %v4545_v1 = vld [vmem:[#allocation5 + $0x2] ss:$0 sm:$0xff]  ;;  %v1240_v9 = vld [vmem:[#allocation8] sm:$0xff] }
 0x18e   : > { %5455 = vset.pattern.permute.xlu1 %v6070_v0  ;;  %5454 = vset.pattern.permute.xlu0 %v6070_v0  ;;  %v4543_v2 = vld [vmem:[#allocation5] ss:$0 sm:$0xff]  ;;  %v4546_v3 = vld [vmem:[#allocation5 + $0x3] ss:$0 sm:$0xff]  ;;  %v4544_v4 = vld [vmem:[#allocation5 + $0x1] ss:$0 sm:$0xff] }
 0x18f   : > { %768 = vperm.xlu1 %5455, %v4545_v1   ;;  %760 = vperm.xlu0 %5454, %v4543_v2   ;;  %v4548_v5 = vld [vmem:[#allocation5 + $0x5] ss:$0 sm:$0xff]  ;;  %v4547_v6 = vld [vmem:[#allocation5 + $0x4] ss:$0 sm:$0xff]  ;;  %v4550_v7 = vld [vmem:[#allocation5 + $0x7] ss:$0 sm:$0xff] }
 0x190   : > { %v4549_v8 = vld [vmem:[#allocation5 + $0x6] ss:$0 sm:$0xff]  ;;  %4833 = vmatprep.subr.mxu0 %v1240_v9  ;;  %v6575_v11 = vld [vmem:[#allocation7] ss:$0 sm:$0xff]  ;;  %vm855_vm0 = vcmask 64512   ;;  %v6594_v19 = vld [vmem:[%s6534_s6 + $0x10] sm:$0xff] }
 0x191   : > { %4834 = vmatpush3.msra.mxu0 %v1240_v9  ;;  %v6573_v10 = vld [vmem:[%s6534_s6] sm:$0xff]  ;;  %v6583_v14 = vld [vmem:[%s6534_s6 + $0x8] sm:$0xff]  ;;  %v986_v23 = vmul.f32 %v6575_v11, %v6594_v19  ;;  %v6603_v24 = vld [vmem:[%s6534_s6 + $0x50] sm:$0xff]  ;;  %vm961_vm1 = vcmask 60416   ;;  %vm1453_vm2 = vcmask 130112   ;;  %vm1460_vm3 = vcmask 195712  }
 0x192   : > { %v984_v12 = vmul.f32 %v6575_v11, %v6573_v10  ;;  %v6580_v13 = vld [vmem:[%s6534_s6 + $0x40] sm:$0xff]  ;;  %v985_v17 = vmul.f32 %v6575_v11, %v6583_v14  ;;  %v6591_v18 = vld [vmem:[%s6534_s6 + $0x48] sm:$0xff]  ;;  %v994_v27 = vmul.f32 %v6575_v11, %v6603_v24  ;;  %v6618_v31 = vld [vmem:[%s6534_s6 + $0x18] sm:$0xff]  ;;  %vm1467_vm4 = vcmask 261312   ;;  %s4541_s22 = sshll.u32 %s6527_s23, 6  ;;  %s4669_s9 = sshll.u32 %s6167_s14, 10 }
 0x193   : > { %772 = vperm.xlu1 %5455, %v4546_v3   ;;  %764 = vperm.xlu0 %5454, %v4544_v4   ;;  %v992_v16 = vmul.f32 %v6575_v11, %v6580_v13  ;;  %v993_v21 = vmul.f32 %v6575_v11, %v6591_v18  ;;  %v6606_v25 = vld [vmem:[%s6534_s6 + $0x80] sm:$0xff]  ;;  %v1054_v28 = vsel %vm855_vm0, %v986_v23, 0.0  ;;  %v6615_v30 = vld [vmem:[%s6534_s6 + $0x88] sm:$0xff]  ;;  %v987_v35 = vmul.f32 %v6575_v11, %v6618_v31  ;;  %v6627_v36 = vld [vmem:[%s6534_s6 + $0x58] sm:$0xff]  ;;  %s7559_s12 = scalar_lea.vmem [#allocation22], %s4541_s22  ;;  %s9851_s7 = sld [smem:[#allocation82_spill]] }
 0x194   : > { %v1048_v15 = vsel %vm855_vm0, %v984_v12, 0.0  ;;  %v1051_v22 = vsel %vm855_vm0, %v985_v17, 0.0  ;;  %v1000_v29 = vmul.f32 %v6575_v11, %v6606_v25  ;;  %v1078_v32 = vsel %vm855_vm0, %v994_v27, 0.0  ;;  %v6630_v37 = vld [vmem:[%s6534_s6 + $0x90] sm:$0xff]  ;;  %v6639_v42 = vld [vmem:[%s6534_s6 + $0xc0] sm:$0xff]  ;;  %v6642_v43 = vld [vmem:[%s6534_s6 + $0xc8] sm:$0xff] }
 0x195   : > { %v1072_v20 = vsel %vm855_vm0, %v992_v16, 0.0  ;;  %v1075_v26 = vsel %vm855_vm0, %v993_v21, 0.0  ;;  %v1001_v33 = vmul.f32 %v6575_v11, %v6615_v30  ;;  %v995_v39 = vmul.f32 %v6575_v11, %v6627_v36  ;;  %9736 = vst [vmem:[#allocation36_spill] sm:$0xff] %v6639_v42  ;;  %9737 = vst [vmem:[#allocation37_spill] sm:$0xff] %v6642_v43  ;;  %v6651_v48 = vld [vmem:[%s6534_s6 + $0x20] sm:$0xff]  ;;  %v6663_v54 = vld [vmem:[%s6534_s6 + $0x98] sm:$0xff] }
 0x196   : > { %v1096_v34 = vsel %vm855_vm0, %v1000_v29, 0.0  ;;  %v1057_v40 = vsel %vm855_vm0, %v987_v35, 0.0  ;;  %v1002_v41 = vmul.f32 %v6575_v11, %v6630_v37  ;;  %v1008_v45 = vmul.f32 %v6575_v11, %v6639_v42  ;;  %v6654_v49 = vld [vmem:[%s6534_s6 + $0x60] sm:$0xff]  ;;  %v6666_v55 = vld [vmem:[%s6534_s6 + $0xd0] sm:$0xff]  ;;  %v6678_v61 = vld [vmem:[%s6534_s6 + $0x108] sm:$0xff]  ;;  %s4270_s5 = sshll.u32 %s7559_s12, 4  ;;  %s8856_s5 = int_to_ptr.vmem [resolvable:$true] %s4270_s5 }
 0x197   : > { %780 = vperm.xlu1 %5455, %v4548_v5   ;;  %776 = vperm.xlu0 %5454, %v4547_v6   ;;  %v1099_v38 = vsel %vm855_vm0, %v1001_v33, 0.0  ;;  %v1081_v44 = vsel %vm855_vm0, %v995_v39, 0.0  ;;  %v1009_v47 = vmul.f32 %v6575_v11, %v6642_v43  ;;  %v988_v51 = vmul.f32 %v6575_v11, %v6651_v48  ;;  %9738 = vst [vmem:[#allocation38_spill] sm:$0xff] %v6666_v55  ;;  %v6675_v60 = vld [vmem:[%s6534_s6 + $0x100] sm:$0xff]  ;;  %v6687_v2 = vld [vmem:[%s6534_s6 + $0x28] sm:$0xff]  ;;  %v6702_v9 = vld [vmem:[%s6534_s6 + $0xd8] sm:$0xff] }
 0x198   : > { %v1102_v46 = vsel %vm855_vm0, %v1002_v41, 0.0  ;;  %v1120_v50 = vsel %vm855_vm0, %v1008_v45, 0.0  ;;  %v996_v53 = vmul.f32 %v6575_v11, %v6654_v49  ;;  %v1003_v57 = vmul.f32 %v6575_v11, %v6663_v54  ;;  %9739 = vst [vmem:[#allocation39_spill] sm:$0xff] %v6675_v60  ;;  %9740 = vst [vmem:[#allocation40_spill] sm:$0xff] %v6678_v61  ;;  %v6690_v3 = vld [vmem:[%s6534_s6 + $0x68] sm:$0xff]  ;;  %v6714_v21 = vld [vmem:[%s6534_s6 + $0x140] sm:$0xff] }
 0x199   : > { %v1123_v52 = vsel %vm855_vm0, %v1009_v47, 0.0  ;;  %v1060_v56 = vsel %vm855_vm0, %v988_v51, 0.0  ;;  %v1010_v59 = vmul.f32 %v6575_v11, %v6666_v55  ;;  %v1016_v63 = vmul.f32 %v6575_v11, %v6675_v60  ;;  %9741 = vst [vmem:[#allocation41_spill] sm:$0xff] %v6702_v9  ;;  %9743 = vst [vmem:[#allocation43_spill] sm:$0xff] %v6714_v21  ;;  %v6726_v29 = vld [vmem:[%s6534_s6 + $0x30] sm:$0xff]  ;;  %v6738_v39 = vld [vmem:[%s6534_s6 + $0xa8] sm:$0xff]  ;;  %s8854_s17 = scalar_lea.hbm %s9851_s7, %s4669_s9 }
 0x19a   : > { %v1084_v58 = vsel %vm855_vm0, %v996_v53, 0.0  ;;  %v1105_v62 = vsel %vm855_vm0, %v1003_v57, 0.0  ;;  %v1017_v1 = vmul.f32 %v6575_v11, %v6678_v61  ;;  %v989_v5 = vmul.f32 %v6575_v11, %v6687_v2  ;;  %v6750_v47 = vld [vmem:[%s6534_s6 + $0x118] sm:$0xff]  ;;  %v6762_v57 = vld [vmem:[%s6534_s6 + $0x180] sm:$0xff]  ;;  %v6908_v55 = vld [vmem:[%s6534_s6 + $0x1a8] sm:$0xff]  ;;  %s4252_s1 = scalar_lea.sflag [#allocation4], %s6527_s23 }
 0x19b   : > { %788 = vperm.xlu1 %5455, %v4550_v7   ;;  %784 = vperm.xlu0 %5454, %v4549_v8   ;;  %v1126_v0 = vsel %vm855_vm0, %v1010_v59, 0.0  ;;  %v1144_v4 = vsel %vm855_vm0, %v1016_v63, 0.0  ;;  %v997_v7 = vmul.f32 %v6575_v11, %v6690_v3  ;;  %v6699_v8 = vld [vmem:[%s6534_s6 + $0xa0] sm:$0xff]  ;;  %v1011_v17 = vmul.f32 %v6575_v11, %v6702_v9  ;;  %9745 = vst [vmem:[#allocation45_spill] sm:$0xff] %v6750_v47  ;;  %v6872_v9 = vld [vmem:[%s6534_s6 + $0x168] sm:$0xff]  ;;  %v6925_v43 = vld [vmem:[%s6534_s6 + $0x1b0] sm:$0xff] }
 0x19c   : > { %v1147_v6 = vsel %vm855_vm0, %v1017_v1, 0.0  ;;  %v1063_v12 = vsel %vm855_vm0, %v989_v5, 0.0  ;;  %v1024_v27 = vmul.f32 %v6575_v11, %v6714_v21  ;;  %v990_v35 = vmul.f32 %v6575_v11, %v6726_v29  ;;  %9747 = vst [vmem:[#allocation47_spill] sm:$0xff] %v6762_v57  ;;  %v6774_v1 = vld [vmem:[%s6534_s6 + $0x38] sm:$0xf]  ;;  %9755 = vst [vmem:[#allocation55_spill] sm:$0xff] %v6872_v9 }
 0x19d   : > { %v1087_v16 = vsel %vm855_vm0, %v997_v7, 0.0  ;;  %v1005_v45 = vmul.f32 %v6575_v11, %v6738_v39  ;;  %v1019_v53 = vmul.f32 %v6575_v11, %v6750_v47  ;;  %v1032_v63 = vmul.f32 %v6575_v11, %v6762_v57  ;;  %9761 = vst [vmem:[#allocation61_spill] sm:$0xff] %v6908_v55  ;;  %v6920_v57 = vld [vmem:[%s6534_s6 + $0x1e8] sm:$0xff]  ;;  %9764 = vst [vmem:[#allocation64_spill] sm:$0xff] %v6925_v43  ;;  %v6928_v21 = vld [vmem:[%s6534_s6 + $0x1b8] sm:$0xf] }
 0x19e   : > { %v991_v7 = vmul.f32 %v6575_v11, %v6774_v1  ;;  %9763 = vst [vmem:[#allocation63_spill] sm:$0xff] %v6920_v57  ;;  %9765 = vst [vmem:[#allocation65_spill] sm:$0xff] %v6928_v21  ;;  %v1039_v42 = vmul.f32 %v6575_v11, %v6928_v21  ;;  %vm1474_vm5 = vcmask 326912   ;;  %vm1481_vm6 = vcmask 392512   ;;  %p9852_p8 = scmp.ne.s32.totalorder %s9715_s3, 0  ;;  %s6072_s4 = smov [#allocation22]  }
 0x19f   : > { %vm1488_vm7 = vcmask 458112   ;;  %vm1495_vm8 = vcmask 523712   ;;  %vm1770_vm9 = vcmask 1041409   ;;  %vm1772_vm10 = vcmask 1042434   ;;  %s5930_s24 = sshll.u32 %s6072_s4, 4  ;;  %s5931_s24 = int_to_ptr.vmem [resolvable:$false] %s5930_s24 }
 0x1a0   : > { %vm1774_vm11 = vcmask 1043459   ;;  %vm1776_vm12 = vcmask 1044484   ;;  %vm1778_vm13 = vcmask 1045509   ;;  %vm1780_vm14 = vcmask 1046534   ;;  %p5933_p10 = scmp.lt.s32.totalorder %s8856_s5, %s5931_s24 }
 0x1a1   : > { %vm1782_vm15 = vcmask 1047559  }
 0x1ba   : > { %1049 = vadd.xlane.f32.xlu0 %v1048_v15  ;;  %v1004_v15 = vmul.f32 %v6575_v11, %v6699_v8 }
 0x1be   : > { %1073 = vadd.xlane.f32.xlu0 %v1072_v20  ;;  %v6711_v20 = vld [vmem:[%s6534_s6 + $0x110] sm:$0xff] }
 0x1bf   : > { %1052 = vadd.xlane.f32.xlu1 %v1051_v22  ;;  %9742 = vst [vmem:[#allocation42_spill] sm:$0xff] %v6711_v20  ;;  %v1108_v22 = vsel %vm855_vm0, %v1004_v15, 0.0  ;;  %v1018_v23 = vmul.f32 %v6575_v11, %v6711_v20  ;;  %v6786_v15 = vld [vmem:[%s6534_s6 + $0xb0] sm:$0xff]  ;;  %v6905_v20 = vld [vmem:[%s6534_s6 + $0x1e0] sm:$0xff] }
 0x1c0   : > { %9760 = vst [vmem:[#allocation60_spill] sm:$0xff] %v6905_v20 }
 0x1c2   : > { %1076 = vadd.xlane.f32.xlu0 %v1075_v26  ;;  %v1129_v26 = vsel %vm855_vm0, %v1011_v17, 0.0 }
 0x1c3   : > { %1055 = vadd.xlane.f32.xlu1 %v1054_v28  ;;  %v6723_v28 = vld [vmem:[%s6534_s6 + $0x148] sm:$0xff] }
 0x1c4   : > { %9744 = vst [vmem:[#allocation44_spill] sm:$0xff] %v6723_v28  ;;  %v1025_v33 = vmul.f32 %v6575_v11, %v6723_v28 }
 0x1c6   : > { %1079 = vadd.xlane.f32.xlu0 %v1078_v32  ;;  %v1150_v32 = vsel %vm855_vm0, %v1018_v23, 0.0  ;;  %v1006_v23 = vmul.f32 %v6575_v11, %v6786_v15 }
 0x1c7   : > { %1097 = vadd.xlane.f32.xlu1 %v1096_v34  ;;  %v1168_v34 = vsel %vm855_vm0, %v1024_v27, 0.0  ;;  %v6798_v27 = vld [vmem:[%s6534_s6 + $0x120] sm:$0xff] }
 0x1ca   : > { %1100 = vadd.xlane.f32.xlu0 %v1099_v38  ;;  %v6735_v38 = vld [vmem:[%s6534_s6 + $0x70] sm:$0xff] }
 0x1cb   : > { %1058 = vadd.xlane.f32.xlu1 %v1057_v40  ;;  %v1171_v40 = vsel %vm855_vm0, %v1025_v33, 0.0  ;;  %v998_v41 = vmul.f32 %v6575_v11, %v6735_v38 }
 0x1ce   : > { %1082 = vadd.xlane.f32.xlu0 %v1081_v44  ;;  %v1066_v44 = vsel %vm855_vm0, %v990_v35, 0.0  ;;  %v1020_v35 = vmul.f32 %v6575_v11, %v6798_v27 }
 0x1cf   : > { %1103 = vadd.xlane.f32.xlu1 %v1102_v46  ;;  %v6747_v46 = vld [vmem:[%s6534_s6 + $0xe0] sm:$0xff] }
 0x1d0   : > { %v1012_v51 = vmul.f32 %v6575_v11, %v6747_v46 }
 0x1d2   : > { %1121 = vadd.xlane.f32.xlu0 %v1120_v50  ;;  %v1090_v50 = vsel %vm855_vm0, %v998_v41, 0.0  ;;  %v6810_v41 = vld [vmem:[%s6534_s6 + $0x190] sm:$0xff] }
 0x1d3   : > { %1124 = vadd.xlane.f32.xlu1 %v1123_v52  ;;  %v1111_v52 = vsel %vm855_vm0, %v1005_v45, 0.0  ;;  %9750 = vst [vmem:[#allocation50_spill] sm:$0xff] %v6810_v41  ;;  %v6816_v45 = vld [vmem:[%s6534_s6 + $0x1c8] sm:$0xff] }
 0x1d4   : > { %9752 = vst [vmem:[#allocation52_spill] sm:$0xff] %v6816_v45 }
 0x1d6   : > { %1061 = vadd.xlane.f32.xlu0 %v1060_v56  ;;  %v6759_v56 = vld [vmem:[%s6534_s6 + $0x150] sm:$0xff] }
 0x1d7   : > { %1085 = vadd.xlane.f32.xlu1 %v1084_v58  ;;  %9746 = vst [vmem:[#allocation46_spill] sm:$0xff] %v6759_v56  ;;  %v1132_v58 = vsel %vm855_vm0, %v1012_v51, 0.0  ;;  %v1026_v59 = vmul.f32 %v6575_v11, %v6759_v56 }
 0x1da   : > { %1106 = vadd.xlane.f32.xlu0 %v1105_v62  ;;  %v1153_v62 = vsel %vm855_vm0, %v1019_v53, 0.0  ;;  %v6825_v53 = vld [vmem:[%s6534_s6 + $0xf0] sm:$0xff] }
 0x1db   : > { %1127 = vadd.xlane.f32.xlu1 %v1126_v0  ;;  %v6771_v0 = vld [vmem:[%s6534_s6 + $0x188] sm:$0xff] }
 0x1dc   : > { %9748 = vst [vmem:[#allocation48_spill] sm:$0xff] %v6771_v0  ;;  %v1033_v5 = vmul.f32 %v6575_v11, %v6771_v0  ;;  %v6911_v0 = vld [vmem:[%s6534_s6 + $0x178] sm:$0xf] }
 0x1dd   : > { %9762 = vst [vmem:[#allocation62_spill] sm:$0xff] %v6911_v0 }
 0x1de   : > { %1145 = vadd.xlane.f32.xlu0 %v1144_v4  ;;  %v1174_v4 = vsel %vm855_vm0, %v1026_v59, 0.0  ;;  %v1156_v59 = vsel %vm855_vm0, %v1020_v35, 0.0 }
 0x1df   : > { %1148 = vadd.xlane.f32.xlu1 %v1147_v6  ;;  %v1192_v6 = vsel %vm855_vm0, %v1032_v63, 0.0  ;;  %v6834_v63 = vld [vmem:[%s6534_s6 + $0x160] sm:$0xff] }
 0x1e2   : > { %1064 = vadd.xlane.f32.xlu0 %v1063_v12  ;;  %v6783_v12 = vld [vmem:[%s6534_s6 + $0x78] sm:$0xf] }
 0x1e3   : > { %1088 = vadd.xlane.f32.xlu1 %v1087_v16  ;;  %v1195_v16 = vsel %vm855_vm0, %v1033_v5, 0.0  ;;  %v999_v17 = vmul.f32 %v6575_v11, %v6783_v12 }
 0x1e6   : > { %1109 = vadd.xlane.f32.xlu0 %v1108_v22  ;;  %v1069_v22 = vsel %vm961_vm1, %v991_v7, 0.0 }
 0x1e7   : > { %1130 = vadd.xlane.f32.xlu1 %v1129_v26  ;;  %v6795_v26 = vld [vmem:[%s6534_s6 + $0xe8] sm:$0xff] }
 0x1e8   : > { %v1013_v33 = vmul.f32 %v6575_v11, %v6795_v26 }
 0x1ea   : > { %1151 = vadd.xlane.f32.xlu0 %v1150_v32  ;;  %v1093_v32 = vsel %vm961_vm1, %v999_v17, 0.0 }
 0x1eb   : > { %1169 = vadd.xlane.f32.xlu1 %v1168_v34  ;;  %v1114_v34 = vsel %vm855_vm0, %v1006_v23, 0.0  ;;  %v1028_v23 = vmul.f32 %v6575_v11, %v6834_v63 }
 0x1ee   : > { %1172 = vadd.xlane.f32.xlu0 %v1171_v40  ;;  %v6807_v40 = vld [vmem:[%s6534_s6 + $0x158] sm:$0xff] }
 0x1ef   : > { %1067 = vadd.xlane.f32.xlu1 %v1066_v44  ;;  %9749 = vst [vmem:[#allocation49_spill] sm:$0xff] %v6807_v40  ;;  %v6813_v44 = vld [vmem:[%s6534_s6 + $0x1c0] sm:$0xff]  ;;  %v1027_v51 = vmul.f32 %v6575_v11, %v6807_v40 }
 0x1f0   : > { %9751 = vst [vmem:[#allocation51_spill] sm:$0xff] %v6813_v44  ;;  %v1040_v5 = vmul.f32 %v6575_v11, %v6813_v44  ;;  %v1037_v44 = vmul.f32 %v6575_v11, %v6908_v55  ;;  %v6940_v55 = vld [vmem:[%s6534_s6 + $0x1f8] sm:$0xf] }
 0x1f1   : > { %9766 = vst [vmem:[#allocation66_spill] sm:$0xff] %v6940_v55 }
 0x1f2   : > { %1091 = vadd.xlane.f32.xlu0 %v1090_v50  ;;  %v1135_v50 = vsel %vm855_vm0, %v1013_v33, 0.0  ;;  %v1216_v35 = vsel %vm855_vm0, %v1040_v5, 0.0  ;;  %v6875_v5 = vld [vmem:[%s6534_s6 + $0x1a0] sm:$0xff] }
 0x1f3   : > { %1112 = vadd.xlane.f32.xlu1 %v1111_v52  ;;  %v6822_v52 = vld [vmem:[%s6534_s6 + $0xb8] sm:$0xf]  ;;  %9756 = vst [vmem:[#allocation56_spill] sm:$0xff] %v6875_v5  ;;  %v1036_v56 = vmul.f32 %v6575_v11, %v6875_v5 }
 0x1f4   : > { %v1007_v7 = vmul.f32 %v6575_v11, %v6822_v52 }
 0x1f5   : > { %v6963_v21 = vsel %vm855_vm0, %v1036_v56, 0.0 }
 0x1f6   : > { %1133 = vadd.xlane.f32.xlu0 %v1132_v58  ;;  %v6828_v58 = vld [vmem:[%s6534_s6 + $0x128] sm:$0xff]  ;;  %v1117_v40 = vsel %vm961_vm1, %v1007_v7, 0.0 }
 0x1f7   : > { %1154 = vadd.xlane.f32.xlu1 %v1153_v62  ;;  %v1034_v62 = vmul.f32 %v6575_v11, %v6810_v41  ;;  %v1021_v17 = vmul.f32 %v6575_v11, %v6828_v58  ;;  %v6878_v41 = vsel %vm855_vm0, %v1028_v23, 0.0 }
 0x1f9   : > { %v1198_v33 = vsel %vm855_vm0, %v1034_v62, 0.0  ;;  %v6869_v62 = vsel %vm855_vm0, %v1021_v17, 0.0  ;;  %v6888_v17 = vld [vmem:[%s6534_s6 + $0x1d8] sm:$0xff] }
 0x1fa   : > { %1175 = vadd.xlane.f32.xlu0 %v1174_v4  ;;  %v6837_v4 = vld [vmem:[%s6534_s6 + $0x198] sm:$0xff]  ;;  %9757 = vst [vmem:[#allocation57_spill] sm:$0xff] %v6888_v17 }
 0x1fb   : > { %1193 = vadd.xlane.f32.xlu1 %v1192_v6  ;;  %v1041_v6 = vmul.f32 %v6575_v11, %v6816_v45  ;;  %v1043_v45 = vmul.f32 %v6575_v11, %v6888_v17  ;;  %v1044_v17 = vmul.f32 %v6575_v11, %v6905_v20  ;;  %v1045_v20 = vmul.f32 %v6575_v11, %v6920_v57 }
 0x1fe   : > { %1196 = vadd.xlane.f32.xlu0 %v1195_v16  ;;  %v1014_v16 = vmul.f32 %v6575_v11, %v6825_v53 }
 0x1ff   : > { %1070 = vadd.xlane.f32.xlu1 %v1069_v22  ;;  %v1177_v22 = vsel %vm855_vm0, %v1027_v51, 0.0  ;;  %v1219_v51 = vsel %vm855_vm0, %v1041_v6, 0.0 }
 0x200   : > { %v1138_v47 = vsel %vm855_vm0, %v1014_v16, 0.0 }
 0x202   : > { %1094 = vadd.xlane.f32.xlu0 %v1093_v32  ;;  %v1035_v32 = vmul.f32 %v6575_v11, %v6837_v4 }
 0x203   : > { %1115 = vadd.xlane.f32.xlu1 %v1114_v34  ;;  %v6856_v34 = vld [vmem:[%s6534_s6 + $0x1d0] sm:$0xff] }
 0x204   : > { %9753 = vst [vmem:[#allocation53_spill] sm:$0xff] %v6856_v34  ;;  %v6881_v6 = vsel %vm855_vm0, %v1035_v32, 0.0  ;;  %v1042_v7 = vmul.f32 %v6575_v11, %v6856_v34  ;;  %v1029_v32 = vmul.f32 %v6575_v11, %v6872_v9  ;;  %v1038_v9 = vmul.f32 %v6575_v11, %v6925_v43 }
 0x206   : > { %1136 = vadd.xlane.f32.xlu0 %v1135_v50  ;;  %v6860_v50 = vld [vmem:[%s6534_s6 + $0xf8] sm:$0xf]  ;;  %v1222_v34 = vsel %vm855_vm0, %v1042_v7, 0.0  ;;  %v6960_v57 = vsel %vm855_vm0, %v1029_v32, 0.0 }
 0x207   : > { %1157 = vadd.xlane.f32.xlu1 %v1156_v59  ;;  %v6863_v59 = vld [vmem:[%s6534_s6 + $0x130] sm:$0xff]  ;;  %v1015_v16 = vmul.f32 %v6575_v11, %v6860_v50 }
 0x208   : > { %9754 = vst [vmem:[#allocation54_spill] sm:$0xff] %v6863_v59  ;;  %v1022_v23 = vmul.f32 %v6575_v11, %v6863_v59  ;;  %v1047_v59 = vmul.f32 %v6575_v11, %v6940_v55 }
 0x20a   : > { %1178 = vadd.xlane.f32.xlu0 %v1177_v22  ;;  %v6891_v22 = vld [vmem:[%s6534_s6 + $0x138] sm:$0xf]  ;;  %v6957_v43 = vsel %vm855_vm0, %v1022_v23, 0.0  ;;  %v6978_v23 = vsel %vm855_vm0, %v1044_v17, 0.0 }
 0x20b   : > { %1199 = vadd.xlane.f32.xlu1 %v1198_v33  ;;  %9758 = vst [vmem:[#allocation58_spill] sm:$0xff] %v6891_v22  ;;  %v6894_v33 = vld [vmem:[%s6534_s6 + $0x170] sm:$0xff]  ;;  %v1023_v28 = vmul.f32 %v6575_v11, %v6891_v22 }
 0x20c   : > { %9759 = vst [vmem:[#allocation59_spill] sm:$0xff] %v6894_v33  ;;  %v1030_v61 = vmul.f32 %v6575_v11, %v6894_v33  ;;  %v6935_v22 = vld [vmem:[%s6534_s6 + $0x1f0] sm:$0xff]  ;;  %v1031_v33 = vmul.f32 %v6575_v11, %v6911_v0 }
 0x20d   : > { %v1046_v0 = vmul.f32 %v6575_v11, %v6935_v22  ;;  %v6969_v7 = vsel %vm961_vm1, %v1023_v28, 0.0  ;;  %v6975_v11 = vsel %vm855_vm0, %v1037_v44, 0.0  ;;  %v6989_v28 = vsel %vm855_vm0, %v1045_v20, 0.0 }
 0x20e   : > { %v6930_v60 = vpop.permute.xlu1 %768  ;;  %v6932_v5 = vpop.permute.xlu0 %760  ;;  %1217 = vadd.xlane.f32.xlu0 %v1216_v35  ;;  %v6950_v35 = vsel %vm961_vm1, %v1015_v16, 0.0  ;;  %v6972_v16 = vsel %vm855_vm0, %v1030_v61, 0.0  ;;  %v6983_v56 = vsel %vm961_vm1, %v1031_v33, 0.0  ;;  %v6992_v61 = vsel %vm961_vm1, %v1039_v42, 0.0 }
 0x20f   : > { %1220 = vadd.xlane.f32.xlu1 %v1219_v51  ;;  %v6966_v51 = vsel %vm855_vm0, %v1043_v45, 0.0  ;;  %v6986_v45 = vsel %vm855_vm0, %v1038_v9, 0.0  ;;  %v797_v44 = vmul.f32 %v6932_v5, %v6726_v29  ;;  %v796_v17 = vmul.f32 %v6932_v5, %v6687_v2 }
 0x210   : > { %v7002_v33 = vsel %vm961_vm1, %v1047_v59, 0.0  ;;  %v7006_v9 = vmul.f32 %v6930_v60, %v6615_v30  ;;  %v7010_v42 = vmul.f32 %v6930_v60, %v6630_v37  ;;  %v7024_v30 = vmul.f32 %v6932_v5, %v6583_v14 }
 0x211   : > { %v798_v37 = vmul.f32 %v6932_v5, %v6774_v1  ;;  %v946_v14 = vsel %vm855_vm0, %v797_v44, 0.0  ;;  %v812_v1 = vmul.f32 %v6930_v60, %v6738_v39  ;;  %v814_v39 = vmul.f32 %v6930_v60, %v6822_v52 }
 0x212   : > { %v6980_v32 = vpop.permute.xlu0 %764  ;;  %1118 = vadd.xlane.f32.xlu0 %v1117_v40  ;;  %v6999_v40 = vsel %vm855_vm0, %v1046_v0, 0.0  ;;  %v7012_v20 = vpop.permute.xlu1 %772 }
 0x213   : > { %1139 = vadd.xlane.f32.xlu1 %v1138_v47  ;;  %v806_v29 = vmul.f32 %v6980_v32, %v6783_v12  ;;  %v805_v2 = vmul.f32 %v6980_v32, %v6735_v38  ;;  %v7020_v47 = vmul.f32 %v6930_v60, %v6663_v54  ;;  %v804_v0 = vmul.f32 %v6980_v32, %v6690_v3 }
 0x214   : > { %v795_v12 = vmul.f32 %v6932_v5, %v6651_v48  ;;  %v803_v38 = vmul.f32 %v6980_v32, %v6654_v49  ;;  %v813_v54 = vmul.f32 %v6930_v60, %v6786_v15  ;;  %v931_v3 = vsel %vm855_vm0, %v796_v17, 0.0 }
 0x215   : > { %v947_v59 = vsel %vm855_vm0, %v805_v2, 0.0  ;;  %v932_v55 = vsel %vm855_vm0, %v804_v0, 0.0  ;;  %v7046_v48 = vmul.f32 %v6932_v5, %v6594_v19  ;;  %v963_v49 = vsel %vm961_vm1, %v806_v29, 0.0 }
 0x216   : > { %1160 = vadd.xlane.f32.xlu0 %v6869_v62  ;;  %v948_v15 = vadd.f32 %v947_v59, %v946_v14  ;;  %v933_v2 = vadd.f32 %v932_v55, %v931_v3  ;;  %v7051_v62 = vmul.f32 %v6932_v5, %v6618_v31  ;;  %v962_v44 = vsel %vm961_vm1, %v798_v37, 0.0  ;;  %v7056_v17 = vpop.permute.xlu0 %776  ;;  %v7063_v55 = vpop.permute.xlu1 %780 }
 0x217   : > { %1181 = vadd.xlane.f32.xlu1 %v6878_v41  ;;  %v811_v41 = vmul.f32 %v6930_v60, %v6699_v8  ;;  %v821_v19 = vmul.f32 %v7012_v20, %v6825_v53  ;;  %v949_v29 = vsel %vm855_vm0, %v813_v54, 0.0  ;;  %v916_v31 = vsel %vm855_vm0, %v795_v12, 0.0 }
 0x218   : > { %v917_v0 = vsel %vm855_vm0, %v803_v38, 0.0  ;;  %v964_v52 = vadd.f32 %v963_v49, %v962_v44  ;;  %v820_v37 = vmul.f32 %v7012_v20, %v6795_v26  ;;  %v934_v59 = vsel %vm855_vm0, %v812_v1, 0.0 }
 0x219   : > { %v918_v8 = vadd.f32 %v917_v0, %v916_v31  ;;  %v950_v14 = vadd.f32 %v949_v29, %v948_v15  ;;  %v828_v53 = vmul.f32 %v7056_v17, %v6828_v58  ;;  %v935_v54 = vadd.f32 %v934_v59, %v933_v2  ;;  %v9767_v31 = vld [vmem:[#allocation54_spill] sm:$0xff] }
 0x21a   : > { %1202 = vadd.xlane.f32.xlu0 %v6881_v6  ;;  %v819_v12 = vmul.f32 %v7012_v20, %v6747_v46  ;;  %v800_v38 = vmul.f32 %v6980_v32, %v6591_v18  ;;  %v7079_v6 = vmul.f32 %v6980_v32, %v6603_v24  ;;  %v827_v26 = vmul.f32 %v7056_v17, %v6798_v27  ;;  %v7094_v27 = vpop.permute.xlu0 %784 }
 0x21b   : > { %1223 = vadd.xlane.f32.xlu1 %v1222_v34  ;;  %v919_v34 = vsel %vm855_vm0, %v811_v41, 0.0  ;;  %v7086_v1 = vmul.f32 %v6980_v32, %v6627_v36  ;;  %v965_v58 = vsel %vm961_vm1, %v814_v39, 0.0  ;;  %v835_v46 = vmul.f32 %v7063_v55, %v6834_v63 }
 0x21c   : > { %v920_v3 = vadd.f32 %v919_v34, %v918_v8  ;;  %v966_v18 = vadd.f32 %v965_v58, %v964_v52  ;;  %v951_v24 = vsel %vm855_vm0, %v821_v19, 0.0  ;;  %v936_v49 = vsel %vm855_vm0, %v820_v37, 0.0  ;;  %v9770_v37 = vld [vmem:[#allocation55_spill] sm:$0xff]  ;;  %v9771_v8 = vld [vmem:[#allocation56_spill] sm:$0xff] }
 0x21d   : > { %v791_v36 = vmul.f32 %v6932_v5, %v6573_v10  ;;  %v7099_v15 = vadd.f32 %v951_v24, %v950_v14  ;;  %v937_v2 = vadd.f32 %v936_v49, %v935_v54  ;;  %v938_v63 = vsel %vm855_vm0, %v828_v53, 0.0 }
 0x21e   : > { %1142 = vadd.xlane.f32.xlu0 %v6950_v35  ;;  %v921_v39 = vsel %vm855_vm0, %v819_v12, 0.0  ;;  %v7103_v35 = vpop.permute.xlu1 %788  ;;  %v923_v44 = vsel %vm855_vm0, %v827_v26, 0.0  ;;  %v822_v41 = vmul.f32 %v7012_v20, %v6860_v50  ;;  %v807_v10 = vmul.f32 %v6930_v60, %v6606_v25  ;;  %v9768_v50 = vld [vmem:[#allocation53_spill] sm:$0xff]  ;;  %v9773_v12 = vld [vmem:[#allocation43_spill] sm:$0xff] }
 0x21f   : > { %1163 = vadd.xlane.f32.xlu1 %v6957_v43  ;;  %v799_v43 = vmul.f32 %v6980_v32, %v6580_v13  ;;  %v922_v5 = vadd.f32 %v921_v39, %v920_v3  ;;  %v7113_v19 = vsel %vm855_vm0, %v835_v46, 0.0  ;;  %v7117_v29 = vmul.f32 %v7094_v27, %v6837_v4  ;;  %v9769_v13 = vld [vmem:[#allocation36_spill] sm:$0xff] }
 0x220   : > { %v829_v0 = vmul.f32 %v7056_v17, %v9767_v31  ;;  %v7124_v52 = vmul.f32 %v7103_v35, %v9768_v50  ;;  %v815_v25 = vmul.f32 %v7012_v20, %v9769_v13  ;;  %v856_v60 = vsel %vm855_vm0, %v791_v36, 0.0  ;;  %v9774_v36 = vld [vmem:[#allocation37_spill] sm:$0xff] }
 0x221   : > { %v857_v32 = vsel %vm855_vm0, %v799_v43, 0.0  ;;  %v7131_v4 = vadd.f32 %v938_v63, %v937_v2  ;;  %v836_v59 = vmul.f32 %v7063_v55, %v9770_v37  ;;  %v967_v53 = vsel %vm961_vm1, %v822_v41, 0.0  ;;  %v9776_v41 = vld [vmem:[#allocation51_spill] sm:$0xff] }
 0x222   : > { %1184 = vadd.xlane.f32.xlu0 %v6960_v57  ;;  %v7137_v57 = vmul.f32 %v7094_v27, %v9771_v8  ;;  %v858_v14 = vadd.f32 %v857_v32, %v856_v60  ;;  %v831_v26 = vmul.f32 %v7063_v55, %v9773_v12  ;;  %v859_v34 = vsel %vm855_vm0, %v807_v10, 0.0  ;;  %v9780_v8 = vld [vmem:[#allocation38_spill] sm:$0xff] }
 0x223   : > { %1205 = vadd.xlane.f32.xlu1 %v6963_v21  ;;  %v9772_v21 = vld [vmem:[#allocation39_spill] sm:$0xff]  ;;  %v7145_v58 = vadd.f32 %v923_v44, %v922_v5  ;;  %v7147_v46 = vadd.f32 %v967_v53, %v966_v18  ;;  %v7150_v3 = vsel %vm855_vm0, %v829_v0, 0.0  ;;  %v861_v49 = vsel %vm855_vm0, %v815_v25, 0.0  ;;  %v9777_v0 = vld [vmem:[#allocation40_spill] sm:$0xff] }
 0x224   : > { %v823_v54 = vmul.f32 %v7056_v17, %v9772_v21  ;;  %v860_v24 = vadd.f32 %v859_v34, %v858_v14  ;;  %v816_v2 = vmul.f32 %v7012_v20, %v9774_v36  ;;  %v871_v63 = vsel %vm855_vm0, %v7024_v30, 0.0  ;;  %v9775_v18 = vld [vmem:[#allocation47_spill] sm:$0xff]  ;;  %v9779_v25 = vld [vmem:[#allocation48_spill] sm:$0xff] }
 0x225   : > { %v872_v39 = vsel %vm855_vm0, %v800_v38, 0.0  ;;  %v839_v44 = vmul.f32 %v7094_v27, %v9775_v18  ;;  %v847_v43 = vmul.f32 %v7103_v35, %v9776_v41  ;;  %v865_v31 = vsel %vm855_vm0, %v831_v26, 0.0 }
 0x226   : > { %1226 = vadd.xlane.f32.xlu0 %v6966_v51  ;;  %v862_v10 = vadd.f32 %v861_v49, %v860_v24  ;;  %v873_v51 = vadd.f32 %v872_v39, %v871_v63  ;;  %v863_v5 = vsel %vm855_vm0, %v823_v54, 0.0  ;;  %v824_v50 = vmul.f32 %v7056_v17, %v9777_v0  ;;  %v9781_v24 = vld [vmem:[#allocation42_spill] sm:$0xff] }
 0x227   : > { %1166 = vadd.xlane.f32.xlu1 %v6969_v7  ;;  %v874_v30 = vsel %vm855_vm0, %v7006_v9, 0.0  ;;  %v9778_v7 = vld [vmem:[#allocation44_spill] sm:$0xff]  ;;  %v840_v60 = vmul.f32 %v7094_v27, %v9779_v25  ;;  %v876_v37 = vsel %vm855_vm0, %v816_v2, 0.0  ;;  %v817_v14 = vmul.f32 %v7012_v20, %v9780_v8 }
 0x228   : > { %v864_v38 = vadd.f32 %v863_v5, %v862_v10  ;;  %v832_v13 = vmul.f32 %v7063_v55, %v9778_v7  ;;  %v875_v32 = vadd.f32 %v874_v30, %v873_v51  ;;  %v886_v53 = vsel %vm855_vm0, %v7046_v48, 0.0  ;;  %v9782_v2 = vld [vmem:[#allocation52_spill] sm:$0xff]  ;;  %v9784_v51 = vld [vmem:[#allocation50_spill] sm:$0xff] }
 0x229   : > { %v887_v9 = vsel %vm855_vm0, %v7079_v6, 0.0  ;;  %v867_v54 = vsel %vm855_vm0, %v839_v44, 0.0  ;;  %v878_v34 = vsel %vm855_vm0, %v824_v50, 0.0  ;;  %v825_v49 = vmul.f32 %v7056_v17, %v9781_v24  ;;  %v9783_v44 = vld [vmem:[#allocation46_spill] sm:$0xff] }
 0x22a   : > { %1187 = vadd.xlane.f32.xlu0 %v6972_v16  ;;  %v866_v21 = vadd.f32 %v865_v31, %v864_v38  ;;  %v877_v12 = vadd.f32 %v876_v37, %v875_v32  ;;  %v888_v26 = vadd.f32 %v887_v9, %v886_v53  ;;  %v869_v16 = vsel %vm855_vm0, %v847_v43, 0.0  ;;  %v9787_v53 = vld [vmem:[#allocation58_spill] sm:$0xff] }
 0x22b   : > { %1208 = vadd.xlane.f32.xlu1 %v6975_v11  ;;  %v889_v48 = vsel %vm855_vm0, %v7010_v42, 0.0  ;;  %v848_v6 = vmul.f32 %v7103_v35, %v9782_v2  ;;  %v880_v39 = vsel %vm855_vm0, %v832_v13, 0.0  ;;  %v882_v18 = vsel %vm855_vm0, %v840_v60, 0.0  ;;  %v9791_v2 = vld [vmem:[#allocation60_spill] sm:$0xff] }
 0x22c   : > { %v868_v36 = vadd.f32 %v867_v54, %v866_v21  ;;  %v879_v11 = vadd.f32 %v878_v34, %v877_v12  ;;  %v890_v63 = vadd.f32 %v889_v48, %v888_v26  ;;  %v833_v41 = vmul.f32 %v7063_v55, %v9783_v44  ;;  %v9788_v21 = vld [vmem:[#allocation49_spill] sm:$0xff] }
 0x22d   : > { %v891_v43 = vsel %vm855_vm0, %v817_v14, 0.0  ;;  %v841_v5 = vmul.f32 %v7094_v27, %v9784_v51  ;;  %v893_v0 = vsel %vm855_vm0, %v825_v49, 0.0  ;;  %v901_v30 = vsel %vm855_vm0, %v7051_v62, 0.0 }
 0x22e   : > { %1229 = vadd.xlane.f32.xlu0 %v6978_v23  ;;  %v870_v42 = vadd.f32 %v869_v16, %v868_v36  ;;  %v881_v10 = vadd.f32 %v880_v39, %v879_v11  ;;  %v892_v31 = vadd.f32 %v891_v43, %v890_v63  ;;  %v9785_v23 = vld [vmem:[#allocation41_spill] sm:$0xff]  ;;  %v902_v38 = vsel %vm855_vm0, %v7086_v1, 0.0  ;;  %v9793_v11 = vld [vmem:[#allocation62_spill] sm:$0xff] }
 0x22f   : > { %1190 = vadd.xlane.f32.xlu1 %v6983_v56  ;;  %v818_v50 = vmul.f32 %v7012_v20, %v9785_v23  ;;  %v940_v7 = vsel %vm855_vm0, %v836_v59, 0.0  ;;  %v903_v25 = vadd.f32 %v902_v38, %v901_v30  ;;  %v884_v60 = vsel %vm855_vm0, %v848_v6, 0.0  ;;  %v9786_v20 = vld [vmem:[#allocation45_spill] sm:$0xff] }
 0x230   : > { %4835 = vmatprep.mubr.msk.f32.mxu0 %vm855_vm0, %v870_v42  ;;  %v883_v56 = vadd.f32 %v882_v18, %v881_v10  ;;  %v894_v13 = vadd.f32 %v893_v0, %v892_v31  ;;  %v895_v32 = vsel %vm855_vm0, %v833_v41, 0.0  ;;  %v826_v37 = vmul.f32 %v7056_v17, %v9786_v20  ;;  %v9792_v6 = vld [vmem:[#allocation61_spill] sm:$0xff]  ;;  %v9794_v18 = vld [vmem:[#allocation64_spill] sm:$0xff] }
 0x231   : > { %v904_v62 = vsel %vm855_vm0, %v7020_v47, 0.0  ;;  %v954_v1 = vadd.f32 %v7150_v3, %v7099_v15  ;;  %v830_v9 = vmul.f32 %v7056_v17, %v9787_v53  ;;  %v834_v54 = vmul.f32 %v7063_v55, %v9788_v21  ;;  %v9789_v15 = vld [vmem:[#allocation59_spill] sm:$0xff] }
 0x232   : > { %1211 = vadd.xlane.f32.xlu0 %v6986_v45  ;;  %v885_v59 = vadd.f32 %v884_v60, %v883_v56  ;;  %v896_v8 = vadd.f32 %v895_v32, %v894_v13  ;;  %v905_v14 = vadd.f32 %v904_v62, %v903_v25  ;;  %v897_v45 = vsel %vm855_vm0, %v841_v5, 0.0  ;;  %v9797_v32 = vld [vmem:[#allocation66_spill] sm:$0xff] }
 0x233   : > { %1232 = vadd.xlane.f32.xlu1 %v6989_v28  ;;  %v906_v12 = vsel %vm855_vm0, %v818_v50, 0.0  ;;  %v941_v47 = vadd.f32 %v940_v7, %v7131_v4  ;;  %v837_v3 = vmul.f32 %v7063_v55, %v9789_v15  ;;  %v926_v16 = vadd.f32 %v7113_v19, %v7145_v58  ;;  %v9790_v4 = vld [vmem:[#allocation57_spill] sm:$0xff] }
 0x234   : > { %4836 = vmatmul.mubr.msk.f32.vlgmr.msra.gmra.mrb[0].mxu0 %vm855_vm0, %v885_v59  ;;  %v898_v28 = vadd.f32 %v897_v45, %v896_v8  ;;  %v907_v26 = vadd.f32 %v906_v12, %v905_v14  ;;  %v927_v17 = vsel %vm855_vm0, %v7137_v57, 0.0  ;;  %v899_v34 = vsel %vm855_vm0, %v7124_v52, 0.0  ;;  %v9796_v50 = vld [vmem:[#allocation65_spill] sm:$0xff] }
 0x235   : > { %v908_v24 = vsel %vm855_vm0, %v826_v37, 0.0  ;;  %v850_v49 = vmul.f32 %v7103_v35, %v9790_v4  ;;  %v851_v19 = vmul.f32 %v7103_v35, %v9791_v2  ;;  %v969_v58 = vsel %vm961_vm1, %v830_v9, 0.0 }
 0x236   : > { %1214 = vadd.xlane.f32.xlu0 %v6992_v61  ;;  %v900_v48 = vadd.f32 %v899_v34, %v898_v28  ;;  %v909_v36 = vadd.f32 %v908_v24, %v907_v26  ;;  %v910_v57 = vsel %vm855_vm0, %v834_v54, 0.0  ;;  %v844_v52 = vmul.f32 %v7094_v27, %v9792_v6 }
 0x237   : > { %1235 = vadd.xlane.f32.xlu1 %v6999_v40  ;;  %v838_v61 = vmul.f32 %v7063_v55, %v9793_v11  ;;  %v970_v40 = vadd.f32 %v969_v58, %v7147_v46  ;;  %v955_v39 = vsel %vm855_vm0, %v837_v3, 0.0  ;;  %v845_v44 = vmul.f32 %v7094_v27, %v9794_v18  ;;  %v9795_v46 = vld [vmem:[#allocation63_spill] sm:$0xff] }
 0x238   : > { %4838 = vmatprep.mubr.msk.f32.mxu0 %vm855_vm0, %v900_v48  ;;  %v911_v63 = vadd.f32 %v910_v57, %v909_v36  ;;  %v912_v41 = vsel %vm855_vm0, %v7117_v29, 0.0  ;;  %v956_v43 = vadd.f32 %v955_v39, %v954_v1  ;;  %v928_v42 = vadd.f32 %v927_v17, %v926_v16 }
 0x239   : > { %v1442_v10 = vlaneseq  ;;  %v914_v55 = vsel %vm855_vm0, %v850_v49, 0.0  ;;  %v929_v5 = vsel %vm855_vm0, %v851_v19, 0.0  ;;  %v852_v31 = vmul.f32 %v7103_v35, %v9795_v46 }
 0x23a   : > { %1238 = vadd.xlane.f32.xlu0 %v7002_v33  ;;  %v913_v51 = vadd.f32 %v912_v41, %v911_v63  ;;  %v942_v0 = vsel %vm855_vm0, %v844_v52, 0.0  ;;  %v853_v23 = vmul.f32 %v7103_v35, %v6935_v22  ;;  %v971_v29 = vsel %vm961_vm1, %v838_v61, 0.0 }
 0x23b   : > { %v846_v30 = vmul.f32 %v7094_v27, %v9796_v50  ;;  %v943_v38 = vadd.f32 %v942_v0, %v941_v47  ;;  %v957_v7 = vsel %vm855_vm0, %v845_v44, 0.0  ;;  %v972_v56 = vadd.f32 %v971_v29, %v970_v40 }
 0x23c   : > { %v915_v33 = vadd.f32 %v914_v55, %v913_v51  ;;  %v930_v13 = vadd.f32 %v929_v5, %v928_v42  ;;  %v958_v25 = vadd.f32 %v957_v7, %v956_v43  ;;  %v944_v60 = vsel %vm855_vm0, %v852_v31, 0.0 }
 0x23d   : > { %v854_v22 = vmul.f32 %v7103_v35, %v9797_v32  ;;  %v973_v20 = vsel %vm961_vm1, %v846_v30, 0.0  ;;  %v7274_v37 = vand.u32 127, %v1442_v10  ;;  %v945_v27 = vadd.f32 %v944_v60, %v943_v38 }
 0x23e   : > { %4839 = vmatmul.mubr.msk.f32.gmra.mrb[2].mxu0 %vm855_vm0, %v915_v33  ;;  %v959_v62 = vsel %vm855_vm0, %v853_v23, 0.0  ;;  %v974_v1 = vadd.f32 %v973_v20, %v972_v56  ;;  %v7277_v8 = vshrl.u32 %v1442_v10, 7 }
 0x23f   : > { %4841 = vmatprep.mubr.msk.f32.mxu0 %vm855_vm0, %v930_v13  ;;  %v960_v59 = vadd.f32 %v959_v62, %v958_v25  ;;  %v975_v14 = vsel %vm961_vm1, %v854_v22, 0.0  ;;  %v1448_v45 = vadd.s32 4294967288, %v7274_v37  ;;  %v1455_v54 = vadd.s32 4294967280, %v7274_v37 }
 0x240   : > { %v976_v35 = vadd.f32 %v975_v14, %v974_v1  ;;  %v7285_v53 = vsub.s32 %v7274_v37, %v7277_v8  ;;  %v1462_v49 = vadd.s32 4294967272, %v7274_v37  ;;  %v1469_v42 = vadd.s32 4294967264, %v7274_v37 }
 0x241   : > { %v7289_v21 = vsub.s32 %v1448_v45, %v7277_v8  ;;  %v7295_v15 = vsub.s32 %v1455_v54, %v7277_v8  ;;  %v1476_v32 = vadd.s32 4294967256, %v7274_v37 }
 0x242   : > { %4842 = vmatmul.mubr.msk.f32.gmra.mrb[4].mxu0 %vm855_vm0, %v945_v27  ;;  %v7306_v57 = vsub.s32 %v1462_v49, %v7277_v8  ;;  %v7321_v0 = vsub.s32 %v1469_v42, %v7277_v8 }
 0x243   : > { %4844 = vmatprep.mubr.msk.f32.mxu0 %vm855_vm0, %v960_v59  ;;  %v7336_v14 = vsub.s32 %v1476_v32, %v7277_v8 }
 0x246   : > { %4845 = vmatmul.mubr.msk.f32.gmra.mrb[6].mxu0 %vm855_vm0, %v976_v35 }
 0x247   : > { %v1050_v9 = vpop.xlane.xlu0 %1049 }
 0x248   : > { %v1447_v12 = vrot.slane %v1050_v9, %v7285_v53 }
 0x24b   : > { %v1074_v47 = vpop.xlane.xlu0 %1073 }
 0x24c   : > { %v1053_v28 = vpop.xlane.xlu1 %1052  ;;  %v1500_v3 = vrot.slane %v1074_v47, %v7285_v53 }
 0x24d   : > { %v1452_v26 = vrot.slane %v1053_v28, %v7289_v21 }
 0x24f   : > { %v1454_v16 = vsel %vm1453_vm2, %v1452_v26, %v1447_v12  ;;  %v1077_v17 = vpop.xlane.xlu0 %1076 }
 0x250   : > { %v1504_v34 = vrot.slane %v1077_v17, %v7289_v21  ;;  %v1056_v24 = vpop.xlane.xlu1 %1055 }
 0x251   : > { %v1459_v4 = vrot.slane %v1056_v24, %v7295_v15  ;;  %v1483_v24 = vadd.s32 4294967248, %v7274_v37 }
 0x252   : > { %v1505_v48 = vsel %vm1453_vm2, %v1504_v34, %v1500_v3 }
 0x253   : > { %v1461_v36 = vsel %vm1460_vm3, %v1459_v4, %v1454_v16  ;;  %v1080_v2 = vpop.xlane.xlu0 %1079 }
 0x254   : > { %v1509_v19 = vrot.slane %v1080_v2, %v7295_v15  ;;  %v1098_v58 = vpop.xlane.xlu1 %1097 }
 0x255   : > { %v1539_v52 = vrot.slane %v1098_v58, %v7285_v53 }
 0x256   : > { %v1510_v6 = vsel %vm1460_vm3, %v1509_v19, %v1505_v48  ;;  %v7351_v19 = vsub.s32 %v1483_v24, %v7277_v8 }
 0x257   : > { %v1101_v11 = vpop.xlane.xlu0 %1100 }
 0x258   : > { %v1543_v61 = vrot.slane %v1101_v11, %v7289_v21  ;;  %v1059_v40 = vpop.xlane.xlu1 %1058 }
 0x259   : > { %v1466_v63 = vrot.slane %v1059_v40, %v7306_v57 }
 0x25a   : > { %v1544_v39 = vsel %vm1453_vm2, %v1543_v61, %v1539_v52 }
 0x25b   : > { %v1468_v18 = vsel %vm1467_vm4, %v1466_v63, %v1461_v36  ;;  %v1083_v44 = vpop.xlane.xlu0 %1082 }
 0x25c   : > { %v1514_v41 = vrot.slane %v1083_v44, %v7306_v57  ;;  %v1104_v43 = vpop.xlane.xlu1 %1103 }
 0x25d   : > { %v1548_v10 = vrot.slane %v1104_v43, %v7295_v15 }
 0x25e   : > { %v1515_v51 = vsel %vm1467_vm4, %v1514_v41, %v1510_v6 }
 0x25f   : > { %v1549_v55 = vsel %vm1460_vm3, %v1548_v10, %v1544_v39  ;;  %v1122_v5 = vpop.xlane.xlu0 %1121 }
 0x260   : > { %v1578_v46 = vrot.slane %v1122_v5, %v7285_v53  ;;  %v1125_v31 = vpop.xlane.xlu1 %1124 }
 0x261   : > { %v1582_v23 = vrot.slane %v1125_v31, %v7289_v21 }
 0x263   : > { %v1583_v29 = vsel %vm1453_vm2, %v1582_v23, %v1578_v46  ;;  %v1062_v50 = vpop.xlane.xlu0 %1061 }
 0x264   : > { %v1473_v30 = vrot.slane %v1062_v50, %v7321_v0  ;;  %v1086_v33 = vpop.xlane.xlu1 %1085 }
 0x265   : > { %v1519_v38 = vrot.slane %v1086_v33, %v7321_v0 }
 0x266   : > { %v1475_v7 = vsel %vm1474_vm5, %v1473_v30, %v1468_v18 }
 0x267   : > { %v1520_v56 = vsel %vm1474_vm5, %v1519_v38, %v1515_v51  ;;  %v1107_v13 = vpop.xlane.xlu0 %1106  ;;  %v1490_v51 = vadd.s32 4294967240, %v7274_v37 }
 0x268   : > { %v1553_v25 = vrot.slane %v1107_v13, %v7306_v57  ;;  %v1128_v60 = vpop.xlane.xlu1 %1127 }
 0x269   : > { %v1587_v22 = vrot.slane %v1128_v60, %v7295_v15  ;;  %v7371_v46 = vsub.s32 %v1490_v51, %v7277_v8 }
 0x26a   : > { %v1554_v20 = vsel %vm1467_vm4, %v1553_v25, %v1549_v55 }
 0x26b   : > { %v1588_v27 = vsel %vm1460_vm3, %v1587_v22, %v1583_v29  ;;  %v1146_v62 = vpop.xlane.xlu0 %1145 }
 0x26c   : > { %v1617_v1 = vrot.slane %v1146_v62, %v7285_v53  ;;  %v1149_v59 = vpop.xlane.xlu1 %1148 }
 0x26d   : > { %v1621_v45 = vrot.slane %v1149_v59, %v7289_v21 }
 0x26f   : > { %v1622_v35 = vsel %vm1453_vm2, %v1621_v45, %v1617_v1  ;;  %v1065_v9 = vpop.xlane.xlu0 %1064 }
 0x270   : > { %v1480_v54 = vrot.slane %v1065_v9, %v7336_v14  ;;  %v1089_v12 = vpop.xlane.xlu1 %1088 }
 0x271   : > { %v1524_v47 = vrot.slane %v1089_v12, %v7336_v14 }
 0x272   : > { %v1482_v28 = vsel %vm1481_vm6, %v1480_v54, %v1475_v7 }
 0x273   : > { %v1525_v26 = vsel %vm1481_vm6, %v1524_v47, %v1520_v56  ;;  %v1110_v3 = vpop.xlane.xlu0 %1109 }
 0x274   : > { %v1558_v16 = vrot.slane %v1110_v3, %v7321_v0  ;;  %v1131_v17 = vpop.xlane.xlu1 %1130 }
 0x275   : > { %v1592_v34 = vrot.slane %v1131_v17, %v7306_v57 }
 0x276   : > { %v1559_v4 = vsel %vm1474_vm5, %v1558_v16, %v1554_v20 }
 0x277   : > { %v1593_v49 = vsel %vm1467_vm4, %v1592_v34, %v1588_v27  ;;  %v1152_v48 = vpop.xlane.xlu0 %1151 }
 0x278   : > { %v1626_v36 = vrot.slane %v1152_v48, %v7295_v15  ;;  %v1170_v2 = vpop.xlane.xlu1 %1169 }
 0x279   : > { %v1656_v6 = vrot.slane %v1170_v2, %v7285_v53 }
 0x27a   : > { %v7354_v58 = vsel %vm1460_vm3, %v1626_v36, %v1622_v35 }
 0x27b   : > { %v1173_v52 = vpop.xlane.xlu0 %1172 }
 0x27c   : > { %v1660_v11 = vrot.slane %v1173_v52, %v7289_v21  ;;  %v1068_v61 = vpop.xlane.xlu1 %1067 }
 0x27d   : > { %v1487_v40 = vrot.slane %v1068_v61, %v7351_v19 }
 0x27e   : > { %v7360_v63 = vsel %vm1453_vm2, %v1660_v11, %v1656_v6 }
 0x27f   : > { %v1489_v39 = vsel %vm1488_vm7, %v1487_v40, %v1482_v28  ;;  %v1092_v18 = vpop.xlane.xlu0 %1091 }
 0x280   : > { %v1529_v44 = vrot.slane %v1092_v18, %v7351_v19  ;;  %v1113_v41 = vpop.xlane.xlu1 %1112 }
 0x281   : > { %v1563_v32 = vrot.slane %v1113_v41, %v7336_v14 }
 0x282   : > { %v1530_v43 = vsel %vm1488_vm7, %v1529_v44, %v1525_v26 }
 0x283   : > { %v1134_v42 = vpop.xlane.xlu0 %1133  ;;  %v1564_v62 = vsel %vm1481_vm6, %v1563_v32, %v1559_v4 }
 0x284   : > { %v1155_v10 = vpop.xlane.xlu1 %1154  ;;  %v1597_v47 = vrot.slane %v1134_v42, %v7321_v0 }
 0x285   : > { %v1631_v36 = vrot.slane %v1155_v10, %v7306_v57 }
 0x286   : > { %v1598_v17 = vsel %vm1474_vm5, %v1597_v47, %v1593_v49 }
 0x287   : > { %v7366_v55 = vpop.xlane.xlu0 %1175  ;;  %v1632_v49 = vsel %vm1467_vm4, %v1631_v36, %v7354_v58 }
 0x288   : > { %v7368_v5 = vpop.xlane.xlu1 %1193  ;;  %v1665_v18 = vrot.slane %v7366_v55, %v7295_v15 }
 0x28a   : > { %v1666_v55 = vsel %vm1460_vm3, %v1665_v18, %v7360_v63 }
 0x28b   : > { %v7373_v31 = vpop.xlane.xlu0 %1196 }
 0x28c   : > { %v1071_v23 = vpop.xlane.xlu1 %1070 }
 0x28d   : > { %v1494_v29 = vrot.slane %v1071_v23, %v7371_v46 }
 0x28f   : > { %v1095_v50 = vpop.xlane.xlu0 %1094  ;;  %v1496_v37 = vsel %vm1495_vm8, %v1494_v29, %v1489_v39 }
 0x290   : > { %v1534_v30 = vrot.slane %v1095_v50, %v7371_v46  ;;  %v1116_v33 = vpop.xlane.xlu1 %1115  ;;  %v1695_v50 = vrot.slane %v7368_v5, %v7285_v53 }
 0x291   : > { %v1568_v20 = vrot.slane %v1116_v33, %v7351_v19 }
 0x292   : > { %v1535_v38 = vsel %vm1495_vm8, %v1534_v30, %v1530_v43  ;;  %v1699_v30 = vrot.slane %v7373_v31, %v7289_v21 }
 0x293   : > { %v1771_v7 = vsel %vm1770_vm9, %v1535_v38, %v1496_v37  ;;  %v1137_v56 = vpop.xlane.xlu0 %1136  ;;  %v1569_v45 = vsel %vm1488_vm7, %v1568_v20, %v1564_v62 }
 0x294   : > { %v1158_v13 = vpop.xlane.xlu1 %1157  ;;  %v1602_v26 = vrot.slane %v1137_v56, %v7336_v14  ;;  %v1700_v5 = vsel %vm1453_vm2, %v1699_v30, %v1695_v50 }
 0x295   : > { %v1636_v61 = vrot.slane %v1158_v13, %v7321_v0 }
 0x296   : > { %v1603_v24 = vsel %vm1481_vm6, %v1602_v26, %v1598_v17 }
 0x297   : > { %v1179_v8 = vpop.xlane.xlu0 %1178  ;;  %v1637_v43 = vsel %vm1474_vm5, %v1636_v61, %v1632_v49 }
 0x298   : > { %v7379_v25 = vpop.xlane.xlu1 %1199  ;;  %v1670_v42 = vrot.slane %v1179_v8, %v7306_v57 }
 0x299   : > { %v1704_v63 = vrot.slane %v7379_v25, %v7295_v15 }
 0x29b   : > { %v1218_v60 = vpop.xlane.xlu0 %1217 }
 0x29c   : > { %v1221_v22 = vpop.xlane.xlu1 %1220  ;;  %v1734_v51 = vrot.slane %v1218_v60, %v7285_v53  ;;  %v1671_v60 = vsel %vm1467_vm4, %v1670_v42, %v1666_v55 }
 0x29d   : > { %v1738_v23 = vrot.slane %v1221_v22, %v7289_v21 }
 0x29f   : > { %v1119_v27 = vpop.xlane.xlu0 %1118  ;;  %v1739_v53 = vsel %vm1453_vm2, %v1738_v23, %v1734_v51  ;;  %v1962_v23 = vld [vmem:[#allocation11] sm:$0xff]  ;;  %vm1970_vm2 = vcmask 490496  }
 0x2a0   : > { %v1573_v1 = vrot.slane %v1119_v27, %v7371_v46  ;;  %v1140_v59 = vpop.xlane.xlu1 %1139  ;;  %4877 = vmatprep.mubr.msk.f32.mxu0 %vm1970_vm2, %v1962_v23  ;;  %v1965_v23 = vld [vmem:[#allocation11 + $0x18] sm:$0xff] }
 0x2a1   : > { %v1607_v16 = vrot.slane %v1140_v59, %v7351_v19 }
 0x2a2   : > { %v1574_v35 = vsel %vm1495_vm8, %v1573_v1, %v1569_v45 }
 0x2a3   : > { %v1773_v9 = vsel %vm1772_vm10, %v1574_v35, %v1771_v7  ;;  %v1161_v54 = vpop.xlane.xlu0 %1160  ;;  %v1608_v2 = vsel %vm1488_vm7, %v1607_v16, %v1603_v24 }
 0x2a4   : > { %v1182_v12 = vpop.xlane.xlu1 %1181  ;;  %v1641_v39 = vrot.slane %v1161_v54, %v7336_v14 }
 0x2a5   : > { %v1675_v7 = vrot.slane %v1182_v12, %v7321_v0 }
 0x2a6   : > { %v1642_v58 = vsel %vm1481_vm6, %v1641_v39, %v1637_v43 }
 0x2a7   : > { %v7388_v28 = vpop.xlane.xlu0 %1202  ;;  %v1676_v20 = vsel %vm1474_vm5, %v1675_v7, %v1671_v60  ;;  %v1373_v7 = vld [vmem:[#allocation10 + $0x18] sm:$0xff] }
 0x2a8   : > { %v1224_v3 = vpop.xlane.xlu1 %1223  ;;  %v1709_v27 = vrot.slane %v7388_v28, %v7306_v57 }
 0x2a9   : > { %v1743_v56 = vrot.slane %v1224_v3, %v7295_v15  ;;  %v1705_v15 = vsel %vm1460_vm3, %v1704_v63, %v1700_v5  ;;  %v1374_v5 = vld [vmem:[#allocation10 + $0x20] sm:$0xff] }
 0x2aa   : > { %v1710_v47 = vsel %vm1467_vm4, %v1709_v27, %v1705_v15 }
 0x2ab   : > { %v1143_v34 = vpop.xlane.xlu0 %1142  ;;  %v1744_v62 = vsel %vm1460_vm3, %v1743_v56, %v1739_v53  ;;  %v1372_v56 = vld [vmem:[#allocation10 + $0x10] sm:$0xff]  ;;  %v1375_v53 = vld [vmem:[#allocation10 + $0x28] sm:$0xff]  ;;  %vm1995_vm3 = vcmask 1043456  }
 0x2ac   : > { %v1612_v4 = vrot.slane %v1143_v34, %v7371_v46  ;;  %v1164_v48 = vpop.xlane.xlu1 %1163 }
 0x2ad   : > { %v1646_v44 = vrot.slane %v1164_v48, %v7351_v19 }
 0x2ae   : > { %v1613_v6 = vsel %vm1495_vm8, %v1612_v4, %v1608_v2 }
 0x2af   : > { %v1775_v52 = vsel %vm1774_vm11, %v1613_v6, %v1773_v9  ;;  %v1185_v11 = vpop.xlane.xlu0 %1184  ;;  %v1647_v33 = vsel %vm1488_vm7, %v1646_v44, %v1642_v58  ;;  %v1371_v58 = vld [vmem:[#allocation10 + $0x8] sm:$0xff] }
 0x2b0   : > { %v1206_v40 = vpop.xlane.xlu1 %1205  ;;  %v1680_v21 = vrot.slane %v1185_v11, %v7336_v14 }
 0x2b1   : > { %v1714_v9 = vrot.slane %v1206_v40, %v7321_v0 }
 0x2b2   : > { %v1681_v25 = vsel %vm1481_vm6, %v1680_v21, %v1676_v20 }
 0x2b3   : > { %v1227_v41 = vpop.xlane.xlu0 %1226  ;;  %v1715_v34 = vsel %vm1474_vm5, %v1714_v9, %v1710_v47 }
 0x2b4   : > { %v1167_v10 = vpop.xlane.xlu1 %1166  ;;  %v1748_v32 = vrot.slane %v1227_v41, %v7306_v57 }
 0x2b5   : > { %v1651_v29 = vrot.slane %v1167_v10, %v7371_v46 }
 0x2b6   : > { %v1749_v54 = vsel %vm1467_vm4, %v1748_v32, %v1744_v62  ;;  %vm6071_vm4 = vmmov 1  }
 0x2b7   : > { %v1652_v37 = vsel %vm1495_vm8, %v1651_v29, %v1647_v33  ;;  %v1188_v38 = vpop.xlane.xlu0 %1187  ;;  %v1370_v29 = vld [vmem:[#allocation10] sm:$0xff] }
 0x2b8   : > { %v1209_v13 = vpop.xlane.xlu1 %1208  ;;  %v1777_v8 = vsel %vm1776_vm12, %v1652_v37, %v1775_v52  ;;  %v1685_v31 = vrot.slane %v1188_v38, %v7351_v19 }
 0x2b9   : > { %v1719_v16 = vrot.slane %v1209_v13, %v7336_v14 }
 0x2ba   : > { %v1686_v45 = vsel %vm1488_vm7, %v1685_v31, %v1681_v25  ;;  %v1377_v25 = vld [vmem:[#allocation10 + $0x38] sm:$0xf] }
 0x2bb   : > { %v1230_v22 = vpop.xlane.xlu0 %1229  ;;  %v1720_v6 = vsel %vm1481_vm6, %v1719_v16, %v1715_v34 }
 0x2bc   : > { %v1191_v1 = vpop.xlane.xlu1 %1190  ;;  %v1753_v35 = vrot.slane %v1230_v22, %v7321_v0 }
 0x2bd   : > { %v1690_v59 = vrot.slane %v1191_v1, %v7371_v46 }
 0x2be   : > { %v1754_v17 = vsel %vm1474_vm5, %v1753_v35, %v1749_v54  ;;  %v1376_v35 = vld [vmem:[#allocation10 + $0x30] sm:$0xff]  ;;  %vm7465_vm5 = vmpackc.low %vm1995_vm3, %vm6071_vm4 }
 0x2bf   : > { %v1691_v57 = vsel %vm1495_vm8, %v1690_v59, %v1686_v45  ;;  %v1212_v12 = vpop.xlane.xlu0 %1211 }
 0x2c0   : > { %v1233_v28 = vpop.xlane.xlu1 %1232  ;;  %v1779_v26 = vsel %vm1778_vm13, %v1691_v57, %v1777_v8  ;;  %v1724_v24 = vrot.slane %v1212_v12, %v7351_v19 }
 0x2c1   : > { %v1758_v3 = vrot.slane %v1233_v28, %v7336_v14 }
 0x2c2   : > { %v1725_v52 = vsel %vm1488_vm7, %v1724_v24, %v1720_v6 }
 0x2c3   : > { %v1215_v0 = vpop.xlane.xlu0 %1214  ;;  %v1759_v48 = vsel %vm1481_vm6, %v1758_v3, %v1754_v17  ;;  %vm2171_vm6 = vcmask 486400  }
 0x2c4   : > { %v1236_v4 = vpop.xlane.xlu1 %1235  ;;  %v1729_v36 = vrot.slane %v1215_v0, %v7371_v46 }
 0x2c5   : > { %v1763_v2 = vrot.slane %v1236_v4, %v7351_v19 }
 0x2c6   : > { %v1730_v14 = vsel %vm1495_vm8, %v1729_v36, %v1725_v52 }
 0x2c7   : > { %v1239_v11 = vpop.xlane.xlu0 %1238  ;;  %v1764_v61 = vsel %vm1488_vm7, %v1763_v2, %v1759_v48  ;;  %v1781_v39 = vsel %vm1780_vm14, %v1730_v14, %v1779_v26 }
 0x2c8   : > { %v1768_v40 = vrot.slane %v1239_v11, %v7371_v46 }
 0x2ca   : > { %v1769_v49 = vsel %vm1495_vm8, %v1768_v40, %v1764_v61 }
 0x2cb   : > { %v1783_v18 = vsel %vm1782_vm15, %v1769_v49, %v1781_v39 }
 0x2cc   : > { %4847 = vmatprep.subr.mxu1 %v1783_v18 }
 0x2cd   : > { %4848 = vmatpush3.msra.mxu1 %v1783_v18 }
 0x307   : > { %v4837_v19 = vpop.f32.mrb[0].mxu0 }
 0x308   : > { %v1331_v44 = vpop.f32.mrb[1].mxu0 }
 0x309   : > { %4849 = vmatprep.mubr.msk.f32.mxu1 %vm855_vm0, %v1331_v44 }
 0x30a   : > { %4850 = vmatmul.mubr.msk.f32.vlgmr.msra.gmra.mrb[0].mxu1 %vm855_vm0, %v4837_v19 }
 0x311   : > { %v4840_v41 = vpop.f32.mrb[2].mxu0 }
 0x312   : > { %v1341_v43 = vpop.f32.mrb[3].mxu0 }
 0x313   : > { %4852 = vmatprep.mubr.msk.f32.mxu1 %vm855_vm0, %v1341_v43 }
 0x314   : > { %4853 = vmatmul.mubr.msk.f32.gmra.mrb[2].mxu1 %vm855_vm0, %v4840_v41 }
 0x315   : > { %v4843_v46 = vpop.f32.mrb[4].mxu0 }
 0x316   : > { %v1351_v42 = vpop.f32.mrb[5].mxu0 }
 0x317   : > { %4855 = vmatprep.mubr.msk.f32.mxu1 %vm855_vm0, %v1351_v42 }
 0x318   : > { %4856 = vmatmul.mubr.msk.f32.gmra.mrb[4].mxu1 %vm855_vm0, %v4843_v46 }
 0x319   : > { %v4846_v10 = vpop.f32.mrb[6].mxu0 }
 0x31a   : > { %v1361_v51 = vpop.f32.mrb[7].mxu0 }
 0x31b   : > { %4858 = vmatprep.mubr.msk.f32.mxu1 %vm855_vm0, %v1361_v51  ;;  %v1964_v51 = vld [vmem:[#allocation11 + $0x10] sm:$0xff] }
 0x31c   : > { %4859 = vmatmul.mubr.msk.f32.gmra.mrb[6].mxu1 %vm855_vm0, %v4846_v10  ;;  %v1963_v10 = vld [vmem:[#allocation11 + $0x8] sm:$0xff] }
 0x3dd   : > { %v4851_v55 = vpop.f32.mrb[0].mxu1 }
 0x3de   : > { %v1881_v50 = vadd.f32 %v4851_v55, %v1371_v58  ;;  %v1875_v30 = vpop.f32.mrb[1].mxu1  ;;  %v1966_v58 = vld [vmem:[#allocation11 + $0x20] sm:$0xff]  ;;  %v1968_v55 = vld [vmem:[#allocation11 + $0x30] sm:$0xff] }
 0x3df   : > { %v1876_v33 = vadd.f32 %v1875_v30, %v1370_v29  ;;  %v1967_v29 = vld [vmem:[#allocation11 + $0x28] sm:$0xff]  ;;  %v4585_v30 = vld [vmem:[#allocation13] ss:$0 sm:$0xff] }
 0x3e0   : > { %v4569_v37 = vmul.f32 -1.442695, %v1881_v50  ;;  %v1969_v50 = vld [vmem:[#allocation11 + $0x38] sm:$0xf] }
 0x3e1   : > { %v4568_v38 = vmul.f32 -1.442695, %v1876_v33 }
 0x3e2   : > { %5456 = vpow2.f32 %v4569_v37  ;;  %v4586_v37 = vld [vmem:[#allocation14] ss:$0 sm:$0xff] }
 0x3e3   : > { %5458 = vpow2.f32 %v4568_v38 }
 0x3e7   : > { %v4854_v13 = vpop.f32.mrb[2].mxu1 }
 0x3e8   : > { %v1891_v8 = vadd.f32 %v4854_v13, %v1373_v7  ;;  %v1885_v60 = vpop.f32.mrb[3].mxu1  ;;  %v2135_v13 = vld [vmem:[#allocation16 + $0x8] sm:$0xff] }
 0x3e9   : > { %v1886_v63 = vadd.f32 %v1885_v60, %v1372_v56  ;;  %v2134_v60 = vld [vmem:[#allocation16] sm:$0xff] }
 0x3ea   : > { %v4571_v21 = vmul.f32 -1.442695, %v1891_v8 }
 0x3eb   : > { %v4570_v31 = vmul.f32 -1.442695, %v1886_v63  ;;  %v4857_v32 = vpop.f32.mrb[4].mxu1 }
 0x3ec   : > { %v5457_v22 = vpop.eup %5456  ;;  %5460 = vpow2.f32 %v4571_v21  ;;  %v1901_v20 = vadd.f32 %v4857_v32, %v1375_v53  ;;  %v1895_v27 = vpop.f32.mrb[5].mxu1 }
 0x3ed   : > { %v5459_v62 = vpop.eup %5458  ;;  %v1939_v1 = vadd.f32 1.0, %v5457_v22  ;;  %5462 = vpow2.f32 %v4570_v31  ;;  %v1896_v15 = vadd.f32 %v1895_v27, %v1374_v5 }
 0x3ee   : > { %v1938_v59 = vadd.f32 1.0, %v5459_v62  ;;  %v4573_v45 = vmul.f32 -1.442695, %v1901_v20  ;;  %v2137_v20 = vld [vmem:[#allocation16 + $0x18] sm:$0xff] }
 0x3ef   : > { %5464 = vrcp.f32 %v1939_v1  ;;  %v4572_v9 = vmul.f32 -1.442695, %v1896_v15  ;;  %v4860_v54 = vpop.f32.mrb[6].mxu1  ;;  %v2136_v1 = vld [vmem:[#allocation16 + $0x10] sm:$0xff] }
 0x3f0   : > { %5466 = vrcp.f32 %v1938_v59  ;;  %v1911_v57 = vadd.f32 %v4860_v54, %v1377_v25  ;;  %v1905_v12 = vpop.f32.mrb[7].mxu1 }
 0x3f1   : > { %5468 = vpow2.f32 %v4573_v45  ;;  %v1906_v47 = vadd.f32 %v1905_v12, %v1376_v35  ;;  %v2139_v12 = vld [vmem:[#allocation16 + $0x28] sm:$0xff] }
 0x3f2   : > { %5470 = vpow2.f32 %v4572_v9  ;;  %v4575_v28 = vmul.f32 -1.442695, %v1911_v57 }
 0x3f3   : > { %v4574_v26 = vmul.f32 -1.442695, %v1906_v47 }
 0x3f4   : > { %5472 = vpow2.f32 %v4575_v28 }
 0x3f5   : > { %5474 = vpow2.f32 %v4574_v26  ;;  %v2138_v26 = vld [vmem:[#allocation16 + $0x20] sm:$0xff] }
 0x3f6   : > { %v5461_v3 = vpop.eup %5460 }
 0x3f7   : > { %v5463_v16 = vpop.eup %5462  ;;  %v1941_v17 = vadd.f32 1.0, %v5461_v3 }
 0x3f8   : > { %v1940_v34 = vadd.f32 1.0, %v5463_v16 }
 0x3f9   : > { %v5465_v24 = vpop.eup %5464  ;;  %5476 = vrcp.f32 %v1941_v17 }
 0x3fa   : > { %v5467_v0 = vpop.eup %5466  ;;  %5478 = vrcp.f32 %v1940_v34 }
 0x3fb   : > { %v5469_v4 = vpop.eup %5468  ;;  %v5113_v48 = vpack.c.bf16 %v5465_v24, %v5467_v0 }
 0x3fc   : > { %v5471_v36 = vpop.eup %5470  ;;  %v1943_v2 = vadd.f32 1.0, %v5469_v4 }
 0x3fd   : > { %v1942_v6 = vadd.f32 1.0, %v5471_v36  ;;  %5114 = vmatprep.subr.bf16.mxu0 %v5113_v48  ;;  %v2141_v36 = vld [vmem:[#allocation16 + $0x38] sm:$0xf] }
 0x3fe   : > { %v5473_v52 = vpop.eup %5472  ;;  %5480 = vrcp.f32 %v1943_v2  ;;  %5116 = vmatpush3.bf16.msra.mxu0 %v5113_v48 }
 0x3ff   : > { %v5475_v11 = vpop.eup %5474  ;;  %5482 = vrcp.f32 %v1942_v6  ;;  %v1945_v14 = vadd.f32 1.0, %v5473_v52  ;;  %v2140_v52 = vld [vmem:[#allocation16 + $0x30] sm:$0xff] }
 0x400   : > { %v1944_v61 = vadd.f32 1.0, %v5475_v11 }
 0x401   : > { %5484 = vrcp.f32 %v1945_v14 }
 0x402   : > { %5486 = vrcp.f32 %v1944_v61 }
 0x403   : > { %v5477_v40 = vpop.eup %5476 }
 0x404   : > { %v5479_v49 = vpop.eup %5478 }
 0x405   : > { %v5117_v39 = vpack.c.bf16 %v5477_v40, %v5479_v49 }
 0x407   : > { %5118 = vmatprep.subr.bf16.mxu0 %v5117_v39 }
 0x408   : > { %v5481_v18 = vpop.eup %5480  ;;  %5120 = vmatpush3.bf16.msra.mxu0 %v5117_v39 }
 0x409   : > { %v5483_v19 = vpop.eup %5482 }
 0x40a   : > { %v5121_v44 = vpack.c.bf16 %v5481_v18, %v5483_v19  ;;  %v5522_v18 = vld [vmem:[%s6534_s6] sm:$0xff]  ;;  %v5523_v19 = vld [vmem:[%s6534_s6 + $0x8] sm:$0xff] }
 0x40b   : > { %v5485_v41 = vpop.eup %5484 }
 0x40c   : > { %v5487_v43 = vpop.eup %5486  ;;  %5122 = vmatprep.subr.bf16.mxu0 %v5121_v44 }
 0x40d   : > { %5124 = vmatpush3.bf16.msra.mxu0 %v5121_v44  ;;  %v5125_v42 = vpack.c.bf16 %v5485_v41, %v5487_v43  ;;  %v5131_v44 = vpack.c.bf16 %v5523_v19, %v5522_v18  ;;  %v5524_v41 = vld [vmem:[%s6534_s6 + $0x40] sm:$0xff]  ;;  %v5525_v43 = vld [vmem:[%s6534_s6 + $0x48] sm:$0xff] }
 0x40e   : > { %v5538_v19 = vld [vmem:[%s6534_s6 + $0x80] sm:$0xff] }
 0x40f   : > { %5127 = vmatprep.subr.msk.bf16.mxu0 %vm7465_vm5, %v5125_v42  ;;  %5132 = vmatprep.subr.bf16.mxu1 %v5131_v44 }
 0x410   : > { %5134 = vmatpush3.bf16.msra.mxu1 %v5131_v44  ;;  %v5539_v44 = vld [vmem:[%s6534_s6 + $0x88] sm:$0xff] }
 0x411   : > { %5130 = vmatpush3.bf16.msk.msra.mxu0 %vm7465_vm5, %v5125_v42  ;;  %v5149_v42 = vpack.c.bf16 %v5525_v43, %v5524_v41  ;;  %v5167_v41 = vpack.c.bf16 %v5539_v44, %v5538_v19  ;;  %v5540_v43 = vld [vmem:[%s6534_s6 + $0xc0] sm:$0xff]  ;;  %v5565_v44 = vld [vmem:[%s6534_s6 + $0x168] sm:$0xff] }
 0x412   : > { %v5564_v19 = vld [vmem:[%s6534_s6 + $0x160] sm:$0xff] }
 0x413   : > { %5150 = vmatprep.subr.bf16.mxu0 %v5149_v42 }
 0x414   : > { %4878 = vmatmul.mubr.msk.f32.vlgmr.msra.gmra.mrb[8].mxu0 %vm1970_vm2, %v1963_v10 }
 0x415   : > { %4880 = vmatprep.mubr.msk.f32.mxu0 %vm1970_vm2, %v1964_v51  ;;  %5152 = vmatpush3.bf16.msra.mxu0 %v5149_v42  ;;  %v5541_v42 = vld [vmem:[%s6534_s6 + $0xc8] sm:$0xff] }
 0x418   : > { %4881 = vmatmul.mubr.msk.f32.gmra.mrb[10].mxu0 %vm1970_vm2, %v1965_v23 }
 0x419   : > { %4883 = vmatprep.mubr.msk.f32.mxu0 %vm1970_vm2, %v1966_v58 }
 0x41c   : > { %4884 = vmatmul.mubr.msk.f32.gmra.mrb[12].mxu0 %vm1970_vm2, %v1967_v29 }
 0x41d   : > { %4886 = vmatprep.mubr.msk.f32.mxu0 %vm1970_vm2, %v1968_v55 }
 0x420   : > { %4887 = vmatmul.mubr.msk.f32.gmra.mrb[14].mxu0 %vm1970_vm2, %v1969_v50 }
 0x4e7   : > { %v4879_v33 = vpop.f32.mrb[8].mxu0 }
 0x4e8   : > { %v2112_v38 = vmul.f32 %v4879_v33, %v4585_v30  ;;  %v2065_v7 = vpop.f32.mrb[9].mxu0 }
 0x4e9   : > { %v2111_v56 = vmul.f32 %v4585_v30, %v2065_v7 }
 0x4ea   : > { %v2127_v8 = vadd.f32 %v4586_v37, %v2112_v38 }
 0x4eb   : > { %v2126_v63 = vadd.f32 %v4586_v37, %v2111_v56  ;;  %v4882_v53 = vpop.f32.mrb[10].mxu0 }
 0x4ec   : > { %v2114_v21 = vmul.f32 %v4882_v53, %v4585_v30  ;;  %v2075_v5 = vpop.f32.mrb[11].mxu0  ;;  %v2143_v31 = vadd.f32 %v2135_v13, %v2127_v8 }
 0x4ed   : > { %v2113_v32 = vmul.f32 %v4585_v30, %v2075_v5  ;;  %v2142_v22 = vadd.f32 %v2134_v60, %v2126_v63 }
 0x4ee   : > { %v2129_v27 = vadd.f32 %v4586_v37, %v2114_v21  ;;  %v2153_v62 = vsel %vm1970_vm2, %v2143_v31, -inf }
 0x4ef   : > { %v2128_v15 = vadd.f32 %v4586_v37, %v2113_v32  ;;  %2154 = vmax.xlane.f32.xlu0 %v2153_v62  ;;  %v4885_v25 = vpop.f32.mrb[12].mxu0  ;;  %v2150_v59 = vsel %vm1970_vm2, %v2142_v22, -inf }
 0x4f0   : > { %v2116_v45 = vmul.f32 %v4885_v25, %v4585_v30  ;;  %2151 = vmax.xlane.f32.xlu1 %v2150_v59  ;;  %v2085_v35 = vpop.f32.mrb[13].mxu0  ;;  %v2145_v9 = vadd.f32 %v2137_v20, %v2129_v27 }
 0x4f1   : > { %v2115_v54 = vmul.f32 %v4585_v30, %v2085_v35  ;;  %v2144_v57 = vadd.f32 %v2136_v1, %v2128_v15 }
 0x4f2   : > { %v2131_v47 = vadd.f32 %v4586_v37, %v2116_v45  ;;  %v2159_v28 = vsel %vm1970_vm2, %v2145_v9, -inf }
 0x4f3   : > { %v2130_v3 = vadd.f32 %v4586_v37, %v2115_v54  ;;  %2160 = vmax.xlane.f32.xlu0 %v2159_v28  ;;  %v4888_v16 = vpop.f32.mrb[14].mxu0  ;;  %v2156_v17 = vsel %vm1970_vm2, %v2144_v57, -inf }
 0x4f4   : > { %v2118_v34 = vmul.f32 %v4888_v16, %v4585_v30  ;;  %2157 = vmax.xlane.f32.xlu1 %v2156_v17  ;;  %v2095_v24 = vpop.f32.mrb[15].mxu0  ;;  %v2147_v0 = vadd.f32 %v2139_v12, %v2131_v47  ;;  %v5526_v16 = vld [vmem:[%s6534_s6 + $0x10] sm:$0xff]  ;;  %v5527_v17 = vld [vmem:[%s6534_s6 + $0x18] sm:$0xff] }
 0x4f5   : > { %v2117_v4 = vmul.f32 %v4585_v30, %v2095_v24  ;;  %v2146_v48 = vadd.f32 %v2138_v26, %v2130_v3  ;;  %v5528_v24 = vld [vmem:[%s6534_s6 + $0x50] sm:$0xff] }
 0x4f6   : > { %v2133_v2 = vadd.f32 %v4586_v37, %v2118_v34  ;;  %v2165_v6 = vsel %vm1970_vm2, %v2147_v0, -inf  ;;  %v5135_v34 = vpack.c.bf16 %v5527_v17, %v5526_v16  ;;  %v5552_v16 = vld [vmem:[%s6534_s6 + $0xf0] sm:$0xff]  ;;  %v5553_v17 = vld [vmem:[%s6534_s6 + $0xf8] sm:$0xf] }
 0x4f7   : > { %v2132_v11 = vadd.f32 %v4586_v37, %v2117_v4  ;;  %2166 = vmax.xlane.f32.xlu0 %v2165_v6  ;;  %v2162_v14 = vsel %vm1970_vm2, %v2146_v48, -inf  ;;  %v5532_v6 = vld [vmem:[%s6534_s6 + $0x70] sm:$0xff] }
 0x4f8   : > { %2163 = vmax.xlane.f32.xlu1 %v2162_v14  ;;  %v2149_v61 = vadd.f32 %v2141_v36, %v2133_v2  ;;  %5136 = vmatprep.subr.bf16.mxu1 %v5135_v34  ;;  %v5531_v36 = vld [vmem:[%s6534_s6 + $0x38] sm:$0xf]  ;;  %v5534_v14 = vld [vmem:[%s6534_s6 + $0x20] sm:$0xff] }
 0x4f9   : > { %v2148_v40 = vadd.f32 %v2140_v52, %v2132_v11  ;;  %5138 = vmatpush3.bf16.msra.mxu1 %v5135_v34  ;;  %v5533_v52 = vld [vmem:[%s6534_s6 + $0x78] sm:$0xf]  ;;  %v5197_v34 = vpack.c.bf16 %v5553_v17, %v5552_v16 }
 0x4fa   : > { %v2172_v49 = vsel %vm2171_vm6, %v2149_v61, -inf  ;;  %v5161_v11 = vpack.c.bf16 %v5533_v52, %v5532_v6  ;;  %v5558_v6 = vld [vmem:[%s6534_s6 + $0x110] sm:$0xff]  ;;  %v5559_v52 = vld [vmem:[%s6534_s6 + $0x118] sm:$0xff] }
 0x4fb   : > { %2173 = vmax.xlane.f32.xlu0 %v2172_v49  ;;  %v2168_v39 = vsel %vm1970_vm2, %v2148_v40, -inf  ;;  %v5536_v49 = vld [vmem:[%s6534_s6 + $0x60] sm:$0xff] }
 0x4fc   : > { %2169 = vmax.xlane.f32.xlu1 %v2168_v39  ;;  %v5537_v39 = vld [vmem:[%s6534_s6 + $0x68] sm:$0xff] }
 0x4fd   : > { %v5157_v18 = vpack.c.bf16 %v5537_v39, %v5536_v49  ;;  %v5562_v49 = vld [vmem:[%s6534_s6 + $0x120] sm:$0xff]  ;;  %v5563_v39 = vld [vmem:[%s6534_s6 + $0x128] sm:$0xff] }
 0x57c   : > { %v2155_v10 = vpop.xlane.xlu0 %2154 }
 0x57d   : > { %v2176_v51 = vsub.f32 %v2143_v31, %v2155_v10  ;;  %v2152_v23 = vpop.xlane.xlu1 %2151  ;;  %v5185_v10 = vpack.c.bf16 %v5541_v42, %v5540_v43  ;;  %v5566_v43 = vld [vmem:[%s6534_s6 + $0x130] sm:$0xff]  ;;  %v5567_v42 = vld [vmem:[%s6534_s6 + $0x138] sm:$0xf] }
 0x57e   : > { %v2175_v58 = vsub.f32 %v2142_v22, %v2152_v23 }
 0x57f   : > { %v2185_v29 = vmul.f32 1.442695, %v2176_v51 }
 0x580   : > { %v2183_v55 = vmul.f32 1.442695, %v2175_v58  ;;  %v2161_v50 = vpop.xlane.xlu0 %2160 }
 0x581   : > { %5488 = vpow2.f32 %v2185_v29  ;;  %v2178_v30 = vsub.f32 %v2145_v9, %v2161_v50  ;;  %v2158_v33 = vpop.xlane.xlu1 %2157 }
 0x582   : > { %5490 = vpow2.f32 %v2183_v55  ;;  %v2177_v37 = vsub.f32 %v2144_v57, %v2158_v33 }
 0x583   : > { %v2189_v38 = vmul.f32 1.442695, %v2178_v30 }
 0x584   : > { %v2187_v7 = vmul.f32 1.442695, %v2177_v37  ;;  %v2167_v56 = vpop.xlane.xlu0 %2166 }
 0x585   : > { %5492 = vpow2.f32 %v2189_v38  ;;  %v2180_v13 = vsub.f32 %v2147_v0, %v2167_v56  ;;  %v2164_v8 = vpop.xlane.xlu1 %2163  ;;  %v5529_v0 = vld [vmem:[%s6534_s6 + $0x58] sm:$0xff] }
 0x586   : > { %5494 = vpow2.f32 %v2187_v7  ;;  %v2179_v60 = vsub.f32 %v2146_v48, %v2164_v8  ;;  %v5153_v4 = vpack.c.bf16 %v5529_v0, %v5528_v24  ;;  %v5530_v48 = vld [vmem:[%s6534_s6 + $0x30] sm:$0xff]  ;;  %v5543_v8 = vld [vmem:[%s6534_s6 + $0x98] sm:$0xff] }
 0x587   : > { %v2193_v63 = vmul.f32 1.442695, %v2180_v13  ;;  %v5143_v2 = vpack.c.bf16 %v5531_v36, %v5530_v48  ;;  %v5542_v13 = vld [vmem:[%s6534_s6 + $0x90] sm:$0xff]  ;;  %v5556_v48 = vld [vmem:[%s6534_s6 + $0x140] sm:$0xff]  ;;  %v5557_v36 = vld [vmem:[%s6534_s6 + $0x148] sm:$0xff] }
 0x588   : > { %v2191_v53 = vmul.f32 1.442695, %v2179_v60  ;;  %v2174_v21 = vpop.xlane.xlu0 %2173  ;;  %5154 = vmatprep.subr.bf16.mxu0 %v5153_v4  ;;  %v5171_v60 = vpack.c.bf16 %v5543_v8, %v5542_v13  ;;  %v5575_v13 = vld [vmem:[%s6534_s6 + $0x198] sm:$0xff] }
 0x589   : > { %5496 = vpow2.f32 %v2193_v63  ;;  %v2182_v5 = vsub.f32 %v2149_v61, %v2174_v21  ;;  %v2170_v31 = vpop.xlane.xlu1 %2169  ;;  %5156 = vmatpush3.bf16.msra.mxu0 %v5153_v4  ;;  %v5535_v61 = vld [vmem:[%s6534_s6 + $0x28] sm:$0xff]  ;;  %v5544_v63 = vld [vmem:[%s6534_s6 + $0xd0] sm:$0xff] }
 0x58a   : > { %5498 = vpow2.f32 %v2191_v53  ;;  %v2181_v32 = vsub.f32 %v2148_v40, %v2170_v31  ;;  %v5139_v40 = vpack.c.bf16 %v5535_v61, %v5534_v14  ;;  %5158 = vmatprep.subr.bf16.mxu0 %v5157_v18  ;;  %v5545_v53 = vld [vmem:[%s6534_s6 + $0xd8] sm:$0xff]  ;;  %v5560_v14 = vld [vmem:[%s6534_s6 + $0x150] sm:$0xff] }
 0x58b   : > { %v7492_v22 = vpop.eup %5488  ;;  %v2197_v20 = vmul.f32 1.442695, %v2182_v5  ;;  %v5189_v21 = vpack.c.bf16 %v5545_v53, %v5544_v63  ;;  %v5561_v61 = vld [vmem:[%s6534_s6 + $0x158] sm:$0xff] }
 0x58c   : > { %v7494_v27 = vpop.eup %5490  ;;  %v2195_v62 = vmul.f32 1.442695, %v2181_v32  ;;  %v2202_v1 = vsel %vm1970_vm2, %v7492_v22, 0.0  ;;  %5140 = vmatprep.subr.bf16.mxu1 %v5139_v40  ;;  %v5577_v63 = vld [vmem:[%s6534_s6 + $0x1d8] sm:$0xff] }
 0x58d   : > { %5500 = vpow2.f32 %v2197_v20  ;;  %2203 = vadd.xlane.f32.xlu0 %v2202_v1  ;;  %v2199_v15 = vsel %vm1970_vm2, %v7494_v27, 0.0  ;;  %5142 = vmatpush3.bf16.msra.mxu1 %v5139_v40  ;;  %v5546_v20 = vld [vmem:[%s6534_s6 + $0xa0] sm:$0xff]  ;;  %v5225_v40 = vpack.c.bf16 %v5561_v61, %v5560_v14 }
 0x58e   : > { %5502 = vpow2.f32 %v2195_v62  ;;  %2200 = vadd.xlane.f32.xlu1 %v2199_v15  ;;  %5160 = vmatpush3.bf16.msra.mxu0 %v5157_v18  ;;  %v5548_v1 = vld [vmem:[%s6534_s6 + $0xe0] sm:$0xff]  ;;  %v5549_v15 = vld [vmem:[%s6534_s6 + $0xe8] sm:$0xff]  ;;  %v5211_v18 = vpack.c.bf16 %v5563_v39, %v5562_v49 }
 0x58f   : > { %v7500_v25 = vpop.eup %5492  ;;  %5145 = vmatprep.subr.msk.bf16.mxu1 %vm7465_vm5, %v5143_v2  ;;  %5163 = vmatprep.subr.msk.bf16.mxu0 %vm7465_vm5, %v5161_v11 }
 0x590   : > { %v7502_v59 = vpop.eup %5494  ;;  %v2208_v45 = vsel %vm1970_vm2, %v7500_v25, 0.0 }
 0x591   : > { %2209 = vadd.xlane.f32.xlu0 %v2208_v45  ;;  %v2205_v35 = vsel %vm1970_vm2, %v7502_v59, 0.0  ;;  %5148 = vmatpush3.bf16.msk.msra.mxu1 %vm7465_vm5, %v5143_v2  ;;  %v5221_v2 = vpack.c.bf16 %v5557_v36, %v5556_v48  ;;  %v3329_v36 = vld [vmem:[%s6558_s18 + $0x10] sm:$0xff] }
 0x592   : > { %2206 = vadd.xlane.f32.xlu1 %v2205_v35  ;;  %5166 = vmatpush3.bf16.msk.msra.mxu0 %vm7465_vm5, %v5161_v11  ;;  %v5207_v11 = vpack.c.bf16 %v5559_v52, %v5558_v6 }
 0x593   : > { %v7508_v9 = vpop.eup %5496  ;;  %5168 = vmatprep.subr.bf16.mxu1 %v5167_v41  ;;  %5186 = vmatprep.subr.bf16.mxu0 %v5185_v10 }
 0x594   : > { %v7510_v54 = vpop.eup %5498  ;;  %v2214_v57 = vsel %vm1970_vm2, %v7508_v9, 0.0 }
 0x595   : > { %2215 = vadd.xlane.f32.xlu0 %v2214_v57  ;;  %v2211_v12 = vsel %vm1970_vm2, %v7510_v54, 0.0 }
 0x596   : > { %2212 = vadd.xlane.f32.xlu1 %v2211_v12  ;;  %v5550_v12 = vld [vmem:[%s6534_s6 + $0xb0] sm:$0xff] }
 0x597   : > { %v7516_v47 = vpop.eup %5500 }
 0x598   : > { %v7518_v28 = vpop.eup %5502  ;;  %v2220_v26 = vsel %vm2171_vm6, %v7516_v47, 0.0 }
 0x599   : > { %2221 = vadd.xlane.f32.xlu0 %v2220_v26  ;;  %v2217_v3 = vsel %vm1970_vm2, %v7518_v28, 0.0  ;;  %v5551_v26 = vld [vmem:[%s6534_s6 + $0xb8] sm:$0xf] }
 0x59a   : > { %2218 = vadd.xlane.f32.xlu1 %v2217_v3  ;;  %v5179_v3 = vpack.c.bf16 %v5551_v26, %v5550_v12 }
 0x61a   : > { %v2204_v51 = vpop.xlane.xlu0 %2203 }
 0x61b   : > { %5504 = vrcp.f32 %v2204_v51  ;;  %v2201_v23 = vpop.xlane.xlu1 %2200  ;;  %v5568_v51 = vld [vmem:[%s6534_s6 + $0x170] sm:$0xff] }
 0x61c   : > { %5506 = vrcp.f32 %v2201_v23  ;;  %v5569_v23 = vld [vmem:[%s6534_s6 + $0x178] sm:$0xf] }
 0x61e   : > { %v2210_v58 = vpop.xlane.xlu0 %2209 }
 0x61f   : > { %5508 = vrcp.f32 %v2210_v58  ;;  %v2207_v29 = vpop.xlane.xlu1 %2206  ;;  %v5233_v58 = vpack.c.bf16 %v5569_v23, %v5568_v51  ;;  %v3331_v23 = vld [vmem:[%s6558_s18 + $0x20] sm:$0xff] }
 0x620   : > { %5510 = vrcp.f32 %v2207_v29  ;;  %v5570_v29 = vld [vmem:[%s6534_s6 + $0x180] sm:$0xff] }
 0x622   : > { %v2216_v55 = vpop.xlane.xlu0 %2215 }
 0x623   : > { %5512 = vrcp.f32 %v2216_v55  ;;  %v2213_v50 = vpop.xlane.xlu1 %2212  ;;  %v5571_v55 = vld [vmem:[%s6534_s6 + $0x188] sm:$0xff] }
 0x624   : > { %5514 = vrcp.f32 %v2213_v50  ;;  %v5239_v50 = vpack.c.bf16 %v5571_v55, %v5570_v29 }
 0x625   : > { %v5505_v30 = vpop.eup %5504 }
 0x626   : > { %v5507_v33 = vpop.eup %5506  ;;  %v7550_v37 = vmul.f32 %v5505_v30, %v7492_v22  ;;  %v2222_v38 = vpop.xlane.xlu0 %2221  ;;  %v5572_v30 = vld [vmem:[%s6534_s6 + $0x1c0] sm:$0xff] }
 0x627   : > { %v7553_v7 = vmul.f32 %v5507_v33, %v7494_v27  ;;  %5516 = vrcp.f32 %v2222_v38  ;;  %v2219_v56 = vpop.xlane.xlu1 %2218  ;;  %v5547_v27 = vld [vmem:[%s6534_s6 + $0xa8] sm:$0xff] }
 0x628   : > { %5518 = vrcp.f32 %v2219_v56  ;;  %2240 = vst.msk [vmem:[%s7559_s12 + $0x8] sm:$0xff] %vm1970_vm2, %v7550_v37  ;;  %v5175_v62 = vpack.c.bf16 %v5547_v27, %v5546_v20  ;;  %v5573_v33 = vld [vmem:[%s6534_s6 + $0x1c8] sm:$0xff]  ;;  %v5574_v56 = vld [vmem:[%s6534_s6 + $0x190] sm:$0xff]  ;;  %v5580_v20 = vld [vmem:[%s6534_s6 + $0x1e0] sm:$0xff] }
 0x629   : > { %v5509_v5 = vpop.eup %5508  ;;  %4905 = vmatprep.mubr.msk.f32.mxu1 %vm1970_vm2, %v7553_v7  ;;  %4933 = vmatprep.mubr.msk.f32.mxu0 %vm1970_vm2, %v7553_v7  ;;  %2239 = vst.msk [vmem:[%s7559_s12] sm:$0xff] %vm1970_vm2, %v7553_v7  ;;  %v5257_v38 = vpack.c.bf16 %v5573_v33, %v5572_v30  ;;  %v5243_v8 = vpack.c.bf16 %v5575_v13, %v5574_v56  ;;  %v5581_v27 = vld [vmem:[%s6534_s6 + $0x1e8] sm:$0xff] }
 0x62a   : > { %v5511_v31 = vpop.eup %5510  ;;  %v7572_v32 = vmul.f32 %v5509_v5, %v7500_v25  ;;  %4906 = vmatmul.mubr.msk.f32.vlgmr.msra.gmra.mrb[8].mxu1 %vm1970_vm2, %v7550_v37  ;;  %4934 = vmatmul.mubr.msk.f32.vlgmr.msra.gmra.mrb[16].mxu0 %vm1970_vm2, %v7550_v37  ;;  %v5193_v25 = vpack.c.bf16 %v5549_v15, %v5548_v1  ;;  %v5579_v5 = vld [vmem:[%s6534_s6 + $0x1a8] sm:$0xff]  ;;  %v5582_v1 = vld [vmem:[%s6534_s6 + $0x1b0] sm:$0xff]  ;;  %v5583_v15 = vld [vmem:[%s6534_s6 + $0x1b8] sm:$0xf] }
 0x62b   : > { %v7579_v22 = vmul.f32 %v5511_v31, %v7502_v59  ;;  %5170 = vmatpush3.bf16.msra.mxu1 %v5167_v41  ;;  %5188 = vmatpush3.bf16.msra.mxu0 %v5185_v10  ;;  %v5229_v41 = vpack.c.bf16 %v5565_v44, %v5564_v19  ;;  %v5215_v10 = vpack.c.bf16 %v5567_v42, %v5566_v43  ;;  %v3332_v44 = vld [vmem:[%s6558_s18 + $0x28] sm:$0xff] }
 0x62c   : > { %5172 = vmatprep.subr.bf16.mxu1 %v5171_v60  ;;  %5190 = vmatprep.subr.bf16.mxu0 %v5189_v21  ;;  %2242 = vst.msk [vmem:[%s7559_s12 + $0x18] sm:$0xff] %vm1970_vm2, %v7572_v32 }
 0x62d   : > { %v5513_v45 = vpop.eup %5512  ;;  %4908 = vmatprep.mubr.msk.f32.mxu1 %vm1970_vm2, %v7579_v22  ;;  %4936 = vmatprep.mubr.msk.f32.mxu0 %vm1970_vm2, %v7579_v22  ;;  %2241 = vst.msk [vmem:[%s7559_s12 + $0x10] sm:$0xff] %vm1970_vm2, %v7579_v22 }
 0x62e   : > { %v5515_v59 = vpop.eup %5514  ;;  %v7596_v35 = vmul.f32 %v5513_v45, %v7508_v9  ;;  %4909 = vmatmul.mubr.msk.f32.gmra.mrb[10].mxu1 %vm1970_vm2, %v7572_v32  ;;  %4937 = vmatmul.mubr.msk.f32.gmra.mrb[18].mxu0 %vm1970_vm2, %v7572_v32  ;;  %v5584_v45 = vld [vmem:[%s6534_s6 + $0x1f0] sm:$0xff] }
 0x62f   : > { %v7603_v57 = vmul.f32 %v5515_v59, %v7510_v54  ;;  %5174 = vmatpush3.bf16.msra.mxu1 %v5171_v60  ;;  %5192 = vmatpush3.bf16.msra.mxu0 %v5189_v21  ;;  %v5576_v60 = vld [vmem:[%s6534_s6 + $0x1d0] sm:$0xff]  ;;  %v5578_v21 = vld [vmem:[%s6534_s6 + $0x1a0] sm:$0xff]  ;;  %v5585_v59 = vld [vmem:[%s6534_s6 + $0x1f8] sm:$0xf] }
 0x630   : > { %5176 = vmatprep.subr.bf16.mxu1 %v5175_v62  ;;  %5194 = vmatprep.subr.bf16.mxu0 %v5193_v25  ;;  %2244 = vst.msk [vmem:[%s7559_s12 + $0x28] sm:$0xff] %vm1970_vm2, %v7596_v35  ;;  %v5261_v53 = vpack.c.bf16 %v5577_v63, %v5576_v60  ;;  %v5247_v31 = vpack.c.bf16 %v5579_v5, %v5578_v21  ;;  %v3334_v5 = vld [vmem:[%s6558_s18 + $0x38] sm:$0xf] }
 0x631   : > { %v5517_v9 = vpop.eup %5516  ;;  %4911 = vmatprep.mubr.msk.f32.mxu1 %vm1970_vm2, %v7603_v57  ;;  %4939 = vmatprep.mubr.msk.f32.mxu0 %vm1970_vm2, %v7603_v57  ;;  %2243 = vst.msk [vmem:[%s7559_s12 + $0x20] sm:$0xff] %vm1970_vm2, %v7603_v57  ;;  %v5269_v12 = vpack.c.bf16 %v5585_v59, %v5584_v45 }
 0x632   : > { %v5519_v54 = vpop.eup %5518  ;;  %v7620_v24 = vmul.f32 %v5517_v9, %v7516_v47  ;;  %4912 = vmatmul.mubr.msk.f32.gmra.mrb[12].mxu1 %vm1970_vm2, %v7596_v35  ;;  %4940 = vmatmul.mubr.msk.f32.gmra.mrb[20].mxu0 %vm1970_vm2, %v7596_v35  ;;  %v5554_v47 = vld [vmem:[%s6534_s6 + $0x100] sm:$0xff] }
 0x633   : > { %v7627_v0 = vmul.f32 %v5519_v54, %v7518_v28  ;;  %5178 = vmatpush3.bf16.msra.mxu1 %v5175_v62  ;;  %5196 = vmatpush3.bf16.msra.mxu0 %v5193_v25  ;;  %v5555_v28 = vld [vmem:[%s6534_s6 + $0x108] sm:$0xff]  ;;  %v5265_v62 = vpack.c.bf16 %v5581_v27, %v5580_v20  ;;  %v5251_v25 = vpack.c.bf16 %v5583_v15, %v5582_v1  ;;  %s5926_s6 = scalar_lea.vmem %s8856_s5, 1024 }
 0x634   : > { %5181 = vmatprep.subr.msk.bf16.mxu1 %vm7465_vm5, %v5179_v3  ;;  %5199 = vmatprep.subr.msk.bf16.mxu0 %vm7465_vm5, %v5197_v34  ;;  %2246 = vst.msk [vmem:[%s7559_s12 + $0x38] sm:$0xf] %vm2171_vm6, %v7620_v24  ;;  %v5203_v4 = vpack.c.bf16 %v5555_v28, %v5554_v47  ;;  %v3333_v15 = vld [vmem:[%s6558_s18 + $0x30] sm:$0xff]  ;;  %p5927_p6 = scmp.ne.s32.totalorder %s8856_s5, %s5926_s6 }
 0x635   : > { %4914 = vmatprep.mubr.msk.f32.mxu1 %vm1970_vm2, %v7627_v0  ;;  %4942 = vmatprep.mubr.msk.f32.mxu0 %vm1970_vm2, %v7627_v0  ;;  %2245 = vst.msk [vmem:[%s7559_s12 + $0x30] sm:$0xff] %vm1970_vm2, %v7627_v0 }
 0x636   : > { %4915 = vmatmul.mubr.msk.f32.gmra.mrb[14].mxu1 %vm1970_vm2, %v7620_v24  ;;  %4943 = vmatmul.mubr.msk.f32.gmra.mrb[22].mxu0 %vm1970_vm2, %v7620_v24  ;;  %p5928_p4 = pnand %p5927_p6, %p9852_p8 }
 0x637   : > { %5184 = vmatpush3.bf16.msk.msra.mxu1 %vm7465_vm5, %v5179_v3  ;;  %4961 = vmatprep.mubr.msk.f32.mxu1 %vm1970_vm2, %v7553_v7  ;;  %v3327_v3 = vld [vmem:[%s6558_s18] sm:$0xff] }
 0x638   : > { %5202 = vmatpush3.bf16.msk.msra.mxu0 %vm7465_vm5, %v5197_v34  ;;  %4989 = vmatprep.mubr.msk.f32.mxu0 %vm1970_vm2, %v7553_v7  ;;  %p5929_p3 = pneg %p5928_p4 }
 0x639   : > { %5204 = vmatprep.subr.bf16.mxu1 %v5203_v4  ;;  %5222 = vmatprep.subr.bf16.mxu0 %v5221_v2 }
 0x63a   : > { %4962 = vmatmul.mubr.msk.f32.vlgmr.msra.gmra.mrb[16].mxu1 %vm1970_vm2, %v7550_v37 }
 0x63b   : > { %4990 = vmatmul.mubr.msk.f32.vlgmr.msra.gmra.mrb[24].mxu0 %vm1970_vm2, %v7550_v37  ;;  %4964 = vmatprep.mubr.msk.f32.mxu1 %vm1970_vm2, %v7579_v22 }
 0x63c   : > { %4992 = vmatprep.mubr.msk.f32.mxu0 %vm1970_vm2, %v7579_v22  ;;  %5206 = vmatpush3.bf16.msra.mxu1 %v5203_v4  ;;  %v3330_v4 = vld [vmem:[%s6558_s18 + $0x18] sm:$0xff] }
 0x63d   : > { %5224 = vmatpush3.bf16.msra.mxu0 %v5221_v2  ;;  %5208 = vmatprep.subr.bf16.mxu1 %v5207_v11 }
 0x63e   : > { %4965 = vmatmul.mubr.msk.f32.gmra.mrb[18].mxu1 %vm1970_vm2, %v7572_v32  ;;  %5226 = vmatprep.subr.bf16.mxu0 %v5225_v40 }
 0x63f   : > { %4993 = vmatmul.mubr.msk.f32.gmra.mrb[26].mxu0 %vm1970_vm2, %v7572_v32  ;;  %4967 = vmatprep.mubr.msk.f32.mxu1 %vm1970_vm2, %v7603_v57 }
 0x640   : > { %4995 = vmatprep.mubr.msk.f32.mxu0 %vm1970_vm2, %v7603_v57  ;;  %5210 = vmatpush3.bf16.msra.mxu1 %v5207_v11 }
 0x641   : > { %5228 = vmatpush3.bf16.msra.mxu0 %v5225_v40  ;;  %5212 = vmatprep.subr.bf16.mxu1 %v5211_v18 }
 0x642   : > { %4968 = vmatmul.mubr.msk.f32.gmra.mrb[20].mxu1 %vm1970_vm2, %v7596_v35  ;;  %5230 = vmatprep.subr.bf16.mxu0 %v5229_v41 }
 0x643   : > { %4996 = vmatmul.mubr.msk.f32.gmra.mrb[28].mxu0 %vm1970_vm2, %v7596_v35  ;;  %4970 = vmatprep.mubr.msk.f32.mxu1 %vm1970_vm2, %v7627_v0 }
 0x644   : > { %4998 = vmatprep.mubr.msk.f32.mxu0 %vm1970_vm2, %v7627_v0  ;;  %5214 = vmatpush3.bf16.msra.mxu1 %v5211_v18 }
 0x645   : > { %5232 = vmatpush3.bf16.msra.mxu0 %v5229_v41  ;;  %5217 = vmatprep.subr.msk.bf16.mxu1 %vm7465_vm5, %v5215_v10 }
 0x646   : > { %4971 = vmatmul.mubr.msk.f32.gmra.mrb[22].mxu1 %vm1970_vm2, %v7620_v24  ;;  %5235 = vmatprep.subr.msk.bf16.mxu0 %vm7465_vm5, %v5233_v58 }
 0x647   : > { %4999 = vmatmul.mubr.msk.f32.gmra.mrb[30].mxu0 %vm1970_vm2, %v7620_v24  ;;  %5017 = vmatprep.mubr.msk.f32.mxu1 %vm1970_vm2, %v7553_v7 }
 0x648   : > { %5220 = vmatpush3.bf16.msk.msra.mxu1 %vm7465_vm5, %v5215_v10  ;;  %5045 = vmatprep.mubr.msk.f32.mxu0 %vm1970_vm2, %v7553_v7 }
 0x649   : > { %5238 = vmatpush3.bf16.msk.msra.mxu0 %vm7465_vm5, %v5233_v58  ;;  %5240 = vmatprep.subr.bf16.mxu1 %v5239_v50 }
 0x64a   : > { %5258 = vmatprep.subr.bf16.mxu0 %v5257_v38 }
 0x64b   : > { %5018 = vmatmul.mubr.msk.f32.vlgmr.msra.gmra.mrb[24].mxu1 %vm1970_vm2, %v7550_v37 }
 0x64c   : > { %5046 = vmatmul.mubr.msk.f32.vlgmr.msra.gmra.mrb[32].mxu0 %vm1970_vm2, %v7550_v37  ;;  %5020 = vmatprep.mubr.msk.f32.mxu1 %vm1970_vm2, %v7579_v22 }
 0x64d   : > { %5048 = vmatprep.mubr.msk.f32.mxu0 %vm1970_vm2, %v7579_v22  ;;  %5242 = vmatpush3.bf16.msra.mxu1 %v5239_v50 }
 0x64e   : > { %5260 = vmatpush3.bf16.msra.mxu0 %v5257_v38  ;;  %5244 = vmatprep.subr.bf16.mxu1 %v5243_v8 }
 0x64f   : > { %5021 = vmatmul.mubr.msk.f32.gmra.mrb[26].mxu1 %vm1970_vm2, %v7572_v32  ;;  %5262 = vmatprep.subr.bf16.mxu0 %v5261_v53 }
 0x650   : > { %5049 = vmatmul.mubr.msk.f32.gmra.mrb[34].mxu0 %vm1970_vm2, %v7572_v32  ;;  %5023 = vmatprep.mubr.msk.f32.mxu1 %vm1970_vm2, %v7603_v57 }
 0x651   : > { %5051 = vmatprep.mubr.msk.f32.mxu0 %vm1970_vm2, %v7603_v57  ;;  %5246 = vmatpush3.bf16.msra.mxu1 %v5243_v8 }
 0x652   : > { %5264 = vmatpush3.bf16.msra.mxu0 %v5261_v53  ;;  %5248 = vmatprep.subr.bf16.mxu1 %v5247_v31 }
 0x653   : > { %5024 = vmatmul.mubr.msk.f32.gmra.mrb[28].mxu1 %vm1970_vm2, %v7596_v35  ;;  %5266 = vmatprep.subr.bf16.mxu0 %v5265_v62 }
 0x654   : > { %5052 = vmatmul.mubr.msk.f32.gmra.mrb[36].mxu0 %vm1970_vm2, %v7596_v35  ;;  %5026 = vmatprep.mubr.msk.f32.mxu1 %vm1970_vm2, %v7627_v0 }
 0x655   : > { %5054 = vmatprep.mubr.msk.f32.mxu0 %vm1970_vm2, %v7627_v0  ;;  %5250 = vmatpush3.bf16.msra.mxu1 %v5247_v31 }
 0x656   : > { %5268 = vmatpush3.bf16.msra.mxu0 %v5265_v62  ;;  %5253 = vmatprep.subr.msk.bf16.mxu1 %vm7465_vm5, %v5251_v25 }
 0x657   : > { %5027 = vmatmul.mubr.msk.f32.gmra.mrb[30].mxu1 %vm1970_vm2, %v7620_v24  ;;  %5271 = vmatprep.subr.msk.bf16.mxu0 %vm7465_vm5, %v5269_v12 }
 0x658   : > { %5055 = vmatmul.mubr.msk.f32.gmra.mrb[38].mxu0 %vm1970_vm2, %v7620_v24  ;;  %5073 = vmatprep.mubr.msk.f32.mxu1 %vm1970_vm2, %v7553_v7 }
 0x659   : > { %5256 = vmatpush3.bf16.msk.msra.mxu1 %vm7465_vm5, %v5251_v25  ;;  %5101 = vmatprep.mubr.msk.f32.mxu0 %vm1970_vm2, %v7553_v7 }
 0x65a   : > { %5274 = vmatpush3.bf16.msk.msra.mxu0 %vm7465_vm5, %v5269_v12  ;;  %5275 = vmatprep.subr.bf16.mxu1 %v5257_v38 }
 0x65c   : > { %5074 = vmatmul.mubr.msk.f32.vlgmr.msra.gmra.mrb[32].mxu1 %vm1970_vm2, %v7550_v37 }
 0x65d   : > { %5102 = vmatmul.mubr.msk.f32.vlgmr.msra.gmra.mrb[40].mxu0 %vm1970_vm2, %v7550_v37  ;;  %5076 = vmatprep.mubr.msk.f32.mxu1 %vm1970_vm2, %v7579_v22 }
 0x65e   : > { %5279 = vmatpush3.bf16.msra.mxu1 %v5257_v38  ;;  %5104 = vmatprep.mubr.msk.f32.mxu0 %vm1970_vm2, %v7579_v22  ;;  %v3328_v22 = vld [vmem:[%s6558_s18 + $0x8] sm:$0xff] }
 0x65f   : > { %5276 = vmatprep.subr.bf16.mxu1 %v5261_v53 }
 0x660   : > { %5077 = vmatmul.mubr.msk.f32.gmra.mrb[34].mxu1 %vm1970_vm2, %v7572_v32 }
 0x661   : > { %5105 = vmatmul.mubr.msk.f32.gmra.mrb[42].mxu0 %vm1970_vm2, %v7572_v32  ;;  %5079 = vmatprep.mubr.msk.f32.mxu1 %vm1970_vm2, %v7603_v57 }
 0x662   : > { %5280 = vmatpush3.bf16.msra.mxu1 %v5261_v53 }
 0x663   : > { %5277 = vmatprep.subr.bf16.mxu1 %v5265_v62 }
 0x664   : > { %5080 = vmatmul.mubr.msk.f32.gmra.mrb[36].mxu1 %vm1970_vm2, %v7596_v35 }
 0x665   : > { %5082 = vmatprep.mubr.msk.f32.mxu1 %vm1970_vm2, %v7627_v0 }
 0x666   : > { %5281 = vmatpush3.bf16.msra.mxu1 %v5265_v62 }
 0x667   : > { %5278 = vmatprep.subr.msk.bf16.mxu1 %vm7465_vm5, %v5269_v12 }
 0x668   : > { %5083 = vmatmul.mubr.msk.f32.gmra.mrb[38].mxu1 %vm1970_vm2, %v7620_v24 }
 0x669   : > { %5107 = vmatprep.mubr.msk.f32.mxu1 %vm1970_vm2, %v7603_v57 }
 0x66a   : > { %5282 = vmatpush3.bf16.msk.msra.mxu1 %vm7465_vm5, %v5269_v12  ;;  %v3335_v12 = vld [vmem:[%s6558_s18 + $0x40] sm:$0xff] }
 0x66d   : > { %5108 = vmatmul.mubr.msk.f32.vlgmr.msra.gmra.mrb[40].mxu1 %vm1970_vm2, %v7596_v35 }
 0x66e   : > { %5110 = vmatprep.mubr.msk.f32.mxu1 %vm1970_vm2, %v7627_v0 }
 0x671   : > { %5111 = vmatmul.mubr.msk.f32.gmra.mrb[42].mxu1 %vm1970_vm2, %v7620_v24 }
 0x6fd   : > { %v4907_v37 = vpop.f32.mrb[8].mxu1  ;;  %v7799_v7 = vpop.f32.mrb[16].mxu0 }
 0x6fe   : > { %vm3136_vm7 = vcmp.gt.f32.partialorder %v4907_v37, 0.0  ;;  %v3200_v32 = vmul.f32 0.01, %v4907_v37  ;;  %v2340_v26 = vpop.f32.mrb[9].mxu1  ;;  %v7802_v57 = vpop.f32.mrb[17].mxu0  ;;  %vm3144_vm2 = vcmp.gt.f32.partialorder %v7799_v7, 0.0 }
 0x6ff   : > { %vm3135_vm8 = vcmp.gt.f32.partialorder %v2340_v26, 0.0  ;;  %v3199_v35 = vmul.f32 0.01, %v2340_v26  ;;  %v3207_v60 = vmul.f32 0.01, %v7802_v57  ;;  %vm3143_vm14 = vcmp.gt.f32.partialorder %v7802_v57, 0.0 }
 0x700   : > { %v3264_v46 = vsel %vm3136_vm7, %v4907_v37, %v3200_v32  ;;  %v3208_v20 = vmul.f32 0.01, %v7799_v7 }
 0x701   : > { %v4910_v16 = vpop.f32.mrb[10].mxu1  ;;  %v7805_v17 = vpop.f32.mrb[18].mxu0  ;;  %v7807_v34 = vadd.f32 %v3328_v22, %v3264_v46  ;;  %v3263_v9 = vsel %vm3135_vm8, %v2340_v26, %v3199_v35  ;;  %v3271_v59 = vsel %vm3143_vm14, %v7802_v57, %v3207_v60 }
 0x702   : > { %vm3138_vm9 = vcmp.gt.f32.partialorder %v4910_v16, 0.0  ;;  %v3202_v54 = vmul.f32 0.01, %v4910_v16  ;;  %v2350_v24 = vpop.f32.mrb[11].mxu1  ;;  %v7809_v0 = vpop.f32.mrb[19].mxu0  ;;  %v7811_v47 = vadd.f32 %v3327_v3, %v3263_v9  ;;  %v3272_v57 = vsel %vm3144_vm2, %v7799_v7, %v3208_v20  ;;  %v3336_v9 = vld [vmem:[%s6558_s18 + $0x48] sm:$0xff] }
 0x703   : > { %vm3137_vm10 = vcmp.gt.f32.partialorder %v2350_v24, 0.0  ;;  %v3201_v48 = vmul.f32 0.01, %v2350_v24  ;;  %v3456_v52 = vsel %vm855_vm0, %v7807_v34, 0.0  ;;  %v3209_v37 = vmul.f32 0.01, %v7809_v0 }
 0x704   : > { %v3266_v28 = vsel %vm3138_vm9, %v4910_v16, %v3202_v54  ;;  %v3455_v11 = vsel %vm855_vm0, %v7811_v47, 0.0  ;;  %vm3145_vm3 = vcmp.gt.f32.partialorder %v7809_v0, 0.0  ;;  %v3210_v54 = vmul.f32 0.01, %v7805_v17 }
 0x705   : > { %v4913_v2 = vpop.f32.mrb[12].mxu1  ;;  %v7815_v6 = vpop.f32.mrb[20].mxu0  ;;  %v3265_v40 = vsel %vm3137_vm10, %v2350_v24, %v3201_v48  ;;  %v7823_v49 = vadd.f32 %v3330_v4, %v3266_v28  ;;  %v3457_v19 = vadd.f32 %v3456_v52, %v3455_v11  ;;  %v7878_v24 = vadd.f32 %v3335_v12, %v3271_v59 }
 0x706   : > { %v2360_v14 = vpop.f32.mrb[13].mxu1  ;;  %v7821_v61 = vpop.f32.mrb[21].mxu0  ;;  %vm3140_vm11 = vcmp.gt.f32.partialorder %v4913_v2, 0.0  ;;  %v7825_v39 = vadd.f32 %v3329_v36, %v3265_v40  ;;  %v3204_v18 = vmul.f32 0.01, %v4913_v2  ;;  %vm3146_vm4 = vcmp.gt.f32.partialorder %v7805_v17, 0.0 }
 0x707   : > { %vm3139_vm12 = vcmp.gt.f32.partialorder %v2360_v14, 0.0  ;;  %v3203_v51 = vmul.f32 0.01, %v2360_v14  ;;  %v3460_v50 = vsel %vm855_vm0, %v7823_v49, 0.0  ;;  %v3273_v48 = vsel %vm3145_vm3, %v7809_v0, %v3209_v37  ;;  %v3337_v36 = vld [vmem:[%s6558_s18 + $0x50] sm:$0xff] }
 0x708   : > { %v3458_v42 = vsel %vm855_vm0, %v7825_v39, 0.0  ;;  %v3268_v10 = vsel %vm3140_vm11, %v4913_v2, %v3204_v18  ;;  %v3211_v2 = vmul.f32 0.01, %v7821_v61  ;;  %vm3147_vm5 = vcmp.gt.f32.partialorder %v7821_v61, 0.0 }
 0x709   : > { %v4916_v41 = vpop.f32.mrb[14].mxu1  ;;  %v7828_v43 = vpop.f32.mrb[22].mxu0  ;;  %v3459_v55 = vadd.f32 %v3458_v42, %v3457_v19  ;;  %v7837_v30 = vadd.f32 %v3332_v44, %v3268_v10  ;;  %v3267_v33 = vsel %vm3139_vm12, %v2360_v14, %v3203_v51  ;;  %v7892_v14 = vadd.f32 %v3336_v9, %v3272_v57  ;;  %v3338_v19 = vld [vmem:[%s6558_s18 + $0x58] sm:$0xff] }
 0x70a   : > { %v2370_v58 = vpop.f32.mrb[15].mxu1  ;;  %v7833_v29 = vpop.f32.mrb[23].mxu0  ;;  %v7839_v38 = vadd.f32 %v3331_v23, %v3267_v33  ;;  %vm3142_vm13 = vcmp.gt.f32.partialorder %v4916_v41, 0.0  ;;  %v3206_v13 = vmul.f32 0.01, %v4916_v41  ;;  %v3274_v0 = vsel %vm3146_vm4, %v7805_v17, %v3210_v54 }
 0x70b   : > { %v3461_v56 = vadd.f32 %v3460_v50, %v3459_v55  ;;  %vm3141_vm15 = vcmp.gt.f32.partialorder %v2370_v58, 0.0  ;;  %v3205_v1 = vmul.f32 0.01, %v2370_v58  ;;  %v3464_v25 = vsel %vm855_vm0, %v7837_v30, 0.0  ;;  %v3342_v57 = vld [vmem:[%s6558_s18 + $0x78] sm:$0xf] }
 0x70c   : > { %v3462_v21 = vsel %vm855_vm0, %v7839_v38, 0.0  ;;  %v3270_v62 = vsel %vm3142_vm13, %v4916_v41, %v3206_v13  ;;  %v3212_v44 = vmul.f32 0.01, %v7815_v6  ;;  %v3470_v42 = vsel %vm855_vm0, %v7878_v24, 0.0 }
 0x70d   : > { %v7841_v8 = vpop.f32.mrb[16].mxu1  ;;  %v3463_v27 = vadd.f32 %v3462_v21, %v3461_v56  ;;  %v3269_v32 = vsel %vm3141_vm15, %v2370_v58, %v3205_v1  ;;  %v7869_v35 = vadd.f32 %v3334_v5, %v3270_v62  ;;  %v7904_v10 = vadd.f32 %v3337_v36, %v3273_v48  ;;  %v3339_v58 = vld [vmem:[%s6558_s18 + $0x60] sm:$0xff]  ;;  %v3340_v21 = vld [vmem:[%s6558_s18 + $0x68] sm:$0xff] }
 0x70e   : > { %v7844_v63 = vpop.f32.mrb[24].mxu0  ;;  %v7846_v53 = vpop.f32.mrb[17].mxu1  ;;  %v7871_v3 = vadd.f32 %v3333_v15, %v3269_v32  ;;  %vm3148_vm6 = vcmp.gt.f32.partialorder %v7815_v6, 0.0  ;;  %v3275_v23 = vsel %vm3147_vm5, %v7821_v61, %v3211_v2  ;;  %v3213_v17 = vmul.f32 0.01, %v7833_v29  ;;  %v3341_v15 = vld [vmem:[%s6558_s18 + $0x70] sm:$0xff] }
 0x70f   : > { %v7852_v31 = vpop.f32.mrb[25].mxu0  ;;  %v3465_v22 = vadd.f32 %v3464_v25, %v3463_v27  ;;  %v3468_v40 = vsel %vm961_vm1, %v7869_v35, 0.0  ;;  %v3472_v56 = vsel %vm855_vm0, %v7892_v14, 0.0  ;;  %v7918_v13 = vadd.f32 %v3338_v19, %v3274_v0 }
 0x710   : > { %v3466_v28 = vsel %vm855_vm0, %v7871_v3, 0.0  ;;  %vm3149_vm7 = vcmp.gt.f32.partialorder %v7833_v29, 0.0  ;;  %v3276_v61 = vsel %vm3148_vm6, %v7815_v6, %v3212_v44  ;;  %v3214_v5 = vmul.f32 0.01, %v7828_v43 }
 0x711   : > { %v7859_v45 = vpop.f32.mrb[18].mxu1  ;;  %v3467_v52 = vadd.f32 %v3466_v28, %v3465_v22  ;;  %v3474_v27 = vsel %vm855_vm0, %v7904_v10, 0.0  ;;  %v7928_v62 = vadd.f32 %v3339_v58, %v3275_v23  ;;  %vm3150_vm8 = vcmp.gt.f32.partialorder %v7828_v43, 0.0  ;;  %v3344_v58 = vld [vmem:[%s6558_s18 + $0x88] sm:$0xff] }
 0x712   : > { %v7864_v26 = vpop.f32.mrb[26].mxu0  ;;  %v7866_v46 = vpop.f32.mrb[19].mxu1  ;;  %v3277_v1 = vsel %vm3149_vm7, %v7833_v29, %v3213_v17  ;;  %v3215_v59 = vmul.f32 0.01, %v7846_v53  ;;  %v3476_v6 = vsel %vm855_vm0, %v7918_v13, 0.0  ;;  %v7938_v37 = vadd.f32 %v3340_v21, %v3276_v61 }
 0x713   : > { %v7873_v16 = vpop.f32.mrb[27].mxu0  ;;  %v3469_v41 = vadd.f32 %v3468_v40, %v3467_v52  ;;  %vm3151_vm9 = vcmp.gt.f32.partialorder %v7846_v53, 0.0  ;;  %v3278_v29 = vsel %vm3150_vm8, %v7828_v43, %v3214_v5  ;;  %v3216_v54 = vmul.f32 0.01, %v7841_v8  ;;  %v3343_v40 = vld [vmem:[%s6558_s18 + $0x80] sm:$0xff] }
 0x714   : > { %v3478_v48 = vsel %vm855_vm0, %v7928_v62, 0.0  ;;  %v7952_v36 = vadd.f32 %v3341_v15, %v3277_v1  ;;  %vm3152_vm10 = vcmp.gt.f32.partialorder %v7841_v8, 0.0  ;;  %v3279_v52 = vsel %vm3151_vm9, %v7846_v53, %v3215_v59 }
 0x715   : > { %v7883_v4 = vpop.f32.mrb[20].mxu1  ;;  %v3471_v55 = vadd.f32 %v3470_v42, %v3469_v41  ;;  %v3217_v43 = vmul.f32 0.01, %v7866_v46  ;;  %v3480_v19 = vsel %vm855_vm0, %v7938_v37, 0.0  ;;  %v7962_v44 = vadd.f32 %v3342_v57, %v3278_v29  ;;  %v3346_v29 = vld [vmem:[%s6558_s18 + $0x98] sm:$0xff] }
 0x716   : > { %v7888_v7 = vpop.f32.mrb[28].mxu0  ;;  %v7890_v11 = vpop.f32.mrb[21].mxu1  ;;  %vm3153_vm11 = vcmp.gt.f32.partialorder %v7866_v46, 0.0  ;;  %v3280_v53 = vsel %vm3152_vm10, %v7841_v8, %v3216_v54  ;;  %v7976_v61 = vadd.f32 %v3343_v40, %v3279_v52  ;;  %vm3154_vm12 = vcmp.gt.f32.partialorder %v7859_v45, 0.0  ;;  %v3347_v40 = vld [vmem:[%s6558_s18 + $0xa0] sm:$0xff] }
 0x717   : > { %v7897_v18 = vpop.f32.mrb[29].mxu0  ;;  %v3473_v20 = vadd.f32 %v3472_v56, %v3471_v55  ;;  %v3218_v55 = vmul.f32 0.01, %v7859_v45  ;;  %v3482_v56 = vsel %vm855_vm0, %v7952_v36, 0.0  ;;  %v3281_v5 = vsel %vm3153_vm11, %v7866_v46, %v3217_v43 }
 0x718   : > { %9800 = vst [vmem:[#allocation54_spill] sm:$0xff] %v7976_v61  ;;  %v3484_v1 = vsel %vm961_vm1, %v7962_v44, 0.0  ;;  %v7986_v15 = vadd.f32 %v3344_v58, %v3280_v53  ;;  %vm3155_vm13 = vcmp.gt.f32.partialorder %v7890_v11, 0.0  ;;  %v3220_v57 = vmul.f32 0.01, %v7883_v4 }
 0x719   : > { %v7907_v51 = vpop.f32.mrb[22].mxu1  ;;  %v3475_v25 = vadd.f32 %v3474_v27, %v3473_v20  ;;  %v3345_v20 = vld [vmem:[%s6558_s18 + $0x90] sm:$0xff]  ;;  %v3219_v27 = vmul.f32 0.01, %v7890_v11  ;;  %v3282_v46 = vsel %vm3154_vm12, %v7859_v45, %v3218_v55  ;;  %v3486_v54 = vsel %vm855_vm0, %v7976_v61, 0.0 }
 0x71a   : > { %v7912_v50 = vpop.f32.mrb[30].mxu0  ;;  %v7914_v33 = vpop.f32.mrb[23].mxu1  ;;  %9801 = vst [vmem:[#allocation53_spill] sm:$0xff] %v7986_v15  ;;  %vm3156_vm14 = vcmp.gt.f32.partialorder %v7883_v4, 0.0  ;;  %vm3158_vm2 = vcmp.gt.f32.partialorder %v7907_v51, 0.0  ;;  %vm3159_vm3 = vcmp.gt.f32.partialorder %v7852_v31, 0.0 }
 0x71b   : > { %v7921_v60 = vpop.f32.mrb[31].mxu0  ;;  %v3477_v9 = vadd.f32 %v3476_v6, %v3475_v25  ;;  %v3283_v52 = vsel %vm3155_vm13, %v7890_v11, %v3219_v27  ;;  %v3221_v43 = vmul.f32 0.01, %v7914_v33  ;;  %vm3157_vm15 = vcmp.gt.f32.partialorder %v7914_v33, 0.0 }
 0x71c   : > { %v3284_v11 = vsel %vm3156_vm14, %v7883_v4, %v3220_v57  ;;  %v8024_v27 = vadd.f32 %v3347_v40, %v3283_v52  ;;  %vm3160_vm4 = vcmp.gt.f32.partialorder %v7844_v63, 0.0  ;;  %vm3161_vm5 = vcmp.gt.f32.partialorder %v7873_v16, 0.0 }
 0x71d   : > { %v3479_v2 = vadd.f32 %v3478_v48, %v3477_v9  ;;  %v8000_v48 = vadd.f32 %v3345_v20, %v3281_v5  ;;  %vm3162_vm6 = vcmp.gt.f32.partialorder %v7864_v26, 0.0  ;;  %vm3163_vm7 = vcmp.gt.f32.partialorder %v7897_v18, 0.0 }
 0x71e   : > { %v7934_v12 = vpop.f32.mrb[24].mxu1  ;;  %9804 = vst [vmem:[#allocation56_spill] sm:$0xff] %v8024_v27  ;;  %vm3164_vm8 = vcmp.gt.f32.partialorder %v7888_v7, 0.0  ;;  %vm3165_vm9 = vcmp.gt.f32.partialorder %v7921_v60, 0.0  ;;  %vm3166_vm10 = vcmp.gt.f32.partialorder %v7912_v50, 0.0 }
 0x71f   : > { %v7941_v32 = vpop.f32.mrb[32].mxu0  ;;  %v7943_v22 = vpop.f32.mrb[25].mxu1  ;;  %v3481_v23 = vadd.f32 %v3480_v19, %v3479_v2  ;;  %9802 = vst [vmem:[#allocation36_spill] sm:$0xff] %v8000_v48  ;;  %v3488_v19 = vsel %vm855_vm0, %v7986_v15, 0.0  ;;  %v3490_v20 = vsel %vm855_vm0, %v8000_v48, 0.0  ;;  %v3354_v15 = vld [vmem:[%s6558_s18 + $0xd8] sm:$0xff] }
 0x720   : > { %v7948_v28 = vpop.f32.mrb[33].mxu0  ;;  %vm3167_vm11 = vcmp.gt.f32.partialorder %v7943_v22, 0.0  ;;  %vm3168_vm12 = vcmp.gt.f32.partialorder %v7934_v12, 0.0 }
 0x721   : > { %v3483_v21 = vadd.f32 %v3482_v56, %v3481_v23  ;;  %v8010_v23 = vadd.f32 %v3346_v29, %v3282_v46  ;;  %v3348_v56 = vld [vmem:[%s6558_s18 + $0xa8] sm:$0xff]  ;;  %v3285_v46 = vsel %vm3157_vm15, %v7914_v33, %v3221_v43  ;;  %v3349_v29 = vld [vmem:[%s6558_s18 + $0xb0] sm:$0xff]  ;;  %v3494_v43 = vsel %vm855_vm0, %v8024_v27, 0.0 }
 0x722   : > { %v7958_v0 = vpop.f32.mrb[26].mxu1  ;;  %v8033_v57 = vadd.f32 %v3348_v56, %v3284_v11  ;;  %v8047_v11 = vadd.f32 %v3349_v29, %v3285_v46  ;;  %v3352_v29 = vld [vmem:[%s6558_s18 + $0xc8] sm:$0xff]  ;;  %v3226_v27 = vmul.f32 0.01, %v7864_v26 }
 0x723   : > { %v7965_v41 = vpop.f32.mrb[34].mxu0  ;;  %v7967_v42 = vpop.f32.mrb[27].mxu1  ;;  %v3485_v6 = vadd.f32 %v3484_v1, %v3483_v21  ;;  %9803 = vst [vmem:[#allocation55_spill] sm:$0xff] %v8010_v23  ;;  %v3222_v21 = vmul.f32 0.01, %v7907_v51  ;;  %v3492_v4 = vsel %vm855_vm0, %v8010_v23, 0.0 }
 0x724   : > { %v7972_v17 = vpop.f32.mrb[35].mxu0  ;;  %v3223_v1 = vmul.f32 0.01, %v7852_v31  ;;  %9805 = vst [vmem:[#allocation39_spill] sm:$0xff] %v8033_v57  ;;  %9806 = vst [vmem:[#allocation43_spill] sm:$0xff] %v8047_v11  ;;  %vm3169_vm13 = vcmp.gt.f32.partialorder %v7967_v42, 0.0 }
 0x725   : > { %v3487_v2 = vadd.f32 %v3486_v54, %v3485_v6  ;;  %v3286_v40 = vsel %vm3158_vm2, %v7907_v51, %v3222_v21  ;;  %v3225_v51 = vmul.f32 0.01, %v7873_v16  ;;  %vm3170_vm14 = vcmp.gt.f32.partialorder %v7958_v0, 0.0 }
 0x726   : > { %v7982_v8 = vpop.f32.mrb[28].mxu1 }
 0x727   : > { %v7989_v25 = vpop.f32.mrb[36].mxu0  ;;  %v7991_v59 = vpop.f32.mrb[29].mxu1  ;;  %v3489_v55 = vadd.f32 %v3488_v19, %v3487_v2  ;;  %v3224_v2 = vmul.f32 0.01, %v7844_v63  ;;  %v3350_v19 = vld [vmem:[%s6558_s18 + $0xb8] sm:$0xf] }
 0x728   : > { %v7996_v9 = vpop.f32.mrb[37].mxu0  ;;  %v8057_v23 = vadd.f32 %v3350_v19, %v3286_v40  ;;  %v3498_v40 = vsel %vm855_vm0, %v8047_v11, 0.0  ;;  %v3290_v11 = vsel %vm3162_vm6, %v7864_v26, %v3226_v27  ;;  %v3229_v26 = vmul.f32 0.01, %v7921_v60 }
 0x729   : > { %v3491_v6 = vadd.f32 %v3490_v20, %v3489_v55  ;;  %v3287_v20 = vsel %vm3159_vm3, %v7852_v31, %v3223_v1  ;;  %v3288_v46 = vsel %vm3160_vm4, %v7844_v63, %v3224_v2  ;;  %v3289_v63 = vsel %vm3161_vm5, %v7873_v16, %v3225_v51  ;;  %v3353_v2 = vld [vmem:[%s6558_s18 + $0xd0] sm:$0xff] }
 0x72a   : > { %v8006_v45 = vpop.f32.mrb[30].mxu1  ;;  %9807 = vst [vmem:[#allocation37_spill] sm:$0xff] %v8057_v23  ;;  %v3228_v16 = vmul.f32 0.01, %v7888_v7  ;;  %vm3171_vm15 = vcmp.gt.f32.partialorder %v7991_v59, 0.0  ;;  %vm3172_vm2 = vcmp.gt.f32.partialorder %v7982_v8, 0.0 }
 0x72b   : > { %v8013_v53 = vpop.f32.mrb[38].mxu0  ;;  %v8015_v58 = vpop.f32.mrb[31].mxu1  ;;  %v3493_v52 = vadd.f32 %v3492_v4, %v3491_v6  ;;  %v3351_v6 = vld [vmem:[%s6558_s18 + $0xc0] sm:$0xff]  ;;  %v3496_v4 = vsel %vm855_vm0, %v8033_v57, 0.0  ;;  %v8078_v57 = vadd.f32 %v3352_v29, %v3288_v46  ;;  %v8092_v29 = vadd.f32 %v3353_v2, %v3289_v63  ;;  %v3356_v2 = vld [vmem:[%s6558_s18 + $0xe8] sm:$0xff] }
 0x72c   : > { %v8020_v5 = vpop.f32.mrb[39].mxu0  ;;  %v3292_v63 = vsel %vm3164_vm8, %v7888_v7, %v3228_v16  ;;  %v3231_v7 = vmul.f32 0.01, %v7943_v22  ;;  %vm3173_vm3 = vcmp.gt.f32.partialorder %v8015_v58, 0.0  ;;  %vm3174_vm4 = vcmp.gt.f32.partialorder %v8006_v45, 0.0 }
 0x72d   : > { %v3495_v21 = vadd.f32 %v3494_v43, %v3493_v52  ;;  %v8068_v43 = vadd.f32 %v3351_v6, %v3287_v20  ;;  %9809 = vst [vmem:[#allocation51_spill] sm:$0xff] %v8078_v57  ;;  %v3500_v20 = vsel %vm961_vm1, %v8057_v23, 0.0  ;;  %9810 = vst [vmem:[#allocation40_spill] sm:$0xff] %v8092_v29  ;;  %v3504_v27 = vsel %vm855_vm0, %v8078_v57, 0.0 }
 0x72e   : > { %vm3175_vm5 = vcmp.gt.f32.partialorder %v7948_v28, 0.0  ;;  %vm3176_vm6 = vcmp.gt.f32.partialorder %v7941_v32, 0.0  ;;  %vm3178_vm8 = vcmp.gt.f32.partialorder %v7965_v41, 0.0 }
 0x72f   : > { %v8035_v54 = vpop.f32.mrb[32].mxu1  ;;  %v3497_v31 = vadd.f32 %v3496_v4, %v3495_v21  ;;  %9808 = vst [vmem:[#allocation47_spill] sm:$0xff] %v8068_v43  ;;  %v3227_v21 = vmul.f32 0.01, %v7897_v18  ;;  %v3502_v46 = vsel %vm855_vm0, %v8068_v43, 0.0 }
 0x730   : > { %v8040_v55 = vpop.f32.mrb[40].mxu0  ;;  %v8042_v33 = vpop.f32.mrb[33].mxu1 }
 0x731   : > { %v8049_v56 = vpop.f32.mrb[41].mxu0  ;;  %v3499_v4 = vadd.f32 %v3498_v40, %v3497_v31  ;;  %v3291_v31 = vsel %vm3163_vm7, %v7897_v18, %v3227_v21  ;;  %v3355_v40 = vld [vmem:[%s6558_s18 + $0xe0] sm:$0xff]  ;;  %v3230_v18 = vmul.f32 0.01, %v7912_v50  ;;  %vm3177_vm7 = vcmp.gt.f32.partialorder %v7972_v17, 0.0 }
 0x733   : > { %v8059_v48 = vpop.f32.mrb[34].mxu1  ;;  %v3501_v51 = vadd.f32 %v3500_v20, %v3499_v4  ;;  %v8100_v4 = vadd.f32 %v3354_v15, %v3290_v11  ;;  %v3293_v15 = vsel %vm3165_vm9, %v7921_v60, %v3229_v26  ;;  %v3357_v11 = vld [vmem:[%s6558_s18 + $0xf0] sm:$0xff]  ;;  %vm3179_vm9 = vcmp.gt.f32.partialorder %v7996_v9, 0.0 }
 0x734   : > { %v8064_v1 = vpop.f32.mrb[42].mxu0  ;;  %v8066_v52 = vpop.f32.mrb[35].mxu1 }
 0x735   : > { %v8073_v19 = vpop.f32.mrb[43].mxu0  ;;  %v3503_v23 = vadd.f32 %v3502_v46, %v3501_v51  ;;  %v3506_v51 = vsel %vm855_vm0, %v8092_v29, 0.0  ;;  %v8112_v46 = vadd.f32 %v3355_v40, %v3291_v31  ;;  %v3508_v16 = vsel %vm855_vm0, %v8100_v4, 0.0  ;;  %v3358_v31 = vld [vmem:[%s6558_s18 + $0xf8] sm:$0xf] }
 0x736   : > { %v3232_v29 = vmul.f32 0.01, %v7934_v12 }
 0x737   : > { %v8083_v6 = vpop.f32.mrb[36].mxu1  ;;  %v3505_v21 = vadd.f32 %v3504_v27, %v3503_v23  ;;  %9811 = vst [vmem:[#allocation44_spill] sm:$0xff] %v8112_v46  ;;  %v8120_v23 = vadd.f32 %v3356_v2, %v3292_v63  ;;  %v3294_v27 = vsel %vm3166_vm10, %v7912_v50, %v3230_v18  ;;  %v3510_v26 = vsel %vm855_vm0, %v8112_v46, 0.0  ;;  %v3359_v50 = vld [vmem:[%s6558_s18 + $0x100] sm:$0xff]  ;;  %v3360_v46 = vld [vmem:[%s6558_s18 + $0x108] sm:$0xff] }
 0x738   : > { %v8088_v61 = vpop.f32.mrb[37].mxu1  ;;  %vm3180_vm10 = vcmp.gt.f32.partialorder %v7989_v25, 0.0 }
 0x739   : > { %v3507_v57 = vadd.f32 %v3506_v51, %v3505_v21  ;;  %9812 = vst [vmem:[#allocation48_spill] sm:$0xff] %v8120_v23  ;;  %v8130_v21 = vadd.f32 %v3357_v11, %v3293_v15  ;;  %v3295_v51 = vsel %vm3167_vm11, %v7943_v22, %v3231_v7  ;;  %v3512_v18 = vsel %vm855_vm0, %v8120_v23, 0.0 }
 0x73a   : > { %v3296_v11 = vsel %vm3168_vm12, %v7934_v12, %v3232_v29  ;;  %v8150_v7 = vadd.f32 %v3359_v50, %v3295_v51  ;;  %v3361_v12 = vld [vmem:[%s6558_s18 + $0x110] sm:$0xff]  ;;  %v3235_v29 = vmul.f32 0.01, %v7991_v59  ;;  %vm3181_vm11 = vcmp.gt.f32.partialorder %v8020_v5, 0.0 }
 0x73b   : > { %v8103_v20 = vpop.f32.mrb[38].mxu1  ;;  %v3509_v40 = vadd.f32 %v3508_v16, %v3507_v57  ;;  %9813 = vst [vmem:[#allocation38_spill] sm:$0xff] %v8130_v21  ;;  %v3233_v57 = vmul.f32 0.01, %v7967_v42  ;;  %v8140_v16 = vadd.f32 %v3358_v31, %v3294_v27  ;;  %v3514_v22 = vsel %vm855_vm0, %v8130_v21, 0.0  ;;  %v3362_v21 = vld [vmem:[%s6558_s18 + $0x118] sm:$0xff] }
 0x73c   : > { %v8108_v43 = vpop.f32.mrb[39].mxu1  ;;  %v8160_v23 = vadd.f32 %v3360_v46, %v3296_v11  ;;  %v3299_v46 = vsel %vm3171_vm15, %v7991_v59, %v3235_v29  ;;  %v3363_v11 = vld [vmem:[%s6558_s18 + $0x120] sm:$0xff]  ;;  %vm3182_vm12 = vcmp.gt.f32.partialorder %v8013_v53, 0.0  ;;  %vm3185_vm15 = vcmp.gt.f32.partialorder %v8066_v52, 0.0 }
 0x73d   : > { %v3511_v2 = vadd.f32 %v3510_v26, %v3509_v40  ;;  %v3234_v40 = vmul.f32 0.01, %v7958_v0  ;;  %v8184_v29 = vadd.f32 %v3363_v11, %v3299_v46  ;;  %v3240_v46 = vmul.f32 0.01, %v7941_v32 }
 0x73f   : > { %v3513_v15 = vadd.f32 %v3512_v18, %v3511_v2  ;;  %v3297_v2 = vsel %vm3169_vm13, %v7967_v42, %v3233_v57  ;;  %v3516_v18 = vsel %vm961_vm1, %v8140_v16, 0.0  ;;  %v3298_v50 = vsel %vm3170_vm14, %v7958_v0, %v3234_v40  ;;  %9815 = vst [vmem:[#allocation52_spill] sm:$0xff] %v8184_v29 }
 0x740   : > { %v8126_v60 = vpop.f32.mrb[40].mxu1  ;;  %v3518_v42 = vsel %vm855_vm0, %v8150_v7, 0.0  ;;  %v8168_v57 = vadd.f32 %v3361_v12, %v3297_v2  ;;  %v3520_v0 = vsel %vm855_vm0, %v8160_v23, 0.0  ;;  %v8176_v40 = vadd.f32 %v3362_v21, %v3298_v50  ;;  %v3364_v12 = vld [vmem:[%s6558_s18 + $0x128] sm:$0xff] }
 0x741   : > { %v8133_v63 = vpop.f32.mrb[41].mxu1  ;;  %v3515_v31 = vadd.f32 %v3514_v22, %v3513_v15  ;;  %v3236_v15 = vmul.f32 0.01, %v7982_v8  ;;  %v3239_v21 = vmul.f32 0.01, %v7948_v28  ;;  %vm3183_vm13 = vcmp.gt.f32.partialorder %v8042_v33, 0.0 }
 0x742   : > { %9814 = vst [vmem:[#allocation42_spill] sm:$0xff] %v8168_v57  ;;  %v3522_v59 = vsel %vm855_vm0, %v8168_v57, 0.0  ;;  %v3366_v57 = vld [vmem:[%s6558_s18 + $0x138] sm:$0xf]  ;;  %vm3184_vm14 = vcmp.gt.f32.partialorder %v8035_v54, 0.0 }
 0x743   : > { %v3517_v51 = vadd.f32 %v3516_v18, %v3515_v31  ;;  %v3237_v31 = vmul.f32 0.01, %v8015_v58  ;;  %v3300_v2 = vsel %vm3172_vm2, %v7982_v8, %v3236_v15  ;;  %v3524_v8 = vsel %vm855_vm0, %v8176_v40, 0.0 }
 0x744   : > { %v8146_v26 = vpop.f32.mrb[42].mxu1  ;;  %v8193_v15 = vadd.f32 %v3364_v12, %v3300_v2  ;;  %v3241_v2 = vmul.f32 0.01, %v7972_v17  ;;  %vm3186_vm2 = vcmp.gt.f32.partialorder %v8059_v48, 0.0 }
 0x745   : > { %v8153_v27 = vpop.f32.mrb[43].mxu1  ;;  %v3519_v22 = vadd.f32 %v3518_v42, %v3517_v51  ;;  %v3238_v51 = vmul.f32 0.01, %v8006_v45  ;;  %v3301_v42 = vsel %vm3173_vm3, %v8015_v58, %v3237_v31  ;;  %v3526_v58 = vsel %vm855_vm0, %v8184_v29, 0.0 }
 0x746   : > { %vm3187_vm3 = vcmp.gt.f32.partialorder %v8088_v61, 0.0 }
 0x747   : > { %v3521_v18 = vadd.f32 %v3520_v0, %v3519_v22  ;;  %v3365_v22 = vld [vmem:[%s6558_s18 + $0x130] sm:$0xff]  ;;  %v3302_v0 = vsel %vm3174_vm4, %v8006_v45, %v3238_v51  ;;  %v3528_v45 = vsel %vm855_vm0, %v8193_v15, 0.0  ;;  %vm3188_vm4 = vcmp.gt.f32.partialorder %v8083_v6, 0.0 }
 0x748   : > { %v8201_v31 = vadd.f32 %v3365_v22, %v3301_v42  ;;  %v8209_v51 = vadd.f32 %v3366_v57, %v3302_v0  ;;  %v3242_v42 = vmul.f32 0.01, %v7965_v41  ;;  %v3243_v57 = vmul.f32 0.01, %v7996_v9 }
 0x749   : > { %v3523_v50 = vadd.f32 %v3522_v59, %v3521_v18  ;;  %v3303_v18 = vsel %vm3175_vm5, %v7948_v28, %v3239_v21  ;;  %v3367_v59 = vld [vmem:[%s6558_s18 + $0x140] sm:$0xff]  ;;  %v3305_v21 = vsel %vm3177_vm7, %v7972_v17, %v3241_v2  ;;  %vm3189_vm5 = vcmp.gt.f32.partialorder %v8108_v43, 0.0 }
 0x74a   : > { %v8214_v29 = vadd.f32 %v3367_v59, %v3303_v18  ;;  %v3530_v28 = vsel %vm855_vm0, %v8201_v31, 0.0  ;;  %v3370_v18 = vld [vmem:[%s6558_s18 + $0x158] sm:$0xff]  ;;  %v3244_v59 = vmul.f32 0.01, %v7989_v25  ;;  %vm3191_vm7 = vcmp.gt.f32.partialorder %v8049_v56, 0.0 }
 0x74b   : > { %v3525_v11 = vadd.f32 %v3524_v8, %v3523_v50  ;;  %v3304_v50 = vsel %vm3176_vm6, %v7941_v32, %v3240_v46  ;;  %v3368_v8 = vld [vmem:[%s6558_s18 + $0x148] sm:$0xff]  ;;  %v3532_v32 = vsel %vm961_vm1, %v8209_v51, 0.0  ;;  %v3306_v46 = vsel %vm3178_vm8, %v7965_v41, %v3242_v42 }
 0x74c   : > { %v3534_v17 = vsel %vm855_vm0, %v8214_v29, 0.0  ;;  %v8240_v42 = vadd.f32 %v3370_v18, %v3306_v46  ;;  %v3373_v46 = vld [vmem:[%s6558_s18 + $0x170] sm:$0xff]  ;;  %vm3190_vm6 = vcmp.gt.f32.partialorder %v8103_v20, 0.0  ;;  %vm3192_vm8 = vcmp.gt.f32.partialorder %v8040_v55, 0.0 }
 0x74d   : > { %v3527_v12 = vadd.f32 %v3526_v58, %v3525_v11  ;;  %v3369_v11 = vld [vmem:[%s6558_s18 + $0x150] sm:$0xff]  ;;  %v8222_v58 = vadd.f32 %v3368_v8, %v3304_v50  ;;  %v3371_v50 = vld [vmem:[%s6558_s18 + $0x160] sm:$0xff] }
 0x74e   : > { %v8232_v2 = vadd.f32 %v3369_v11, %v3305_v21  ;;  %v3372_v21 = vld [vmem:[%s6558_s18 + $0x168] sm:$0xff]  ;;  %v3246_v11 = vmul.f32 0.01, %v8013_v53 }
 0x74f   : > { %v3529_v22 = vadd.f32 %v3528_v45, %v3527_v12  ;;  %v3307_v45 = vsel %vm3179_vm9, %v7996_v9, %v3243_v57  ;;  %v3536_v41 = vsel %vm855_vm0, %v8222_v58, 0.0  ;;  %vm3193_vm9 = vcmp.gt.f32.partialorder %v8073_v19, 0.0 }
 0x750   : > { %v3538_v9 = vsel %vm855_vm0, %v8232_v2, 0.0  ;;  %v8248_v57 = vadd.f32 %v3371_v50, %v3307_v45  ;;  %v3374_v45 = vld [vmem:[%s6558_s18 + $0x178] sm:$0xf] }
 0x751   : > { %v3531_v0 = vadd.f32 %v3530_v28, %v3529_v22  ;;  %v3245_v22 = vmul.f32 0.01, %v8020_v5  ;;  %v3308_v28 = vsel %vm3180_vm10, %v7989_v25, %v3244_v59  ;;  %v3540_v25 = vsel %vm855_vm0, %v8240_v42, 0.0 }
 0x752   : > { %v8256_v59 = vadd.f32 %v3372_v21, %v3308_v28  ;;  %v3375_v21 = vld [vmem:[%s6558_s18 + $0x180] sm:$0xff]  ;;  %vm3194_vm10 = vcmp.gt.f32.partialorder %v8064_v1, 0.0 }
 0x753   : > { %v3533_v12 = vadd.f32 %v3532_v32, %v3531_v0  ;;  %v3309_v32 = vsel %vm3181_vm11, %v8020_v5, %v3245_v22  ;;  %v3542_v5 = vsel %vm855_vm0, %v8248_v57, 0.0  ;;  %vm3195_vm11 = vcmp.gt.f32.partialorder %v8133_v63, 0.0 }
 0x754   : > { %v8264_v22 = vadd.f32 %v3373_v46, %v3309_v32  ;;  %v3376_v46 = vld [vmem:[%s6558_s18 + $0x188] sm:$0xff] }
 0x755   : > { %v3535_v8 = vadd.f32 %v3534_v17, %v3533_v12  ;;  %v3247_v12 = vmul.f32 0.01, %v8042_v33  ;;  %v3310_v17 = vsel %vm3182_vm12, %v8013_v53, %v3246_v11  ;;  %v3544_v53 = vsel %vm855_vm0, %v8256_v59, 0.0 }
 0x756   : > { %v8272_v11 = vadd.f32 %v3374_v45, %v3310_v17  ;;  %v3377_v45 = vld [vmem:[%s6558_s18 + $0x190] sm:$0xff]  ;;  %vm3196_vm12 = vcmp.gt.f32.partialorder %v8126_v60, 0.0 }
 0x757   : > { %v3537_v0 = vadd.f32 %v3536_v41, %v3535_v8  ;;  %v3248_v8 = vmul.f32 0.01, %v8035_v54  ;;  %v3311_v28 = vsel %vm3183_vm13, %v8042_v33, %v3247_v12  ;;  %v3546_v33 = vsel %vm855_vm0, %v8264_v22, 0.0 }
 0x758   : > { %v8280_v12 = vadd.f32 %v3375_v21, %v3311_v28  ;;  %v3378_v28 = vld [vmem:[%s6558_s18 + $0x198] sm:$0xff]  ;;  %v3252_v21 = vmul.f32 0.01, %v8083_v6  ;;  %vm3197_vm13 = vcmp.gt.f32.partialorder %v8153_v27, 0.0 }
 0x759   : > { %v3539_v18 = vadd.f32 %v3538_v9, %v3537_v0  ;;  %v3249_v0 = vmul.f32 0.01, %v8066_v52  ;;  %v3312_v32 = vsel %vm3184_vm14, %v8035_v54, %v3248_v8  ;;  %v3548_v54 = vsel %vm961_vm1, %v8272_v11, 0.0 }
 0x75a   : > { %v8288_v8 = vadd.f32 %v3376_v46, %v3312_v32  ;;  %v3379_v32 = vld [vmem:[%s6558_s18 + $0x1a0] sm:$0xff]  ;;  %v3253_v46 = vmul.f32 0.01, %v8108_v43  ;;  %vm3198_vm14 = vcmp.gt.f32.partialorder %v8146_v26, 0.0 }
 0x75b   : > { %v3541_v50 = vadd.f32 %v3540_v25, %v3539_v18  ;;  %v3250_v18 = vmul.f32 0.01, %v8059_v48  ;;  %v3313_v17 = vsel %vm3185_vm15, %v8066_v52, %v3249_v0  ;;  %v3550_v52 = vsel %vm855_vm0, %v8280_v12, 0.0 }
 0x75c   : > { %v8296_v0 = vadd.f32 %v3377_v45, %v3313_v17  ;;  %v3380_v17 = vld [vmem:[%s6558_s18 + $0x1a8] sm:$0xff]  ;;  %v3254_v45 = vmul.f32 0.01, %v8103_v20 }
 0x75d   : > { %v3543_v41 = vadd.f32 %v3542_v5, %v3541_v50  ;;  %v3251_v50 = vmul.f32 0.01, %v8088_v61 }
 0x75f   : > { %v3545_v9 = vadd.f32 %v3544_v53, %v3543_v41  ;;  %v3314_v41 = vsel %vm3186_vm2, %v8059_v48, %v3250_v18  ;;  %v3552_v48 = vsel %vm855_vm0, %v8288_v8, 0.0 }
 0x760   : > { %v8304_v18 = vadd.f32 %v3378_v28, %v3314_v41  ;;  %v3317_v41 = vsel %vm3189_vm5, %v8108_v43, %v3253_v46  ;;  %v3381_v28 = vld [vmem:[%s6558_s18 + $0x1b0] sm:$0xff] }
 0x761   : > { %v3547_v25 = vadd.f32 %v3546_v33, %v3545_v9  ;;  %v3315_v9 = vsel %vm3187_vm3, %v8088_v61, %v3251_v50  ;;  %v3554_v61 = vsel %vm855_vm0, %v8296_v0, 0.0  ;;  %v8329_v46 = vadd.f32 %v3381_v28, %v3317_v41 }
 0x762   : > { %v8312_v50 = vadd.f32 %v3379_v32, %v3315_v9  ;;  %v3318_v9 = vsel %vm3190_vm6, %v8103_v20, %v3254_v45  ;;  %v3382_v32 = vld [vmem:[%s6558_s18 + $0x1b8] sm:$0xf]  ;;  %v3258_v41 = vmul.f32 0.01, %v8064_v1 }
 0x763   : > { %v3549_v5 = vadd.f32 %v3548_v54, %v3547_v25  ;;  %v3316_v25 = vsel %vm3188_vm4, %v8083_v6, %v3252_v21  ;;  %v3255_v54 = vmul.f32 0.01, %v8049_v56  ;;  %v3556_v6 = vsel %vm855_vm0, %v8304_v18, 0.0 }
 0x764   : > { %v8321_v21 = vadd.f32 %v3380_v17, %v3316_v25  ;;  %v3558_v43 = vsel %vm855_vm0, %v8312_v50, 0.0  ;;  %v3257_v25 = vmul.f32 0.01, %v8073_v19  ;;  %v8337_v45 = vadd.f32 %v3382_v32, %v3318_v9 }
 0x765   : > { %v3551_v53 = vadd.f32 %v3550_v52, %v3549_v5  ;;  %v3256_v52 = vmul.f32 0.01, %v8040_v55  ;;  %v3259_v32 = vmul.f32 0.01, %v8133_v63 }
 0x766   : > { %v3560_v20 = vsel %vm855_vm0, %v8321_v21, 0.0 }
 0x767   : > { %v3553_v33 = vadd.f32 %v3552_v48, %v3551_v53  ;;  %v3319_v48 = vsel %vm3191_vm7, %v8049_v56, %v3255_v54  ;;  %v3562_v56 = vsel %vm855_vm0, %v8329_v46, 0.0  ;;  %v3321_v54 = vsel %vm3193_vm9, %v8073_v19, %v3257_v25 }
 0x769   : > { %v3555_v5 = vadd.f32 %v3554_v61, %v3553_v33  ;;  %v3383_v33 = vld [vmem:[%s6558_s18 + $0x1c0] sm:$0xff]  ;;  %v3320_v61 = vsel %vm3192_vm8, %v8040_v55, %v3256_v52  ;;  %v3564_v55 = vsel %vm961_vm1, %v8337_v45, 0.0  ;;  %v3322_v52 = vsel %vm3194_vm10, %v8064_v1, %v3258_v41 }
 0x76b   : > { %v3557_v53 = vadd.f32 %v3556_v6, %v3555_v5  ;;  %v3384_v5 = vld [vmem:[%s6558_s18 + $0x1c8] sm:$0xff]  ;;  %v8342_v6 = vadd.f32 %v3383_v33, %v3319_v48  ;;  %v3386_v48 = vld [vmem:[%s6558_s18 + $0x1d8] sm:$0xff] }
 0x76c   : > { %v8368_v41 = vadd.f32 %v3386_v48, %v3322_v52 }
 0x76d   : > { %v3559_v17 = vadd.f32 %v3558_v43, %v3557_v53  ;;  %v3385_v53 = vld [vmem:[%s6558_s18 + $0x1d0] sm:$0xff]  ;;  %v8350_v43 = vadd.f32 %v3384_v5, %v3320_v61  ;;  %v3566_v19 = vsel %vm855_vm0, %v8342_v6, 0.0  ;;  %v3323_v61 = vsel %vm3195_vm11, %v8133_v63, %v3259_v32  ;;  %v3387_v5 = vld [vmem:[%s6558_s18 + $0x1e0] sm:$0xff] }
 0x76e   : > { %v8360_v25 = vadd.f32 %v3385_v53, %v3321_v54  ;;  %v3388_v54 = vld [vmem:[%s6558_s18 + $0x1e8] sm:$0xff]  ;;  %v3262_v53 = vmul.f32 0.01, %v8146_v26  ;;  %v8376_v32 = vadd.f32 %v3387_v5, %v3323_v61  ;;  %v3572_v48 = vsel %vm855_vm0, %v8368_v41, 0.0 }
 0x76f   : > { %v3561_v28 = vadd.f32 %v3560_v20, %v3559_v17  ;;  %v3260_v17 = vmul.f32 0.01, %v8126_v60  ;;  %v3568_v1 = vsel %vm855_vm0, %v8350_v43, 0.0 }
 0x770   : > { %9816 = vst [vmem:[#allocation46_spill] sm:$0xff] %v8360_v25  ;;  %v3570_v63 = vsel %vm855_vm0, %v8360_v25, 0.0 }
 0x771   : > { %v3563_v9 = vadd.f32 %v3562_v56, %v3561_v28  ;;  %v3261_v28 = vmul.f32 0.01, %v8153_v27  ;;  %v3324_v56 = vsel %vm3196_vm12, %v8126_v60, %v3260_v17  ;;  %v3326_v60 = vsel %vm3198_vm14, %v8146_v26, %v3262_v53  ;;  %v3390_v17 = vld [vmem:[%s6558_s18 + $0x1f8] sm:$0xf] }
 0x772   : > { %v8391_v25 = vadd.f32 %v3390_v17, %v3326_v60 }
 0x773   : > { %v3565_v33 = vadd.f32 %v3564_v55, %v3563_v9  ;;  %v3325_v55 = vsel %vm3197_vm13, %v8153_v27, %v3261_v28 }
 0x774   : > { %v3580_v26 = vsel %vm961_vm1, %v8391_v25, 0.0 }
 0x775   : > { %v3567_v20 = vadd.f32 %v3566_v19, %v3565_v33  ;;  %v3389_v33 = vld [vmem:[%s6558_s18 + $0x1f0] sm:$0xff]  ;;  %v8383_v19 = vadd.f32 %v3388_v54, %v3324_v56  ;;  %s5932_s18 = scalar_lea.vmem %s5931_s24, 2048 }
 0x776   : > { %v8389_v61 = vadd.f32 %v3389_v33, %v3325_v55  ;;  %p5934_p1 = scmp.lt.s32.totalorder %s5932_s18, %s5926_s6 }
 0x777   : > { %v3569_v9 = vadd.f32 %v3568_v1, %v3567_v20  ;;  %v3574_v1 = vsel %vm855_vm0, %v8376_v32, 0.0  ;;  %v3576_v27 = vsel %vm855_vm0, %v8383_v19, 0.0 }
 0x778   : > { %v3578_v56 = vsel %vm855_vm0, %v8389_v61, 0.0  ;;  %p5935_p11 = por %p5934_p1, %p5933_p10 }
 0x779   : > { %v3571_v52 = vadd.f32 %v3570_v63, %v3569_v9 }
 0x77a   : > { %p5936_p12 = pnand %p5935_p11, %p5929_p3 }
 0x77b   : > { %v3573_v20 = vadd.f32 %v3572_v48, %v3571_v52 }
 0x77d   : > { %v3575_v5 = vadd.f32 %v3574_v1, %v3573_v20 }
 0x77f   : > { %v3577_v28 = vadd.f32 %v3576_v27, %v3575_v5 }
 0x781   : > { %v3579_v54 = vadd.f32 %v3578_v56, %v3577_v28 }
 0x783   : > { %v3581_v53 = vadd.f32 %v3580_v26, %v3579_v54 }
 0x785   : > { %3582 = vadd.xlane.f32.xlu1 %v3581_v53 }
 0x812   : > { %v3583_v9 = vpop.xlane.xlu1 %3582 }
 0x813   : > { %v3584_v63 = vrot.slane %v3583_v9, 4 }
 0x815   : > { %v3585_v55 = vadd.f32 %v3584_v63, %v3583_v9 }
 0x817   : > { %v3586_v33 = vrot.slane %v3585_v55, 2 }
 0x819   : > { %v3587_v52 = vadd.f32 %v3586_v33, %v3585_v55 }
 0x81b   : > { %v3588_v48 = vrot.slane %v3587_v52, 1 }
 0x81d   : > { %v3589_v60 = vadd.f32 %v3588_v48, %v3587_v52 }
 0x81f   : > { %5283 = vpush %v3589_v60 }
 0x850   : > { %s5284_s21 = spop %5283 }
 0x851   : > { %s3593_s13 = smul.f32 0.00026041668, %s5284_s21 }
 0x853   : > { %v8399_v17 = vstv %s3593_s13 }
 0x854   : > { %v8403_v20 = vsub.f32 %v7811_v47, %v8399_v17  ;;  %v8407_v1 = vsub.f32 %v7807_v34, %v8399_v17  ;;  %v8411_v5 = vsub.f32 %v7825_v39, %v8399_v17  ;;  %v8415_v27 = vsub.f32 %v7823_v49, %v8399_v17 }
 0x855   : > { %v8423_v47 = vsub.f32 %v7839_v38, %v8399_v17  ;;  %v8429_v39 = vsub.f32 %v7837_v30, %v8399_v17  ;;  %v8437_v9 = vsub.f32 %v7871_v3, %v8399_v17  ;;  %v8444_v30 = vsub.f32 %v7869_v35, %v8399_v17 }
 0x856   : > { %v3659_v28 = vmul.f32 %v8403_v20, %v8403_v20  ;;  %v3660_v56 = vmul.f32 %v8407_v1, %v8407_v1  ;;  %v3661_v34 = vmul.f32 %v8411_v5, %v8411_v5  ;;  %v3662_v49 = vmul.f32 %v8415_v27, %v8415_v27 }
 0x857   : > { %v3663_v38 = vmul.f32 %v8423_v47, %v8423_v47  ;;  %v3664_v33 = vmul.f32 %v8429_v39, %v8429_v39  ;;  %v8451_v3 = vsub.f32 %v7878_v24, %v8399_v17  ;;  %v3665_v60 = vmul.f32 %v8437_v9, %v8437_v9 }
 0x858   : > { %v3723_v54 = vsel %vm855_vm0, %v3659_v28, 0.0  ;;  %v3724_v26 = vsel %vm855_vm0, %v3660_v56, 0.0  ;;  %v3726_v63 = vsel %vm855_vm0, %v3661_v34, 0.0  ;;  %v3728_v52 = vsel %vm855_vm0, %v3662_v49, 0.0 }
 0x859   : > { %v3725_v53 = vadd.f32 %v3724_v26, %v3723_v54  ;;  %v3730_v28 = vsel %vm855_vm0, %v3663_v38, 0.0  ;;  %v8458_v35 = vsub.f32 %v7892_v14, %v8399_v17  ;;  %v3666_v34 = vmul.f32 %v8444_v30, %v8444_v30 }
 0x85a   : > { %v3732_v49 = vsel %vm855_vm0, %v3664_v33, 0.0  ;;  %v8465_v24 = vsub.f32 %v7904_v10, %v8399_v17  ;;  %v3667_v26 = vmul.f32 %v8451_v3, %v8451_v3  ;;  %v8472_v14 = vsub.f32 %v7918_v13, %v8399_v17 }
 0x85b   : > { %v3727_v55 = vadd.f32 %v3726_v63, %v3725_v53  ;;  %v3734_v53 = vsel %vm855_vm0, %v3665_v60, 0.0  ;;  %v3668_v63 = vmul.f32 %v8458_v35, %v8458_v35  ;;  %v8479_v10 = vsub.f32 %v7928_v62, %v8399_v17 }
 0x85c   : > { %v8486_v13 = vsub.f32 %v7938_v37, %v8399_v17  ;;  %v8493_v62 = vsub.f32 %v7952_v36, %v8399_v17  ;;  %v8500_v37 = vsub.f32 %v7962_v44, %v8399_v17 }
 0x85d   : > { %v3729_v48 = vadd.f32 %v3728_v52, %v3727_v55  ;;  %v3736_v55 = vsel %vm961_vm1, %v3666_v34, 0.0  ;;  %v3669_v52 = vmul.f32 %v8465_v24, %v8465_v24 }
 0x85f   : > { %v3731_v56 = vadd.f32 %v3730_v28, %v3729_v48  ;;  %v3738_v48 = vsel %vm855_vm0, %v3667_v26, 0.0  ;;  %v3670_v28 = vmul.f32 %v8472_v14, %v8472_v14 }
 0x861   : > { %v3733_v54 = vadd.f32 %v3732_v49, %v3731_v56  ;;  %v3740_v56 = vsel %vm855_vm0, %v3668_v63, 0.0  ;;  %v3671_v49 = vmul.f32 %v8479_v10, %v8479_v10 }
 0x863   : > { %v3735_v38 = vadd.f32 %v3734_v53, %v3733_v54  ;;  %v3742_v54 = vsel %vm855_vm0, %v3669_v52, 0.0  ;;  %v3672_v53 = vmul.f32 %v8486_v13, %v8486_v13  ;;  %v3746_v52 = vsel %vm855_vm0, %v3671_v49, 0.0 }
 0x865   : > { %v3737_v33 = vadd.f32 %v3736_v55, %v3735_v38  ;;  %v3744_v38 = vsel %vm855_vm0, %v3670_v28, 0.0  ;;  %v9817_v55 = vld [vmem:[#allocation54_spill] sm:$0xff]  ;;  %v3748_v28 = vsel %vm855_vm0, %v3672_v53, 0.0 }
 0x866   : > { %v8507_v36 = vsub.f32 %v9817_v55, %v8399_v17  ;;  %v9823_v55 = vld [vmem:[#allocation55_spill] sm:$0xff] }
 0x867   : > { %v3739_v60 = vadd.f32 %v3738_v48, %v3737_v33  ;;  %v3673_v33 = vmul.f32 %v8493_v62, %v8493_v62 }
 0x868   : > { %9818 = vst [vmem:[#allocation50_spill] sm:$0xff] %v8507_v36 }
 0x869   : > { %v3741_v34 = vadd.f32 %v3740_v56, %v3739_v60  ;;  %v9819_v60 = vld [vmem:[#allocation53_spill] sm:$0xff]  ;;  %v3674_v56 = vmul.f32 %v8500_v37, %v8500_v37  ;;  %v3750_v49 = vsel %vm855_vm0, %v3673_v33, 0.0 }
 0x86a   : > { %v8514_v44 = vsub.f32 %v9819_v60, %v8399_v17 }
 0x86b   : > { %v3743_v26 = vadd.f32 %v3742_v54, %v3741_v34  ;;  %v9821_v54 = vld [vmem:[#allocation36_spill] sm:$0xff]  ;;  %v3752_v53 = vsel %vm961_vm1, %v3674_v56, 0.0 }
 0x86c   : > { %9820 = vst [vmem:[#allocation41_spill] sm:$0xff] %v8514_v44  ;;  %v3676_v60 = vmul.f32 %v8514_v44, %v8514_v44 }
 0x86d   : > { %v3745_v63 = vadd.f32 %v3744_v38, %v3743_v26  ;;  %v8521_v26 = vsub.f32 %v9821_v54, %v8399_v17  ;;  %v3675_v38 = vmul.f32 %v8507_v36, %v8507_v36 }
 0x86e   : > { %v3756_v56 = vsel %vm855_vm0, %v3676_v60, 0.0 }
 0x86f   : > { %v3747_v48 = vadd.f32 %v3746_v52, %v3745_v63  ;;  %9822 = vst [vmem:[#allocation45_spill] sm:$0xff] %v8521_v26  ;;  %v8528_v52 = vsub.f32 %v9823_v55, %v8399_v17  ;;  %v3677_v36 = vmul.f32 %v8521_v26, %v8521_v26  ;;  %v3754_v33 = vsel %vm855_vm0, %v3675_v38, 0.0 }
 0x871   : > { %v3749_v34 = vadd.f32 %v3748_v28, %v3747_v48  ;;  %9824 = vst [vmem:[#allocation58_spill] sm:$0xff] %v8528_v52  ;;  %v9825_v28 = vld [vmem:[#allocation56_spill] sm:$0xff]  ;;  %v3678_v44 = vmul.f32 %v8528_v52, %v8528_v52  ;;  %v3758_v38 = vsel %vm855_vm0, %v3677_v36, 0.0 }
 0x872   : > { %v8535_v54 = vsub.f32 %v9825_v28, %v8399_v17 }
 0x873   : > { %v3751_v63 = vadd.f32 %v3750_v49, %v3749_v34  ;;  %v9827_v49 = vld [vmem:[#allocation39_spill] sm:$0xff]  ;;  %v3760_v60 = vsel %vm855_vm0, %v3678_v44, 0.0 }
 0x874   : > { %9826 = vst [vmem:[#allocation49_spill] sm:$0xff] %v8535_v54  ;;  %v8542_v55 = vsub.f32 %v9827_v49, %v8399_v17  ;;  %v3679_v26 = vmul.f32 %v8535_v54, %v8535_v54 }
 0x875   : > { %v3753_v48 = vadd.f32 %v3752_v53, %v3751_v63  ;;  %v9829_v53 = vld [vmem:[#allocation43_spill] sm:$0xff] }
 0x876   : > { %9828 = vst [vmem:[#allocation59_spill] sm:$0xff] %v8542_v55  ;;  %v8549_v28 = vsub.f32 %v9829_v53, %v8399_v17  ;;  %v3680_v52 = vmul.f32 %v8542_v55, %v8542_v55  ;;  %v3762_v36 = vsel %vm855_vm0, %v3679_v26, 0.0 }
 0x877   : > { %v3755_v34 = vadd.f32 %v3754_v33, %v3753_v48  ;;  %v9831_v33 = vld [vmem:[#allocation37_spill] sm:$0xff] }
 0x878   : > { %9830 = vst [vmem:[#allocation57_spill] sm:$0xff] %v8549_v28  ;;  %v8556_v49 = vsub.f32 %v9831_v33, %v8399_v17  ;;  %v3681_v54 = vmul.f32 %v8549_v28, %v8549_v28  ;;  %v3764_v44 = vsel %vm855_vm0, %v3680_v52, 0.0 }
 0x879   : > { %v3757_v63 = vadd.f32 %v3756_v56, %v3755_v34  ;;  %v9832_v56 = vld [vmem:[#allocation47_spill] sm:$0xff] }
 0x87a   : > { %v8563_v53 = vsub.f32 %v9832_v56, %v8399_v17  ;;  %v3682_v55 = vmul.f32 %v8556_v49, %v8556_v49  ;;  %v3766_v26 = vsel %vm855_vm0, %v3681_v54, 0.0 }
 0x87b   : > { %v3759_v48 = vadd.f32 %v3758_v38, %v3757_v63  ;;  %v9834_v38 = vld [vmem:[#allocation51_spill] sm:$0xff] }
 0x87c   : > { %9833 = vst [vmem:[#allocation60_spill] sm:$0xff] %v8563_v53  ;;  %v8570_v33 = vsub.f32 %v9834_v38, %v8399_v17  ;;  %v3683_v28 = vmul.f32 %v8563_v53, %v8563_v53  ;;  %v3768_v52 = vsel %vm961_vm1, %v3682_v55, 0.0 }
 0x87d   : > { %v3761_v34 = vadd.f32 %v3760_v60, %v3759_v48  ;;  %v9836_v60 = vld [vmem:[#allocation40_spill] sm:$0xff] }
 0x87e   : > { %9835 = vst [vmem:[#allocation61_spill] sm:$0xff] %v8570_v33  ;;  %v8577_v56 = vsub.f32 %v9836_v60, %v8399_v17  ;;  %v3684_v38 = vmul.f32 %v8570_v33, %v8570_v33  ;;  %v3770_v54 = vsel %vm855_vm0, %v3683_v28, 0.0 }
 0x87f   : > { %v3763_v63 = vadd.f32 %v3762_v36, %v3761_v34  ;;  %v8584_v36 = vsub.f32 %v8100_v4, %v8399_v17 }
 0x880   : > { %9837 = vst [vmem:[#allocation62_spill] sm:$0xff] %v8577_v56  ;;  %v3685_v53 = vmul.f32 %v8577_v56, %v8577_v56  ;;  %v3772_v55 = vsel %vm855_vm0, %v3684_v38, 0.0 }
 0x881   : > { %v3765_v48 = vadd.f32 %v3764_v44, %v3763_v63  ;;  %v9838_v44 = vld [vmem:[#allocation44_spill] sm:$0xff]  ;;  %v3686_v33 = vmul.f32 %v8584_v36, %v8584_v36 }
 0x882   : > { %v8591_v60 = vsub.f32 %v9838_v44, %v8399_v17  ;;  %v3774_v28 = vsel %vm855_vm0, %v3685_v53, 0.0 }
 0x883   : > { %v3767_v34 = vadd.f32 %v3766_v26, %v3765_v48  ;;  %v9839_v26 = vld [vmem:[#allocation48_spill] sm:$0xff]  ;;  %v3776_v38 = vsel %vm855_vm0, %v3686_v33, 0.0 }
 0x884   : > { %v8598_v4 = vsub.f32 %v9839_v26, %v8399_v17  ;;  %v3687_v56 = vmul.f32 %v8591_v60, %v8591_v60 }
 0x885   : > { %v3769_v63 = vadd.f32 %v3768_v52, %v3767_v34  ;;  %v9840_v52 = vld [vmem:[#allocation38_spill] sm:$0xff] }
 0x886   : > { %v8605_v44 = vsub.f32 %v9840_v52, %v8399_v17  ;;  %v3688_v26 = vmul.f32 %v8598_v4, %v8598_v4  ;;  %v3778_v53 = vsel %vm855_vm0, %v3687_v56, 0.0 }
 0x887   : > { %v3771_v48 = vadd.f32 %v3770_v54, %v3769_v63  ;;  %v8612_v54 = vsub.f32 %v8140_v16, %v8399_v17  ;;  %v8626_v16 = vsub.f32 %v8160_v23, %v8399_v17  ;;  %v8640_v23 = vsub.f32 %v8176_v40, %v8399_v17 }
 0x888   : > { %9841 = vst [vmem:[#allocation64_spill] sm:$0xff] %v8605_v44  ;;  %v3689_v52 = vmul.f32 %v8605_v44, %v8605_v44  ;;  %v3780_v33 = vsel %vm855_vm0, %v3688_v26, 0.0  ;;  %v8654_v40 = vsub.f32 %v8193_v15, %v8399_v17  ;;  %v8668_v15 = vsub.f32 %v8209_v51, %v8399_v17 }
 0x889   : > { %v3773_v34 = vadd.f32 %v3772_v55, %v3771_v48  ;;  %v8619_v55 = vsub.f32 %v8150_v7, %v8399_v17  ;;  %v8682_v51 = vsub.f32 %v8222_v58, %v8399_v17  ;;  %v8696_v58 = vsub.f32 %v8240_v42, %v8399_v17 }
 0x88a   : > { %v3782_v56 = vsel %vm855_vm0, %v3689_v52, 0.0  ;;  %v8710_v42 = vsub.f32 %v8256_v59, %v8399_v17  ;;  %v8724_v59 = vsub.f32 %v8272_v11, %v8399_v17  ;;  %v8738_v11 = vsub.f32 %v8288_v8, %v8399_v17 }
 0x88b   : > { %v3775_v63 = vadd.f32 %v3774_v28, %v3773_v34  ;;  %9842 = vst [vmem:[#allocation63_spill] sm:$0xff] %v8619_v55  ;;  %v3690_v28 = vmul.f32 %v8612_v54, %v8612_v54  ;;  %v3691_v44 = vmul.f32 %v8619_v55, %v8619_v55  ;;  %v8752_v8 = vsub.f32 %v8304_v18, %v8399_v17 }
 0x88c   : > { %v8766_v18 = vsub.f32 %v8321_v21, %v8399_v17  ;;  %v8780_v21 = vsub.f32 %v8337_v45, %v8399_v17  ;;  %v8794_v45 = vsub.f32 %v8350_v43, %v8399_v17  ;;  %v8808_v43 = vsub.f32 %v8368_v41, %v8399_v17 }
 0x88d   : > { %v3777_v48 = vadd.f32 %v3776_v38, %v3775_v63  ;;  %v9843_v38 = vld [vmem:[#allocation42_spill] sm:$0xff]  ;;  %v3784_v26 = vsel %vm961_vm1, %v3690_v28, 0.0  ;;  %v3786_v52 = vsel %vm855_vm0, %v3691_v44, 0.0  ;;  %v8822_v41 = vsub.f32 %v8383_v19, %v8399_v17 }
 0x88e   : > { %v8633_v7 = vsub.f32 %v9843_v38, %v8399_v17  ;;  %9847 = vst [vmem:[#allocation66_spill] sm:$0xff] %v8808_v43  ;;  %v8836_v19 = vsub.f32 %v8391_v25, %v8399_v17 }
 0x88f   : > { %v3779_v34 = vadd.f32 %v3778_v53, %v3777_v48  ;;  %v3692_v53 = vmul.f32 %v8626_v16, %v8626_v16  ;;  %9848 = vst [vmem:[#allocation54_spill] sm:$0xff] %v8822_v41 }
 0x890   : > { %v3693_v55 = vmul.f32 %v8633_v7, %v8633_v7  ;;  %9850 = vst [vmem:[#allocation36_spill] sm:$0xff] %v8836_v19 }
 0x891   : > { %v3781_v63 = vadd.f32 %v3780_v33, %v3779_v34  ;;  %v9844_v33 = vld [vmem:[#allocation52_spill] sm:$0xff]  ;;  %v3788_v28 = vsel %vm855_vm0, %v3692_v53, 0.0 }
 0x892   : > { %v8647_v38 = vsub.f32 %v9844_v33, %v8399_v17  ;;  %v3790_v44 = vsel %vm855_vm0, %v3693_v55, 0.0 }
 0x893   : > { %v3783_v48 = vadd.f32 %v3782_v56, %v3781_v63  ;;  %v3694_v56 = vmul.f32 %v8640_v23, %v8640_v23 }
 0x894   : > { %v3695_v33 = vmul.f32 %v8647_v38, %v8647_v38 }
 0x895   : > { %v3785_v34 = vadd.f32 %v3784_v26, %v3783_v48  ;;  %v8661_v26 = vsub.f32 %v8201_v31, %v8399_v17  ;;  %v3792_v53 = vsel %vm855_vm0, %v3694_v56, 0.0  ;;  %v8675_v31 = vsub.f32 %v8214_v29, %v8399_v17 }
 0x896   : > { %v3794_v55 = vsel %vm855_vm0, %v3695_v33, 0.0  ;;  %v8689_v29 = vsub.f32 %v8232_v2, %v8399_v17  ;;  %v8703_v2 = vsub.f32 %v8248_v57, %v8399_v17  ;;  %v8717_v57 = vsub.f32 %v8264_v22, %v8399_v17 }
 0x897   : > { %v3787_v63 = vadd.f32 %v3786_v52, %v3785_v34  ;;  %v3696_v52 = vmul.f32 %v8654_v40, %v8654_v40  ;;  %v8731_v22 = vsub.f32 %v8280_v12, %v8399_v17  ;;  %v8745_v12 = vsub.f32 %v8296_v0, %v8399_v17 }
 0x898   : > { %v8759_v0 = vsub.f32 %v8312_v50, %v8399_v17  ;;  %v8773_v50 = vsub.f32 %v8329_v46, %v8399_v17  ;;  %v8787_v46 = vsub.f32 %v8342_v6, %v8399_v17 }
 0x899   : > { %v3789_v48 = vadd.f32 %v3788_v28, %v3787_v63  ;;  %v3697_v28 = vmul.f32 %v8661_v26, %v8661_v26  ;;  %v3796_v56 = vsel %vm855_vm0, %v3696_v52, 0.0 }
 0x89a   : > { %9845 = vst [vmem:[#allocation65_spill] sm:$0xff] %v8773_v50 }
 0x89b   : > { %v3791_v34 = vadd.f32 %v3790_v44, %v3789_v48  ;;  %v3698_v44 = vmul.f32 %v8668_v15, %v8668_v15  ;;  %v3798_v33 = vsel %vm855_vm0, %v3697_v28, 0.0 }
 0x89d   : > { %v3793_v63 = vadd.f32 %v3792_v53, %v3791_v34  ;;  %v3699_v53 = vmul.f32 %v8675_v31, %v8675_v31  ;;  %v3800_v52 = vsel %vm961_vm1, %v3698_v44, 0.0 }
 0x89f   : > { %v3795_v48 = vadd.f32 %v3794_v55, %v3793_v63  ;;  %v3700_v55 = vmul.f32 %v8682_v51, %v8682_v51  ;;  %v3802_v28 = vsel %vm855_vm0, %v3699_v53, 0.0 }
 0x8a1   : > { %v3797_v34 = vadd.f32 %v3796_v56, %v3795_v48  ;;  %v3701_v56 = vmul.f32 %v8689_v29, %v8689_v29  ;;  %v3804_v44 = vsel %vm855_vm0, %v3700_v55, 0.0 }
 0x8a3   : > { %v3799_v63 = vadd.f32 %v3798_v33, %v3797_v34  ;;  %v3702_v33 = vmul.f32 %v8696_v58, %v8696_v58  ;;  %v3806_v53 = vsel %vm855_vm0, %v3701_v56, 0.0 }
 0x8a5   : > { %v3801_v48 = vadd.f32 %v3800_v52, %v3799_v63  ;;  %v3703_v52 = vmul.f32 %v8703_v2, %v8703_v2  ;;  %v3808_v55 = vsel %vm855_vm0, %v3702_v33, 0.0 }
 0x8a7   : > { %v3803_v34 = vadd.f32 %v3802_v28, %v3801_v48  ;;  %v3704_v28 = vmul.f32 %v8710_v42, %v8710_v42  ;;  %v3810_v56 = vsel %vm855_vm0, %v3703_v52, 0.0 }
 0x8a9   : > { %v3805_v63 = vadd.f32 %v3804_v44, %v3803_v34  ;;  %v3705_v44 = vmul.f32 %v8717_v57, %v8717_v57  ;;  %v3812_v33 = vsel %vm855_vm0, %v3704_v28, 0.0 }
 0x8ab   : > { %v3807_v48 = vadd.f32 %v3806_v53, %v3805_v63  ;;  %v3706_v53 = vmul.f32 %v8724_v59, %v8724_v59  ;;  %v3814_v52 = vsel %vm855_vm0, %v3705_v44, 0.0 }
 0x8ad   : > { %v3809_v34 = vadd.f32 %v3808_v55, %v3807_v48  ;;  %v3707_v55 = vmul.f32 %v8731_v22, %v8731_v22  ;;  %v3816_v28 = vsel %vm961_vm1, %v3706_v53, 0.0 }
 0x8af   : > { %v3811_v63 = vadd.f32 %v3810_v56, %v3809_v34  ;;  %v3708_v56 = vmul.f32 %v8738_v11, %v8738_v11  ;;  %v3818_v44 = vsel %vm855_vm0, %v3707_v55, 0.0 }
 0x8b1   : > { %v3813_v48 = vadd.f32 %v3812_v33, %v3811_v63  ;;  %v3709_v33 = vmul.f32 %v8745_v12, %v8745_v12  ;;  %v3820_v53 = vsel %vm855_vm0, %v3708_v56, 0.0 }
 0x8b3   : > { %v3815_v34 = vadd.f32 %v3814_v52, %v3813_v48  ;;  %v3710_v52 = vmul.f32 %v8752_v8, %v8752_v8  ;;  %v3822_v55 = vsel %vm855_vm0, %v3709_v33, 0.0 }
 0x8b5   : > { %v3817_v63 = vadd.f32 %v3816_v28, %v3815_v34  ;;  %v3711_v28 = vmul.f32 %v8759_v0, %v8759_v0  ;;  %v3824_v56 = vsel %vm855_vm0, %v3710_v52, 0.0 }
 0x8b7   : > { %v3819_v48 = vadd.f32 %v3818_v44, %v3817_v63  ;;  %v3712_v44 = vmul.f32 %v8766_v18, %v8766_v18  ;;  %v3826_v33 = vsel %vm855_vm0, %v3711_v28, 0.0 }
 0x8b9   : > { %v3821_v34 = vadd.f32 %v3820_v53, %v3819_v48  ;;  %v3713_v53 = vmul.f32 %v8773_v50, %v8773_v50  ;;  %v3828_v52 = vsel %vm855_vm0, %v3712_v44, 0.0  ;;  %v3715_v50 = vmul.f32 %v8787_v46, %v8787_v46 }
 0x8bb   : > { %v3823_v63 = vadd.f32 %v3822_v55, %v3821_v34  ;;  %v3714_v55 = vmul.f32 %v8780_v21, %v8780_v21  ;;  %v3830_v28 = vsel %vm855_vm0, %v3713_v53, 0.0  ;;  %v3834_v53 = vsel %vm855_vm0, %v3715_v50, 0.0 }
 0x8bd   : > { %v3825_v48 = vadd.f32 %v3824_v56, %v3823_v63  ;;  %v9846_v56 = vld [vmem:[#allocation46_spill] sm:$0xff]  ;;  %v3832_v44 = vsel %vm961_vm1, %v3714_v55, 0.0 }
 0x8be   : > { %v8801_v6 = vsub.f32 %v9846_v56, %v8399_v17 }
 0x8bf   : > { %v3827_v34 = vadd.f32 %v3826_v33, %v3825_v48  ;;  %v3716_v33 = vmul.f32 %v8794_v45, %v8794_v45 }
 0x8c0   : > { %v3717_v56 = vmul.f32 %v8801_v6, %v8801_v6 }
 0x8c1   : > { %v3829_v63 = vadd.f32 %v3828_v52, %v3827_v34  ;;  %v8815_v52 = vsub.f32 %v8376_v32, %v8399_v17  ;;  %v3836_v55 = vsel %vm855_vm0, %v3716_v33, 0.0  ;;  %v8829_v32 = vsub.f32 %v8389_v61, %v8399_v17 }
 0x8c2   : > { %v3838_v50 = vsel %vm855_vm0, %v3717_v56, 0.0  ;;  %v3722_v56 = vmul.f32 %v8836_v19, %v8836_v19 }
 0x8c3   : > { %v3831_v48 = vadd.f32 %v3830_v28, %v3829_v63  ;;  %v3718_v28 = vmul.f32 %v8808_v43, %v8808_v43  ;;  %9849 = vst [vmem:[#allocation53_spill] sm:$0xff] %v8829_v32  ;;  %v3721_v61 = vmul.f32 %v8829_v32, %v8829_v32 }
 0x8c5   : > { %v3833_v34 = vadd.f32 %v3832_v44, %v3831_v48  ;;  %v3719_v44 = vmul.f32 %v8815_v52, %v8815_v52  ;;  %v3840_v33 = vsel %vm855_vm0, %v3718_v28, 0.0  ;;  %v3846_v17 = vsel %vm855_vm0, %v3721_v61, 0.0 }
 0x8c6   : > { %v3848_v28 = vsel %vm961_vm1, %v3722_v56, 0.0 }
 0x8c7   : > { %v3835_v63 = vadd.f32 %v3834_v53, %v3833_v34  ;;  %v3720_v53 = vmul.f32 %v8822_v41, %v8822_v41 }
 0x8c9   : > { %v3837_v48 = vadd.f32 %v3836_v55, %v3835_v63  ;;  %v3842_v55 = vsel %vm855_vm0, %v3719_v44, 0.0 }
 0x8cb   : > { %v3839_v34 = vadd.f32 %v3838_v50, %v3837_v48  ;;  %v3844_v48 = vsel %vm855_vm0, %v3720_v53, 0.0 }
 0x8cd   : > { %v3841_v63 = vadd.f32 %v3840_v33, %v3839_v34 }
 0x8cf   : > { %v3843_v43 = vadd.f32 %v3842_v55, %v3841_v63 }
 0x8d1   : > { %v3845_v25 = vadd.f32 %v3844_v48, %v3843_v43 }
 0x8d3   : > { %v3847_v50 = vadd.f32 %v3846_v17, %v3845_v25 }
 0x8d5   : > { %v3849_v34 = vadd.f32 %v3848_v28, %v3847_v50 }
 0x8d7   : > { %3850 = vadd.xlane.f32.xlu0 %v3849_v34 }
 0x964   : > { %v3851_v33 = vpop.xlane.xlu0 %3850 }
 0x965   : > { %v3852_v44 = vrot.slane %v3851_v33, 4 }
 0x967   : > { %v3853_v63 = vadd.f32 %v3852_v44, %v3851_v33 }
 0x969   : > { %v3854_v55 = vrot.slane %v3853_v63, 2 }
 0x96b   : > { %v3855_v32 = vadd.f32 %v3854_v55, %v3853_v63 }
 0x96d   : > { %v3856_v19 = vrot.slane %v3855_v32, 1 }
 0x96f   : > { %v3857_v41 = vadd.f32 %v3856_v19, %v3855_v32 }
 0x971   : > { %5285 = vpush %v3857_v41 }
 0x972   : > { %5939 = shalt.err (!%p5936_p12)
}
 0x973   : > { %s5940_s22 = scalar_lea.hbm %s8854_s17, 1024  ;;  %s5944_s13 = scalar_lea.hbm %s9851_s7, 2048 }
 0x974   : > { %p5941_p13 = scmp.ne.s32.totalorder %s8854_s17, %s5940_s22  ;;  %p5945_p0 = scmp.lt.u32.totalorder %s8854_s17, %s9851_s7 }
 0x975   : > { %p5946_p2 = scmp.lt.u32.totalorder %s5944_s13, %s5940_s22  ;;  %p5948_p6 = scmp.lt.u32.totalorder %s5940_s22, %s8854_s17 }
 0x976   : > { %p5942_p7 = pnand %p5941_p13, %p9852_p8 }
 0x977   : > { %p5947_p5 = por %p5946_p2, %p5945_p0 }
 0x978   : > { %p5943_p9 = pneg %p5942_p7 }
 0x979   : > { %p5949_p4 = por %p5948_p6, %p5947_p5 }
 0x97b   : > { %p5950_p3 = pnand %p5949_p4, %p5943_p9 }
 0x97d   : > { %5953 = shalt.err (!%p5950_p3)
}
 0x97e   : > { %s6073_s20 = smov 128   ;;  %s6074_s6 = smov 8   ;;  %v9853_v25 = vld [vmem:[#allocation50_spill] sm:$0xff]  ;;  %v9854_v17 = vld [vmem:[#allocation41_spill] sm:$0xff]  ;;  %v9858_v33 = vld [vmem:[#allocation59_spill] sm:$0xff] }
 0x97f   : > { %5333 = dma.vmem_to_hbm [thread:$0]  (%p9852_p8), %s8856_s5, 1024, %s8854_s17, %s4252_s1, %s6073_s20, %s6073_s20, %s6074_s6   ;;  %v9855_v50 = vld [vmem:[#allocation45_spill] sm:$0xff]  ;;  %v9856_v28 = vld [vmem:[#allocation58_spill] sm:$0xff] }
 0x980   : > { %v9857_v34 = vld [vmem:[#allocation49_spill] sm:$0xff]  ;;  %s9354_s5 = scalar_lea.vmem [#allocation23], %s6530_s30  ;;  %s4670_s30 = sshll.u32 %s6167_s14, 13 }
 0x981   : > { %v9859_v63 = vld [vmem:[#allocation57_spill] sm:$0xff]  ;;  %s4286_s17 = sshll.u32 %s9354_s5, 4  ;;  %s9998_s12 = sld [smem:[#allocation83_spill]]  ;;  %s9536_s17 = int_to_ptr.vmem [resolvable:$true] %s4286_s17 }
 0x982   : > { %s4257_s13 = scalar_lea.sflag [#allocation24], %s6527_s23  ;;  %s5954_s9 = scalar_lea.vmem %s9536_s17, 8192 }
 0x983   : > { %p5955_p10 = scmp.ne.s32.totalorder %s9536_s17, %s5954_s9  ;;  %s6075_s19 = smov [#allocation23]  }
 0x985   : > { %p5956_p1 = pnand %p5955_p10, %p9852_p8 }
 0x987   : > { %s9534_s21 = scalar_lea.hbm %s9998_s12, %s4670_s30  ;;  %p5957_p11 = pneg %p5956_p1 }
 0x9a2   : > { %s5286_s4 = spop %5285 }
 0x9a3   : > { %s3861_s24 = smul.f32 0.00026041668, %s5286_s4  ;;  %s5958_s4 = sshll.u32 %s6075_s19, 4  ;;  %s5959_s4 = int_to_ptr.vmem [resolvable:$false] %s5958_s4 }
 0x9a4   : > { %p5961_p12 = scmp.lt.s32.totalorder %s9536_s17, %s5959_s4 }
 0x9a5   : > { %s3862_s18 = sadd.f32 1e-05, %s3861_s24  ;;  %s5960_s24 = scalar_lea.vmem %s5959_s4, 16384 }
 0x9a6   : > { %p5962_p13 = scmp.lt.s32.totalorder %s5960_s24, %s5954_s9 }
 0x9a7   : > { %v3863_v43 = vstv %s3862_s18 }
 0x9a8   : > { %5520 = vrsqrt.f32 %v3863_v43  ;;  %p5963_p7 = por %p5962_p13, %p5961_p12 }
 0x9aa   : > { %p5964_p9 = pnand %p5963_p7, %p5957_p11 }
 0x9b2   : > { %v5521_v41 = vpop.eup %5520 }
 0x9b3   : > { %5287 = vpush %v5521_v41  ;;  %v9860_v41 = vld [vmem:[#allocation60_spill] sm:$0xff] }
 0x9e4   : > { %s5288_s22 = spop %5287 }
 0x9e5   : > { %v8885_v32 = vstv %s5288_s22 }
 0x9e6   : > { %v8889_v19 = vmul.f32 %v8885_v32, %v8403_v20  ;;  %v8893_v53 = vmul.f32 %v8885_v32, %v8407_v1  ;;  %v8897_v61 = vmul.f32 %v8885_v32, %v8411_v5  ;;  %v8901_v56 = vmul.f32 %v8885_v32, %v8415_v27 }
 0x9e7   : > { %v8905_v48 = vmul.f32 %v8885_v32, %v8423_v47  ;;  %v8909_v20 = vmul.f32 %v8885_v32, %v8429_v39  ;;  %v8913_v1 = vmul.f32 %v8885_v32, %v8437_v9  ;;  %v8917_v5 = vmul.f32 %v8885_v32, %v8444_v30 }
 0x9e8   : > { %v8921_v27 = vmul.f32 %v8885_v32, %v8451_v3  ;;  %v8925_v47 = vmul.f32 %v8885_v32, %v8458_v35  ;;  %v8929_v39 = vmul.f32 %v8885_v32, %v8465_v24  ;;  %v8933_v9 = vmul.f32 %v8885_v32, %v8472_v14 }
 0x9e9   : > { %v8937_v30 = vmul.f32 %v8885_v32, %v8479_v10  ;;  %v8941_v3 = vmul.f32 %v8885_v32, %v8486_v13  ;;  %v8945_v35 = vmul.f32 %v8885_v32, %v8493_v62  ;;  %v8949_v24 = vmul.f32 %v8885_v32, %v8500_v37 }
 0x9ea   : > { %v8953_v14 = vmul.f32 %v8885_v32, %v9853_v25  ;;  %v8957_v10 = vmul.f32 %v8885_v32, %v9854_v17  ;;  %v8961_v13 = vmul.f32 %v8885_v32, %v9855_v50  ;;  %v8965_v62 = vmul.f32 %v8885_v32, %v9856_v28  ;;  %v9861_v17 = vld [vmem:[#allocation61_spill] sm:$0xff]  ;;  %v9862_v28 = vld [vmem:[#allocation62_spill] sm:$0xff] }
 0x9eb   : > { %v8969_v37 = vmul.f32 %v8885_v32, %v9857_v34  ;;  %v8973_v44 = vmul.f32 %v8885_v32, %v9858_v33  ;;  %v8977_v55 = vmul.f32 %v8885_v32, %v9859_v63  ;;  %v8981_v43 = vmul.f32 %v8885_v32, %v8556_v49 }
 0x9ec   : > { %v8985_v25 = vmul.f32 %v8885_v32, %v9860_v41  ;;  %v8989_v50 = vmul.f32 %v8885_v32, %v9861_v17  ;;  %v8993_v34 = vmul.f32 %v8885_v32, %v9862_v28  ;;  %v8997_v33 = vmul.f32 %v8885_v32, %v8584_v36  ;;  %v9864_v41 = vld [vmem:[#allocation64_spill] sm:$0xff] }
 0x9ed   : > { %v9001_v49 = vmul.f32 %v8885_v32, %v8591_v60  ;;  %v9005_v63 = vmul.f32 %v8885_v32, %v8598_v4  ;;  %v9009_v17 = vmul.f32 %v8885_v32, %v9864_v41  ;;  %v9013_v28 = vmul.f32 %v8885_v32, %v8612_v54 }
 0x9ee   : > { %9863 = vst [vmem:[#allocation55_spill] sm:$0xff] %v8993_v34  ;;  %v9865_v34 = vld [vmem:[#allocation63_spill] sm:$0xff]  ;;  %v9021_v60 = vmul.f32 %v8885_v32, %v8626_v16  ;;  %v9025_v4 = vmul.f32 %v8885_v32, %v8633_v7  ;;  %v9029_v41 = vmul.f32 %v8885_v32, %v8640_v23  ;;  %v9033_v54 = vmul.f32 %v8885_v32, %v8647_v38 }
 0x9ef   : > { %v9017_v36 = vmul.f32 %v8885_v32, %v9865_v34  ;;  %v9037_v34 = vmul.f32 %v8885_v32, %v8654_v40  ;;  %v9041_v16 = vmul.f32 %v8885_v32, %v8661_v26  ;;  %v9045_v7 = vmul.f32 %v8885_v32, %v8668_v15 }
 0x9f0   : > { %9866 = vst [vmem:[#allocation56_spill] sm:$0xff] %v9029_v41  ;;  %9867 = vst [vmem:[#allocation39_spill] sm:$0xff] %v9033_v54  ;;  %v9049_v23 = vmul.f32 %v8885_v32, %v8675_v31  ;;  %v9053_v38 = vmul.f32 %v8885_v32, %v8682_v51  ;;  %v9057_v40 = vmul.f32 %v8885_v32, %v8689_v29 }
 0x9f1   : > { %9868 = vst [vmem:[#allocation43_spill] sm:$0xff] %v9037_v34  ;;  %9869 = vst [vmem:[#allocation37_spill] sm:$0xff] %v9041_v16  ;;  %v9061_v26 = vmul.f32 %v8885_v32, %v8696_v58  ;;  %v9065_v15 = vmul.f32 %v8885_v32, %v8703_v2  ;;  %v9069_v31 = vmul.f32 %v8885_v32, %v8710_v42  ;;  %v3934_v58 = vld [vmem:[#allocation19 + $0x18] sm:$0xff] }
 0x9f2   : > { %9870 = vst [vmem:[#allocation47_spill] sm:$0xff] %v9045_v7  ;;  %9871 = vst [vmem:[#allocation51_spill] sm:$0xff] %v9049_v23  ;;  %v9073_v51 = vmul.f32 %v8885_v32, %v8717_v57  ;;  %v9077_v29 = vmul.f32 %v8885_v32, %v8724_v59  ;;  %v9085_v2 = vmul.f32 %v8885_v32, %v8738_v11  ;;  %v3940_v59 = vld [vmem:[#allocation19 + $0x48] sm:$0xff]  ;;  %v3937_v7 = vld [vmem:[#allocation19 + $0x30] sm:$0xff] }
 0x9f3   : > { %9872 = vst [vmem:[#allocation40_spill] sm:$0xff] %v9053_v38  ;;  %9873 = vst [vmem:[#allocation44_spill] sm:$0xff] %v9057_v40  ;;  %v3932_v40 = vld [vmem:[#allocation19 + $0x8] sm:$0xff]  ;;  %v3931_v38 = vld [vmem:[#allocation19] sm:$0xff]  ;;  %v9089_v42 = vmul.f32 %v8885_v32, %v8745_v12  ;;  %v9093_v57 = vmul.f32 %v8885_v32, %v8752_v8  ;;  %v9101_v11 = vmul.f32 %v8885_v32, %v8766_v18 }
 0x9f4   : > { %9874 = vst [vmem:[#allocation48_spill] sm:$0xff] %v9061_v26  ;;  %9875 = vst [vmem:[#allocation38_spill] sm:$0xff] %v9065_v15  ;;  %v9081_v26 = vmul.f32 %v8885_v32, %v8731_v22  ;;  %v3941_v15 = vld [vmem:[#allocation19 + $0x50] sm:$0xff]  ;;  %v3936_v23 = vld [vmem:[#allocation19 + $0x28] sm:$0xff]  ;;  %v9097_v22 = vmul.f32 %v8885_v32, %v8759_v0  ;;  %v9109_v8 = vmul.f32 %v8885_v32, %v8780_v21 }
 0x9f5   : > { %9876 = vst [vmem:[#allocation42_spill] sm:$0xff] %v9069_v31  ;;  %9877 = vst [vmem:[#allocation52_spill] sm:$0xff] %v9073_v51  ;;  %v3942_v51 = vld [vmem:[#allocation19 + $0x58] sm:$0xff]  ;;  %v3933_v31 = vld [vmem:[#allocation19 + $0x10] sm:$0xff]  ;;  %v9113_v0 = vmul.f32 %v8885_v32, %v8787_v46  ;;  %v9117_v18 = vmul.f32 %v8885_v32, %v8794_v45  ;;  %v9129_v16 = vmul.f32 %v8885_v32, %v8815_v52 }
 0x9f6   : > { %9878 = vst [vmem:[#allocation46_spill] sm:$0xff] %v9077_v29  ;;  %9879 = vst [vmem:[#allocation50_spill] sm:$0xff] %v9081_v26  ;;  %v3939_v29 = vld [vmem:[#allocation19 + $0x40] sm:$0xff]  ;;  %v9885_v12 = vld [vmem:[#allocation65_spill] sm:$0xff]  ;;  %v9144_v54 = vmul.f32 %v3931_v38, %v8889_v19  ;;  %v9147_v52 = vmul.f32 %v3932_v40, %v8893_v53  ;;  %v9159_v19 = vmul.f32 %v3936_v23, %v8909_v20 }
 0x9f7   : > { %9880 = vst [vmem:[#allocation41_spill] sm:$0xff] %v9085_v2  ;;  %9881 = vst [vmem:[#allocation45_spill] sm:$0xff] %v9089_v42  ;;  %v9105_v42 = vmul.f32 %v8885_v32, %v9885_v12  ;;  %v3935_v2 = vld [vmem:[#allocation19 + $0x20] sm:$0xff]  ;;  %v3938_v26 = vld [vmem:[#allocation19 + $0x38] sm:$0xf]  ;;  %v9121_v12 = vmul.f32 %v8885_v32, %v8801_v6  ;;  %v9162_v53 = vmul.f32 %v3937_v7, %v8913_v1 }
 0x9f8   : > { %9882 = vst [vmem:[#allocation58_spill] sm:$0xff] %v9093_v57  ;;  %9883 = vst [vmem:[#allocation49_spill] sm:$0xff] %v9097_v22  ;;  %v3944_v57 = vld [vmem:[#allocation19 + $0x68] sm:$0xff]  ;;  %v3945_v22 = vld [vmem:[#allocation19 + $0x70] sm:$0xff]  ;;  %v9156_v41 = vmul.f32 %v3935_v2, %v8905_v48  ;;  %v9174_v48 = vmul.f32 %v3941_v15, %v8929_v39  ;;  %v9177_v20 = vmul.f32 %v3942_v51, %v8933_v9 }
 0x9f9   : > { %9884 = vst [vmem:[#allocation59_spill] sm:$0xff] %v9101_v11  ;;  %9886 = vst [vmem:[#allocation57_spill] sm:$0xff] %v9105_v42  ;;  %v9891_v42 = vld [vmem:[#allocation66_spill] sm:$0xff]  ;;  %v3946_v11 = vld [vmem:[#allocation19 + $0x78] sm:$0xf] }
 0x9fa   : > { %9887 = vst [vmem:[#allocation60_spill] sm:$0xff] %v9109_v8  ;;  %9888 = vst [vmem:[#allocation61_spill] sm:$0xff] %v9113_v0  ;;  %v9125_v21 = vmul.f32 %v8885_v32, %v9891_v42  ;;  %v3943_v8 = vld [vmem:[#allocation19 + $0x60] sm:$0xff]  ;;  %v9894_v46 = vld [vmem:[#allocation54_spill] sm:$0xff] }
 0x9fb   : > { %9889 = vst [vmem:[#allocation62_spill] sm:$0xff] %v9117_v18  ;;  %9890 = vst [vmem:[#allocation64_spill] sm:$0xff] %v9121_v12  ;;  %v9133_v0 = vmul.f32 %v8885_v32, %v9894_v46  ;;  %v9896_v45 = vld [vmem:[#allocation53_spill] sm:$0xff]  ;;  %v9898_v6 = vld [vmem:[#allocation36_spill] sm:$0xff]  ;;  %v9150_v46 = vmul.f32 %v3933_v31, %v8897_v61  ;;  %v9165_v61 = vmul.f32 %v3938_v26, %v8917_v5 }
 0x9fc   : > { %9892 = vst [vmem:[#allocation63_spill] sm:$0xff] %v9125_v21  ;;  %9893 = vst [vmem:[#allocation65_spill] sm:$0xff] %v9129_v16  ;;  %v9137_v18 = vmul.f32 %v8885_v32, %v9896_v45  ;;  %v9141_v12 = vmul.f32 %v8885_v32, %v9898_v6  ;;  %v3948_v42 = vld [vmem:[#allocation19 + $0x88] sm:$0xff]  ;;  %v3947_v21 = vld [vmem:[#allocation19 + $0x80] sm:$0xff]  ;;  %v9180_v23 = vmul.f32 %v3943_v8, %v8937_v30 }
 0x9fd   : > { %9895 = vst [vmem:[#allocation66_spill] sm:$0xff] %v9133_v0  ;;  %v3950_v34 = vld [vmem:[#allocation19 + $0x98] sm:$0xff]  ;;  %v9153_v0 = vmul.f32 %v3934_v58, %v8901_v56  ;;  %v3956_v45 = vld [vmem:[#allocation19 + $0xc8] sm:$0xff]  ;;  %v3949_v32 = vld [vmem:[#allocation19 + $0x90] sm:$0xff]  ;;  %v9168_v58 = vmul.f32 %v3939_v29, %v8921_v27  ;;  %v9183_v26 = vmul.f32 %v3944_v57, %v8941_v3  ;;  %v9186_v27 = vmul.f32 %v3945_v22, %v8945_v35 }
 0x9fe   : > { %9897 = vst [vmem:[#allocation54_spill] sm:$0xff] %v9137_v18  ;;  %9899 = vst [vmem:[#allocation53_spill] sm:$0xff] %v9141_v12  ;;  %v3955_v18 = vld [vmem:[#allocation19 + $0xc0] sm:$0xff]  ;;  %v3958_v16 = vld [vmem:[#allocation19 + $0xd8] sm:$0xff]  ;;  %v9192_v9 = vmul.f32 %v3947_v21, %v8953_v14  ;;  %v9195_v51 = vmul.f32 %v3948_v42, %v8957_v10  ;;  %v9198_v30 = vmul.f32 %v3949_v32, %v8961_v13 }
 0x9ff   : > { %9900 = vst [vmem:[#allocation36_spill] sm:$0xff] %v9153_v0  ;;  %v3957_v6 = vld [vmem:[#allocation19 + $0xd0] sm:$0xff]  ;;  %v3952_v12 = vld [vmem:[#allocation19 + $0xa8] sm:$0xff]  ;;  %v3951_v38 = vld [vmem:[#allocation19 + $0xa0] sm:$0xff]  ;;  %v9171_v0 = vmul.f32 %v3940_v59, %v8925_v47  ;;  %v9189_v47 = vmul.f32 %v3946_v11, %v8949_v24  ;;  %v9201_v3 = vmul.f32 %v3950_v34, %v8965_v62  ;;  %v9216_v21 = vmul.f32 %v3955_v18, %v8985_v25 }
 0xa00   : > { %v3960_v56 = vld [vmem:[#allocation19 + $0xe8] sm:$0xff]  ;;  %v3954_v40 = vld [vmem:[#allocation19 + $0xb8] sm:$0xf]  ;;  %v3953_v31 = vld [vmem:[#allocation19 + $0xb0] sm:$0xff]  ;;  %v9204_v11 = vmul.f32 %v3951_v38, %v8969_v37  ;;  %v9207_v14 = vmul.f32 %v3952_v12, %v8973_v44  ;;  %v9219_v42 = vmul.f32 %v3956_v45, %v8989_v50  ;;  %v9225_v44 = vmul.f32 %v3958_v16, %v8997_v33 }
 0xa01   : > { %v3959_v1 = vld [vmem:[#allocation19 + $0xe0] sm:$0xff]  ;;  %v3962_v7 = vld [vmem:[#allocation19 + $0xf8] sm:$0xf]  ;;  %v3961_v5 = vld [vmem:[#allocation19 + $0xf0] sm:$0xff]  ;;  %v9210_v10 = vmul.f32 %v3953_v31, %v8977_v55  ;;  %v9213_v13 = vmul.f32 %v3954_v40, %v8981_v43  ;;  %v9231_v40 = vmul.f32 %v3960_v56, %v9005_v63 }
 0xa02   : > { %v3964_v39 = vld [vmem:[#allocation19 + $0x108] sm:$0xff]  ;;  %v3963_v15 = vld [vmem:[#allocation19 + $0x100] sm:$0xff]  ;;  %v3966_v29 = vld [vmem:[#allocation19 + $0x118] sm:$0xff]  ;;  %v9228_v43 = vmul.f32 %v3959_v1, %v9001_v49  ;;  %v9234_v25 = vmul.f32 %v3961_v5, %v9009_v17  ;;  %v9237_v50 = vmul.f32 %v3962_v7, %v9013_v28 }
 0xa03   : > { %v3972_v35 = vld [vmem:[#allocation19 + $0x148] sm:$0xff]  ;;  %v3971_v2 = vld [vmem:[#allocation19 + $0x140] sm:$0xff]  ;;  %v3974_v57 = vld [vmem:[#allocation19 + $0x158] sm:$0xff]  ;;  %9903 = vst [vmem:[#allocation67_spill] sm:$0xff] %v9231_v40  ;;  %v9240_v33 = vmul.f32 %v3963_v15, %v9017_v36  ;;  %v9243_v16 = vmul.f32 %v3964_v39, %v9021_v60 }
 0xa04   : > { %v3965_v24 = vld [vmem:[#allocation19 + $0x110] sm:$0xff]  ;;  %v3968_v22 = vld [vmem:[#allocation19 + $0x128] sm:$0xff]  ;;  %v3967_v62 = vld [vmem:[#allocation19 + $0x120] sm:$0xff]  ;;  %9904 = vst [vmem:[#allocation68_spill] sm:$0xff] %v9234_v25 }
 0xa05   : > { %v3973_v59 = vld [vmem:[#allocation19 + $0x150] sm:$0xff]  ;;  %v3970_v34 = vld [vmem:[#allocation19 + $0x138] sm:$0xf]  ;;  %v3976_v55 = vld [vmem:[#allocation19 + $0x168] sm:$0xff]  ;;  %9905 = vst [vmem:[#allocation69_spill] sm:$0xff] %v9237_v50  ;;  %v9246_v49 = vmul.f32 %v3965_v24, %v9025_v4 }
 0xa06   : > { %v3969_v8 = vld [vmem:[#allocation19 + $0x130] sm:$0xff]  ;;  %v9901_v37 = vld [vmem:[#allocation55_spill] sm:$0xff]  ;;  %v3975_v12 = vld [vmem:[#allocation19 + $0x160] sm:$0xff]  ;;  %9906 = vst [vmem:[#allocation70_spill] sm:$0xff] %v9240_v33 }
 0xa07   : > { %v9222_v32 = vmul.f32 %v3957_v6, %v9901_v37  ;;  %v3978_v38 = vld [vmem:[#allocation19 + $0x178] sm:$0xf]  ;;  %9902 = vst [vmem:[#allocation55_spill] sm:$0xff] %v9228_v43  ;;  %v3977_v18 = vld [vmem:[#allocation19 + $0x170] sm:$0xff]  ;;  %v3980_v45 = vld [vmem:[#allocation19 + $0x188] sm:$0xff] }
 0xa08   : > { %v3979_v6 = vld [vmem:[#allocation19 + $0x180] sm:$0xff]  ;;  %9907 = vst [vmem:[#allocation71_spill] sm:$0xff] %v9243_v16  ;;  %9908 = vst [vmem:[#allocation72_spill] sm:$0xff] %v9246_v49  ;;  %v3988_v17 = vld [vmem:[#allocation19 + $0x1c8] sm:$0xff] }
 0xa09   : > { %v9909_v63 = vld [vmem:[#allocation56_spill] sm:$0xff]  ;;  %v3982_v1 = vld [vmem:[#allocation19 + $0x198] sm:$0xff]  ;;  %v3981_v28 = vld [vmem:[#allocation19 + $0x190] sm:$0xff] }
 0xa0a   : > { %v9249_v56 = vmul.f32 %v3966_v29, %v9909_v63  ;;  %v3987_v31 = vld [vmem:[#allocation19 + $0x1c0] sm:$0xff]  ;;  %v3984_v7 = vld [vmem:[#allocation19 + $0x1a8] sm:$0xff]  ;;  %v9911_v5 = vld [vmem:[#allocation39_spill] sm:$0xff] }
 0xa0b   : > { %v9252_v37 = vmul.f32 %v3967_v62, %v9911_v5  ;;  %v9913_v50 = vld [vmem:[#allocation43_spill] sm:$0xff]  ;;  %v9915_v15 = vld [vmem:[#allocation37_spill] sm:$0xff]  ;;  %v3983_v24 = vld [vmem:[#allocation19 + $0x1a0] sm:$0xff] }
 0xa0c   : > { %9910 = vst [vmem:[#allocation56_spill] sm:$0xff] %v9249_v56  ;;  %v9255_v36 = vmul.f32 %v3968_v22, %v9913_v50  ;;  %v9258_v60 = vmul.f32 %v3969_v8, %v9915_v15  ;;  %v9917_v39 = vld [vmem:[#allocation47_spill] sm:$0xff]  ;;  %v3985_v63 = vld [vmem:[#allocation19 + $0x1b0] sm:$0xff]  ;;  %v9921_v16 = vld [vmem:[#allocation40_spill] sm:$0xff] }
 0xa0d   : > { %9912 = vst [vmem:[#allocation39_spill] sm:$0xff] %v9252_v37  ;;  %v9261_v4 = vmul.f32 %v3970_v34, %v9917_v39  ;;  %v3986_v29 = vld [vmem:[#allocation19 + $0x1b8] sm:$0xf]  ;;  %v9267_v33 = vmul.f32 %v3972_v35, %v9921_v16  ;;  %v9923_v62 = vld [vmem:[#allocation44_spill] sm:$0xff]  ;;  %v4060_v8 = vld [vmem:[#allocation20 + $0x8] sm:$0xff] }
 0xa0e   : > { %9914 = vst [vmem:[#allocation43_spill] sm:$0xff] %v9255_v36  ;;  %9916 = vst [vmem:[#allocation37_spill] sm:$0xff] %v9258_v60  ;;  %v9919_v56 = vld [vmem:[#allocation51_spill] sm:$0xff]  ;;  %v9270_v5 = vmul.f32 %v3973_v59, %v9923_v62  ;;  %v9925_v22 = vld [vmem:[#allocation48_spill] sm:$0xff] }
 0xa0f   : > { %9918 = vst [vmem:[#allocation47_spill] sm:$0xff] %v9261_v4  ;;  %v9264_v49 = vmul.f32 %v3971_v2, %v9919_v56  ;;  %9922 = vst [vmem:[#allocation40_spill] sm:$0xff] %v9267_v33  ;;  %v9273_v50 = vmul.f32 %v3974_v57, %v9925_v22  ;;  %v4059_v15 = vld [vmem:[#allocation20] sm:$0xff]  ;;  %v4062_v60 = vld [vmem:[#allocation20 + $0x18] sm:$0xff] }
 0xa10   : > { %9924 = vst [vmem:[#allocation44_spill] sm:$0xff] %v9270_v5  ;;  %v3990_v34 = vld [vmem:[#allocation19 + $0x1d8] sm:$0xff]  ;;  %v3989_v39 = vld [vmem:[#allocation19 + $0x1d0] sm:$0xff]  ;;  %v3992_v4 = vld [vmem:[#allocation19 + $0x1e8] sm:$0xff] }
 0xa11   : > { %9920 = vst [vmem:[#allocation51_spill] sm:$0xff] %v9264_v49  ;;  %9926 = vst [vmem:[#allocation48_spill] sm:$0xff] %v9273_v50  ;;  %v9927_v36 = vld [vmem:[#allocation38_spill] sm:$0xff]  ;;  %v9931_v35 = vld [vmem:[#allocation52_spill] sm:$0xff] }
 0xa12   : > { %v9276_v37 = vmul.f32 %v3975_v12, %v9927_v36  ;;  %v9929_v2 = vld [vmem:[#allocation42_spill] sm:$0xff]  ;;  %v9282_v16 = vmul.f32 %v3977_v18, %v9931_v35  ;;  %v3991_v57 = vld [vmem:[#allocation19 + $0x1e0] sm:$0xff]  ;;  %v3994_v50 = vld [vmem:[#allocation19 + $0x1f8] sm:$0xf] }
 0xa13   : > { %v9279_v56 = vmul.f32 %v3976_v55, %v9929_v2  ;;  %v9933_v59 = vld [vmem:[#allocation46_spill] sm:$0xff]  ;;  %v9937_v49 = vld [vmem:[#allocation41_spill] sm:$0xff]  ;;  %v4067_v35 = vld [vmem:[#allocation20 + $0x40] sm:$0xff] }
 0xa14   : > { %9928 = vst [vmem:[#allocation38_spill] sm:$0xff] %v9276_v37  ;;  %9932 = vst [vmem:[#allocation52_spill] sm:$0xff] %v9282_v16  ;;  %v9285_v62 = vmul.f32 %v3978_v38, %v9933_v59  ;;  %v3993_v22 = vld [vmem:[#allocation19 + $0x1f0] sm:$0xff]  ;;  %v9291_v25 = vmul.f32 %v3980_v45, %v9937_v49  ;;  %v9939_v12 = vld [vmem:[#allocation45_spill] sm:$0xff] }
 0xa15   : > { %9930 = vst [vmem:[#allocation42_spill] sm:$0xff] %v9279_v56  ;;  %v9935_v5 = vld [vmem:[#allocation50_spill] sm:$0xff]  ;;  %v9294_v36 = vmul.f32 %v3981_v28, %v9939_v12  ;;  %v4068_v18 = vld [vmem:[#allocation20 + $0x48] sm:$0xff]  ;;  %v4070_v16 = vld [vmem:[#allocation20 + $0x58] sm:$0xff] }
 0xa16   : > { %9934 = vst [vmem:[#allocation46_spill] sm:$0xff] %v9285_v62  ;;  %v9288_v33 = vmul.f32 %v3979_v6, %v9935_v5  ;;  %9938 = vst [vmem:[#allocation41_spill] sm:$0xff] %v9291_v25  ;;  %v9941_v55 = vld [vmem:[#allocation58_spill] sm:$0xff]  ;;  %v4064_v62 = vld [vmem:[#allocation20 + $0x28] sm:$0xff] }
 0xa17   : > { %9940 = vst [vmem:[#allocation45_spill] sm:$0xff] %v9294_v36  ;;  %v9297_v2 = vmul.f32 %v3982_v1, %v9941_v55  ;;  %v4061_v38 = vld [vmem:[#allocation20 + $0x10] sm:$0xff]  ;;  %v9943_v56 = vld [vmem:[#allocation49_spill] sm:$0xff]  ;;  %v9944_v6 = vld [vmem:[#allocation59_spill] sm:$0xff] }
 0xa18   : > { %9936 = vst [vmem:[#allocation50_spill] sm:$0xff] %v9288_v33  ;;  %v4069_v59 = vld [vmem:[#allocation20 + $0x50] sm:$0xff]  ;;  %v9300_v37 = vmul.f32 %v3983_v24, %v9943_v56  ;;  %v9303_v5 = vmul.f32 %v3984_v7, %v9944_v6  ;;  %v9946_v45 = vld [vmem:[#allocation57_spill] sm:$0xff]  ;;  %v9948_v28 = vld [vmem:[#allocation60_spill] sm:$0xff] }
 0xa19   : > { %9942 = vst [vmem:[#allocation58_spill] sm:$0xff] %v9297_v2  ;;  %v9306_v49 = vmul.f32 %v3985_v63, %v9946_v45  ;;  %v9309_v12 = vmul.f32 %v3986_v29, %v9948_v28  ;;  %v4072_v1 = vld [vmem:[#allocation20 + $0x68] sm:$0xff]  ;;  %v4063_v55 = vld [vmem:[#allocation20 + $0x20] sm:$0xff]  ;;  %v4066_v2 = vld [vmem:[#allocation20 + $0x38] sm:$0xf] }
 0xa1a   : > { %9945 = vst [vmem:[#allocation49_spill] sm:$0xff] %v9303_v5  ;;  %v4065_v36 = vld [vmem:[#allocation20 + $0x30] sm:$0xff]  ;;  %v9950_v25 = vld [vmem:[#allocation61_spill] sm:$0xff]  ;;  %v9952_v24 = vld [vmem:[#allocation64_spill] sm:$0xff] }
 0xa1b   : > { %9947 = vst [vmem:[#allocation59_spill] sm:$0xff] %v9306_v49  ;;  %9949 = vst [vmem:[#allocation57_spill] sm:$0xff] %v9309_v12  ;;  %v9312_v33 = vmul.f32 %v3987_v31, %v9950_v25  ;;  %v9951_v40 = vld [vmem:[#allocation62_spill] sm:$0xff]  ;;  %v9318_v56 = vmul.f32 %v3989_v39, %v9952_v24  ;;  %v9954_v7 = vld [vmem:[#allocation63_spill] sm:$0xff] }
 0xa1c   : > { %v9315_v43 = vmul.f32 %v3988_v17, %v9951_v40  ;;  %v9321_v6 = vmul.f32 %v3990_v34, %v9954_v7  ;;  %v4071_v63 = vld [vmem:[#allocation20 + $0x60] sm:$0xff]  ;;  %v4074_v45 = vld [vmem:[#allocation20 + $0x78] sm:$0xf]  ;;  %v4073_v29 = vld [vmem:[#allocation20 + $0x70] sm:$0xff]  ;;  %v4123_v34 = vadd.f32 %v4059_v15, %v9144_v54  ;;  %v4124_v7 = vadd.f32 %v4060_v8, %v9147_v52 }
 0xa1d   : > { %9953 = vst [vmem:[#allocation60_spill] sm:$0xff] %v9318_v56  ;;  %v9956_v28 = vld [vmem:[#allocation65_spill] sm:$0xff]  ;;  %v9958_v49 = vld [vmem:[#allocation66_spill] sm:$0xff]  ;;  %v4075_v24 = vld [vmem:[#allocation20 + $0x80] sm:$0xff]  ;;  %v4129_v54 = vadd.f32 %v4065_v36, %v9162_v53  ;;  %v4130_v52 = vadd.f32 %v4066_v2, %v9165_v61  ;;  %v4135_v53 = vadd.f32 %v4071_v63, %v9180_v23  ;;  %v4136_v61 = vadd.f32 %v4072_v1, %v9183_v26 }
 0xa1e   : > { %9955 = vst [vmem:[#allocation61_spill] sm:$0xff] %v9321_v6  ;;  %v9324_v12 = vmul.f32 %v3991_v57, %v9956_v28  ;;  %v9327_v5 = vmul.f32 %v3992_v4, %v9958_v49  ;;  %v9960_v25 = vld [vmem:[#allocation54_spill] sm:$0xff]  ;;  %v9962_v40 = vld [vmem:[#allocation53_spill] sm:$0xff]  ;;  %v4078_v56 = vld [vmem:[#allocation20 + $0x98] sm:$0xff]  ;;  %v4125_v6 = vadd.f32 %v4061_v38, %v9150_v46  ;;  %v4131_v38 = vadd.f32 %v4067_v35, %v9168_v58 }
 0xa1f   : > { %v9330_v31 = vmul.f32 %v3993_v22, %v9960_v25  ;;  %v9333_v17 = vmul.f32 %v3994_v50, %v9962_v40  ;;  %v4076_v39 = vld [vmem:[#allocation20 + $0x88] sm:$0xff]  ;;  %v9964_v57 = vld [vmem:[#allocation36_spill] sm:$0xff]  ;;  %v9341_v49 = vld [vmem:[#allocation20 + $0xd8] sm:$0xff]  ;;  %v4127_v40 = vadd.f32 %v4063_v55, %v9156_v41  ;;  %4187 = vst.msk [vmem:[%s9354_s5] sm:$0xff] %vm855_vm0, %v4123_v34  ;;  %v4137_v58 = vadd.f32 %v4073_v29, %v9186_v27 }
 0xa20   : > { %9957 = vst [vmem:[#allocation62_spill] sm:$0xff] %v9324_v12  ;;  %9959 = vst [vmem:[#allocation64_spill] sm:$0xff] %v9327_v5  ;;  %v4126_v28 = vadd.f32 %v4062_v60, %v9964_v57  ;;  %v9339_v12 = vld [vmem:[#allocation20 + $0xc8] sm:$0xff]  ;;  %v4083_v4 = vld [vmem:[#allocation20 + $0xc0] sm:$0xff]  ;;  %v4132_v57 = vadd.f32 %v4068_v18, %v9171_v0  ;;  %v4134_v5 = vadd.f32 %v4070_v16, %v9177_v20 }
 0xa21   : > { %9961 = vst [vmem:[#allocation63_spill] sm:$0xff] %v9330_v31  ;;  %9963 = vst [vmem:[#allocation65_spill] sm:$0xff] %v9333_v17  ;;  %v4077_v22 = vld [vmem:[#allocation20 + $0x90] sm:$0xff]  ;;  %v4080_v25 = vld [vmem:[#allocation20 + $0xa8] sm:$0xff]  ;;  %v4128_v17 = vadd.f32 %v4064_v62, %v9159_v19  ;;  %v4133_v31 = vadd.f32 %v4069_v59, %v9174_v48  ;;  %v4138_v48 = vadd.f32 %v4074_v45, %v9189_v47 }
 0xa22   : > { %v4085_v50 = vld [vmem:[#allocation20 + $0xd0] sm:$0xff]  ;;  %v9347_v46 = vld [vmem:[#allocation20 + $0xe8] sm:$0xff]  ;;  %v4079_v60 = vld [vmem:[#allocation20 + $0xa0] sm:$0xff]  ;;  %4188 = vst.msk [vmem:[%s9354_s5 + $0x8] sm:$0xff] %vm855_vm0, %v4124_v7  ;;  %v4139_v62 = vadd.f32 %v4075_v24, %v9192_v9  ;;  %v4140_v26 = vadd.f32 %v4076_v39, %v9195_v51  ;;  %v4141_v27 = vadd.f32 %v4077_v22, %v9198_v30  ;;  %v4142_v47 = vadd.f32 %v4078_v56, %v9201_v3 }
 0xa23   : > { %v4082_v8 = vld [vmem:[#allocation20 + $0xb8] sm:$0xf]  ;;  %v4081_v15 = vld [vmem:[#allocation20 + $0xb0] sm:$0xff]  ;;  %4189 = vst.msk [vmem:[%s9354_s5 + $0x10] sm:$0xff] %vm855_vm0, %v4125_v6  ;;  %4190 = vst.msk [vmem:[%s9354_s5 + $0x18] sm:$0xff] %vm855_vm0, %v4126_v28  ;;  %v4143_v3 = vadd.f32 %v4079_v60, %v9204_v11  ;;  %v4144_v35 = vadd.f32 %v4080_v25, %v9207_v14  ;;  %v4147_v14 = vadd.f32 %v4083_v4, %v9216_v21 }
 0xa24   : > { %v4087_v41 = vld [vmem:[#allocation20 + $0xe0] sm:$0xff]  ;;  %v4090_v0 = vld [vmem:[#allocation20 + $0xf8] sm:$0xf]  ;;  %v4089_v19 = vld [vmem:[#allocation20 + $0xf0] sm:$0xff]  ;;  %4191 = vst.msk [vmem:[%s9354_s5 + $0x20] sm:$0xff] %vm855_vm0, %v4127_v40  ;;  %v4145_v59 = vadd.f32 %v4081_v15, %v9210_v10  ;;  %v4148_v10 = vadd.f32 %v9339_v12, %v9219_v42  ;;  %v4150_v56 = vadd.f32 %v9341_v49, %v9225_v44 }
 0xa25   : > { %4192 = vst.msk [vmem:[%s9354_s5 + $0x28] sm:$0xff] %vm855_vm0, %v4128_v17  ;;  %4193 = vst.msk [vmem:[%s9354_s5 + $0x30] sm:$0xff] %vm855_vm0, %v4129_v54  ;;  %v4092_v20 = vld [vmem:[#allocation20 + $0x108] sm:$0xff]  ;;  %v4091_v16 = vld [vmem:[#allocation20 + $0x100] sm:$0xff] }
 0xa26   : > { %4194 = vst.msk [vmem:[%s9354_s5 + $0x38] sm:$0xf] %vm961_vm1, %v4130_v52  ;;  %v4094_v23 = vld [vmem:[#allocation20 + $0x118] sm:$0xff]  ;;  %v9388_v36 = vld [vmem:[#allocation20 + $0x148] sm:$0xff]  ;;  %v4099_v9 = vld [vmem:[#allocation20 + $0x140] sm:$0xff] }
 0xa27   : > { %4195 = vst.msk [vmem:[%s9354_s5 + $0x40] sm:$0xff] %vm855_vm0, %v4131_v38  ;;  %4196 = vst.msk [vmem:[%s9354_s5 + $0x48] sm:$0xff] %vm855_vm0, %v4132_v57  ;;  %v9390_v51 = vld [vmem:[#allocation20 + $0x158] sm:$0xff]  ;;  %v4093_v30 = vld [vmem:[#allocation20 + $0x110] sm:$0xff] }
 0xa28   : > { %4197 = vst.msk [vmem:[%s9354_s5 + $0x50] sm:$0xff] %vm855_vm0, %v4133_v31  ;;  %4198 = vst.msk [vmem:[%s9354_s5 + $0x58] sm:$0xff] %vm855_vm0, %v4134_v5  ;;  %v4101_v2 = vld [vmem:[#allocation20 + $0x150] sm:$0xff]  ;;  %v4096_v18 = vld [vmem:[#allocation20 + $0x128] sm:$0xff]  ;;  %v4146_v5 = vadd.f32 %v4082_v8, %v9213_v13  ;;  %v4149_v13 = vadd.f32 %v4085_v50, %v9222_v32 }
 0xa29   : > { %4199 = vst.msk [vmem:[%s9354_s5 + $0x60] sm:$0xff] %vm855_vm0, %v4135_v53  ;;  %4200 = vst.msk [vmem:[%s9354_s5 + $0x68] sm:$0xff] %vm855_vm0, %v4136_v61  ;;  %v4095_v1 = vld [vmem:[#allocation20 + $0x120] sm:$0xff]  ;;  %v4098_v55 = vld [vmem:[#allocation20 + $0x138] sm:$0xf] }
 0xa2a   : > { %4201 = vst.msk [vmem:[%s9354_s5 + $0x70] sm:$0xff] %vm855_vm0, %v4137_v58  ;;  %v4097_v11 = vld [vmem:[#allocation20 + $0x130] sm:$0xff]  ;;  %4203 = vst.msk [vmem:[%s9354_s5 + $0x80] sm:$0xff] %vm855_vm0, %v4139_v62  ;;  %v4104_v21 = vld [vmem:[#allocation20 + $0x168] sm:$0xff] }
 0xa2b   : > { %4202 = vst.msk [vmem:[%s9354_s5 + $0x78] sm:$0xf] %vm961_vm1, %v4138_v48  ;;  %v4103_v6 = vld [vmem:[#allocation20 + $0x160] sm:$0xff]  ;;  %v4106_v63 = vld [vmem:[#allocation20 + $0x178] sm:$0xf]  ;;  %v9968_v31 = vld [vmem:[#allocation69_spill] sm:$0xff] }
 0xa2c   : > { %4204 = vst.msk [vmem:[%s9354_s5 + $0x88] sm:$0xff] %vm855_vm0, %v4140_v26  ;;  %4205 = vst.msk [vmem:[%s9354_s5 + $0x90] sm:$0xff] %vm855_vm0, %v4141_v27  ;;  %v9965_v45 = vld [vmem:[#allocation55_spill] sm:$0xff]  ;;  %v9967_v29 = vld [vmem:[#allocation68_spill] sm:$0xff]  ;;  %v4154_v17 = vadd.f32 %v4090_v0, %v9968_v31 }
 0xa2d   : > { %4206 = vst.msk [vmem:[%s9354_s5 + $0x98] sm:$0xff] %vm855_vm0, %v4142_v47  ;;  %v4151_v42 = vadd.f32 %v4087_v41, %v9965_v45  ;;  %v9966_v12 = vld [vmem:[#allocation67_spill] sm:$0xff]  ;;  %v4153_v44 = vadd.f32 %v4089_v19, %v9967_v29  ;;  %4207 = vst.msk [vmem:[%s9354_s5 + $0xa0] sm:$0xff] %vm855_vm0, %v4143_v3  ;;  %v4105_v39 = vld [vmem:[#allocation20 + $0x170] sm:$0xff] }
 0xa2e   : > { %v4152_v32 = vadd.f32 %v9347_v46, %v9966_v12  ;;  %4208 = vst.msk [vmem:[%s9354_s5 + $0xa8] sm:$0xff] %vm855_vm0, %v4144_v35  ;;  %4209 = vst.msk [vmem:[%s9354_s5 + $0xb0] sm:$0xff] %vm855_vm0, %v4145_v59  ;;  %v4108_v24 = vld [vmem:[#allocation20 + $0x188] sm:$0xff]  ;;  %v4107_v34 = vld [vmem:[#allocation20 + $0x180] sm:$0xff] }
 0xa2f   : > { %4210 = vst.msk [vmem:[%s9354_s5 + $0xb8] sm:$0xf] %vm961_vm1, %v4146_v5  ;;  %v9969_v7 = vld [vmem:[#allocation70_spill] sm:$0xff]  ;;  %v9970_v4 = vld [vmem:[#allocation71_spill] sm:$0xff]  ;;  %v9971_v22 = vld [vmem:[#allocation72_spill] sm:$0xff] }
 0xa30   : > { %v4155_v28 = vadd.f32 %v4091_v16, %v9969_v7  ;;  %v4156_v49 = vadd.f32 %v4092_v20, %v9970_v4  ;;  %v4157_v50 = vadd.f32 %v4093_v30, %v9971_v22  ;;  %v9972_v25 = vld [vmem:[#allocation56_spill] sm:$0xff]  ;;  %4211 = vst.msk [vmem:[%s9354_s5 + $0xc0] sm:$0xff] %vm855_vm0, %v4147_v14  ;;  %4212 = vst.msk [vmem:[%s9354_s5 + $0xc8] sm:$0xff] %vm855_vm0, %v4148_v10  ;;  %v4116_v54 = vld [vmem:[#allocation20 + $0x1c8] sm:$0xff] }
 0xa31   : > { %v4158_v40 = vadd.f32 %v4094_v23, %v9972_v25  ;;  %4213 = vst.msk [vmem:[%s9354_s5 + $0xd0] sm:$0xff] %vm855_vm0, %v4149_v13  ;;  %4214 = vst.msk [vmem:[%s9354_s5 + $0xd8] sm:$0xff] %vm855_vm0, %v4150_v56  ;;  %v4115_v52 = vld [vmem:[#allocation20 + $0x1c0] sm:$0xff]  ;;  %v4110_v46 = vld [vmem:[#allocation20 + $0x198] sm:$0xff]  ;;  %v4180_v7 = vadd.f32 %v4116_v54, %v9315_v43 }
 0xa32   : > { %v4109_v60 = vld [vmem:[#allocation20 + $0x190] sm:$0xff]  ;;  %v4112_v8 = vld [vmem:[#allocation20 + $0x1a8] sm:$0xff]  ;;  %v9973_v15 = vld [vmem:[#allocation39_spill] sm:$0xff]  ;;  %4215 = vst.msk [vmem:[%s9354_s5 + $0xe0] sm:$0xff] %vm855_vm0, %v4151_v42 }
 0xa33   : > { %v4159_v38 = vadd.f32 %v4095_v1, %v9973_v15  ;;  %v9974_v57 = vld [vmem:[#allocation43_spill] sm:$0xff]  ;;  %v9975_v0 = vld [vmem:[#allocation37_spill] sm:$0xff]  ;;  %4216 = vst.msk [vmem:[%s9354_s5 + $0xe8] sm:$0xff] %vm855_vm0, %v4152_v32  ;;  %4217 = vst.msk [vmem:[%s9354_s5 + $0xf0] sm:$0xff] %vm855_vm0, %v4153_v44 }
 0xa34   : > { %v4160_v41 = vadd.f32 %v4096_v18, %v9974_v57  ;;  %v4161_v19 = vadd.f32 %v4097_v11, %v9975_v0  ;;  %v9976_v53 = vld [vmem:[#allocation47_spill] sm:$0xff]  ;;  %4218 = vst.msk [vmem:[%s9354_s5 + $0xf8] sm:$0xf] %vm961_vm1, %v4154_v17  ;;  %v4111_v58 = vld [vmem:[#allocation20 + $0x1a0] sm:$0xff]  ;;  %v4113_v20 = vld [vmem:[#allocation20 + $0x1b0] sm:$0xff] }
 0xa35   : > { %v4162_v61 = vadd.f32 %v4098_v55, %v9976_v53  ;;  %v4114_v48 = vld [vmem:[#allocation20 + $0x1b8] sm:$0xf]  ;;  %v9978_v62 = vld [vmem:[#allocation40_spill] sm:$0xff]  ;;  %4219 = vst.msk [vmem:[%s9354_s5 + $0x100] sm:$0xff] %vm855_vm0, %v4155_v28  ;;  %4220 = vst.msk [vmem:[%s9354_s5 + $0x108] sm:$0xff] %vm855_vm0, %v4156_v49  ;;  %v4175_v29 = vadd.f32 %v4111_v58, %v9300_v37  ;;  %v4179_v37 = vadd.f32 %v4115_v52, %v9312_v33 }
 0xa36   : > { %v9977_v16 = vld [vmem:[#allocation51_spill] sm:$0xff]  ;;  %v4164_v26 = vadd.f32 %v9388_v36, %v9978_v62  ;;  %v9979_v27 = vld [vmem:[#allocation44_spill] sm:$0xff]  ;;  %4221 = vst.msk [vmem:[%s9354_s5 + $0x110] sm:$0xff] %vm855_vm0, %v4157_v50  ;;  %4222 = vst.msk [vmem:[%s9354_s5 + $0x118] sm:$0xff] %vm855_vm0, %v4158_v40 }
 0xa37   : > { %v4163_v23 = vadd.f32 %v4099_v9, %v9977_v16  ;;  %v4165_v47 = vadd.f32 %v4101_v2, %v9979_v27  ;;  %v9980_v30 = vld [vmem:[#allocation48_spill] sm:$0xff]  ;;  %v4118_v9 = vld [vmem:[#allocation20 + $0x1d8] sm:$0xff]  ;;  %v4117_v3 = vld [vmem:[#allocation20 + $0x1d0] sm:$0xff]  ;;  %4223 = vst.msk [vmem:[%s9354_s5 + $0x120] sm:$0xff] %vm855_vm0, %v4159_v38 }
 0xa38   : > { %v4166_v18 = vadd.f32 %v9390_v51, %v9980_v30  ;;  %v4120_v35 = vld [vmem:[#allocation20 + $0x1e8] sm:$0xff]  ;;  %v9981_v59 = vld [vmem:[#allocation38_spill] sm:$0xff]  ;;  %v9983_v1 = vld [vmem:[#allocation52_spill] sm:$0xff]  ;;  %4224 = vst.msk [vmem:[%s9354_s5 + $0x128] sm:$0xff] %vm855_vm0, %v4160_v41 }
 0xa39   : > { %v4167_v36 = vadd.f32 %v4103_v6, %v9981_v59  ;;  %v9982_v5 = vld [vmem:[#allocation42_spill] sm:$0xff]  ;;  %v4169_v51 = vadd.f32 %v4105_v39, %v9983_v1  ;;  %4225 = vst.msk [vmem:[%s9354_s5 + $0x130] sm:$0xff] %vm855_vm0, %v4161_v19  ;;  %v4119_v14 = vld [vmem:[#allocation20 + $0x1e0] sm:$0xff]  ;;  %v4122_v13 = vld [vmem:[#allocation20 + $0x1f8] sm:$0xf] }
 0xa3a   : > { %v4168_v2 = vadd.f32 %v4104_v21, %v9982_v5  ;;  %v9984_v55 = vld [vmem:[#allocation46_spill] sm:$0xff]  ;;  %4226 = vst.msk [vmem:[%s9354_s5 + $0x138] sm:$0xf] %vm961_vm1, %v4162_v61  ;;  %v9986_v6 = vld [vmem:[#allocation41_spill] sm:$0xff]  ;;  %v9990_v17 = vld [vmem:[#allocation59_spill] sm:$0xff] }
 0xa3b   : > { %v4170_v11 = vadd.f32 %v4106_v63, %v9984_v55  ;;  %v4121_v10 = vld [vmem:[#allocation20 + $0x1f0] sm:$0xff]  ;;  %v4172_v63 = vadd.f32 %v4108_v24, %v9986_v6  ;;  %v9987_v45 = vld [vmem:[#allocation45_spill] sm:$0xff]  ;;  %4227 = vst.msk [vmem:[%s9354_s5 + $0x140] sm:$0xff] %vm855_vm0, %v4163_v23  ;;  %4228 = vst.msk [vmem:[%s9354_s5 + $0x148] sm:$0xff] %vm855_vm0, %v4164_v26  ;;  %v4177_v39 = vadd.f32 %v4113_v20, %v9990_v17 }
 0xa3c   : > { %v9985_v56 = vld [vmem:[#allocation50_spill] sm:$0xff]  ;;  %v4173_v42 = vadd.f32 %v4109_v60, %v9987_v45  ;;  %4229 = vst.msk [vmem:[%s9354_s5 + $0x150] sm:$0xff] %vm855_vm0, %v4165_v47  ;;  %4230 = vst.msk [vmem:[%s9354_s5 + $0x158] sm:$0xff] %vm855_vm0, %v4166_v18  ;;  %v9989_v44 = vld [vmem:[#allocation49_spill] sm:$0xff] }
 0xa3d   : > { %v4171_v21 = vadd.f32 %v4107_v34, %v9985_v56  ;;  %v9988_v12 = vld [vmem:[#allocation58_spill] sm:$0xff]  ;;  %v4176_v31 = vadd.f32 %v4112_v8, %v9989_v44  ;;  %v9991_v24 = vld [vmem:[#allocation57_spill] sm:$0xff]  ;;  %4231 = vst.msk [vmem:[%s9354_s5 + $0x160] sm:$0xff] %vm855_vm0, %v4167_v36  ;;  %4232 = vst.msk [vmem:[%s9354_s5 + $0x168] sm:$0xff] %vm855_vm0, %v4168_v2 }
 0xa3e   : > { %v4174_v32 = vadd.f32 %v4110_v46, %v9988_v12  ;;  %v4178_v34 = vadd.f32 %v4114_v48, %v9991_v24  ;;  %4233 = vst.msk [vmem:[%s9354_s5 + $0x170] sm:$0xff] %vm855_vm0, %v4169_v51  ;;  %v9992_v28 = vld [vmem:[#allocation60_spill] sm:$0xff]  ;;  %v9993_v49 = vld [vmem:[#allocation61_spill] sm:$0xff]  ;;  %4236 = vst.msk [vmem:[%s9354_s5 + $0x188] sm:$0xff] %vm855_vm0, %v4172_v63 }
 0xa3f   : > { %4234 = vst.msk [vmem:[%s9354_s5 + $0x178] sm:$0xf] %vm961_vm1, %v4170_v11  ;;  %v4181_v4 = vadd.f32 %v4117_v3, %v9992_v28  ;;  %v4182_v22 = vadd.f32 %v4118_v9, %v9993_v49  ;;  %v9994_v33 = vld [vmem:[#allocation62_spill] sm:$0xff]  ;;  %v9995_v50 = vld [vmem:[#allocation64_spill] sm:$0xff]  ;;  %v9996_v40 = vld [vmem:[#allocation63_spill] sm:$0xff] }
 0xa40   : > { %4235 = vst.msk [vmem:[%s9354_s5 + $0x180] sm:$0xff] %vm855_vm0, %v4171_v21  ;;  %4237 = vst.msk [vmem:[%s9354_s5 + $0x190] sm:$0xff] %vm855_vm0, %v4173_v42  ;;  %v4183_v43 = vadd.f32 %v4119_v14, %v9994_v33  ;;  %v4184_v25 = vadd.f32 %v4120_v35, %v9995_v50  ;;  %v4185_v54 = vadd.f32 %v4121_v10, %v9996_v40  ;;  %v9997_v52 = vld [vmem:[#allocation65_spill] sm:$0xff] }
 0xa41   : > { %4238 = vst.msk [vmem:[%s9354_s5 + $0x198] sm:$0xff] %vm855_vm0, %v4174_v32  ;;  %v4186_v46 = vadd.f32 %v4122_v13, %v9997_v52  ;;  %4239 = vst.msk [vmem:[%s9354_s5 + $0x1a0] sm:$0xff] %vm855_vm0, %v4175_v29 }
 0xa42   : > { %4240 = vst.msk [vmem:[%s9354_s5 + $0x1a8] sm:$0xff] %vm855_vm0, %v4176_v31  ;;  %4241 = vst.msk [vmem:[%s9354_s5 + $0x1b0] sm:$0xff] %vm855_vm0, %v4177_v39 }
 0xa43   : > { %4242 = vst.msk [vmem:[%s9354_s5 + $0x1b8] sm:$0xf] %vm961_vm1, %v4178_v34  ;;  %4250 = vst.msk [vmem:[%s9354_s5 + $0x1f8] sm:$0xf] %vm961_vm1, %v4186_v46 }
 0xa44   : > { %4243 = vst.msk [vmem:[%s9354_s5 + $0x1c0] sm:$0xff] %vm855_vm0, %v4179_v37  ;;  %4244 = vst.msk [vmem:[%s9354_s5 + $0x1c8] sm:$0xff] %vm855_vm0, %v4180_v7 }
 0xa45   : > { %4245 = vst.msk [vmem:[%s9354_s5 + $0x1d0] sm:$0xff] %vm855_vm0, %v4181_v4  ;;  %4246 = vst.msk [vmem:[%s9354_s5 + $0x1d8] sm:$0xff] %vm855_vm0, %v4182_v22 }
 0xa46   : > { %4247 = vst.msk [vmem:[%s9354_s5 + $0x1e0] sm:$0xff] %vm855_vm0, %v4183_v43  ;;  %4248 = vst.msk [vmem:[%s9354_s5 + $0x1e8] sm:$0xff] %vm855_vm0, %v4184_v25 }
 0xa47   : > { %4249 = vst.msk [vmem:[%s9354_s5 + $0x1f0] sm:$0xff] %vm855_vm0, %v4185_v54 }
 0xa48   : > { %5967 = shalt.err (!%p5964_p9)
}
 0xa49   : > { %s5968_s18 = scalar_lea.hbm %s9534_s21, 8192  ;;  %s5972_s30 = scalar_lea.hbm %s9998_s12, 16384 }
 0xa4a   : > { %p5969_p0 = scmp.ne.s32.totalorder %s9534_s21, %s5968_s18  ;;  %p5973_p6 = scmp.lt.u32.totalorder %s9534_s21, %s9998_s12 }
 0xa4b   : > { %p5974_p4 = scmp.lt.u32.totalorder %s5972_s30, %s5968_s18  ;;  %p5976_p10 = scmp.lt.u32.totalorder %s5968_s18, %s9534_s21 }
 0xa4c   : > { %p5970_p2 = pnand %p5969_p0, %p9852_p8 }
 0xa4d   : > { %p5975_p3 = por %p5974_p4, %p5973_p6 }
 0xa4e   : > { %p5971_p5 = pneg %p5970_p2 }
 0xa4f   : > { %p5977_p1 = por %p5976_p10, %p5975_p3 }
 0xa51   : > { %p5978_p11 = pnand %p5977_p1, %p5971_p5 }
 0xa53   : > { %5981 = shalt.err (!%p5978_p11)
}
 0xa54   : > { %5334 = dma.vmem_to_hbm [thread:$0]  (%p9852_p8), %s9536_s17, 8192, %s9534_s21, %s4257_s13, %s6073_s20, %s6073_s20, %s6074_s6  }
 0xa55 PF: > { %s4301_s9 = sand.u32 1, %s6040_s25   ;;  %p9999_p12 = scmp.ne.s32.totalorder %s9716_s15, 0 }
 0xa56   : > { %p10000_p13 = scmp.ge.s32.totalorder %s6052_s28, 2  ;;  %s4302_s19 = scalar_lea.sflag [#allocation4], %s4301_s9 }
 0xa58   : > { %p5376_p7 = pnand %p10000_p13, %p9999_p12 }
 0xa5a   : > { %6031 = dma.done.wait (!%p5376_p7), %s4302_s19, 1024  }
 0xa5b   : > { %6033 = vsyncadd (!%p5376_p7), %s4302_s19, 4294966272  ;;  %s4311_s3 = scalar_lea.sflag [#allocation24], %s4301_s9 }
 0xa5c   : > { %6035 = dma.done.wait (!%p5376_p7), %s4311_s3, 8192  }
 0xa5d   : > { %6037 = vsyncadd (!%p5376_p7), %s4311_s3, 4294959104  ;;  %p38_p8 = scmp.ge.s32.totalorder %s6405_s16, 4   ;;  %s10001_s25 = smov %s6044_s26 }
 0xa5e   : > { %s10002_s26 = smov %s6048_s27  ;;  %s10003_s27 = smov %s6416_s0 }
 0xa5f   : > { %s10004_s28 = smov %s6405_s16  ;;  %40 = sbr.rel (!%p38_p8) target bundleno = 26 (0x1a), region = 183 }
 0xa66   :  { %4316 = vsyncpa [#allocation3], 1 }
 0xa67   :  { %4318 = vsyncpa [#allocation3 + $0x1], 1 }
 0xa68   :  { %4319 = vsyncpa [#allocation6], 1 }
 0xa69   :  { %4320 = vsyncpa [#allocation9], 1 }
 0xa6a   :  { %4321 = vsyncpa [#allocation12], 1 }
 0xa6b   :  { %4322 = vsyncpa [#allocation15], 1 }
 0xa6c   :  { %4323 = vsyncpa [#allocation18], 1 }
 0xa6d   :  { %4325 = vsyncpa [#allocation18 + $0x1], 1 }
 0xa6e   :  { %4326 = vsyncpa [#allocation21], 1 }
 0xa6f   :  { %4327 = vsyncpa [#allocation4], 1 }
 0xa70   :  { %4329 = vsyncpa [#allocation4 + $0x1], 1 }
 0xa71   :  { %4330 = vsyncpa [#allocation24], 1 }
 0xa72   :  { %4332 = vsyncpa [#allocation24 + $0x1], 1 }

</bundles_post_ra>
